<compile_context>
chip_gen: v6e
topology: v6e:2x2x1
jax: 0.10.0
libtpu: 0.0.40
codegen_flags: <defaults>
</compile_context>

<pallas_src>
import jax
import jax.numpy as jnp
import numpy as np
from jax import lax
from jax.experimental import pallas as pl
from jax.experimental.pallas import tpu as pltpu


# ---------------------------------------------------------------------------
# Pure-JAX trilinear x2 upsample (PyTorch align_corners=False semantics).
# Used ONLY to build the validation reference in __main__.
# ---------------------------------------------------------------------------
def _upsample_trilinear_x2_ref(x):
    """x: (N, D, H, W, C) float32 -> (N, 2D, 2H, 2W, C)."""
    def upsample_axis(x, axis):
        n = x.shape[axis]
        o = jnp.arange(2 * n, dtype=jnp.float32)
        coord = jnp.maximum((o + 0.5) / 2.0 - 0.5, 0.0)
        i0 = jnp.floor(coord).astype(jnp.int32)
        i1 = jnp.minimum(i0 + 1, n - 1)
        w1 = coord - i0.astype(jnp.float32)
        shape = [1] * x.ndim
        shape[axis] = 2 * n
        w1 = w1.reshape(shape)
        x0 = jnp.take(x, i0, axis=axis)
        x1 = jnp.take(x, i1, axis=axis)
        return (1.0 - w1) * x0 + w1 * x1

    x = upsample_axis(x, 1)
    x = upsample_axis(x, 2)
    x = upsample_axis(x, 3)
    return x


# ---------------------------------------------------------------------------
# Constant-matrix builders (wrapper side).
# ---------------------------------------------------------------------------
def _interp_matrix_1d(n):
    """(2n, n+2): replicate-padded length-(n+2) axis -> length-2n x2-upsampled axis
    (align_corners=False; the clamping is baked into the replicate padding)."""
    a = np.zeros((2 * n, n + 2), np.float32)
    for m in range(n):
        a[2 * m, m] = 0.25
        a[2 * m, m + 1] = 0.75
        a[2 * m + 1, m + 1] = 0.75
        a[2 * m + 1, m + 2] = 0.25
    return a


def _build_upsample_matrix(tds, H):
    """Fused depth+height x2 upsample of one halo'd slab as a single matrix.

    Shape ((2*tds+2)*2H, (tds+2)*(H+2)).  Row block u (0..2*tds+1) produces the upsampled-depth
    plane at global upsampled depth t*2*tds - 1 + u from source slab rows u//2 and u//2+1 with
    weights (0.75, 0.25) for even u and (0.25, 0.75) for odd u; each block is the H-axis
    interpolation matrix scaled by the depth weight.  All coefficients are bf16-exact.
    """
    Hp, H2, tdo = H + 2, 2 * H, 2 * tds
    a_h = _interp_matrix_1d(H)                                     # (H2, Hp)
    b = np.zeros(((tdo + 2) * H2, (tds + 2) * Hp), np.float32)
    for u in range(tdo + 2):
        m = u // 2
        w_hi = 0.25 + 0.5 * (u % 2)
        b[u * H2:(u + 1) * H2, m * Hp:(m + 1) * Hp] += (1.0 - w_hi) * a_h
        b[u * H2:(u + 1) * H2, (m + 1) * Hp:(m + 2) * Hp] += w_hi * a_h
    return jnp.asarray(b)


def _build_toeplitz_weight(w_torch, W):
    """(3, 3, (W+2)*Cin, 2W*Cout): for each (kd, kh), a banded matrix that applies the W-axis
    trilinear x2 upsample, the conv's W zero-padding AND the 3 kw taps in one MXU contraction.
    w_torch: (Cout, Cin, kd, kh, kw) PyTorch Conv3d weight."""
    C = w_torch.shape[0]
    Wp, W2 = W + 2, 2 * W
    # A_w maps the replicate-padded original W axis -> the zero-padded upsampled W axis
    # (rows 0 and W2+1 are the conv zero-pad -> stay zero).
    a_w = np.zeros((W2 + 2, Wp), np.float32)
    a_w[1:W2 + 1] = _interp_matrix_1d(W)
    # Output position v uses padded-upsampled rows v+kw for kw in {0,1,2}.
    s = np.stack([a_w[kw:kw + W2, :] for kw in range(3)], axis=0)   # (3, W2, Wp)
    t6 = jnp.einsum("qvu,oidhq->dhuivo", jnp.asarray(s), w_torch.astype(jnp.float32))
    return t6.reshape(3, 3, Wp * C, W2 * C)


# ---------------------------------------------------------------------------
# Fused kernel: (trilinear x2 upsample + zero-pad + 3x3x3 conv) for one depth tile.
# ---------------------------------------------------------------------------
def _upsample_conv_kernel(x_ref, up_mat_ref, w_ref, bias_ref, o_ref, u_ref, acc_ref):
    # x_ref     : ((tds+2)*Hp, Wp*C)        replicate-padded source slab (compute dtype)
    # up_mat_ref: ((tdo+2)*H2, (tds+2)*Hp)  fused D+H upsample matrix (compute dtype)
    # w_ref     : (3, 3, Wp*C, W2*C)        conv weights, W-upsample + kw taps folded (Toeplitz)
    # bias_ref  : (1, W2*C) f32             bias tiled over W
    # o_ref     : (tdo, H2, W2*C) f32       output depth tile (tdo = 2*tds)
    # u_ref     : (tdo+2, H2+2, Wp*C)       VMEM scratch: D/H-upsampled planes + conv H/D pads
    # acc_ref   : (tdo*H2, W2*C) f32        VMEM scratch: conv accumulator
    tdo, H2, W2C = o_ref.shape
    WpC = x_ref.shape[-1]
    cdt = u_ref.dtype
    rows = tdo * H2

    t = pl.program_id(1)
    n_t = pl.num_programs(1)

    # ---- D + H trilinear x2 upsample of the whole halo'd slab: ONE MXU matmul --------------
    # (W stays at original resolution; its upsample lives inside the Toeplitz conv weights.)
    up = jnp.dot(up_mat_ref[...], x_ref[...], preferred_element_type=jnp.float32)

    # Conv zero-padding along H (always) and store the upsampled interior.
    u_ref[:, pl.ds(0, 1), :] = jnp.zeros((tdo + 2, 1, WpC), cdt)
    u_ref[:, pl.ds(H2 + 1, 1), :] = jnp.zeros((tdo + 2, 1, WpC), cdt)
    u_ref[:, pl.ds(1, H2), :] = up.reshape(tdo + 2, H2, WpC).astype(cdt)

    # Conv zero-padding along D: only at the volume boundary (interior tiles carry real halo data).
    @pl.when(t == 0)
    def _():
        u_ref[pl.ds(0, 1), :, :] = jnp.zeros((1, H2 + 2, WpC), cdt)

    @pl.when(t == n_t - 1)
    def _():
        u_ref[pl.ds(tdo + 1, 1), :, :] = jnp.zeros((1, H2 + 2, WpC), cdt)

    # ---- conv: 9 MXU matmuls (kd, kh); kw + W-upsample are inside the (WpC, W2C) weight ----
    # Accumulate in a bias-initialized f32 VMEM scratch; output is lane-dense (W2*C lanes).
    acc_ref[...] = jnp.broadcast_to(bias_ref[...], (rows, W2C))
    for kd in range(3):
        for kh in range(3):
            slab = u_ref[kd:kd + tdo, kh:kh + H2, :]               # (tdo, H2, WpC)
            acc_ref[...] += jnp.dot(slab.reshape(rows, WpC), w_ref[kd, kh],
                                    preferred_element_type=jnp.float32)

    o_ref[...] = acc_ref[...].reshape(tdo, H2, W2C).astype(o_ref.dtype)


# ---------------------------------------------------------------------------
# Tiling / VMEM budgeting helpers.
# ---------------------------------------------------------------------------
def _vmem_capacity_bytes():
    try:
        return int(pltpu.get_tpu_info().vmem_capacity_bytes)
    except Exception:
        return 64 * 2**20       # conservative (v7x per-TensorCore VMEM)


def _vmem_estimate(tds, H, W, C, cbytes):
    Hp, Wp, H2, W2 = H + 2, W + 2, 2 * H, 2 * W
    tdo = 2 * tds
    WpC, W2C = Wp * C, W2 * C
    S2 = (tds + 2) * Hp
    rows = tdo * H2
    est = (S2 * WpC * cbytes * 2                      # input block (x2 pipeline buffers)
           + (tdo + 2) * H2 * S2 * cbytes * 2         # fused upsample matrix (x2 buffers)
           + 9 * WpC * W2C * cbytes * 2               # Toeplitz conv weights (x2 buffers)
           + W2C * 4 * 2                              # bias row
           + rows * W2C * 4 * 2                       # output block (x2 buffers, f32)
           + (tdo + 2) * (H2 + 2) * WpC * cbytes      # u_ref scratch
           + rows * W2C * 4                           # acc_ref scratch (f32)
           + (tdo + 2) * H2 * WpC * 4                 # live upsample matmul result (f32)
           + 2 * rows * WpC * cbytes)                 # conv slab temporaries (slack)
    return int(est * 1.15)


def _pick_tds(D, H, W, C, cbytes, budget_bytes, max_tds):
    """Largest depth tile (original-resolution rows) dividing D, <= max_tds, within budget."""
    divisors = sorted([d for d in range(1, D + 1) if D % d == 0 and d <= max_tds], reverse=True)
    if not divisors:
        return 1
    for tds in divisors:
        if _vmem_estimate(tds, H, W, C, cbytes) <= budget_bytes:
            return tds
    return divisors[-1]


# ---------------------------------------------------------------------------
# Public wrapper.
# ---------------------------------------------------------------------------
def upsample_block(x_ncdhw, w_torch, b, *, compute_dtype=jnp.bfloat16, tds=None,
                   channels_last_out=False):
    """UpsampleBlock.forward: trilinear x2 upsample (align_corners=False) then Conv3d(k=3, p=1).

    x_ncdhw : (N, C, D, H, W) float32 (PyTorch layout).
    w_torch : (C, C, 3, 3, 3)  Conv3d weight in PyTorch (Cout, Cin, kd, kh, kw) layout.
    b       : (C,)             Conv3d bias.
    Returns : (N, C, 2D, 2H, 2W) float32 (or (N, 2D, 2H, 2W, C) if channels_last_out).
    """
    N, C, D, H, W = x_ncdhw.shape
    assert w_torch.shape == (C, C, 3, 3, 3) and b.shape == (C,)
    Hp, Wp, H2, W2, D2 = H + 2, W + 2, 2 * H, 2 * W, 2 * D
    WpC, W2C = Wp * C, W2 * C
    cbytes = jnp.dtype(compute_dtype).itemsize

    # Generation-aware VMEM budget (128 MiB on v5e/v6e, 64 MiB per TC on v7x).
    cap = _vmem_capacity_bytes()
    tile_budget = (cap * 45) // 100
    vmem_limit = (cap * 3) // 4

    if tds is None:
        # Keep >= 2 grid iterations when N == 1 so both v7x TensorCores get work.
        max_tds = D if (N >= 2 or D == 1) else max(1, D // 2)
        tds = _pick_tds(D, H, W, C, cbytes, tile_budget, max_tds)
    assert D % tds == 0, "depth tile must divide D"
    ndt = D // tds
    tdo = 2 * tds
    S2 = (tds + 2) * Hp

    # ---- input: NCDHW -> NDHWC, replicate-pad the 3 spatial axes by 1 (implements the
    #      align_corners=False source clamping), flatten (W, C) onto the lane axis and gather
    #      overlapping halo'd depth slabs of the SMALL pre-upsample tensor. ----
    x = jnp.transpose(x_ncdhw, (0, 2, 3, 4, 1)).astype(compute_dtype)
    xp = jnp.pad(x, ((0, 0), (1, 1), (1, 1), (1, 1), (0, 0)), mode="edge")
    xp = xp.reshape(N, D + 2, Hp, WpC)
    x_tiles = jnp.stack([xp[:, t0 * tds: t0 * tds + tds + 2] for t0 in range(ndt)], axis=1)
    x_tiles = x_tiles.reshape(N * ndt, S2, WpC)

    # ---- constants: fused D+H upsample matrix, W-folded Toeplitz conv weights, tiled bias ----
    up_mat = _build_upsample_matrix(tds, H).astype(compute_dtype)        # ((tdo+2)*H2, S2)
    w_toe = _build_toeplitz_weight(w_torch, W).astype(compute_dtype)     # (3, 3, WpC, W2C)
    bias_row = jnp.tile(b.astype(jnp.float32), W2).reshape(1, W2C)

    out = pl.pallas_call(
        _upsample_conv_kernel,
        out_shape=jax.ShapeDtypeStruct((N, D2, H2, W2C), jnp.float32),
        grid_spec=pltpu.PrefetchScalarGridSpec(
            num_scalar_prefetch=0,
            grid=(N, ndt),
            in_specs=[
                pl.BlockSpec((None, S2, WpC), lambda n, t: (n * ndt + t, 0, 0)),
                pl.BlockSpec(((tdo + 2) * H2, S2), lambda n, t: (0, 0)),
                pl.BlockSpec((3, 3, WpC, W2C), lambda n, t: (0, 0, 0, 0)),
                pl.BlockSpec((1, W2C), lambda n, t: (0, 0)),
            ],
            out_specs=pl.BlockSpec((None, tdo, H2, W2C), lambda n, t: (n, t, 0, 0)),
            scratch_shapes=[
                pltpu.VMEM((tdo + 2, H2 + 2, WpC), compute_dtype),  # upsampled (D,H) tile + pads
                pltpu.VMEM((tdo * H2, W2C), jnp.float32),           # conv accumulator
            ]),
        compiler_params=pltpu.CompilerParams(
            dimension_semantics=("parallel", "parallel"),
            vmem_limit_bytes=vmem_limit),
    )(x_tiles, up_mat, w_toe, bias_row)

    y = out.reshape(N, D2, H2, W2, C)                 # free reshape (contiguous)
    if channels_last_out:
        return y                                      # avoids the HBM relayout entirely
    # TODO(synk): fold this NDHWC->NCDHW relayout into the kernel's store (in-VMEM tile
    # transpose) to remove the extra full-size HBM pass; kept in XLA here for robustness.
    return jnp.transpose(y, (0, 4, 1, 2, 3))


if __name__ == "__main__":
    key = jax.random.PRNGKey(0)
    k_x, k_w, k_b = jax.random.split(key, 3)

    N, C, D, H, W = 2, 32, 8, 8, 8
    x = jax.random.normal(k_x, (N, C, D, H, W), dtype=jnp.float32)
    # Deterministic synthetic Conv3d params, torch layout: weight (Cout, Cin, 3, 3, 3), bias (Cout,).
    w_torch = 0.1 * jax.random.normal(k_w, (C, C, 3, 3, 3), dtype=jnp.float32)
    b = 0.1 * jax.random.normal(k_b, (C,), dtype=jnp.float32)

    # Pure-JAX reference (same upsample semantics + XLA conv at HIGHEST precision).
    x_ndhwc = jnp.transpose(x, (0, 2, 3, 4, 1))
    x_up_ref = _upsample_trilinear_x2_ref(x_ndhwc)
    w_dhwio = jnp.transpose(w_torch, (2, 3, 4, 1, 0))
    ref = jax.lax.conv_general_dilated(
        x_up_ref, w_dhwio, window_strides=(1, 1, 1), padding=[(1, 1)] * 3,
        dimension_numbers=("NDHWC", "DHWIO", "NDHWC"),
        precision=jax.lax.Precision.HIGHEST) + b
    ref = jnp.transpose(ref, (0, 4, 1, 2, 3))

    # 1) f32 compute path with forced depth tiling (tds=2 -> 4 depth tiles) to exercise the
    #    halo / boundary-zeroing logic.  Tolerance covers possible bf16-pass MXU lowering of f32.
    y32 = jax.block_until_ready(
        upsample_block(x, w_torch, b, compute_dtype=jnp.float32, tds=2))
    assert y32.shape == (N, C, 2 * D, 2 * H, 2 * W), y32.shape
    np.testing.assert_allclose(np.asarray(y32), np.asarray(ref), atol=3e-2, rtol=3e-2)

    # 2) Default bf16-operand / f32-accumulate path with automatic (generation-aware) tiling.
    y16 = jax.block_until_ready(upsample_block(x, w_torch, b))
    assert y16.shape == (N, C, 2 * D, 2 * H, 2 * W), y16.shape
    np.testing.assert_allclose(np.asarray(y16), np.asarray(ref), atol=8e-2, rtol=8e-2)

    print("KERNEL_OK")
</pallas_src>

<mosaic_0001>
module attributes {stable_mosaic.version = 11 : i64} {
  func.func @_upsample_conv_kernel(%arg0: i32, %arg1: i32, %arg2: memref<1x40x320xf32, #tpu.memory_space<vmem>>, %arg3: memref<96x40xf32, #tpu.memory_space<vmem>>, %arg4: memref<3x3x320x512xf32, #tpu.memory_space<vmem>>, %arg5: memref<1x512xf32, #tpu.memory_space<vmem>>, %arg6: memref<1x4x16x512xf32, #tpu.memory_space<vmem>>, %arg7: memref<6x18x320xf32, #tpu.memory_space<vmem>>, %arg8: memref<64x512xf32, #tpu.memory_space<vmem>>) attributes {dimension_semantics = [#tpu.dimension_semantics<parallel>, #tpu.dimension_semantics<parallel>], iteration_bounds = array<i64: 2, 4>, scalar_prefetch = 0 : i64, scratch_operands = 2 : i64, tpu.core_type = #tpu.core_type<tc>, window_params = [{transform_indices = @transform_0, window_bounds = array<i64: 1, 40, 320>}, {pipeline_mode = #tpu.pipeline_mode<synchronous>, transform_indices = @transform_1, window_bounds = array<i64: 96, 40>}, {pipeline_mode = #tpu.pipeline_mode<synchronous>, transform_indices = @transform_2, window_bounds = array<i64: 3, 3, 320, 512>}, {pipeline_mode = #tpu.pipeline_mode<synchronous>, transform_indices = @transform_3, window_bounds = array<i64: 1, 512>}, {transform_indices = @transform_4, window_bounds = array<i64: 1, 4, 16, 512>}]} {
    %c0 = arith.constant 0 : index
    %c0_0 = arith.constant 0 : index
    %0 = vector.load %arg3[%c0, %c0_0] : memref<96x40xf32, #tpu.memory_space<vmem>>, vector<96x40xf32>
    %c0_1 = arith.constant 0 : index
    %c0_2 = arith.constant 0 : index
    %c0_3 = arith.constant 0 : index
    %1 = vector.load %arg2[%c0_1, %c0_2, %c0_3] : memref<1x40x320xf32, #tpu.memory_space<vmem>>, vector<1x40x320xf32>
    %2 = vector.shape_cast %1 : vector<1x40x320xf32> to vector<40x320xf32>
    %cst = arith.constant dense<0.000000e+00> : vector<96x320xf32>
    %3 = tpu.matmul %0, %2, %cst {dimension_numbers = #tpu.dot_dimension_numbers<[1], [0], [0], [1], [0, 0, 1, 1], [], []>} : vector<96x40xf32>, vector<40x320xf32>, vector<96x320xf32> -> vector<96x320xf32>
    %cst_4 = arith.constant 0.000000e+00 : f32
    %4 = vector.broadcast %cst_4 : f32 to vector<6x1x320xf32>
    %c0_5 = arith.constant 0 : index
    %c0_6 = arith.constant 0 : index
    %c0_7 = arith.constant 0 : index
    %5 = vector.load %arg7[%c0_5, %c0_6, %c0_7] : memref<6x18x320xf32, #tpu.memory_space<vmem>>, vector<6x1x320xf32>
    tpu.vector_store %arg7[%c0_5, %c0_6, %c0_7], %4 {strides = array<i32>} : memref<6x18x320xf32, #tpu.memory_space<vmem>>, vector<6x1x320xf32>,
    %cst_8 = arith.constant 0.000000e+00 : f32
    %6 = vector.broadcast %cst_8 : f32 to vector<6x1x320xf32>
    %c0_9 = arith.constant 0 : index
    %c17 = arith.constant 17 : index
    %c0_10 = arith.constant 0 : index
    %7 = vector.load %arg7[%c0_9, %c17, %c0_10] : memref<6x18x320xf32, #tpu.memory_space<vmem>>, vector<6x1x320xf32>
    tpu.vector_store %arg7[%c0_9, %c17, %c0_10], %6 {strides = array<i32>} : memref<6x18x320xf32, #tpu.memory_space<vmem>>, vector<6x1x320xf32>,
    %8 = vector.shape_cast %3 : vector<96x320xf32> to vector<6x16x320xf32>
    %c0_11 = arith.constant 0 : index
    %c1 = arith.constant 1 : index
    %c0_12 = arith.constant 0 : index
    %9 = vector.load %arg7[%c0_11, %c1, %c0_12] : memref<6x18x320xf32, #tpu.memory_space<vmem>>, vector<6x16x320xf32>
    tpu.vector_store %arg7[%c0_11, %c1, %c0_12], %8 {strides = array<i32>} : memref<6x18x320xf32, #tpu.memory_space<vmem>>, vector<6x16x320xf32>,
    %c0_i32 = arith.constant 0 : i32
    %10 = arith.cmpi eq, %arg1, %c0_i32 : i32
    %11 = arith.extui %10 : i1 to i32
    %c0_i32_13 = arith.constant 0 : i32
    %12 = arith.cmpi ne, %11, %c0_i32_13 : i32
    scf.if %12 {
      %cst_132 = arith.constant 0.000000e+00 : f32
      %97 = vector.broadcast %cst_132 : f32 to vector<1x18x320xf32>
      %c0_133 = arith.constant 0 : index
      %c0_134 = arith.constant 0 : index
      %c0_135 = arith.constant 0 : index
      %98 = vector.load %arg7[%c0_133, %c0_134, %c0_135] : memref<6x18x320xf32, #tpu.memory_space<vmem>>, vector<1x18x320xf32>
      tpu.vector_store %arg7[%c0_133, %c0_134, %c0_135], %97 {strides = array<i32>} : memref<6x18x320xf32, #tpu.memory_space<vmem>>, vector<1x18x320xf32>,
    } else {
    }
    %c3_i32 = arith.constant 3 : i32
    %13 = arith.cmpi eq, %arg1, %c3_i32 : i32
    %14 = arith.extui %13 : i1 to i32
    %c0_i32_14 = arith.constant 0 : i32
    %15 = arith.cmpi ne, %14, %c0_i32_14 : i32
    scf.if %15 {
      %cst_132 = arith.constant 0.000000e+00 : f32
      %97 = vector.broadcast %cst_132 : f32 to vector<1x18x320xf32>
      %c5 = arith.constant 5 : index
      %c0_133 = arith.constant 0 : index
      %c0_134 = arith.constant 0 : index
      %98 = vector.load %arg7[%c5, %c0_133, %c0_134] : memref<6x18x320xf32, #tpu.memory_space<vmem>>, vector<1x18x320xf32>
      tpu.vector_store %arg7[%c5, %c0_133, %c0_134], %97 {strides = array<i32>} : memref<6x18x320xf32, #tpu.memory_space<vmem>>, vector<1x18x320xf32>,
    } else {
    }
    %c0_15 = arith.constant 0 : index
    %c0_16 = arith.constant 0 : index
    %16 = vector.load %arg5[%c0_15, %c0_16] : memref<1x512xf32, #tpu.memory_space<vmem>>, vector<1x512xf32>
    %17 = vector.shape_cast %16 : vector<1x512xf32> to vector<1x512xf32>
    %18 = vector.broadcast %17 : vector<1x512xf32> to vector<64x512xf32>
    %c0_17 = arith.constant 0 : index
    %c0_18 = arith.constant 0 : index
    %19 = vector.load %arg8[%c0_17, %c0_18] : memref<64x512xf32, #tpu.memory_space<vmem>>, vector<64x512xf32>
    tpu.vector_store %arg8[%c0_17, %c0_18], %18 {strides = array<i32>} : memref<64x512xf32, #tpu.memory_space<vmem>>, vector<64x512xf32>,
    %c0_19 = arith.constant 0 : index
    %c0_20 = arith.constant 0 : index
    %c0_21 = arith.constant 0 : index
    %20 = vector.load %arg7[%c0_19, %c0_20, %c0_21] : memref<6x18x320xf32, #tpu.memory_space<vmem>>, vector<4x16x320xf32>
    %c0_22 = arith.constant 0 : index
    %c0_23 = arith.constant 0 : index
    %21 = vector.load %arg8[%c0_22, %c0_23] : memref<64x512xf32, #tpu.memory_space<vmem>>, vector<64x512xf32>
    %22 = vector.shape_cast %20 : vector<4x16x320xf32> to vector<64x320xf32>
    %c0_24 = arith.constant 0 : index
    %c0_25 = arith.constant 0 : index
    %c0_26 = arith.constant 0 : index
    %c0_27 = arith.constant 0 : index
    %23 = vector.load %arg4[%c0_24, %c0_25, %c0_26, %c0_27] : memref<3x3x320x512xf32, #tpu.memory_space<vmem>>, vector<1x1x320x512xf32>
    %24 = vector.shape_cast %23 : vector<1x1x320x512xf32> to vector<320x512xf32>
    %cst_28 = arith.constant dense<0.000000e+00> : vector<64x512xf32>
    %25 = tpu.matmul %22, %24, %cst_28 {dimension_numbers = #tpu.dot_dimension_numbers<[1], [0], [0], [1], [0, 0, 1, 1], [], []>} : vector<64x320xf32>, vector<320x512xf32>, vector<64x512xf32> -> vector<64x512xf32>
    %26 = arith.addf %21, %25 : vector<64x512xf32>
    %c0_29 = arith.constant 0 : index
    %c0_30 = arith.constant 0 : index
    %27 = vector.load %arg8[%c0_29, %c0_30] : memref<64x512xf32, #tpu.memory_space<vmem>>, vector<64x512xf32>
    tpu.vector_store %arg8[%c0_29, %c0_30], %26 {strides = array<i32>} : memref<64x512xf32, #tpu.memory_space<vmem>>, vector<64x512xf32>,
    %c0_31 = arith.constant 0 : index
    %c1_32 = arith.constant 1 : index
    %c0_33 = arith.constant 0 : index
    %28 = vector.load %arg7[%c0_31, %c1_32, %c0_33] : memref<6x18x320xf32, #tpu.memory_space<vmem>>, vector<4x16x320xf32>
    %c0_34 = arith.constant 0 : index
    %c0_35 = arith.constant 0 : index
    %29 = vector.load %arg8[%c0_34, %c0_35] : memref<64x512xf32, #tpu.memory_space<vmem>>, vector<64x512xf32>
    %30 = vector.shape_cast %28 : vector<4x16x320xf32> to vector<64x320xf32>
    %c0_36 = arith.constant 0 : index
    %c1_37 = arith.constant 1 : index
    %c0_38 = arith.constant 0 : index
    %c0_39 = arith.constant 0 : index
    %31 = vector.load %arg4[%c0_36, %c1_37, %c0_38, %c0_39] : memref<3x3x320x512xf32, #tpu.memory_space<vmem>>, vector<1x1x320x512xf32>
    %32 = vector.shape_cast %31 : vector<1x1x320x512xf32> to vector<320x512xf32>
    %cst_40 = arith.constant dense<0.000000e+00> : vector<64x512xf32>
    %33 = tpu.matmul %30, %32, %cst_40 {dimension_numbers = #tpu.dot_dimension_numbers<[1], [0], [0], [1], [0, 0, 1, 1], [], []>} : vector<64x320xf32>, vector<320x512xf32>, vector<64x512xf32> -> vector<64x512xf32>
    %34 = arith.addf %29, %33 : vector<64x512xf32>
    %c0_41 = arith.constant 0 : index
    %c0_42 = arith.constant 0 : index
    %35 = vector.load %arg8[%c0_41, %c0_42] : memref<64x512xf32, #tpu.memory_space<vmem>>, vector<64x512xf32>
    tpu.vector_store %arg8[%c0_41, %c0_42], %34 {strides = array<i32>} : memref<64x512xf32, #tpu.memory_space<vmem>>, vector<64x512xf32>,
    %c0_43 = arith.constant 0 : index
    %c2 = arith.constant 2 : index
    %c0_44 = arith.constant 0 : index
    %36 = vector.load %arg7[%c0_43, %c2, %c0_44] : memref<6x18x320xf32, #tpu.memory_space<vmem>>, vector<4x16x320xf32>
    %c0_45 = arith.constant 0 : index
    %c0_46 = arith.constant 0 : index
    %37 = vector.load %arg8[%c0_45, %c0_46] : memref<64x512xf32, #tpu.memory_space<vmem>>, vector<64x512xf32>
    %38 = vector.shape_cast %36 : vector<4x16x320xf32> to vector<64x320xf32>
    %c0_47 = arith.constant 0 : index
    %c2_48 = arith.constant 2 : index
    %c0_49 = arith.constant 0 : index
    %c0_50 = arith.constant 0 : index
    %39 = vector.load %arg4[%c0_47, %c2_48, %c0_49, %c0_50] : memref<3x3x320x512xf32, #tpu.memory_space<vmem>>, vector<1x1x320x512xf32>
    %40 = vector.shape_cast %39 : vector<1x1x320x512xf32> to vector<320x512xf32>
    %cst_51 = arith.constant dense<0.000000e+00> : vector<64x512xf32>
    %41 = tpu.matmul %38, %40, %cst_51 {dimension_numbers = #tpu.dot_dimension_numbers<[1], [0], [0], [1], [0, 0, 1, 1], [], []>} : vector<64x320xf32>, vector<320x512xf32>, vector<64x512xf32> -> vector<64x512xf32>
    %42 = arith.addf %37, %41 : vector<64x512xf32>
    %c0_52 = arith.constant 0 : index
    %c0_53 = arith.constant 0 : index
    %43 = vector.load %arg8[%c0_52, %c0_53] : memref<64x512xf32, #tpu.memory_space<vmem>>, vector<64x512xf32>
    tpu.vector_store %arg8[%c0_52, %c0_53], %42 {strides = array<i32>} : memref<64x512xf32, #tpu.memory_space<vmem>>, vector<64x512xf32>,
    %c1_54 = arith.constant 1 : index
    %c0_55 = arith.constant 0 : index
    %c0_56 = arith.constant 0 : index
    %44 = vector.load %arg7[%c1_54, %c0_55, %c0_56] : memref<6x18x320xf32, #tpu.memory_space<vmem>>, vector<4x16x320xf32>
    %c0_57 = arith.constant 0 : index
    %c0_58 = arith.constant 0 : index
    %45 = vector.load %arg8[%c0_57, %c0_58] : memref<64x512xf32, #tpu.memory_space<vmem>>, vector<64x512xf32>
    %46 = vector.shape_cast %44 : vector<4x16x320xf32> to vector<64x320xf32>
    %c1_59 = arith.constant 1 : index
    %c0_60 = arith.constant 0 : index
    %c0_61 = arith.constant 0 : index
    %c0_62 = arith.constant 0 : index
    %47 = vector.load %arg4[%c1_59, %c0_60, %c0_61, %c0_62] : memref<3x3x320x512xf32, #tpu.memory_space<vmem>>, vector<1x1x320x512xf32>
    %48 = vector.shape_cast %47 : vector<1x1x320x512xf32> to vector<320x512xf32>
    %cst_63 = arith.constant dense<0.000000e+00> : vector<64x512xf32>
    %49 = tpu.matmul %46, %48, %cst_63 {dimension_numbers = #tpu.dot_dimension_numbers<[1], [0], [0], [1], [0, 0, 1, 1], [], []>} : vector<64x320xf32>, vector<320x512xf32>, vector<64x512xf32> -> vector<64x512xf32>
    %50 = arith.addf %45, %49 : vector<64x512xf32>
    %c0_64 = arith.constant 0 : index
    %c0_65 = arith.constant 0 : index
    %51 = vector.load %arg8[%c0_64, %c0_65] : memref<64x512xf32, #tpu.memory_space<vmem>>, vector<64x512xf32>
    tpu.vector_store %arg8[%c0_64, %c0_65], %50 {strides = array<i32>} : memref<64x512xf32, #tpu.memory_space<vmem>>, vector<64x512xf32>,
    %c1_66 = arith.constant 1 : index
    %c1_67 = arith.constant 1 : index
    %c0_68 = arith.constant 0 : index
    %52 = vector.load %arg7[%c1_66, %c1_67, %c0_68] : memref<6x18x320xf32, #tpu.memory_space<vmem>>, vector<4x16x320xf32>
    %c0_69 = arith.constant 0 : index
    %c0_70 = arith.constant 0 : index
    %53 = vector.load %arg8[%c0_69, %c0_70] : memref<64x512xf32, #tpu.memory_space<vmem>>, vector<64x512xf32>
    %54 = vector.shape_cast %52 : vector<4x16x320xf32> to vector<64x320xf32>
    %c1_71 = arith.constant 1 : index
    %c1_72 = arith.constant 1 : index
    %c0_73 = arith.constant 0 : index
    %c0_74 = arith.constant 0 : index
    %55 = vector.load %arg4[%c1_71, %c1_72, %c0_73, %c0_74] : memref<3x3x320x512xf32, #tpu.memory_space<vmem>>, vector<1x1x320x512xf32>
    %56 = vector.shape_cast %55 : vector<1x1x320x512xf32> to vector<320x512xf32>
    %cst_75 = arith.constant dense<0.000000e+00> : vector<64x512xf32>
    %57 = tpu.matmul %54, %56, %cst_75 {dimension_numbers = #tpu.dot_dimension_numbers<[1], [0], [0], [1], [0, 0, 1, 1], [], []>} : vector<64x320xf32>, vector<320x512xf32>, vector<64x512xf32> -> vector<64x512xf32>
    %58 = arith.addf %53, %57 : vector<64x512xf32>
    %c0_76 = arith.constant 0 : index
    %c0_77 = arith.constant 0 : index
    %59 = vector.load %arg8[%c0_76, %c0_77] : memref<64x512xf32, #tpu.memory_space<vmem>>, vector<64x512xf32>
    tpu.vector_store %arg8[%c0_76, %c0_77], %58 {strides = array<i32>} : memref<64x512xf32, #tpu.memory_space<vmem>>, vector<64x512xf32>,
    %c1_78 = arith.constant 1 : index
    %c2_79 = arith.constant 2 : index
    %c0_80 = arith.constant 0 : index
    %60 = vector.load %arg7[%c1_78, %c2_79, %c0_80] : memref<6x18x320xf32, #tpu.memory_space<vmem>>, vector<4x16x320xf32>
    %c0_81 = arith.constant 0 : index
    %c0_82 = arith.constant 0 : index
    %61 = vector.load %arg8[%c0_81, %c0_82] : memref<64x512xf32, #tpu.memory_space<vmem>>, vector<64x512xf32>
    %62 = vector.shape_cast %60 : vector<4x16x320xf32> to vector<64x320xf32>
    %c1_83 = arith.constant 1 : index
    %c2_84 = arith.constant 2 : index
    %c0_85 = arith.constant 0 : index
    %c0_86 = arith.constant 0 : index
    %63 = vector.load %arg4[%c1_83, %c2_84, %c0_85, %c0_86] : memref<3x3x320x512xf32, #tpu.memory_space<vmem>>, vector<1x1x320x512xf32>
    %64 = vector.shape_cast %63 : vector<1x1x320x512xf32> to vector<320x512xf32>
    %cst_87 = arith.constant dense<0.000000e+00> : vector<64x512xf32>
    %65 = tpu.matmul %62, %64, %cst_87 {dimension_numbers = #tpu.dot_dimension_numbers<[1], [0], [0], [1], [0, 0, 1, 1], [], []>} : vector<64x320xf32>, vector<320x512xf32>, vector<64x512xf32> -> vector<64x512xf32>
    %66 = arith.addf %61, %65 : vector<64x512xf32>
    %c0_88 = arith.constant 0 : index
    %c0_89 = arith.constant 0 : index
    %67 = vector.load %arg8[%c0_88, %c0_89] : memref<64x512xf32, #tpu.memory_space<vmem>>, vector<64x512xf32>
    tpu.vector_store %arg8[%c0_88, %c0_89], %66 {strides = array<i32>} : memref<64x512xf32, #tpu.memory_space<vmem>>, vector<64x512xf32>,
    %c2_90 = arith.constant 2 : index
    %c0_91 = arith.constant 0 : index
    %c0_92 = arith.constant 0 : index
    %68 = vector.load %arg7[%c2_90, %c0_91, %c0_92] : memref<6x18x320xf32, #tpu.memory_space<vmem>>, vector<4x16x320xf32>
    %c0_93 = arith.constant 0 : index
    %c0_94 = arith.constant 0 : index
    %69 = vector.load %arg8[%c0_93, %c0_94] : memref<64x512xf32, #tpu.memory_space<vmem>>, vector<64x512xf32>
    %70 = vector.shape_cast %68 : vector<4x16x320xf32> to vector<64x320xf32>
    %c2_95 = arith.constant 2 : index
    %c0_96 = arith.constant 0 : index
    %c0_97 = arith.constant 0 : index
    %c0_98 = arith.constant 0 : index
    %71 = vector.load %arg4[%c2_95, %c0_96, %c0_97, %c0_98] : memref<3x3x320x512xf32, #tpu.memory_space<vmem>>, vector<1x1x320x512xf32>
    %72 = vector.shape_cast %71 : vector<1x1x320x512xf32> to vector<320x512xf32>
    %cst_99 = arith.constant dense<0.000000e+00> : vector<64x512xf32>
    %73 = tpu.matmul %70, %72, %cst_99 {dimension_numbers = #tpu.dot_dimension_numbers<[1], [0], [0], [1], [0, 0, 1, 1], [], []>} : vector<64x320xf32>, vector<320x512xf32>, vector<64x512xf32> -> vector<64x512xf32>
    %74 = arith.addf %69, %73 : vector<64x512xf32>
    %c0_100 = arith.constant 0 : index
    %c0_101 = arith.constant 0 : index
    %75 = vector.load %arg8[%c0_100, %c0_101] : memref<64x512xf32, #tpu.memory_space<vmem>>, vector<64x512xf32>
    tpu.vector_store %arg8[%c0_100, %c0_101], %74 {strides = array<i32>} : memref<64x512xf32, #tpu.memory_space<vmem>>, vector<64x512xf32>,
    %c2_102 = arith.constant 2 : index
    %c1_103 = arith.constant 1 : index
    %c0_104 = arith.constant 0 : index
    %76 = vector.load %arg7[%c2_102, %c1_103, %c0_104] : memref<6x18x320xf32, #tpu.memory_space<vmem>>, vector<4x16x320xf32>
    %c0_105 = arith.constant 0 : index
    %c0_106 = arith.constant 0 : index
    %77 = vector.load %arg8[%c0_105, %c0_106] : memref<64x512xf32, #tpu.memory_space<vmem>>, vector<64x512xf32>
    %78 = vector.shape_cast %76 : vector<4x16x320xf32> to vector<64x320xf32>
    %c2_107 = arith.constant 2 : index
    %c1_108 = arith.constant 1 : index
    %c0_109 = arith.constant 0 : index
    %c0_110 = arith.constant 0 : index
    %79 = vector.load %arg4[%c2_107, %c1_108, %c0_109, %c0_110] : memref<3x3x320x512xf32, #tpu.memory_space<vmem>>, vector<1x1x320x512xf32>
    %80 = vector.shape_cast %79 : vector<1x1x320x512xf32> to vector<320x512xf32>
    %cst_111 = arith.constant dense<0.000000e+00> : vector<64x512xf32>
    %81 = tpu.matmul %78, %80, %cst_111 {dimension_numbers = #tpu.dot_dimension_numbers<[1], [0], [0], [1], [0, 0, 1, 1], [], []>} : vector<64x320xf32>, vector<320x512xf32>, vector<64x512xf32> -> vector<64x512xf32>
    %82 = arith.addf %77, %81 : vector<64x512xf32>
    %c0_112 = arith.constant 0 : index
    %c0_113 = arith.constant 0 : index
    %83 = vector.load %arg8[%c0_112, %c0_113] : memref<64x512xf32, #tpu.memory_space<vmem>>, vector<64x512xf32>
    tpu.vector_store %arg8[%c0_112, %c0_113], %82 {strides = array<i32>} : memref<64x512xf32, #tpu.memory_space<vmem>>, vector<64x512xf32>,
    %c2_114 = arith.constant 2 : index
    %c2_115 = arith.constant 2 : index
    %c0_116 = arith.constant 0 : index
    %84 = vector.load %arg7[%c2_114, %c2_115, %c0_116] : memref<6x18x320xf32, #tpu.memory_space<vmem>>, vector<4x16x320xf32>
    %c0_117 = arith.constant 0 : index
    %c0_118 = arith.constant 0 : index
    %85 = vector.load %arg8[%c0_117, %c0_118] : memref<64x512xf32, #tpu.memory_space<vmem>>, vector<64x512xf32>
    %86 = vector.shape_cast %84 : vector<4x16x320xf32> to vector<64x320xf32>
    %c2_119 = arith.constant 2 : index
    %c2_120 = arith.constant 2 : index
    %c0_121 = arith.constant 0 : index
    %c0_122 = arith.constant 0 : index
    %87 = vector.load %arg4[%c2_119, %c2_120, %c0_121, %c0_122] : memref<3x3x320x512xf32, #tpu.memory_space<vmem>>, vector<1x1x320x512xf32>
    %88 = vector.shape_cast %87 : vector<1x1x320x512xf32> to vector<320x512xf32>
    %cst_123 = arith.constant dense<0.000000e+00> : vector<64x512xf32>
    %89 = tpu.matmul %86, %88, %cst_123 {dimension_numbers = #tpu.dot_dimension_numbers<[1], [0], [0], [1], [0, 0, 1, 1], [], []>} : vector<64x320xf32>, vector<320x512xf32>, vector<64x512xf32> -> vector<64x512xf32>
    %90 = arith.addf %85, %89 : vector<64x512xf32>
    %c0_124 = arith.constant 0 : index
    %c0_125 = arith.constant 0 : index
    %91 = vector.load %arg8[%c0_124, %c0_125] : memref<64x512xf32, #tpu.memory_space<vmem>>, vector<64x512xf32>
    tpu.vector_store %arg8[%c0_124, %c0_125], %90 {strides = array<i32>} : memref<64x512xf32, #tpu.memory_space<vmem>>, vector<64x512xf32>,
    %c0_126 = arith.constant 0 : index
    %c0_127 = arith.constant 0 : index
    %92 = vector.load %arg8[%c0_126, %c0_127] : memref<64x512xf32, #tpu.memory_space<vmem>>, vector<64x512xf32>
    %93 = vector.shape_cast %92 : vector<64x512xf32> to vector<4x16x512xf32>
    %c0_128 = arith.constant 0 : index
    %c0_129 = arith.constant 0 : index
    %c0_130 = arith.constant 0 : index
    %c0_131 = arith.constant 0 : index
    %94 = vector.load %arg6[%c0_128, %c0_129, %c0_130, %c0_131] : memref<1x4x16x512xf32, #tpu.memory_space<vmem>>, vector<1x4x16x512xf32>
    %95 = vector.shape_cast %94 : vector<1x4x16x512xf32> to vector<4x16x512xf32>
    %96 = vector.shape_cast %93 : vector<4x16x512xf32> to vector<1x4x16x512xf32>
    tpu.vector_store %arg6[%c0_128, %c0_129, %c0_130, %c0_131], %96 {strides = array<i32>} : memref<1x4x16x512xf32, #tpu.memory_space<vmem>>, vector<1x4x16x512xf32>,
    return
  }
  func.func @transform_0(%arg0: i32, %arg1: i32) -> (i32, i32, i32) {
    %c4_i32 = arith.constant 4 : i32
    %0 = arith.muli %arg0, %c4_i32 : i32
    %1 = arith.addi %0, %arg1 : i32
    %c0_i32 = arith.constant 0 : i32
    %c0_i32_0 = arith.constant 0 : i32
    %c0_i32_1 = arith.constant 0 : i32
    return %1, %c0_i32, %c0_i32_0 : i32, i32, i32
  }
  func.func @transform_1(%arg0: i32, %arg1: i32) -> (i32, i32) {
    %c0_i32 = arith.constant 0 : i32
    %c0_i32_0 = arith.constant 0 : i32
    %c0_i32_1 = arith.constant 0 : i32
    return %c0_i32, %c0_i32_0 : i32, i32
  }
  func.func @transform_2(%arg0: i32, %arg1: i32) -> (i32, i32, i32, i32) {
    %c0_i32 = arith.constant 0 : i32
    %c0_i32_0 = arith.constant 0 : i32
    %c0_i32_1 = arith.constant 0 : i32
    %c0_i32_2 = arith.constant 0 : i32
    %c0_i32_3 = arith.constant 0 : i32
    return %c0_i32, %c0_i32_0, %c0_i32_1, %c0_i32_2 : i32, i32, i32, i32
  }
  func.func @transform_3(%arg0: i32, %arg1: i32) -> (i32, i32) {
    %c0_i32 = arith.constant 0 : i32
    %c0_i32_0 = arith.constant 0 : i32
    %c0_i32_1 = arith.constant 0 : i32
    return %c0_i32, %c0_i32_0 : i32, i32
  }
  func.func @transform_4(%arg0: i32, %arg1: i32) -> (i32, i32, i32, i32) {
    %c0_i32 = arith.constant 0 : i32
    %c0_i32_0 = arith.constant 0 : i32
    %c0_i32_1 = arith.constant 0 : i32
    return %arg0, %arg1, %c0_i32, %c0_i32_0 : i32, i32, i32, i32
  }
}

</mosaic_0001>

<bundles_post_ra>
// kernel: tpu_custom_call.1
= control target key start
LH: loop header
LB: loop body
LE: loop exit
PB: predicated region body
PF: predicated region fallthrough
CT: control target
= control target key end

     0   :  { %s12312_s0 = inlined_call_operand.hbm [shape: f32[8,40,320], index: 0, kind: input, shape index: {}]   ;;  %s12313_s1 = inlined_call_operand.vmem [shape: f32[96,40], index: 1, kind: input, shape index: {}]   ;;  %s12314_s2 = inlined_call_operand.hbm [shape: f32[3,3,320,512], index: 2, kind: input, shape index: {}]   ;;  %s12315_s3 = inlined_call_operand.hbm [shape: f32[1,512], index: 3, kind: input, shape index: {}]   ;;  %s12316_s4 = inlined_call_operand.hbm [shape: f32[2,16,16,512], index: 4, kind: output, shape index: {}]  }
   0x1   :  { %12341 = sst [smem:[#allocation218_spill]] %s12314_s2 }
   0x2   :  { %12342 = sst [smem:[#allocation219_spill]] %s12315_s3 }
   0x3   :  { %12343 = sst [smem:[#allocation220_spill]] %s12316_s4 }
   0x4   :  { %9 = vsyncpa [#allocation5], 0 }
   0x5   :  { %11 = vsyncpa [#allocation5 + $0x1], 0 }
   0x6   :  { %12 = vsyncpa [#allocation8], 0 }
   0x7   :  { %13 = vsyncpa [#allocation6], 0 }
   0x8   :  { %15 = vsyncpa [#allocation6 + $0x1], 0  ;;  %s9234_s15 = smov 0   ;;  %s9236_s16 = smov 0  }
   0x9   :  { %s9238_s17 = smov 0   ;;  %s9240_s18 = smov 0  }
   0xa   :  { %s9242_s19 = smov 0   ;;  %s9244_s20 = smov 0  }
   0xb   :  { %s9246_s21 = smov 0   ;;  %s9248_s22 = smov 0  }
   0xc   :  { %s9250_s23 = smov 0   ;;  %s9252_s24 = smov 0  }
   0xd   :  { %s9254_s25 = smov 0  }
   0xe LB: > { %12344 = sst [smem:[#allocation14_spill]] %s9154_s15  ;;  %s8617_s26 = sadd.s32 4294967295, %s9194_s25   ;;  %s9194_s25 = sphi %s9254_s25, %s21_s25   ;;  %s9190_s24 = sphi %s9252_s24, %s12814_s24   ;;  %s9186_s23 = sphi %s9250_s23, %s12813_s23   ;;  %s9182_s22 = sphi %s9248_s22, %s12812_s22   ;;  %s9178_s21 = sphi %s9246_s21, %s12804_s21   ;;  %s9174_s20 = sphi %s9244_s20, %s12811_s20   ;;  %s9170_s19 = sphi %s9242_s19, %s12810_s19   ;;  %s9166_s18 = sphi %s9240_s18, %s12809_s18   ;;  %s9162_s17 = sphi %s9238_s17, %s12808_s17   ;;  %s9158_s16 = sphi %s9236_s16, %s12807_s16   ;;  %s9154_s15 = sphi %s9234_s15, %s12806_s15  }
   0xf   : > { %12345 = sst [smem:[#allocation15_spill]] %s9182_s22  ;;  %s8618_s27 = sadd.s32 4294967294, %s9194_s25  }
  0x10   : > { %12346 = sst [smem:[#allocation16_spill]] %s9186_s23  ;;  %p57_p0 = scmp.ne.s32.totalorder %s9170_s19, %s9166_s18 }
  0x11   : > { %p9290_p1 = scmp.eq.s32.totalorder %s8617_s26, 0  ;;  %p145_p2 = scmp.ne.s32.totalorder %s9162_s17, %s9158_s16 }
  0x12   : > { %p146_p3 = scmp.eq.s32.totalorder %s8617_s26, 7  ;;  %p151_p5 = scmp.ne.s32.totalorder %s9158_s16, %s9154_s15 }
  0x13   : > { %s12347_s28 = scalar_select %p9290_p1, 1, 0 }
  0x14   : > { %p9298_p4 = por %p9290_p1, %p57_p0  ;;  %p9304_p6 = por %p146_p3, %p145_p2 }
  0x15   : > { %p152_p7 = scmp.eq.s32.totalorder %s8618_s27, 7  ;;  %p8621_p8 = scmp.ge.s32.totalorder %s9194_s25, 1 }
  0x16   : > { %s12349_s30 = scalar_select %p9304_p6, 1, 0 }
  0x17   : > { %p159_p9 = scmp.lt.s32.totalorder %s9194_s25, 9  ;;  %p9310_p10 = por %p152_p7, %p151_p5 }
  0x18   : > { %12350 = sst [smem:[#allocation17_spill]] %s12349_s30  ;;  %s9196_s7 = smov [#allocation7]  }
  0x19   : > { %s12351_s5 = scalar_select %p9310_p10, 1, 0 }
  0x1a   : > { %p9314_p11 = pnand %p8621_p8, %p159_p9  ;;  %s174_s8 = sshll.u32 %s9196_s7, 4  ;;  %s175_s8 = int_to_ptr.vmem [resolvable:$true] %s174_s8 }
  0x1b   : > { %12352 = sst [smem:[#allocation18_spill]] %s12351_s5  ;;  %s9197_s10 = smov [#allocation9]  }
  0x1c   : > { %p8869_p12 = pneg %p9314_p11  ;;  %s188_s11 = sshll.u32 %s9197_s10, 4  ;;  %s189_s11 = int_to_ptr.vmem [resolvable:$true] %s188_s11 }
  0x1d   : > { %s9001_s12 = scalar_lea.vmem %s175_s8, 184320  ;;  %p9009_p7 = scmp.lt.s32.totalorder %s175_s8, %s175_s8 }
  0x1e   : > { %p9322_p13 = pnand %p8869_p12, %p9290_p1  ;;  %p9002_p2 = scmp.ne.s32.totalorder %s175_s8, %s9001_s12 }
  0x1f   : > { %p9010_p8 = scmp.lt.s32.totalorder %s9001_s12, %s9001_s12 }
  0x20   : > { %p8992_p0 = pneg %p9322_p13 }
  0x21   : > { %p9011_p9 = por %p9010_p8, %p9009_p7 }
  0x22   : > { %p9004_p3 = pnand %p9002_p2, %p8992_p0 }
  0x24   : > { %p9005_p5 = pneg %p9004_p3 }
  0x26   : > { %p9012_p12 = pnand %p9011_p9, %p9005_p5 }
  0x28   : > { %9015 = shalt.err (!%p9012_p12)
}
  0x29   : > { %s9198_s13 = smov 512   ;;  %s9199_s14 = smov 32  }
  0x2a   : > { %s12355_s2 = sld [smem:[#allocation218_spill]]  ;;  %s9027_s27 = scalar_lea.vmem %s189_s11, 64 }
  0x2b   : > { %p9028_p10 = scmp.ne.s32.totalorder %s189_s11, %s9027_s27  ;;  %p9035_p6 = scmp.lt.s32.totalorder %s189_s11, %s189_s11 }
  0x2c   : > { %p9036_p1 = scmp.lt.s32.totalorder %s9027_s27, %s9027_s27 }
  0x2d   : > { %p9030_p2 = pnand %p9028_p10, %p8992_p0 }
  0x2e   : > { %p9037_p7 = por %p9036_p1, %p9035_p6 }
  0x2f   : > { %p9031_p3 = pneg %p9030_p2 }
  0x30   : > { %8872 = dma.hbm_to_vmem [thread:$0]  (!%p9322_p13), %s12355_s2, 184320, %s175_s8, [#allocation8], %s9198_s13, %s9198_s13, %s9199_s14  }
  0x31   : > { %p9038_p5 = pnand %p9037_p7, %p9031_p3 }
  0x33   : > { %9041 = shalt.err (!%p9038_p5)
}
  0x34   : > { %s12356_s3 = sld [smem:[#allocation219_spill]]  ;;  %s30_s8 = sadd.s32 1, %s9186_s23 }
  0x35   : > { %p31_p1 = scmp.ge.s32.totalorder %s30_s8, 4  ;;  %s33_s9 = sadd.s32 1, %s9190_s24 }
  0x36   : > { %s8619_s12 = sshll.u32 %s9190_s24, 2  ;;  %s44_s13 = sadd.s32 1, %s9174_s20 }
  0x37   : > { %s12816_s8 = smov (%p31_p1, %s30_s8), 0  ;;  %s12818_s9 = smov (!%p31_p1, %s33_s9), %s9190_s24 }
  0x38   : > { %s38_s14 = sadd.s32 %s9186_s23, %s8619_s12  ;;  %p51_p6 = scmp.ne.s32.totalorder %s9174_s20, %s9170_s19 }
  0x39   : > { %p35_p10 = scmp.ge.s32.totalorder %s12818_s9, 2  ;;  %p52_p0 = scmp.eq.s32.totalorder %s9194_s25, 0 }
  0x3a   : > { %8875 = dma.hbm_to_vmem [thread:$0]  (!%p9322_p13), %s12356_s3, 64, %s189_s11, [#allocation8]  }
  0x3b   : > { %s131_s11 = ssub.s32 %s9186_s23, %s12816_s8  ;;  %s135_s18 = sadd.s32 1, %s9162_s17 }
  0x3c   : > { %s12820_s9 = smov (%p35_p10, %s12818_s9), 0  ;;  %p9360_p13 = por %p52_p0, %p51_p6 }
  0x3d   : > { %12357 = sst [smem:[#allocation19_spill]] %s12820_s9  ;;  %p8886_p8 = scmp.lt.s32.totalorder %s9194_s25, 8 }
  0x3e   : > { %s8620_s27 = sshll.u32 %s12820_s9, 2  ;;  %s130_s7 = ssub.s32 %s9190_s24, %s12820_s9 }
  0x3f   : > { %s40_s10 = sadd.s32 %s8620_s27, %s12816_s8  ;;  %s132_s12 = sor.u32 %s131_s11, %s130_s7 }
  0x40   : > { %s41_s2 = ssub.s32 %s38_s14, %s40_s10  ;;  %p133_p9 = scmp.eq.s32.totalorder %s132_s12, 0 }
  0x41   : > { %p42_p12 = scmp.eq.s32.totalorder %s41_s2, 0  ;;  %s199_s3 = sand.u32 1, %s9174_s20  }
  0x42   : > { %s9371_s23 = scalar_select %p133_p9, %s9162_s17, %s135_s18  }
  0x43   : > { %s9374_s5 = scalar_select %p42_p12, %s9174_s20, %s44_s13  }
  0x44   : > { %s8854_s15 = smul.u32 120, %s199_s3  ;;  %p9380_p2 = pnand %p8886_p8, %p9360_p13 }
  0x45   : > { %s8855_s4 = smul.u32 1920, %s38_s14  ;;  %s200_s18 = scalar_lea.sflag [#allocation5], %s199_s3 }
  0x46   : > { %s203_s27 = scalar_lea.vmem [#allocation4], %s8854_s15  ;;  %p9044_p3 = pneg %p9380_p2 }
  0x47   : > { %s211_s11 = scalar_lea.hbm %s12312_s0, %s8855_s4  ;;  %s212_s2 = sshll.u32 %s203_s27, 4  ;;  %s213_s2 = int_to_ptr.vmem [resolvable:$true] %s212_s2 }
  0x48   : > { %s9055_s13 = scalar_lea.vmem %s213_s2, 1920  ;;  %s9200_s14 = smov [#allocation4]  }
  0x49   : > { %p9056_p7 = scmp.ne.s32.totalorder %s213_s2, %s9055_s13  ;;  %s9060_s26 = sshll.u32 %s9200_s14, 4  ;;  %s9061_s26 = int_to_ptr.vmem [resolvable:$false] %s9060_s26 }
  0x4a   : > { %s9062_s7 = scalar_lea.vmem %s9061_s26, 3840  ;;  %p9063_p6 = scmp.lt.s32.totalorder %s213_s2, %s9061_s26 }
  0x4b   : > { %p9058_p5 = pnand %p9056_p7, %p9044_p3  ;;  %p9064_p10 = scmp.lt.s32.totalorder %s9062_s7, %s9055_s13 }
  0x4d   : > { %p9059_p1 = pneg %p9058_p5  ;;  %p9065_p0 = por %p9064_p10, %p9063_p6 }
  0x4f   : > { %p9066_p13 = pnand %p9065_p0, %p9059_p1 }
  0x51   : > { %9069 = shalt.err (!%p9066_p13)
}
  0x52   : > { %s9201_s4 = smov 384   ;;  %s9202_s15 = smov 24  }
  0x53   : > { %8879 = dma.hbm_to_vmem [thread:$0]  (!%p9380_p2), %s211_s11, 1920, %s213_s2, %s200_s18, %s9201_s4, %s9201_s4, %s9202_s15  }
  0x54   : > { %224 = sbr.rel (%p9314_p11) target bundleno = 1617 (0x651), region = 36 }
  0x59   : > { %s226_s3 = sand.u32 1, %s9170_s19  }
  0x5a   : > { %s8856_s22 = smul.u32 120, %s226_s3  ;;  %s227_s9 = scalar_lea.sflag [#allocation5], %s226_s3 }
  0x5c   : > { %s9394_s10 = scalar_lea.vmem [#allocation4], %s8856_s22 }
  0x5d   : > { %9141 = dma.done.wait (%p9298_p4), %s227_s9, 1920  }
  0x5e   : > { %9143 = vsyncadd (%p9298_p4), %s227_s9, 4294965376  ;;  %p12360_p8 = scmp.ne.s32.totalorder %s12347_s28, 0 }
  0x60   : > { %9145 = dma.done.wait (%p12360_p8), [#allocation8], 184384  }
  0x61   : > { %9147 = vsyncadd (%p12360_p8), [#allocation8], 4294782912  ;;  %s260_s30 = sand.u32 1, %s9158_s16   ;;  %v12327_v0 = vlaneseq  ;;  %v12328_v1 = vmov 0.0   ;;  %v291_v2 = vld [vmem:[%s9394_s10 + $0x68] sm:$0xff]  ;;  %v290_v3 = vld [vmem:[%s9394_s10 + $0x60] sm:$0xff] }
  0x62   : > { %s9407_s6 = sshll.u32 %s260_s30, 8  ;;  %394 = vmatprep.mubr.f32.mxu0 %v12328_v1  ;;  %v288_v4 = vld [vmem:[%s9394_s10 + $0x50] sm:$0xff]  ;;  %352 = vmatprep.subr.mxu0 %v291_v2  ;;  %v287_v5 = vld [vmem:[%s9394_s10 + $0x48] sm:$0xff]  ;;  %v285_v6 = vld [vmem:[%s9394_s10 + $0x38] sm:$0xff]  ;;  %vm293_vm1 = vcmask 326656   ;;  %vm667_vm2 = vcmask 1040384  }
  0x63   : > { %vm594_vm0 = vcmp.lt.s32.totalorder %v12327_v0, 320  ;;  %353 = vmatpush1.msra.mxu0 %v290_v3  ;;  %v284_v7 = vld [vmem:[%s9394_s10 + $0x30] sm:$0xff]  ;;  %v282_v9 = vld [vmem:[%s9394_s10 + $0x20] sm:$0xff]  ;;  %v281_v11 = vld [vmem:[%s9394_s10 + $0x18] sm:$0xff]  ;;  %vm786_vm3 = vcmask 516096   ;;  %vm778_vm4 = vcmask 523265  }
  0x64   : > { %596 = vst.msk [vmem:[#allocation2] ss:$8 sm:$0x7] %vm594_vm0, %v12328_v1  ;;  %599 = vst.msk [vmem:[#allocation2 + $0x48] ss:$8 sm:$0x7] %vm594_vm0, %v12328_v1  ;;  %354 = vmatprep.subr.mxu0 %v288_v4 }
  0x65   : > { %602 = vst.msk [vmem:[#allocation2 + $0x90] ss:$8 sm:$0x7] %vm594_vm0, %v12328_v1  ;;  %605 = vst.msk [vmem:[#allocation2 + $0xd8] ss:$8 sm:$0x7] %vm594_vm0, %v12328_v1  ;;  %355 = vmatpush1.msra.mxu0 %v287_v5 }
  0x66   : > { %608 = vst.msk [vmem:[#allocation2 + $0x120] ss:$8 sm:$0x7] %vm594_vm0, %v12328_v1  ;;  %611 = vst.msk [vmem:[#allocation2 + $0x168] ss:$8 sm:$0x7] %vm594_vm0, %v12328_v1  ;;  %356 = vmatprep.subr.mxu0 %v285_v6 }
  0x67   : > { %614 = vst.msk [vmem:[#allocation2 + $0x31] ss:$8 sm:$0x7] %vm594_vm0, %v12328_v1  ;;  %617 = vst.msk [vmem:[#allocation2 + $0x79] ss:$8 sm:$0x7] %vm594_vm0, %v12328_v1  ;;  %357 = vmatpush1.msra.mxu0 %v284_v7 }
  0x68   : > { %620 = vst.msk [vmem:[#allocation2 + $0xc1] ss:$8 sm:$0x7] %vm594_vm0, %v12328_v1  ;;  %623 = vst.msk [vmem:[#allocation2 + $0x109] ss:$8 sm:$0x7] %vm594_vm0, %v12328_v1  ;;  %358 = vmatprep.subr.mxu0 %v282_v9 }
  0x69   : > { %626 = vst.msk [vmem:[#allocation2 + $0x151] ss:$8 sm:$0x7] %vm594_vm0, %v12328_v1  ;;  %629 = vst.msk [vmem:[#allocation2 + $0x199] ss:$8 sm:$0x7] %vm594_vm0, %v12328_v1  ;;  %359 = vmatpush1.msra.mxu0 %v281_v11 }
  0x6a   : > { %v266_v8 = vld [vmem:[%s12313_s1] sm:$0xff]  ;;  %v279_v13 = vld [vmem:[%s9394_s10 + $0x8] sm:$0xff]  ;;  %v286_v14 = vld [vmem:[%s9394_s10 + $0x40] sm:$0xff]  ;;  %vm782_vm5 = vcmask 523264   ;;  %s9546_s13 = scalar_lea.vmem [#allocation10], %s9407_s6  ;;  %p8655_p4 = scmp.ne.s32.totalorder %s9178_s21, 0 }
  0x6b   : > { %v292_v10 = vld [vmem:[%s9394_s10 + $0x70] sm:$0xff]  ;;  %8836 = vmatprep.mubr.msk.f32.mxu1 %vm293_vm1, %v266_v8  ;;  %v289_v12 = vld [vmem:[%s9394_s10 + $0x58] sm:$0xff]  ;;  %v278_v15 = vld [vmem:[%s9394_s10] sm:$0xff]  ;;  %360 = vmatprep.subr.mxu0 %v279_v13 }
  0x6c   : > { %8826 = vmatprep.subr.mxu1 %v292_v10  ;;  %v283_v16 = vld [vmem:[%s9394_s10 + $0x28] sm:$0xff]  ;;  %361 = vmatpush1.msra.mxu0 %v278_v15  ;;  %v280_v17 = vld [vmem:[%s9394_s10 + $0x10] sm:$0xff]  ;;  %v267_v18 = vld [vmem:[%s12313_s1 + $0x8] sm:$0xff] }
  0x6d   : > { %8827 = vmatpush3.msra.mxu1 %v292_v10  ;;  %8631 = vmatmul.mubr.msk.f32.vlgmr.msra.gmra.mxu0 %vm293_vm1, %v266_v8  ;;  %v268_v19 = vld [vmem:[%s12313_s1 + $0x10] sm:$0xff]  ;;  %v269_v20 = vld [vmem:[%s12313_s1 + $0x18] sm:$0xff]  ;;  %v270_v21 = vld [vmem:[%s12313_s1 + $0x20] sm:$0xff] }
  0x6e   : > { %8828 = vmatprep.subr.mxu1 %v289_v12  ;;  %400 = vmatprep.mubr.f32.mxu0 %v12328_v1  ;;  %v271_v22 = vld [vmem:[%s12313_s1 + $0x28] sm:$0xff]  ;;  %v272_v23 = vld [vmem:[%s12313_s1 + $0x30] sm:$0xff]  ;;  %v273_v24 = vld [vmem:[%s12313_s1 + $0x38] sm:$0xff] }
  0x6f   : > { %8829 = vmatpush3.msra.mxu1 %v289_v12  ;;  %v274_v25 = vld [vmem:[%s12313_s1 + $0x40] sm:$0xff]  ;;  %v276_v26 = vld [vmem:[%s12313_s1 + $0x50] sm:$0xff]  ;;  %v275_v27 = vld [vmem:[%s12313_s1 + $0x48] sm:$0xff] }
  0x70   : > { %8830 = vmatprep.subr.mxu1 %v286_v14  ;;  %v277_v28 = vld [vmem:[%s12313_s1 + $0x58] sm:$0xff] }
  0x71   : > { %8831 = vmatpush3.msra.mxu1 %v286_v14  ;;  %8632 = vmatmul.mubr.msk.f32.gmra.mxu0 %vm293_vm1, %v267_v18 }
  0x72   : > { %8832 = vmatprep.subr.mxu1 %v283_v16  ;;  %406 = vmatprep.mubr.f32.mxu0 %v12328_v1 }
  0x73   : > { %8833 = vmatpush3.msra.mxu1 %v283_v16 }
  0x74   : > { %8834 = vmatprep.subr.mxu1 %v280_v17 }
  0x75   : > { %8835 = vmatpush3.msra.mxu1 %v280_v17  ;;  %8633 = vmatmul.mubr.msk.f32.gmra.mxu0 %vm293_vm1, %v268_v19 }
  0x76   : > { %8837 = vmatmul.mubr.msk.f32.vlgmr.msra.gmra.mxu1 %vm293_vm1, %v267_v18  ;;  %412 = vmatprep.mubr.f32.mxu0 %v12328_v1 }
  0x77   : > { %8839 = vmatprep.mubr.msk.f32.mxu1 %vm293_vm1, %v268_v19 }
  0x79   : > { %8634 = vmatmul.mubr.msk.f32.gmra.mxu0 %vm293_vm1, %v269_v20 }
  0x7a   : > { %8840 = vmatmul.mubr.msk.f32.gmra.mxu1 %vm293_vm1, %v269_v20  ;;  %418 = vmatprep.mubr.f32.mxu0 %v12328_v1 }
  0x7b   : > { %8842 = vmatprep.mubr.msk.f32.mxu1 %vm293_vm1, %v270_v21 }
  0x7d   : > { %8635 = vmatmul.mubr.msk.f32.gmra.mxu0 %vm293_vm1, %v270_v21 }
  0x7e   : > { %8843 = vmatmul.mubr.msk.f32.gmra.mxu1 %vm293_vm1, %v271_v22  ;;  %424 = vmatprep.mubr.f32.mxu0 %v12328_v1 }
  0x7f   : > { %8845 = vmatprep.mubr.msk.f32.mxu1 %vm293_vm1, %v272_v23 }
  0x81   : > { %8636 = vmatmul.mubr.msk.f32.gmra.mxu0 %vm293_vm1, %v271_v22 }
  0x82   : > { %8846 = vmatmul.mubr.msk.f32.gmra.mxu1 %vm293_vm1, %v273_v24  ;;  %430 = vmatprep.mubr.f32.mxu0 %v12328_v1 }
  0x83   : > { %8848 = vmatprep.mubr.msk.f32.mxu1 %vm293_vm1, %v274_v25 }
  0x85   : > { %8637 = vmatmul.mubr.msk.f32.gmra.mxu0 %vm293_vm1, %v272_v23 }
  0x86   : > { %8849 = vmatmul.mubr.msk.f32.gmra.mxu1 %vm293_vm1, %v275_v27  ;;  %436 = vmatprep.mubr.f32.mxu0 %v12328_v1 }
  0x87   : > { %8851 = vmatprep.mubr.msk.f32.mxu1 %vm293_vm1, %v276_v26 }
  0x89   : > { %8638 = vmatmul.mubr.msk.f32.gmra.mxu0 %vm293_vm1, %v273_v24 }
  0x8a   : > { %8852 = vmatmul.mubr.msk.f32.gmra.mxu1 %vm293_vm1, %v277_v28  ;;  %442 = vmatprep.mubr.f32.mxu0 %v12328_v1 }
  0x8d   : > { %8639 = vmatmul.mubr.msk.f32.gmra.mxu0 %vm293_vm1, %v274_v25 }
  0x8e   : > { %448 = vmatprep.mubr.f32.mxu0 %v12328_v1 }
  0x91   : > { %8640 = vmatmul.mubr.msk.f32.gmra.mxu0 %vm293_vm1, %v275_v27 }
  0x92   : > { %454 = vmatprep.mubr.f32.mxu0 %v12328_v1 }
  0x95   : > { %8641 = vmatmul.mubr.msk.f32.gmra.mxu0 %vm293_vm1, %v276_v26 }
  0x96   : > { %460 = vmatprep.mubr.f32.mxu0 %v12328_v1 }
  0x99   : > { %8642 = vmatmul.mubr.msk.f32.gmra.mxu0 %vm293_vm1, %v277_v28 }
 0x12d   : > { %v396_v29 = vpop.f32.mrf.mxu0 }
 0x12e   : > { %v668_v30 = vrot.slane %v396_v29, 7 }
 0x12f   : > { %v398_v31 = vpop.f32.mrf.mxu0 }
 0x130   : > { %776 = vst [vmem:[#allocation2] sm:$0xfe] %v668_v30  ;;  %v669_v32 = vrot.slane %v398_v31, 7 }
 0x131   : > { %v402_v33 = vpop.f32.mrf.mxu0 }
 0x132   : > { %777 = vst [vmem:[#allocation2 + $0x8] sm:$0xfe] %v669_v32  ;;  %v671_v35 = vrot.slane %v402_v33, 7 }
 0x133   : > { %v404_v37 = vpop.f32.mrf.mxu0 }
 0x134   : > { %v672_v39 = vsel %vm667_vm2, %v668_v30, %v671_v35  ;;  %784 = vst [vmem:[#allocation2 + $0x30] sm:$0x1] %v671_v35  ;;  %v673_v40 = vrot.slane %v404_v37, 7 }
 0x135   : > { %780 = vst [vmem:[#allocation2 + $0x18] sm:$0xff] %v672_v39  ;;  %v408_v42 = vpop.f32.mrf.mxu0 }
 0x136   : > { %v8838_v34 = vpop.f32.mrf.mxu1  ;;  %v674_v44 = vsel %vm667_vm2, %v669_v32, %v673_v40  ;;  %785 = vst [vmem:[#allocation2 + $0x38] sm:$0x1] %v673_v40  ;;  %v677_v45 = vrot.slane %v408_v42, 7 }
 0x137   : > { %v675_v36 = vrot.slane %v8838_v34, 7  ;;  %781 = vst [vmem:[#allocation2 + $0x20] sm:$0xff] %v674_v44  ;;  %v410_v48 = vpop.f32.mrf.mxu0 }
 0x138   : > { %v533_v38 = vpop.f32.mrf.mxu1  ;;  %788 = vst [vmem:[#allocation2 + $0x48] sm:$0xfe] %v677_v45  ;;  %v678_v50 = vrot.slane %v410_v48, 7 }
 0x139   : > { %787 = vst.msk [vmem:[#allocation2 + $0x40] sm:$0x1] %vm786_vm3, %v675_v36  ;;  %v670_v41 = vrot.slane %v533_v38, 7  ;;  %v414_v52 = vpop.f32.mrf.mxu0 }
 0x13a   : > { %v8841_v43 = vpop.f32.mrf.mxu1  ;;  %789 = vst [vmem:[#allocation2 + $0x50] sm:$0xfe] %v678_v50  ;;  %v680_v54 = vrot.slane %v414_v52, 7 }
 0x13b   : > { %v676_v46 = vsel %vm667_vm2, %v670_v41, %v675_v36  ;;  %779 = vst.msk [vmem:[#allocation2 + $0x10] sm:$0xfe] %vm778_vm4, %v670_v41  ;;  %v684_v47 = vrot.slane %v8841_v43, 7  ;;  %v416_v57 = vpop.f32.mrf.mxu0 }
 0x13c   : > { %783 = vst.msk [vmem:[#allocation2 + $0x28] sm:$0xff] %vm782_vm5, %v676_v46  ;;  %v543_v49 = vpop.f32.mrf.mxu1  ;;  %v681_v59 = vsel %vm667_vm2, %v677_v45, %v680_v54  ;;  %794 = vst [vmem:[#allocation2 + $0x78] sm:$0x1] %v680_v54  ;;  %v682_v60 = vrot.slane %v416_v57, 7 }
 0x13d   : > { %796 = vst.msk [vmem:[#allocation2 + $0x88] sm:$0x1] %vm786_vm3, %v684_v47  ;;  %v679_v51 = vrot.slane %v543_v49, 7  ;;  %791 = vst [vmem:[#allocation2 + $0x60] sm:$0xff] %v681_v59  ;;  %v420_v62 = vpop.f32.mrf.mxu0 }
 0x13e   : > { %v8844_v53 = vpop.f32.mrf.mxu1  ;;  %v683_v2 = vsel %vm667_vm2, %v678_v50, %v682_v60  ;;  %795 = vst [vmem:[#allocation2 + $0x80] sm:$0x1] %v682_v60  ;;  %v686_v3 = vrot.slane %v420_v62, 7 }
 0x13f   : > { %v685_v55 = vsel %vm667_vm2, %v679_v51, %v684_v47  ;;  %790 = vst.msk [vmem:[#allocation2 + $0x58] sm:$0xfe] %vm778_vm4, %v679_v51  ;;  %v693_v56 = vrot.slane %v8844_v53, 7  ;;  %792 = vst [vmem:[#allocation2 + $0x68] sm:$0xff] %v683_v2  ;;  %v422_v6 = vpop.f32.mrf.mxu0 }
 0x140   : > { %793 = vst.msk [vmem:[#allocation2 + $0x70] sm:$0xff] %vm782_vm5, %v685_v55  ;;  %v553_v58 = vpop.f32.mrf.mxu1  ;;  %797 = vst [vmem:[#allocation2 + $0x90] sm:$0xfe] %v686_v3  ;;  %v687_v8 = vrot.slane %v422_v6, 7 }
 0x141   : > { %805 = vst.msk [vmem:[#allocation2 + $0xd0] sm:$0x1] %vm786_vm3, %v693_v56  ;;  %v688_v61 = vrot.slane %v553_v58, 7  ;;  %v426_v10 = vpop.f32.mrf.mxu0 }
 0x142   : > { %v8847_v63 = vpop.f32.mrf.mxu1  ;;  %798 = vst [vmem:[#allocation2 + $0x98] sm:$0xfe] %v687_v8  ;;  %v689_v12 = vrot.slane %v426_v10, 7 }
 0x143   : > { %v694_v4 = vsel %vm667_vm2, %v688_v61, %v693_v56  ;;  %799 = vst.msk [vmem:[#allocation2 + $0xa0] sm:$0xfe] %vm778_vm4, %v688_v61  ;;  %v702_v5 = vrot.slane %v8847_v63, 7  ;;  %v428_v15 = vpop.f32.mrf.mxu0 }
 0x144   : > { %802 = vst.msk [vmem:[#allocation2 + $0xb8] sm:$0xff] %vm782_vm5, %v694_v4  ;;  %v563_v7 = vpop.f32.mrf.mxu1  ;;  %v690_v17 = vsel %vm667_vm2, %v686_v3, %v689_v12  ;;  %803 = vst [vmem:[#allocation2 + $0xc0] sm:$0x1] %v689_v12  ;;  %v691_v18 = vrot.slane %v428_v15, 7 }
 0x145   : > { %814 = vst.msk [vmem:[#allocation2 + $0x118] sm:$0x1] %vm786_vm3, %v702_v5  ;;  %v697_v9 = vrot.slane %v563_v7, 7  ;;  %800 = vst [vmem:[#allocation2 + $0xa8] sm:$0xff] %v690_v17  ;;  %v432_v20 = vpop.f32.mrf.mxu0 }
 0x146   : > { %v8850_v11 = vpop.f32.mrf.mxu1  ;;  %v692_v22 = vsel %vm667_vm2, %v687_v8, %v691_v18  ;;  %804 = vst [vmem:[#allocation2 + $0xc8] sm:$0x1] %v691_v18  ;;  %v695_v23 = vrot.slane %v432_v20, 7 }
 0x147   : > { %v703_v13 = vsel %vm667_vm2, %v697_v9, %v702_v5  ;;  %808 = vst.msk [vmem:[#allocation2 + $0xe8] sm:$0xfe] %vm778_vm4, %v697_v9  ;;  %v711_v14 = vrot.slane %v8850_v11, 7  ;;  %801 = vst [vmem:[#allocation2 + $0xb0] sm:$0xff] %v692_v22  ;;  %v434_v26 = vpop.f32.mrf.mxu0 }
 0x148   : > { %811 = vst.msk [vmem:[#allocation2 + $0x100] sm:$0xff] %vm782_vm5, %v703_v13  ;;  %v573_v16 = vpop.f32.mrf.mxu1  ;;  %806 = vst [vmem:[#allocation2 + $0xd8] sm:$0xfe] %v695_v23  ;;  %v696_v28 = vrot.slane %v434_v26, 7 }
 0x149   : > { %823 = vst.msk [vmem:[#allocation2 + $0x160] sm:$0x1] %vm786_vm3, %v711_v14  ;;  %v706_v19 = vrot.slane %v573_v16, 7  ;;  %v438_v30 = vpop.f32.mrf.mxu0 }
 0x14a   : > { %v8853_v21 = vpop.f32.mrf.mxu1  ;;  %807 = vst [vmem:[#allocation2 + $0xe0] sm:$0xfe] %v696_v28  ;;  %v698_v31 = vrot.slane %v438_v30, 7 }
 0x14b   : > { %v712_v24 = vsel %vm667_vm2, %v706_v19, %v711_v14  ;;  %817 = vst.msk [vmem:[#allocation2 + $0x130] sm:$0xfe] %vm778_vm4, %v706_v19  ;;  %v720_v25 = vrot.slane %v8853_v21, 7  ;;  %v440_v33 = vpop.f32.mrf.mxu0 }
 0x14c   : > { %820 = vst.msk [vmem:[#allocation2 + $0x148] sm:$0xff] %vm782_vm5, %v712_v24  ;;  %v583_v27 = vpop.f32.mrf.mxu1  ;;  %v699_v34 = vsel %vm667_vm2, %v695_v23, %v698_v31  ;;  %812 = vst [vmem:[#allocation2 + $0x108] sm:$0x1] %v698_v31  ;;  %v700_v35 = vrot.slane %v440_v33, 7 }
 0x14d   : > { %832 = vst.msk [vmem:[#allocation2 + $0x1a8] sm:$0x1] %vm786_vm3, %v720_v25  ;;  %v715_v29 = vrot.slane %v583_v27, 7  ;;  %809 = vst [vmem:[#allocation2 + $0xf0] sm:$0xff] %v699_v34  ;;  %v444_v36 = vpop.f32.mrf.mxu0 }
 0x14e   : > { %v701_v37 = vsel %vm667_vm2, %v696_v28, %v700_v35  ;;  %813 = vst [vmem:[#allocation2 + $0x110] sm:$0x1] %v700_v35  ;;  %v704_v38 = vrot.slane %v444_v36, 7 }
 0x14f   : > { %v721_v32 = vsel %vm667_vm2, %v715_v29, %v720_v25  ;;  %826 = vst.msk [vmem:[#allocation2 + $0x178] sm:$0xfe] %vm778_vm4, %v715_v29  ;;  %810 = vst [vmem:[#allocation2 + $0xf8] sm:$0xff] %v701_v37  ;;  %v446_v39 = vpop.f32.mrf.mxu0 }
 0x150   : > { %829 = vst.msk [vmem:[#allocation2 + $0x190] sm:$0xff] %vm782_vm5, %v721_v32  ;;  %815 = vst [vmem:[#allocation2 + $0x120] sm:$0xfe] %v704_v38  ;;  %v705_v40 = vrot.slane %v446_v39, 7 }
 0x151   : > { %v450_v41 = vpop.f32.mrf.mxu0 }
 0x152   : > { %816 = vst [vmem:[#allocation2 + $0x128] sm:$0xfe] %v705_v40  ;;  %v707_v42 = vrot.slane %v450_v41, 7 }
 0x153   : > { %v452_v43 = vpop.f32.mrf.mxu0 }
 0x154   : > { %v708_v44 = vsel %vm667_vm2, %v704_v38, %v707_v42  ;;  %821 = vst [vmem:[#allocation2 + $0x150] sm:$0x1] %v707_v42  ;;  %v709_v45 = vrot.slane %v452_v43, 7 }
 0x155   : > { %818 = vst [vmem:[#allocation2 + $0x138] sm:$0xff] %v708_v44  ;;  %v456_v46 = vpop.f32.mrf.mxu0 }
 0x156   : > { %v710_v47 = vsel %vm667_vm2, %v705_v40, %v709_v45  ;;  %822 = vst [vmem:[#allocation2 + $0x158] sm:$0x1] %v709_v45  ;;  %v713_v48 = vrot.slane %v456_v46, 7 }
 0x157   : > { %819 = vst [vmem:[#allocation2 + $0x140] sm:$0xff] %v710_v47  ;;  %v458_v49 = vpop.f32.mrf.mxu0 }
 0x158   : > { %824 = vst [vmem:[#allocation2 + $0x168] sm:$0xfe] %v713_v48  ;;  %v714_v50 = vrot.slane %v458_v49, 7 }
 0x159   : > { %v462_v51 = vpop.f32.mrf.mxu0 }
 0x15a   : > { %825 = vst [vmem:[#allocation2 + $0x170] sm:$0xfe] %v714_v50  ;;  %v716_v52 = vrot.slane %v462_v51, 7 }
 0x15b   : > { %v464_v53 = vpop.f32.mrf.mxu0  ;;  %836 = sbr.rel (%p8655_p4) target bundleno = 358 (0x166), region = 52 }
 0x15c   : > { %v717_v54 = vsel %vm667_vm2, %v713_v48, %v716_v52  ;;  %830 = vst [vmem:[#allocation2 + $0x198] sm:$0x1] %v716_v52  ;;  %v718_v55 = vrot.slane %v464_v53, 7 }
 0x15d   : > { %827 = vst [vmem:[#allocation2 + $0x180] sm:$0xff] %v717_v54 }
 0x15e   : > { %v719_v56 = vsel %vm667_vm2, %v714_v50, %v718_v55  ;;  %831 = vst [vmem:[#allocation2 + $0x1a0] sm:$0x1] %v718_v55 }
 0x15f   : > { %828 = vst [vmem:[#allocation2 + $0x188] sm:$0xff] %v719_v56 }
 0x160   : > { %vm845_vm6 = vcmask 517120   ;;  %v9204_v57 = vmov 0.0  }
 0x161   : > { %837 = vst [vmem:[#allocation2] sm:$0xff] %v9204_v57  ;;  %838 = vst [vmem:[#allocation2 + $0x8] sm:$0xff] %v9204_v57 }
 0x162   : > { %839 = vst.msk [vmem:[#allocation2 + $0x10] sm:$0xff] %vm782_vm5, %v9204_v57  ;;  %840 = vst [vmem:[#allocation2 + $0x18] sm:$0xff] %v9204_v57 }
 0x163   : > { %841 = vst [vmem:[#allocation2 + $0x20] sm:$0xff] %v9204_v57  ;;  %842 = vst.msk [vmem:[#allocation2 + $0x28] sm:$0xff] %vm782_vm5, %v9204_v57 }
 0x164   : > { %843 = vst [vmem:[#allocation2 + $0x30] sm:$0x3] %v9204_v57  ;;  %844 = vst [vmem:[#allocation2 + $0x38] sm:$0x3] %v9204_v57 }
 0x165   : > { %846 = vst.msk [vmem:[#allocation2 + $0x40] sm:$0x3] %vm845_vm6, %v9204_v57 }
 0x166 PF: > { %p8656_p11 = scmp.ne.s32.totalorder %s9178_s21, 3 }
 0x168   : > { %850 = sbr.rel (%p8656_p11) target bundleno = 371 (0x173), region = 56 }
 0x16d   : > { %vm860_vm7 = vcmask 517120   ;;  %v9205_v58 = vmov 0.0  }
 0x16e   : > { %852 = vst [vmem:[#allocation2 + $0x168] sm:$0xff] %v9205_v58  ;;  %853 = vst [vmem:[#allocation2 + $0x170] sm:$0xff] %v9205_v58 }
 0x16f   : > { %854 = vst.msk [vmem:[#allocation2 + $0x178] sm:$0xff] %vm782_vm5, %v9205_v58  ;;  %855 = vst [vmem:[#allocation2 + $0x180] sm:$0xff] %v9205_v58 }
 0x170   : > { %856 = vst [vmem:[#allocation2 + $0x188] sm:$0xff] %v9205_v58  ;;  %857 = vst.msk [vmem:[#allocation2 + $0x190] sm:$0xff] %vm782_vm5, %v9205_v58 }
 0x171   : > { %858 = vst [vmem:[#allocation2 + $0x198] sm:$0x3] %v9205_v58  ;;  %859 = vst [vmem:[#allocation2 + $0x1a0] sm:$0x3] %v9205_v58 }
 0x172   : > { %861 = vst.msk [vmem:[#allocation2 + $0x1a8] sm:$0x3] %vm860_vm7, %v9205_v58 }
 0x173 PF: > { %v1033_v59 = vld [vmem:[#allocation7 + $0x1e8] sm:$0xff]  ;;  %v1032_v61 = vld [vmem:[#allocation7 + $0x1e0] sm:$0xff]  ;;  %1333 = vmatprep.mubr.f32.mxu1 %v12328_v1  ;;  %v1035_v30 = vld [vmem:[#allocation7 + $0x1f8] sm:$0xff]  ;;  %vm1776_vm8 = vcmask 1046528   ;;  %vm2650_vm9 = vcmask 1045504   ;;  %s12789_s6 = sld [smem:[#allocation15_spill]] }
 0x174   : > { %v1129_v60 = vld [vmem:[#allocation7 + $0x4e8] sm:$0xff]  ;;  %1156 = vmatprep.subr.mxu0 %v1033_v59  ;;  %v1128_v62 = vld [vmem:[#allocation7 + $0x4e0] sm:$0xff]  ;;  %v9555_v32 = vld [vmem:[#allocation2 + $0x10] sm:$0xff]  ;;  %s8808_s14 = sshll.u32 %s9178_s21, 5  ;;  %s12796_s21 = sld [smem:[#allocation17_spill]] }
 0x175   : > { %1285 = vmatprep.subr.mxu1 %v1129_v60  ;;  %v1029_v63 = vld [vmem:[#allocation7 + $0x1c8] sm:$0xff]  ;;  %1157 = vmatpush1.msra.mxu0 %v1032_v61  ;;  %v1028_v3 = vld [vmem:[#allocation7 + $0x1c0] sm:$0xff]  ;;  %v1034_v33 = vld [vmem:[#allocation7 + $0x1f0] sm:$0xff]  ;;  %s8509_s15 = sshll.u32 %s9546_s13, 4  ;;  %s12798_s9 = sld [smem:[#allocation220_spill]]  ;;  %s12245_s15 = int_to_ptr.vmem [resolvable:$true] %s8509_s15 }
 0x176   : > { %v1125_v2 = vld [vmem:[#allocation7 + $0x4c8] sm:$0xff]  ;;  %1286 = vmatpush1.msra.mxu1 %v1128_v62  ;;  %v1124_v4 = vld [vmem:[#allocation7 + $0x4c0] sm:$0xff]  ;;  %1158 = vmatprep.subr.mxu0 %v1029_v63  ;;  %v1031_v35 = vld [vmem:[#allocation7 + $0x1d8] sm:$0xff]  ;;  %s12252_s28 = scalar_lea.sflag [#allocation6], %s260_s30  ;;  %s9070_s29 = scalar_lea.vmem %s12245_s15, 4096 }
 0x177   : > { %v1025_v5 = vld [vmem:[#allocation7 + $0x1a8] sm:$0xff]  ;;  %1287 = vmatprep.subr.mxu1 %v1125_v2  ;;  %v1024_v7 = vld [vmem:[#allocation7 + $0x1a0] sm:$0xff]  ;;  %1159 = vmatpush1.msra.mxu0 %v1028_v3  ;;  %v1030_v37 = vld [vmem:[#allocation7 + $0x1d0] sm:$0xff]  ;;  %p9071_p9 = scmp.ne.s32.totalorder %s12245_s15, %s9070_s29  ;;  %s9206_s12 = smov [#allocation10]  }
 0x178   : > { %v1121_v6 = vld [vmem:[#allocation7 + $0x4a8] sm:$0xff]  ;;  %v1120_v8 = vld [vmem:[#allocation7 + $0x4a0] sm:$0xff]  ;;  %1288 = vmatpush1.msra.mxu1 %v1124_v4  ;;  %1160 = vmatprep.subr.mxu0 %v1025_v5  ;;  %v1027_v39 = vld [vmem:[#allocation7 + $0x1b8] sm:$0xff]  ;;  %s9074_s11 = sshll.u32 %s9206_s12, 4  ;;  %s9075_s11 = int_to_ptr.vmem [resolvable:$false] %s9074_s11 }
 0x179   : > { %v1021_v9 = vld [vmem:[#allocation7 + $0x188] sm:$0xff]  ;;  %1289 = vmatprep.subr.mxu1 %v1121_v6  ;;  %v1020_v11 = vld [vmem:[#allocation7 + $0x180] sm:$0xff]  ;;  %1161 = vmatpush1.msra.mxu0 %v1024_v7  ;;  %v1026_v41 = vld [vmem:[#allocation7 + $0x1b0] sm:$0xff]  ;;  %s8804_s26 = sshll.u32 %s12789_s6, 7  ;;  %s9076_s27 = scalar_lea.vmem %s9075_s11, 8192 }
 0x17a   : > { %v1117_v10 = vld [vmem:[#allocation7 + $0x488] sm:$0xff]  ;;  %v1116_v12 = vld [vmem:[#allocation7 + $0x480] sm:$0xff]  ;;  %1290 = vmatpush1.msra.mxu1 %v1120_v8  ;;  %1162 = vmatprep.subr.mxu0 %v1021_v9  ;;  %v1023_v43 = vld [vmem:[#allocation7 + $0x198] sm:$0xff]  ;;  %s8506_s7 = sadd.s32 %s8808_s14, %s8804_s26  ;;  %p12800_p12 = scmp.ne.s32.totalorder %s12796_s21, 0 }
 0x17b   : > { %v1017_v13 = vld [vmem:[#allocation7 + $0x168] sm:$0xff]  ;;  %1291 = vmatprep.subr.mxu1 %v1117_v10  ;;  %v1016_v15 = vld [vmem:[#allocation7 + $0x160] sm:$0xff]  ;;  %1163 = vmatpush1.msra.mxu0 %v1020_v11  ;;  %v1022_v45 = vld [vmem:[#allocation7 + $0x190] sm:$0xff]  ;;  %s8805_s4 = sshll.u32 %s8506_s7, 7  ;;  %p9077_p7 = scmp.lt.s32.totalorder %s12245_s15, %s9075_s11 }
 0x17c   : > { %v1113_v14 = vld [vmem:[#allocation7 + $0x468] sm:$0xff]  ;;  %v1112_v16 = vld [vmem:[#allocation7 + $0x460] sm:$0xff]  ;;  %1292 = vmatpush1.msra.mxu1 %v1116_v12  ;;  %1164 = vmatprep.subr.mxu0 %v1017_v13  ;;  %v1019_v47 = vld [vmem:[#allocation7 + $0x178] sm:$0xff]  ;;  %s12243_s10 = scalar_lea.hbm %s12798_s9, %s8805_s4  ;;  %p9072_p2 = pnand %p9071_p9, %p12800_p12 }
 0x17d   : > { %v1013_v17 = vld [vmem:[#allocation7 + $0x148] sm:$0xff]  ;;  %1293 = vmatprep.subr.mxu1 %v1113_v14  ;;  %v1012_v19 = vld [vmem:[#allocation7 + $0x140] sm:$0xff]  ;;  %1165 = vmatpush1.msra.mxu0 %v1016_v15  ;;  %v1018_v49 = vld [vmem:[#allocation7 + $0x170] sm:$0xff]  ;;  %p9078_p5 = scmp.lt.s32.totalorder %s9076_s27, %s9070_s29 }
 0x17e   : > { %v1109_v18 = vld [vmem:[#allocation7 + $0x448] sm:$0xff]  ;;  %v1108_v20 = vld [vmem:[#allocation7 + $0x440] sm:$0xff]  ;;  %1294 = vmatpush1.msra.mxu1 %v1112_v16  ;;  %1166 = vmatprep.subr.mxu0 %v1013_v17  ;;  %v1015_v51 = vld [vmem:[#allocation7 + $0x158] sm:$0xff]  ;;  %p9073_p3 = pneg %p9072_p2 }
 0x17f   : > { %v1009_v21 = vld [vmem:[#allocation7 + $0x128] sm:$0xff]  ;;  %1295 = vmatprep.subr.mxu1 %v1109_v18  ;;  %v1008_v23 = vld [vmem:[#allocation7 + $0x120] sm:$0xff]  ;;  %1167 = vmatpush1.msra.mxu0 %v1012_v19  ;;  %v1014_v53 = vld [vmem:[#allocation7 + $0x150] sm:$0xff]  ;;  %p9079_p1 = por %p9078_p5, %p9077_p7 }
 0x180   : > { %v1105_v22 = vld [vmem:[#allocation7 + $0x428] sm:$0xff]  ;;  %v1104_v24 = vld [vmem:[#allocation7 + $0x420] sm:$0xff]  ;;  %1296 = vmatpush1.msra.mxu1 %v1108_v20  ;;  %1168 = vmatprep.subr.mxu0 %v1009_v21  ;;  %v1011_v55 = vld [vmem:[#allocation7 + $0x138] sm:$0xff] }
 0x181   : > { %v1005_v25 = vld [vmem:[#allocation7 + $0x108] sm:$0xff]  ;;  %1297 = vmatprep.subr.mxu1 %v1105_v22  ;;  %v1004_v27 = vld [vmem:[#allocation7 + $0x100] sm:$0xff]  ;;  %1169 = vmatpush1.msra.mxu0 %v1008_v23  ;;  %v1010_v57 = vld [vmem:[#allocation7 + $0x130] sm:$0xff]  ;;  %p9080_p6 = pnand %p9079_p1, %p9073_p3 }
 0x182   : > { %v1101_v26 = vld [vmem:[#allocation7 + $0x408] sm:$0xff]  ;;  %v1100_v28 = vld [vmem:[#allocation7 + $0x400] sm:$0xff]  ;;  %1298 = vmatpush1.msra.mxu1 %v1104_v24  ;;  %1170 = vmatprep.subr.mxu0 %v1005_v25  ;;  %v1007_v59 = vld [vmem:[#allocation7 + $0x118] sm:$0xff] }
 0x183   : > { %v1001_v29 = vld [vmem:[#allocation7 + $0xe8] sm:$0xff]  ;;  %1299 = vmatprep.subr.mxu1 %v1101_v26  ;;  %v1000_v31 = vld [vmem:[#allocation7 + $0xe0] sm:$0xff]  ;;  %1171 = vmatpush1.msra.mxu0 %v1004_v27  ;;  %v1006_v61 = vld [vmem:[#allocation7 + $0x110] sm:$0xff] }
 0x184   : > { %1300 = vmatpush1.msra.mxu1 %v1100_v28  ;;  %v997_v34 = vld [vmem:[#allocation7 + $0xc8] sm:$0xff]  ;;  %1172 = vmatprep.subr.mxu0 %v1001_v29  ;;  %v996_v36 = vld [vmem:[#allocation7 + $0xc0] sm:$0xff]  ;;  %v1003_v63 = vld [vmem:[#allocation7 + $0xf8] sm:$0xff] }
 0x185   : > { %1382 = vmatprep.subr.mxu1 %v1035_v30  ;;  %1173 = vmatpush1.msra.mxu0 %v1000_v31  ;;  %v993_v38 = vld [vmem:[#allocation7 + $0xa8] sm:$0xff]  ;;  %v992_v40 = vld [vmem:[#allocation7 + $0xa0] sm:$0xff]  ;;  %v1002_v3 = vld [vmem:[#allocation7 + $0xf0] sm:$0xff] }
 0x186   : > { %8657 = vmatmul.mubr.msk.f32.vlgmr.msra.gmra.mxu1 %vm782_vm5, %v9555_v32  ;;  %1174 = vmatprep.subr.mxu0 %v997_v34  ;;  %v989_v42 = vld [vmem:[#allocation7 + $0x88] sm:$0xff]  ;;  %v988_v44 = vld [vmem:[#allocation7 + $0x80] sm:$0xff]  ;;  %v999_v5 = vld [vmem:[#allocation7 + $0xd8] sm:$0xff] }
 0x187   : > { %1383 = vmatpush1.msra.mxu1 %v1034_v33  ;;  %1175 = vmatpush1.msra.mxu0 %v996_v36  ;;  %v985_v46 = vld [vmem:[#allocation7 + $0x68] sm:$0xff]  ;;  %v984_v48 = vld [vmem:[#allocation7 + $0x60] sm:$0xff]  ;;  %v998_v7 = vld [vmem:[#allocation7 + $0xd0] sm:$0xff] }
 0x188   : > { %1384 = vmatprep.subr.mxu1 %v1031_v35  ;;  %1176 = vmatprep.subr.mxu0 %v993_v38  ;;  %v981_v50 = vld [vmem:[#allocation7 + $0x48] sm:$0xff]  ;;  %v980_v52 = vld [vmem:[#allocation7 + $0x40] sm:$0xff]  ;;  %v995_v9 = vld [vmem:[#allocation7 + $0xb8] sm:$0xff] }
 0x189   : > { %1385 = vmatpush1.msra.mxu1 %v1030_v37  ;;  %1177 = vmatpush1.msra.mxu0 %v992_v40  ;;  %v977_v54 = vld [vmem:[#allocation7 + $0x28] sm:$0xff]  ;;  %v976_v56 = vld [vmem:[#allocation7 + $0x20] sm:$0xff]  ;;  %v994_v11 = vld [vmem:[#allocation7 + $0xb0] sm:$0xff] }
 0x18a   : > { %1386 = vmatprep.subr.mxu1 %v1027_v39  ;;  %1178 = vmatprep.subr.mxu0 %v989_v42  ;;  %v973_v58 = vld [vmem:[#allocation7 + $0x8] sm:$0xff]  ;;  %v972_v60 = vld [vmem:[#allocation7] sm:$0xff]  ;;  %v991_v13 = vld [vmem:[#allocation7 + $0x98] sm:$0xff] }
 0x18b   : > { %1387 = vmatpush1.msra.mxu1 %v1026_v41  ;;  %1179 = vmatpush1.msra.mxu0 %v988_v44  ;;  %v1097_v62 = vld [vmem:[#allocation7 + $0x3e8] sm:$0xff]  ;;  %v1096_v2 = vld [vmem:[#allocation7 + $0x3e0] sm:$0xff]  ;;  %v990_v15 = vld [vmem:[#allocation7 + $0x90] sm:$0xff] }
 0x18c   : > { %1388 = vmatprep.subr.mxu1 %v1023_v43  ;;  %1180 = vmatprep.subr.mxu0 %v985_v46  ;;  %v1093_v4 = vld [vmem:[#allocation7 + $0x3c8] sm:$0xff]  ;;  %v1092_v6 = vld [vmem:[#allocation7 + $0x3c0] sm:$0xff]  ;;  %v987_v17 = vld [vmem:[#allocation7 + $0x78] sm:$0xff] }
 0x18d   : > { %1389 = vmatpush1.msra.mxu1 %v1022_v45  ;;  %1181 = vmatpush1.msra.mxu0 %v984_v48  ;;  %v1089_v8 = vld [vmem:[#allocation7 + $0x3a8] sm:$0xff]  ;;  %v1088_v10 = vld [vmem:[#allocation7 + $0x3a0] sm:$0xff]  ;;  %v986_v19 = vld [vmem:[#allocation7 + $0x70] sm:$0xff] }
 0x18e   : > { %1390 = vmatprep.subr.mxu1 %v1019_v47  ;;  %1182 = vmatprep.subr.mxu0 %v981_v50  ;;  %v1085_v12 = vld [vmem:[#allocation7 + $0x388] sm:$0xff]  ;;  %v1084_v14 = vld [vmem:[#allocation7 + $0x380] sm:$0xff]  ;;  %v983_v21 = vld [vmem:[#allocation7 + $0x58] sm:$0xff] }
 0x18f   : > { %1391 = vmatpush1.msra.mxu1 %v1018_v49  ;;  %1183 = vmatpush1.msra.mxu0 %v980_v52  ;;  %v1081_v16 = vld [vmem:[#allocation7 + $0x368] sm:$0xff]  ;;  %v1080_v18 = vld [vmem:[#allocation7 + $0x360] sm:$0xff]  ;;  %v982_v23 = vld [vmem:[#allocation7 + $0x50] sm:$0xff] }
 0x190   : > { %1392 = vmatprep.subr.mxu1 %v1015_v51  ;;  %1184 = vmatprep.subr.mxu0 %v977_v54  ;;  %v1077_v20 = vld [vmem:[#allocation7 + $0x348] sm:$0xff]  ;;  %v1076_v22 = vld [vmem:[#allocation7 + $0x340] sm:$0xff]  ;;  %v979_v25 = vld [vmem:[#allocation7 + $0x38] sm:$0xff] }
 0x191   : > { %1393 = vmatpush1.msra.mxu1 %v1014_v53  ;;  %1185 = vmatpush1.msra.mxu0 %v976_v56  ;;  %v1073_v24 = vld [vmem:[#allocation7 + $0x328] sm:$0xff]  ;;  %v1072_v26 = vld [vmem:[#allocation7 + $0x320] sm:$0xff]  ;;  %v978_v27 = vld [vmem:[#allocation7 + $0x30] sm:$0xff] }
 0x192   : > { %1394 = vmatprep.subr.mxu1 %v1011_v55  ;;  %1186 = vmatprep.subr.mxu0 %v973_v58  ;;  %v1069_v28 = vld [vmem:[#allocation7 + $0x308] sm:$0xff]  ;;  %v975_v29 = vld [vmem:[#allocation7 + $0x18] sm:$0xff]  ;;  %v1068_v30 = vld [vmem:[#allocation7 + $0x300] sm:$0xff] }
 0x193   : > { %1395 = vmatpush1.msra.mxu1 %v1010_v57  ;;  %1187 = vmatpush1.msra.mxu0 %v972_v60  ;;  %v974_v31 = vld [vmem:[#allocation7 + $0x10] sm:$0xff]  ;;  %v1065_v33 = vld [vmem:[#allocation7 + $0x2e8] sm:$0xff]  ;;  %v1099_v34 = vld [vmem:[#allocation7 + $0x3f8] sm:$0xff] }
 0x194   : > { %1396 = vmatprep.subr.mxu1 %v1007_v59  ;;  %1188 = vmatprep.subr.mxu0 %v1097_v62  ;;  %v1064_v35 = vld [vmem:[#allocation7 + $0x2e0] sm:$0xff]  ;;  %v1098_v36 = vld [vmem:[#allocation7 + $0x3f0] sm:$0xff]  ;;  %v1061_v37 = vld [vmem:[#allocation7 + $0x2c8] sm:$0xff] }
 0x195   : > { %1397 = vmatpush1.msra.mxu1 %v1006_v61  ;;  %1189 = vmatpush2.msra.mxu0 %v1096_v2  ;;  %v1095_v38 = vld [vmem:[#allocation7 + $0x3d8] sm:$0xff]  ;;  %v1060_v39 = vld [vmem:[#allocation7 + $0x2c0] sm:$0xff]  ;;  %v1094_v40 = vld [vmem:[#allocation7 + $0x3d0] sm:$0xff] }
 0x196   : > { %1398 = vmatprep.subr.mxu1 %v1003_v63  ;;  %1190 = vmatprep.subr.mxu0 %v1093_v4  ;;  %v1057_v41 = vld [vmem:[#allocation7 + $0x2a8] sm:$0xff]  ;;  %v1091_v42 = vld [vmem:[#allocation7 + $0x3b8] sm:$0xff]  ;;  %v1056_v43 = vld [vmem:[#allocation7 + $0x2a0] sm:$0xff] }
 0x197   : > { %1399 = vmatpush1.msra.mxu1 %v1002_v3  ;;  %1191 = vmatpush2.msra.mxu0 %v1092_v6  ;;  %v9559_v44 = vld [vmem:[#allocation2 + $0x28] sm:$0xff]  ;;  %v1090_v45 = vld [vmem:[#allocation7 + $0x3b0] sm:$0xff]  ;;  %v1087_v47 = vld [vmem:[#allocation7 + $0x398] sm:$0xff] }
 0x198   : > { %1400 = vmatprep.subr.mxu1 %v999_v5  ;;  %1192 = vmatprep.subr.mxu0 %v1089_v8  ;;  %v1053_v46 = vld [vmem:[#allocation7 + $0x288] sm:$0xff]  ;;  %v1052_v48 = vld [vmem:[#allocation7 + $0x280] sm:$0xff]  ;;  %v1086_v49 = vld [vmem:[#allocation7 + $0x390] sm:$0xff] }
 0x199   : > { %1401 = vmatpush1.msra.mxu1 %v998_v7  ;;  %1193 = vmatpush2.msra.mxu0 %v1088_v10  ;;  %v1049_v50 = vld [vmem:[#allocation7 + $0x268] sm:$0xff]  ;;  %v1083_v51 = vld [vmem:[#allocation7 + $0x378] sm:$0xff]  ;;  %v1048_v52 = vld [vmem:[#allocation7 + $0x260] sm:$0xff] }
 0x19a   : > { %1402 = vmatprep.subr.mxu1 %v995_v9  ;;  %1194 = vmatprep.subr.mxu0 %v1085_v12  ;;  %v9564_v53 = vld [vmem:[#allocation2 + $0x58] sm:$0xff]  ;;  %v1082_v54 = vld [vmem:[#allocation7 + $0x370] sm:$0xff]  ;;  %v1045_v55 = vld [vmem:[#allocation7 + $0x248] sm:$0xff] }
 0x19b   : > { %1403 = vmatpush1.msra.mxu1 %v994_v11  ;;  %1195 = vmatpush2.msra.mxu0 %v1084_v14  ;;  %v1079_v56 = vld [vmem:[#allocation7 + $0x358] sm:$0xff]  ;;  %v1044_v57 = vld [vmem:[#allocation7 + $0x240] sm:$0xff]  ;;  %v1078_v58 = vld [vmem:[#allocation7 + $0x350] sm:$0xff] }
 0x19c   : > { %1404 = vmatprep.subr.mxu1 %v991_v13  ;;  %1196 = vmatprep.subr.mxu0 %v1081_v16  ;;  %v1041_v59 = vld [vmem:[#allocation7 + $0x228] sm:$0xff]  ;;  %v1075_v60 = vld [vmem:[#allocation7 + $0x338] sm:$0xff]  ;;  %v1040_v61 = vld [vmem:[#allocation7 + $0x220] sm:$0xff] }
 0x19d   : > { %1405 = vmatpush1.msra.mxu1 %v990_v15  ;;  %1197 = vmatpush2.msra.mxu0 %v1080_v18  ;;  %v9569_v62 = vld [vmem:[#allocation2 + $0x70] sm:$0xff]  ;;  %v1037_v2 = vld [vmem:[#allocation7 + $0x208] sm:$0xff]  ;;  %v1071_v3 = vld [vmem:[#allocation7 + $0x318] sm:$0xff] }
 0x19e   : > { %1406 = vmatprep.subr.mxu1 %v987_v17  ;;  %1198 = vmatprep.subr.mxu0 %v1077_v20  ;;  %v1074_v63 = vld [vmem:[#allocation7 + $0x330] sm:$0xff]  ;;  %v1036_v4 = vld [vmem:[#allocation7 + $0x200] sm:$0xff]  ;;  %v9574_v5 = vld [vmem:[#allocation2 + $0x8] sm:$0xff] }
 0x19f   : > { %1407 = vmatpush1.msra.mxu1 %v986_v19  ;;  %1199 = vmatpush2.msra.mxu0 %v1076_v22  ;;  %v1070_v6 = vld [vmem:[#allocation7 + $0x310] sm:$0xff]  ;;  %v9576_v7 = vld [vmem:[#allocation2] sm:$0xff]  ;;  %v1067_v8 = vld [vmem:[#allocation7 + $0x2f8] sm:$0xff] }
 0x1a0   : > { %1408 = vmatprep.subr.mxu1 %v983_v21  ;;  %1200 = vmatprep.subr.mxu0 %v1073_v24  ;;  %v1131_v9 = vld [vmem:[#allocation7 + $0x4f8] sm:$0xff]  ;;  %v9579_v10 = vld [vmem:[#allocation2 + $0xa0] sm:$0xff]  ;;  %v1130_v11 = vld [vmem:[#allocation7 + $0x4f0] sm:$0xff] }
 0x1a1   : > { %1409 = vmatpush1.msra.mxu1 %v982_v23  ;;  %1201 = vmatpush2.msra.mxu0 %v1072_v26  ;;  %v1066_v12 = vld [vmem:[#allocation7 + $0x2f0] sm:$0xff]  ;;  %v9583_v13 = vld [vmem:[#allocation2 + $0x20] sm:$0xff]  ;;  %v1063_v14 = vld [vmem:[#allocation7 + $0x2d8] sm:$0xff] }
 0x1a2   : > { %1410 = vmatprep.subr.mxu1 %v979_v25  ;;  %1202 = vmatprep.subr.mxu0 %v1069_v28  ;;  %v9585_v15 = vld [vmem:[#allocation2 + $0x18] sm:$0xff]  ;;  %v1062_v16 = vld [vmem:[#allocation7 + $0x2d0] sm:$0xff]  ;;  %v9596_v24 = vld [vmem:[#allocation2 + $0x48] sm:$0xff] }
 0x1a3   : > { %1411 = vmatpush1.msra.mxu1 %v978_v27  ;;  %1203 = vmatpush2.msra.mxu0 %v1068_v30  ;;  %v1059_v17 = vld [vmem:[#allocation7 + $0x2b8] sm:$0xff]  ;;  %v1126_v20 = vld [vmem:[#allocation7 + $0x4d0] sm:$0xff]  ;;  %v9602_v28 = vld [vmem:[#allocation2 + $0xe8] sm:$0xff] }
 0x1a4   : > { %1412 = vmatprep.subr.mxu1 %v975_v29  ;;  %1204 = vmatprep.subr.mxu0 %v1065_v33  ;;  %v1127_v18 = vld [vmem:[#allocation7 + $0x4d8] sm:$0xff]  ;;  %v1058_v21 = vld [vmem:[#allocation7 + $0x2b0] sm:$0xff] }
 0x1a5   : > { %1413 = vmatpush1.msra.mxu1 %v974_v31  ;;  %1205 = vmatpush2.msra.mxu0 %v1064_v35  ;;  %v9591_v19 = vld [vmem:[#allocation2 + $0xb8] sm:$0xff]  ;;  %v9594_v22 = vld [vmem:[#allocation2 + $0x50] sm:$0xff]  ;;  %v9605_v31 = vld [vmem:[#allocation2 + $0x68] sm:$0xff] }
 0x1a6   : > { %1414 = vmatprep.subr.mxu1 %v1099_v34  ;;  %1206 = vmatprep.subr.mxu0 %v1061_v37  ;;  %v1055_v23 = vld [vmem:[#allocation7 + $0x298] sm:$0xff]  ;;  %v1054_v25 = vld [vmem:[#allocation7 + $0x290] sm:$0xff]  ;;  %v9607_v34 = vld [vmem:[#allocation2 + $0x60] sm:$0xff] }
 0x1a7   : > { %1415 = vmatpush2.msra.mxu1 %v1098_v36  ;;  %1207 = vmatpush2.msra.mxu0 %v1060_v39  ;;  %v1051_v26 = vld [vmem:[#allocation7 + $0x278] sm:$0xff]  ;;  %v1122_v29 = vld [vmem:[#allocation7 + $0x4b0] sm:$0xff] }
 0x1a8   : > { %1416 = vmatprep.subr.mxu1 %v1095_v38  ;;  %1208 = vmatprep.subr.mxu0 %v1057_v41  ;;  %v1123_v27 = vld [vmem:[#allocation7 + $0x4b8] sm:$0xff]  ;;  %v1050_v30 = vld [vmem:[#allocation7 + $0x270] sm:$0xff]  ;;  %v9613_v38 = vld [vmem:[#allocation2 + $0x100] sm:$0xff] }
 0x1a9   : > { %1417 = vmatpush2.msra.mxu1 %v1094_v40  ;;  %1339 = vmatprep.mubr.f32.mxu1 %v12328_v1  ;;  %v1047_v33 = vld [vmem:[#allocation7 + $0x258] sm:$0xff]  ;;  %v1046_v35 = vld [vmem:[#allocation7 + $0x250] sm:$0xff] }
 0x1aa   : > { %1418 = vmatprep.subr.mxu1 %v1091_v42  ;;  %1209 = vmatpush2.msra.mxu0 %v1056_v43  ;;  %v1043_v36 = vld [vmem:[#allocation7 + $0x238] sm:$0xff]  ;;  %v1118_v39 = vld [vmem:[#allocation7 + $0x490] sm:$0xff] }
 0x1ab   : > { %8658 = vmatmul.mubr.msk.f32.gmra.mxu1 %vm782_vm5, %v9559_v44  ;;  %1210 = vmatprep.subr.mxu0 %v1053_v46  ;;  %v1119_v37 = vld [vmem:[#allocation7 + $0x498] sm:$0xff]  ;;  %v1042_v40 = vld [vmem:[#allocation7 + $0x230] sm:$0xff] }
 0x1ac   : > { %1419 = vmatpush2.msra.mxu1 %v1090_v45  ;;  %1211 = vmatpush2.msra.mxu0 %v1052_v48  ;;  %v9616_v41 = vld [vmem:[#allocation2 + $0x98] sm:$0xff]  ;;  %v9618_v43 = vld [vmem:[#allocation2 + $0x90] sm:$0xff] }
 0x1ad   : > { %1420 = vmatprep.subr.mxu1 %v1087_v47  ;;  %1212 = vmatprep.subr.mxu0 %v1049_v50  ;;  %v1039_v42 = vld [vmem:[#allocation7 + $0x218] sm:$0xff]  ;;  %v1038_v45 = vld [vmem:[#allocation7 + $0x210] sm:$0xff]  ;;  %v1915_v47 = vld [vmem:[#allocation7 + $0x6e8] sm:$0xff] }
 0x1ae   : > { %1421 = vmatpush2.msra.mxu1 %v1086_v49  ;;  %1345 = vmatprep.mubr.f32.mxu1 %v12328_v1  ;;  %v1115_v46 = vld [vmem:[#allocation7 + $0x478] sm:$0xff]  ;;  %v1114_v48 = vld [vmem:[#allocation7 + $0x470] sm:$0xff]  ;;  %v1914_v49 = vld [vmem:[#allocation7 + $0x6e0] sm:$0xff] }
 0x1af   : > { %1422 = vmatprep.subr.mxu1 %v1083_v51  ;;  %1213 = vmatpush2.msra.mxu0 %v1048_v52  ;;  %v9625_v50 = vld [vmem:[#allocation2 + $0xb0] sm:$0xff]  ;;  %v1911_v51 = vld [vmem:[#allocation7 + $0x6c8] sm:$0xff] }
 0x1b0   : > { %8659 = vmatmul.mubr.msk.f32.gmra.mxu1 %vm782_vm5, %v9564_v53  ;;  %1214 = vmatprep.subr.mxu0 %v1045_v55  ;;  %v9627_v52 = vld [vmem:[#allocation2 + $0xa8] sm:$0xff]  ;;  %v1111_v55 = vld [vmem:[#allocation7 + $0x458] sm:$0xff] }
 0x1b1   : > { %1423 = vmatpush2.msra.mxu1 %v1082_v54  ;;  %1215 = vmatpush2.msra.mxu0 %v1044_v57  ;;  %v1910_v54 = vld [vmem:[#allocation7 + $0x6c0] sm:$0xff]  ;;  %v1110_v57 = vld [vmem:[#allocation7 + $0x450] sm:$0xff] }
 0x1b2   : > { %1424 = vmatprep.subr.mxu1 %v1079_v56  ;;  %1216 = vmatprep.subr.mxu0 %v1041_v59  ;;  %v1907_v56 = vld [vmem:[#allocation7 + $0x6a8] sm:$0xff]  ;;  %v9632_v59 = vld [vmem:[#allocation2 + $0xe0] sm:$0xff] }
 0x1b3   : > { %1425 = vmatpush2.msra.mxu1 %v1078_v58  ;;  %1351 = vmatprep.mubr.f32.mxu1 %v12328_v1  ;;  %v1906_v58 = vld [vmem:[#allocation7 + $0x6a0] sm:$0xff] }
 0x1b4   : > { %1426 = vmatprep.subr.mxu1 %v1075_v60  ;;  %1217 = vmatpush2.msra.mxu0 %v1040_v61  ;;  %v1903_v60 = vld [vmem:[#allocation7 + $0x688] sm:$0xff]  ;;  %v9634_v61 = vld [vmem:[#allocation2 + $0xd8] sm:$0xff] }
 0x1b5   : > { %8660 = vmatmul.mubr.msk.f32.gmra.mxu1 %vm782_vm5, %v9569_v62  ;;  %1218 = vmatprep.subr.mxu0 %v1037_v2  ;;  %v1107_v2 = vld [vmem:[#allocation7 + $0x438] sm:$0xff] }
 0x1b6   : > { %1427 = vmatpush2.msra.mxu1 %v1074_v63  ;;  %1219 = vmatpush2.msra.mxu0 %v1036_v4  ;;  %v1902_v63 = vld [vmem:[#allocation7 + $0x680] sm:$0xff]  ;;  %v1106_v4 = vld [vmem:[#allocation7 + $0x430] sm:$0xff] }
 0x1b7   : > { %1428 = vmatprep.subr.mxu1 %v1071_v3  ;;  %1220 = vmatprep.mubr.f32.mxu0 %v9574_v5  ;;  %v1899_v3 = vld [vmem:[#allocation7 + $0x668] sm:$0xff] }
 0x1b8   : > { %1429 = vmatpush2.msra.mxu1 %v1070_v6  ;;  %1221 = vmatmul.mubr.f32.vlgmr.msra.gmra.mxu0 %v9576_v7  ;;  %v9638_v6 = vld [vmem:[#allocation2 + $0xf8] sm:$0xff] }
 0x1b9   : > { %1357 = vmatprep.mubr.f32.mxu1 %v12328_v1  ;;  %1430 = vmatprep.subr.mxu1 %v1067_v8  ;;  %v9640_v8 = vld [vmem:[#allocation2 + $0xf0] sm:$0xff] }
 0x1ba   : > { %1511 = vmatprep.subr.mxu0 %v1131_v9  ;;  %8661 = vmatmul.mubr.msk.f32.gmra.mxu1 %vm782_vm5, %v9579_v10  ;;  %v1894_v9 = vld [vmem:[#allocation7 + $0x640] sm:$0xff] }
 0x1bb   : > { %1512 = vmatpush1.msra.mxu0 %v1130_v11  ;;  %1431 = vmatpush2.msra.mxu1 %v1066_v12  ;;  %v1103_v11 = vld [vmem:[#allocation7 + $0x418] sm:$0xff]  ;;  %v1891_v12 = vld [vmem:[#allocation7 + $0x628] sm:$0xff] }
 0x1bc   : > { %1226 = vmatprep.mubr.f32.mxu0 %v9583_v13  ;;  %1432 = vmatprep.subr.mxu1 %v1063_v14  ;;  %v1102_v14 = vld [vmem:[#allocation7 + $0x410] sm:$0xff] }
 0x1bd   : > { %1227 = vmatmul.mubr.f32.gmra.mxu0 %v9585_v15  ;;  %1433 = vmatpush2.msra.mxu1 %v1062_v16  ;;  %v1890_v16 = vld [vmem:[#allocation7 + $0x620] sm:$0xff] }
 0x1be   : > { %1363 = vmatprep.mubr.f32.mxu1 %v12328_v1  ;;  %1434 = vmatprep.subr.mxu1 %v1059_v17  ;;  %v1887_v17 = vld [vmem:[#allocation7 + $0x608] sm:$0xff] }
 0x1bf   : > { %1513 = vmatprep.subr.mxu0 %v1127_v18  ;;  %8662 = vmatmul.mubr.msk.f32.gmra.mxu1 %vm782_vm5, %v9591_v19  ;;  %v1886_v18 = vld [vmem:[#allocation7 + $0x600] sm:$0xff] }
 0x1c0   : > { %1514 = vmatpush1.msra.mxu0 %v1126_v20  ;;  %1435 = vmatpush2.msra.mxu1 %v1058_v21  ;;  %v2011_v20 = vld [vmem:[#allocation7 + $0x9e8] sm:$0xff] }
 0x1c1   : > { %1232 = vmatprep.mubr.f32.mxu0 %v9594_v22  ;;  %1436 = vmatprep.subr.mxu1 %v1055_v23  ;;  %v1883_v21 = vld [vmem:[#allocation7 + $0x5e8] sm:$0xff]  ;;  %v2010_v23 = vld [vmem:[#allocation7 + $0x9e0] sm:$0xff] }
 0x1c2   : > { %1233 = vmatmul.mubr.f32.gmra.mxu0 %v9596_v24  ;;  %1437 = vmatpush2.msra.mxu1 %v1054_v25  ;;  %v1882_v25 = vld [vmem:[#allocation7 + $0x5e0] sm:$0xff] }
 0x1c3   : > { %1369 = vmatprep.mubr.f32.mxu1 %v12328_v1  ;;  %1438 = vmatprep.subr.mxu1 %v1051_v26  ;;  %v1879_v26 = vld [vmem:[#allocation7 + $0x5c8] sm:$0xff] }
 0x1c4   : > { %1515 = vmatprep.subr.mxu0 %v1123_v27  ;;  %8663 = vmatmul.mubr.msk.f32.gmra.mxu1 %vm782_vm5, %v9602_v28  ;;  %v1878_v27 = vld [vmem:[#allocation7 + $0x5c0] sm:$0xff] }
 0x1c5   : > { %1516 = vmatpush1.msra.mxu0 %v1122_v29  ;;  %1439 = vmatpush2.msra.mxu1 %v1050_v30  ;;  %v1875_v29 = vld [vmem:[#allocation7 + $0x5a8] sm:$0xff] }
 0x1c6   : > { %1238 = vmatprep.mubr.f32.mxu0 %v9605_v31  ;;  %1440 = vmatprep.subr.mxu1 %v1047_v33  ;;  %v2007_v30 = vld [vmem:[#allocation7 + $0x9c8] sm:$0xff]  ;;  %v1874_v33 = vld [vmem:[#allocation7 + $0x5a0] sm:$0xff] }
 0x1c7   : > { %1239 = vmatmul.mubr.f32.gmra.mxu0 %v9607_v34  ;;  %1441 = vmatpush2.msra.mxu1 %v1046_v35  ;;  %v1871_v35 = vld [vmem:[#allocation7 + $0x588] sm:$0xff] }
 0x1c8   : > { %1375 = vmatprep.mubr.f32.mxu1 %v12328_v1  ;;  %1442 = vmatprep.subr.mxu1 %v1043_v36  ;;  %v1870_v36 = vld [vmem:[#allocation7 + $0x580] sm:$0xff] }
 0x1c9   : > { %1517 = vmatprep.subr.mxu0 %v1119_v37  ;;  %8664 = vmatmul.mubr.msk.f32.gmra.mxu1 %vm782_vm5, %v9613_v38  ;;  %v1867_v37 = vld [vmem:[#allocation7 + $0x568] sm:$0xff] }
 0x1ca   : > { %1518 = vmatpush1.msra.mxu0 %v1118_v39  ;;  %1443 = vmatpush2.msra.mxu1 %v1042_v40  ;;  %v2003_v39 = vld [vmem:[#allocation7 + $0x9a8] sm:$0xff]  ;;  %v1866_v40 = vld [vmem:[#allocation7 + $0x560] sm:$0xff] }
 0x1cb   : > { %1244 = vmatprep.mubr.f32.mxu0 %v9616_v41  ;;  %1444 = vmatprep.subr.mxu1 %v1039_v42  ;;  %v2002_v42 = vld [vmem:[#allocation7 + $0x9a0] sm:$0xff] }
 0x1cc   : > { %1245 = vmatmul.mubr.f32.gmra.mxu0 %v9618_v43  ;;  %1445 = vmatpush2.msra.mxu1 %v1038_v45  ;;  %v1863_v45 = vld [vmem:[#allocation7 + $0x548] sm:$0xff] }
 0x1cd   : > { %1446 = vmatprep.mubr.f32.mxu1 %v9574_v5  ;;  %1519 = vmatprep.subr.mxu0 %v1115_v46  ;;  %v1898_v5 = vld [vmem:[#allocation7 + $0x660] sm:$0xff] }
 0x1ce   : > { %2030 = vmatprep.subr.mxu1 %v1915_v47  ;;  %1447 = vmatmul.mubr.f32.vlgmr.msra.gmra.mxu1 %v9576_v7  ;;  %v1895_v7 = vld [vmem:[#allocation7 + $0x648] sm:$0xff]  ;;  %v1862_v46 = vld [vmem:[#allocation7 + $0x540] sm:$0xff] }
 0x1cf   : > { %1520 = vmatpush1.msra.mxu0 %v1114_v48  ;;  %2031 = vmatpush1.msra.mxu1 %v1914_v49  ;;  %v1859_v47 = vld [vmem:[#allocation7 + $0x528] sm:$0xff]  ;;  %v1858_v48 = vld [vmem:[#allocation7 + $0x520] sm:$0xff] }
 0x1d0   : > { %1250 = vmatprep.mubr.f32.mxu0 %v9625_v50  ;;  %2032 = vmatprep.subr.mxu1 %v1911_v51  ;;  %v1855_v49 = vld [vmem:[#allocation7 + $0x508] sm:$0xff] }
 0x1d1   : > { %1251 = vmatmul.mubr.f32.gmra.mxu0 %v9627_v52  ;;  %2033 = vmatpush1.msra.mxu1 %v1910_v54  ;;  %v1979_v51 = vld [vmem:[#allocation7 + $0x8e8] sm:$0xff] }
 0x1d2   : > { %1521 = vmatprep.subr.mxu0 %v1111_v55  ;;  %2034 = vmatprep.subr.mxu1 %v1907_v56  ;;  %v1995_v54 = vld [vmem:[#allocation7 + $0x968] sm:$0xff]  ;;  %v1978_v55 = vld [vmem:[#allocation7 + $0x8e0] sm:$0xff] }
 0x1d3   : > { %1522 = vmatpush1.msra.mxu0 %v1110_v57  ;;  %2035 = vmatpush1.msra.mxu1 %v1906_v58  ;;  %v1994_v56 = vld [vmem:[#allocation7 + $0x960] sm:$0xff]  ;;  %v1975_v57 = vld [vmem:[#allocation7 + $0x8c8] sm:$0xff] }
 0x1d4   : > { %1256 = vmatprep.mubr.f32.mxu0 %v9632_v59  ;;  %2036 = vmatprep.subr.mxu1 %v1903_v60  ;;  %v1974_v58 = vld [vmem:[#allocation7 + $0x8c0] sm:$0xff]  ;;  %v1971_v60 = vld [vmem:[#allocation7 + $0x8a8] sm:$0xff] }
 0x1d5   : > { %1257 = vmatmul.mubr.f32.gmra.mxu0 %v9634_v61  ;;  %2037 = vmatpush1.msra.mxu1 %v1902_v63  ;;  %v1970_v63 = vld [vmem:[#allocation7 + $0x8a0] sm:$0xff] }
 0x1d6   : > { %1523 = vmatprep.subr.mxu0 %v1107_v2  ;;  %2038 = vmatprep.subr.mxu1 %v1899_v3  ;;  %v1967_v2 = vld [vmem:[#allocation7 + $0x888] sm:$0xff] }
 0x1d7   : > { %1524 = vmatpush1.msra.mxu0 %v1106_v4  ;;  %2039 = vmatpush1.msra.mxu1 %v1898_v5  ;;  %v1963_v3 = vld [vmem:[#allocation7 + $0x868] sm:$0xff]  ;;  %v1962_v5 = vld [vmem:[#allocation7 + $0x860] sm:$0xff] }
 0x1d8   : > { %1262 = vmatprep.mubr.f32.mxu0 %v9638_v6  ;;  %2040 = vmatprep.subr.mxu1 %v1895_v7  ;;  %v1987_v4 = vld [vmem:[#allocation7 + $0x928] sm:$0xff]  ;;  %v1986_v7 = vld [vmem:[#allocation7 + $0x920] sm:$0xff] }
 0x1d9   : > { %1263 = vmatmul.mubr.f32.gmra.mxu0 %v9640_v8  ;;  %2041 = vmatpush1.msra.mxu1 %v1894_v9  ;;  %v1959_v9 = vld [vmem:[#allocation7 + $0x848] sm:$0xff] }
 0x1da   : > { %1525 = vmatprep.subr.mxu0 %v1103_v11  ;;  %2042 = vmatprep.subr.mxu1 %v1891_v12  ;;  %v1674_v11 = vld [vmem:[#allocation2 + $0x10] sm:$0xfe]  ;;  %v1958_v12 = vld [vmem:[#allocation7 + $0x840] sm:$0xff] }
 0x1db   : > { %1526 = vmatpush1.msra.mxu0 %v1102_v14  ;;  %2043 = vmatpush1.msra.mxu1 %v1890_v16  ;;  %v1983_v14 = vld [vmem:[#allocation7 + $0x908] sm:$0xff]  ;;  %v1954_v16 = vld [vmem:[#allocation7 + $0x820] sm:$0xff] }
 0x1dc   : > { %1559 = vmatprep.mubr.f32.mxu0 %v12328_v1  ;;  %2044 = vmatprep.subr.mxu1 %v1887_v17  ;;  %v1783_v17 = vrot.slane %v1674_v11, 1  ;;  %v1918_v11 = vld [vmem:[#allocation7 + $0x700] sm:$0xff] }
 0x1dd   : > { %8665 = vmatmul.mubr.msk.f32.vlgmr.msra.gmra.mxu0 %vm782_vm5, %v9555_v32  ;;  %2045 = vmatpush1.msra.mxu1 %v1886_v18  ;;  %v2006_v32 = vld [vmem:[#allocation7 + $0x9c0] sm:$0xff]  ;;  %v1951_v18 = vld [vmem:[#allocation7 + $0x808] sm:$0xff] }
 0x1de   : > { %2159 = vmatprep.subr.mxu0 %v2011_v20  ;;  %2046 = vmatprep.subr.mxu1 %v1883_v21  ;;  %v1950_v20 = vld [vmem:[#allocation7 + $0x800] sm:$0xff]  ;;  %v1917_v21 = vld [vmem:[#allocation7 + $0x6f8] sm:$0xff] }
 0x1df   : > { %2160 = vmatpush1.msra.mxu0 %v2010_v23  ;;  %2047 = vmatpush1.msra.mxu1 %v1882_v25  ;;  %v1947_v23 = vld [vmem:[#allocation7 + $0x7e8] sm:$0xff] }
 0x1e0   : > { %1452 = vmatprep.mubr.f32.mxu1 %v9583_v13  ;;  %2048 = vmatprep.subr.mxu1 %v1879_v26  ;;  %v1946_v26 = vld [vmem:[#allocation7 + $0x7e0] sm:$0xff] }
 0x1e1   : > { %1565 = vmatprep.mubr.f32.mxu0 %v12328_v1  ;;  %2049 = vmatpush1.msra.mxu1 %v1878_v27  ;;  %v1916_v27 = vld [vmem:[#allocation7 + $0x6f0] sm:$0xff] }
 0x1e2   : > { %8666 = vmatmul.mubr.msk.f32.gmra.mxu0 %vm782_vm5, %v9559_v44  ;;  %1453 = vmatmul.mubr.f32.gmra.mxu1 %v9585_v15 }
 0x1e3   : > { %2050 = vmatprep.subr.mxu1 %v1875_v29  ;;  %2161 = vmatprep.subr.mxu0 %v2007_v30  ;;  %v1943_v29 = vld [vmem:[#allocation7 + $0x7c8] sm:$0xff]  ;;  %v1913_v30 = vld [vmem:[#allocation7 + $0x6d8] sm:$0xff] }
 0x1e4   : > { %2051 = vmatpush1.msra.mxu1 %v1874_v33  ;;  %2162 = vmatpush1.msra.mxu0 %v2006_v32  ;;  %v1942_v33 = vld [vmem:[#allocation7 + $0x7c0] sm:$0xff]  ;;  %v1912_v32 = vld [vmem:[#allocation7 + $0x6d0] sm:$0xff] }
 0x1e5   : > { %2052 = vmatprep.subr.mxu1 %v1871_v35  ;;  %1458 = vmatprep.mubr.f32.mxu1 %v9594_v22  ;;  %v1999_v22 = vld [vmem:[#allocation7 + $0x988] sm:$0xff] }
 0x1e6   : > { %1571 = vmatprep.mubr.f32.mxu0 %v12328_v1  ;;  %2053 = vmatpush1.msra.mxu1 %v1870_v36  ;;  %v1939_v35 = vld [vmem:[#allocation7 + $0x7a8] sm:$0xff]  ;;  %v1909_v36 = vld [vmem:[#allocation7 + $0x6b8] sm:$0xff] }
 0x1e7   : > { %8667 = vmatmul.mubr.msk.f32.gmra.mxu0 %vm782_vm5, %v9564_v53  ;;  %1459 = vmatmul.mubr.f32.gmra.mxu1 %v9596_v24  ;;  %v1998_v53 = vld [vmem:[#allocation7 + $0x980] sm:$0xff] }
 0x1e8   : > { %2054 = vmatprep.subr.mxu1 %v1867_v37  ;;  %2163 = vmatprep.subr.mxu0 %v2003_v39  ;;  %v1854_v24 = vld [vmem:[#allocation7 + $0x500] sm:$0xff]  ;;  %v1908_v39 = vld [vmem:[#allocation7 + $0x6b0] sm:$0xff] }
 0x1e9   : > { %2055 = vmatpush1.msra.mxu1 %v1866_v40  ;;  %2164 = vmatpush1.msra.mxu0 %v2002_v42  ;;  %v1938_v37 = vld [vmem:[#allocation7 + $0x7a0] sm:$0xff]  ;;  %v1935_v40 = vld [vmem:[#allocation7 + $0x788] sm:$0xff]  ;;  %v1905_v42 = vld [vmem:[#allocation7 + $0x698] sm:$0xff] }
 0x1ea   : > { %2056 = vmatprep.subr.mxu1 %v1863_v45  ;;  %1464 = vmatprep.mubr.f32.mxu1 %v9605_v31  ;;  %v1934_v45 = vld [vmem:[#allocation7 + $0x780] sm:$0xff] }
 0x1eb   : > { %1577 = vmatprep.mubr.f32.mxu0 %v12328_v1  ;;  %2057 = vmatpush1.msra.mxu1 %v1862_v46  ;;  %v1904_v46 = vld [vmem:[#allocation7 + $0x690] sm:$0xff] }
 0x1ec   : > { %8668 = vmatmul.mubr.msk.f32.gmra.mxu0 %vm782_vm5, %v9569_v62  ;;  %1465 = vmatmul.mubr.f32.gmra.mxu1 %v9607_v34 }
 0x1ed   : > { %2058 = vmatprep.subr.mxu1 %v1859_v47  ;;  %2165 = vmatprep.subr.mxu0 %v1999_v22  ;;  %v1931_v47 = vld [vmem:[#allocation7 + $0x768] sm:$0xff]  ;;  %v1901_v22 = vld [vmem:[#allocation7 + $0x678] sm:$0xff] }
 0x1ee   : > { %2059 = vmatpush1.msra.mxu1 %v1858_v48  ;;  %2166 = vmatpush1.msra.mxu0 %v1998_v53  ;;  %v1930_v48 = vld [vmem:[#allocation7 + $0x760] sm:$0xff]  ;;  %v1673_v53 = vld [vmem:[#allocation2 + $0x8] sm:$0xfe] }
 0x1ef   : > { %2060 = vmatprep.subr.mxu1 %v1855_v49  ;;  %1470 = vmatprep.mubr.f32.mxu1 %v9616_v41  ;;  %v1991_v41 = vld [vmem:[#allocation7 + $0x948] sm:$0xff]  ;;  %v1900_v49 = vld [vmem:[#allocation7 + $0x670] sm:$0xff] }
 0x1f0   : > { %1583 = vmatprep.mubr.f32.mxu0 %v12328_v1  ;;  %2061 = vmatpush1.msra.mxu1 %v1854_v24  ;;  %v1927_v24 = vld [vmem:[#allocation7 + $0x748] sm:$0xff] }
 0x1f1   : > { %8669 = vmatmul.mubr.msk.f32.gmra.mxu0 %vm782_vm5, %v9579_v10  ;;  %1471 = vmatmul.mubr.f32.gmra.mxu1 %v9618_v43  ;;  %v1990_v10 = vld [vmem:[#allocation7 + $0x940] sm:$0xff] }
 0x1f2   : > { %2062 = vmatprep.subr.mxu1 %v1979_v51  ;;  %2167 = vmatprep.subr.mxu0 %v1995_v54  ;;  %v1966_v43 = vld [vmem:[#allocation7 + $0x880] sm:$0xff]  ;;  %v1897_v54 = vld [vmem:[#allocation7 + $0x658] sm:$0xff] }
 0x1f3   : > { %2063 = vmatpush2.msra.mxu1 %v1978_v55  ;;  %2168 = vmatpush1.msra.mxu0 %v1994_v56  ;;  %v1672_v51 = vld [vmem:[#allocation2] sm:$0xfe]  ;;  %v1679_v56 = vld [vmem:[#allocation2 + $0x38] sm:$0x1] }
 0x1f4   : > { %2064 = vmatprep.subr.mxu1 %v1975_v57  ;;  %1476 = vmatprep.mubr.f32.mxu1 %v9625_v50  ;;  %v1926_v55 = vld [vmem:[#allocation7 + $0x740] sm:$0xff]  ;;  %v1896_v57 = vld [vmem:[#allocation7 + $0x650] sm:$0xff] }
 0x1f5   : > { %1589 = vmatprep.mubr.f32.mxu0 %v12328_v1  ;;  %2065 = vmatpush2.msra.mxu1 %v1974_v58  ;;  %v1923_v58 = vld [vmem:[#allocation7 + $0x728] sm:$0xff] }
 0x1f6   : > { %8670 = vmatmul.mubr.msk.f32.gmra.mxu0 %vm782_vm5, %v9591_v19  ;;  %1477 = vmatmul.mubr.f32.gmra.mxu1 %v9627_v52 }
 0x1f7   : > { %2066 = vmatprep.subr.mxu1 %v1971_v60  ;;  %2169 = vmatprep.subr.mxu0 %v1991_v41  ;;  %v1780_v60 = vrot.slane %v1673_v53, 1  ;;  %v1781_v41 = vrot.slane %v9583_v13, 1  ;;  %v1888_v13 = vld [vmem:[#allocation7 + $0x610] sm:$0xff] }
 0x1f8   : > { %2067 = vmatpush2.msra.mxu1 %v1970_v63  ;;  %2170 = vmatpush1.msra.mxu0 %v1990_v10  ;;  %v1893_v63 = vld [vmem:[#allocation7 + $0x638] sm:$0xff]  ;;  %v1892_v10 = vld [vmem:[#allocation7 + $0x630] sm:$0xff] }
 0x1f9   : > { %2068 = vmatprep.subr.mxu1 %v1967_v2  ;;  %1482 = vmatprep.mubr.f32.mxu1 %v9632_v59  ;;  %v1955_v59 = vld [vmem:[#allocation7 + $0x828] sm:$0xff]  ;;  %v1922_v2 = vld [vmem:[#allocation7 + $0x720] sm:$0xff]  ;;  %v2012_v53 = vld [vmem:[#allocation7 + $0x9f0] sm:$0xff] }
 0x1fa   : > { %1595 = vmatprep.mubr.f32.mxu0 %v12328_v1  ;;  %2069 = vmatpush2.msra.mxu1 %v1966_v43  ;;  %v1777_v43 = vrot.slane %v1672_v51, 1 }
 0x1fb   : > { %8671 = vmatmul.mubr.msk.f32.gmra.mxu0 %vm782_vm5, %v9602_v28  ;;  %1483 = vmatmul.mubr.f32.gmra.mxu1 %v9634_v61  ;;  %v1784_v28 = vrot.slane %v9559_v44, 1  ;;  %v1982_v61 = vld [vmem:[#allocation7 + $0x900] sm:$0xff]  ;;  %v1691_v44 = vld [vmem:[#allocation2 + $0x98] sm:$0xfe] }
 0x1fc   : > { %2070 = vmatprep.subr.mxu1 %v1963_v3  ;;  %2171 = vmatprep.subr.mxu0 %v1987_v4  ;;  %v1778_v3 = vrot.slane %v9585_v15, 1  ;;  %v1889_v4 = vld [vmem:[#allocation7 + $0x618] sm:$0xff] }
 0x1fd   : > { %2071 = vmatpush2.msra.mxu1 %v1962_v5  ;;  %2172 = vmatpush1.msra.mxu0 %v1986_v7  ;;  %v9686_v25 = vsel %vm1776_vm8, %v1783_v17, %v1784_v28  ;;  %v1919_v5 = vld [vmem:[#allocation7 + $0x708] sm:$0xff]  ;;  %v1788_v7 = vrot.slane %v1679_v56, 1  ;;  %v1885_v15 = vld [vmem:[#allocation7 + $0x5f8] sm:$0xff]  ;;  %v1868_v56 = vld [vmem:[#allocation7 + $0x570] sm:$0xff] }
 0x1fe   : > { %2072 = vmatprep.subr.mxu1 %v1959_v9  ;;  %1488 = vmatprep.mubr.f32.mxu1 %v9638_v6  ;;  %v1678_v9 = vld [vmem:[#allocation2 + $0x30] sm:$0x1] }
 0x1ff   : > { %1601 = vmatprep.mubr.f32.mxu0 %v12328_v1  ;;  %2073 = vmatpush2.msra.mxu1 %v1958_v12  ;;  %v1680_v12 = vld [vmem:[#allocation2 + $0x40] sm:$0x1]  ;;  %v1786_v17 = vrot.slane %v1678_v9, 1  ;;  %v1697_v9 = vld [vmem:[#allocation2 + $0xc8] sm:$0x1] }
 0x200   : > { %8672 = vmatmul.mubr.msk.f32.gmra.mxu0 %vm782_vm5, %v9613_v38  ;;  %1489 = vmatmul.mubr.f32.gmra.mxu1 %v9640_v8 }
 0x201   : > { %2074 = vmatprep.subr.mxu1 %v1955_v59  ;;  %2173 = vmatprep.subr.mxu0 %v1983_v14  ;;  %v1682_v59 = vld [vmem:[#allocation2 + $0x50] sm:$0xfe]  ;;  %v9694_v14 = vsel %vm1776_vm8, %v1780_v60, %v1781_v41  ;;  %v1811_v60 = vrot.slane %v9625_v50, 1  ;;  %v1861_v50 = vld [vmem:[#allocation7 + $0x538] sm:$0xff] }
 0x202   : > { %2075 = vmatpush2.msra.mxu1 %v1954_v16  ;;  %2174 = vmatpush1.msra.mxu0 %v1982_v61  ;;  %v9697_v16 = vsel %vm1776_vm8, %v1777_v43, %v1778_v3  ;;  %v1884_v61 = vld [vmem:[#allocation7 + $0x5f0] sm:$0xff] }
 0x203   : > { %2076 = vmatprep.subr.mxu1 %v1951_v18  ;;  %2207 = vmatprep.mubr.f32.mxu0 %v12328_v1  ;;  %v9700_v18 = vsel %vm1776_vm8, %v1781_v41, %v1788_v7  ;;  %v1692_v41 = vld [vmem:[#allocation2 + $0xa0] sm:$0xfe]  ;;  %v1814_v7 = vrot.slane %v9591_v19, 1 }
 0x204   : > { %2077 = vmatpush2.msra.mxu1 %v1950_v20  ;;  %2256 = vmatprep.subr.mxu0 %v1917_v21  ;;  %v1790_v20 = vrot.slane %v1680_v12, 1  ;;  %v1795_v21 = vrot.slane %v1682_v59, 1  ;;  %v1696_v59 = vld [vmem:[#allocation2 + $0xc0] sm:$0x1] }
 0x205   : > { %2078 = vmatprep.subr.mxu1 %v1947_v23  ;;  %8673 = vmatmul.mubr.msk.f32.vlgmr.msra.gmra.mxu0 %vm782_vm5, %v9686_v25  ;;  %v1796_v23 = vrot.slane %v9605_v31, 1 }
 0x206   : > { %2079 = vmatpush2.msra.mxu1 %v1946_v26  ;;  %2257 = vmatpush1.msra.mxu0 %v1916_v27  ;;  %v1681_v26 = vld [vmem:[#allocation2 + $0x48] sm:$0xfe]  ;;  %v1881_v27 = vld [vmem:[#allocation7 + $0x5d8] sm:$0xff] }
 0x207   : > { %2080 = vmatprep.subr.mxu1 %v1943_v29  ;;  %2258 = vmatprep.subr.mxu0 %v1913_v30  ;;  %v1683_v29 = vld [vmem:[#allocation2 + $0x58] sm:$0xfe]  ;;  %v1880_v30 = vld [vmem:[#allocation7 + $0x5d0] sm:$0xff]  ;;  %v1792_v31 = vrot.slane %v1681_v26, 1  ;;  %v1816_v26 = vrot.slane %v1696_v59, 1 }
 0x208   : > { %2081 = vmatpush2.msra.mxu1 %v1942_v33  ;;  %2259 = vmatpush1.msra.mxu0 %v1912_v32  ;;  %v1688_v33 = vld [vmem:[#allocation2 + $0x80] sm:$0x1]  ;;  %v2013_v32 = vld [vmem:[#allocation7 + $0x9f8] sm:$0xff] }
 0x209   : > { %2082 = vmatprep.subr.mxu1 %v1939_v35  ;;  %2260 = vmatprep.subr.mxu0 %v1909_v36  ;;  %v1877_v35 = vld [vmem:[#allocation7 + $0x5b8] sm:$0xff]  ;;  %v9707_v36 = vsel %vm1776_vm8, %v1778_v3, %v1786_v17  ;;  %v1808_v3 = vrot.slane %v9627_v52, 1  ;;  %v1698_v17 = vld [vmem:[#allocation2 + $0xd0] sm:$0x1] }
 0x20a   : > { %2083 = vmatpush2.msra.mxu1 %v1938_v37  ;;  %2261 = vmatpush1.msra.mxu0 %v1908_v39  ;;  %v1793_v37 = vrot.slane %v9607_v34, 1  ;;  %v9714_v39 = vsel %vm1776_vm8, %v1784_v28, %v1790_v20  ;;  %v1873_v34 = vld [vmem:[#allocation7 + $0x598] sm:$0xff]  ;;  %v1872_v28 = vld [vmem:[#allocation7 + $0x590] sm:$0xff] }
 0x20b   : > { %2084 = vmatprep.subr.mxu1 %v1935_v40  ;;  %2262 = vmatprep.subr.mxu0 %v1905_v42  ;;  %v9717_v40 = vsel %vm1776_vm8, %v1795_v21, %v1796_v23  ;;  %v1798_v42 = vrot.slane %v1683_v29, 1  ;;  %v1857_v52 = vld [vmem:[#allocation7 + $0x518] sm:$0xff]  ;;  %v1980_v21 = vld [vmem:[#allocation7 + $0x8f0] sm:$0xff] }
 0x20c   : > { %2085 = vmatpush2.msra.mxu1 %v1934_v45  ;;  %2263 = vmatpush1.msra.mxu0 %v1904_v46  ;;  %v1799_v45 = vrot.slane %v9569_v62, 1  ;;  %v1687_v46 = vld [vmem:[#allocation2 + $0x78] sm:$0x1]  ;;  %v9725_v62 = vsel %vm1776_vm8, %v1792_v31, %v1793_v37  ;;  %v2008_v29 = vld [vmem:[#allocation7 + $0x9d0] sm:$0xff] }
 0x20d   : > { %2086 = vmatprep.subr.mxu1 %v1931_v47  ;;  %2264 = vmatprep.subr.mxu0 %v1901_v22  ;;  %v1876_v47 = vld [vmem:[#allocation7 + $0x5b0] sm:$0xff]  ;;  %v1803_v22 = vrot.slane %v1688_v33, 1  ;;  %v1700_v33 = vld [vmem:[#allocation2 + $0xe0] sm:$0xfe]  ;;  %v1973_v31 = vld [vmem:[#allocation7 + $0x8b8] sm:$0xff] }
 0x20e   : > { %2087 = vmatpush2.msra.mxu1 %v1930_v48  ;;  %2265 = vmatpush1.msra.mxu0 %v1900_v49  ;;  %v1689_v48 = vld [vmem:[#allocation2 + $0x88] sm:$0x1]  ;;  %v1801_v49 = vrot.slane %v1687_v46, 1  ;;  %v9729_v51 = vsel %vm1776_vm8, %v1798_v42, %v1799_v45  ;;  %v2005_v42 = vld [vmem:[#allocation7 + $0x9b8] sm:$0xff]  ;;  %v1825_v46 = vrot.slane %v1700_v33, 1  ;;  %v1984_v33 = vld [vmem:[#allocation7 + $0x910] sm:$0xff] }
 0x20f   : > { %2088 = vmatprep.subr.mxu1 %v1927_v24  ;;  %2266 = vmatprep.subr.mxu0 %v1897_v54  ;;  %v1869_v24 = vld [vmem:[#allocation7 + $0x578] sm:$0xff]  ;;  %v1805_v54 = vrot.slane %v1689_v48, 1 }
 0x210   : > { %2089 = vmatpush2.msra.mxu1 %v1926_v55  ;;  %2267 = vmatpush1.msra.mxu0 %v1896_v57  ;;  %v1690_v55 = vld [vmem:[#allocation2 + $0x90] sm:$0xfe]  ;;  %v9732_v57 = vsel %vm1776_vm8, %v1796_v23, %v1803_v22  ;;  %v2009_v23 = vld [vmem:[#allocation7 + $0x9d8] sm:$0xff]  ;;  %v1701_v22 = vld [vmem:[#allocation2 + $0xe8] sm:$0xfe] }
 0x211   : > { %2090 = vmatprep.subr.mxu1 %v1923_v58  ;;  %2268 = vmatprep.subr.mxu0 %v1893_v63  ;;  %v1810_v58 = vrot.slane %v1691_v44, 1  ;;  %v1865_v63 = vld [vmem:[#allocation7 + $0x558] sm:$0xff]  ;;  %v1807_v43 = vrot.slane %v1690_v55, 1  ;;  %v1972_v44 = vld [vmem:[#allocation7 + $0x8b0] sm:$0xff]  ;;  %v1829_v55 = vrot.slane %v9613_v38, 1 }
 0x212   : > { %2091 = vmatpush2.msra.mxu1 %v1922_v2  ;;  %2269 = vmatpush1.msra.mxu0 %v1892_v10  ;;  %v1864_v10 = vld [vmem:[#allocation7 + $0x550] sm:$0xff]  ;;  %v9739_v2 = vsel %vm1776_vm8, %v1793_v37, %v1801_v49  ;;  %v1699_v37 = vld [vmem:[#allocation2 + $0xd8] sm:$0xfe]  ;;  %v1823_v49 = vrot.slane %v9640_v8, 1 }
 0x213   : > { %2092 = vmatprep.subr.mxu1 %v1919_v5  ;;  %2270 = vmatprep.subr.mxu0 %v1889_v4  ;;  %v9744_v4 = vsel %vm1776_vm8, %v1799_v45, %v1805_v54  ;;  %v1813_v5 = vrot.slane %v1692_v41, 1  ;;  %v9749_v12 = vsel %vm1776_vm8, %v1810_v58, %v1811_v60  ;;  %v9755_v19 = vsel %vm1776_vm8, %v1807_v43, %v1808_v3  ;;  %v1968_v58 = vld [vmem:[#allocation7 + $0x890] sm:$0xff]  ;;  %v1965_v8 = vld [vmem:[#allocation7 + $0x878] sm:$0xff]  ;;  %v1705_v41 = vld [vmem:[#allocation2 + $0x108] sm:$0x1] }
 0x214   : > { %2093 = vmatpush2.msra.mxu1 %v1918_v11  ;;  %2271 = vmatpush1.msra.mxu0 %v1888_v13  ;;  %v1860_v11 = vld [vmem:[#allocation7 + $0x530] sm:$0xff]  ;;  %v9769_v45 = vsel %vm1776_vm8, %v1808_v3, %v1816_v26  ;;  %v1828_v54 = vrot.slane %v1701_v22, 1  ;;  %v1707_v43 = vld [vmem:[#allocation2 + $0x118] sm:$0x1]  ;;  %v2785_v22 = vld [vmem:[#allocation7 + $0xbc8] sm:$0xff] }
 0x215   : > { %2094 = vmatprep.mubr.f32.mxu1 %v9694_v14  ;;  %2272 = vmatprep.subr.mxu0 %v1885_v15  ;;  %v1856_v13 = vld [vmem:[#allocation7 + $0x510] sm:$0xff]  ;;  %v1818_v15 = vrot.slane %v1697_v9, 1  ;;  %v9759_v20 = vsel %vm1776_vm8, %v1813_v5, %v1814_v7  ;;  %v1831_v9 = vrot.slane %v1705_v41, 1  ;;  %v1835_v59 = vrot.slane %v1707_v43, 1  ;;  %v2772_v41 = vld [vmem:[#allocation7 + $0xb60] sm:$0xff] }
 0x216   : > { %2095 = vmatmul.mubr.f32.vlgmr.msra.gmra.mxu1 %v9697_v16  ;;  %2273 = vmatpush1.msra.mxu0 %v1884_v61  ;;  %v1981_v61 = vld [vmem:[#allocation7 + $0x8f8] sm:$0xff]  ;;  %v9790_v3 = vsel %vm1776_vm8, %v1828_v54, %v1829_v55  ;;  %v1964_v5 = vld [vmem:[#allocation7 + $0x870] sm:$0xff]  ;;  %v2777_v54 = vld [vmem:[#allocation7 + $0xb88] sm:$0xff] }
 0x217   : > { %2100 = vmatprep.mubr.f32.mxu1 %v9700_v18  ;;  %2274 = vmatprep.subr.mxu0 %v1881_v27  ;;  %v1977_v27 = vld [vmem:[#allocation7 + $0x8d8] sm:$0xff]  ;;  %v1988_v26 = vld [vmem:[#allocation7 + $0x930] sm:$0xff] }
 0x218   : > { %2213 = vmatprep.mubr.f32.mxu0 %v12328_v1  ;;  %2275 = vmatpush1.msra.mxu0 %v1880_v30  ;;  %v1820_v30 = vrot.slane %v1698_v17, 1  ;;  %v1957_v17 = vld [vmem:[#allocation7 + $0x838] sm:$0xff]  ;;  %v1928_v43 = vld [vmem:[#allocation7 + $0x750] sm:$0xff] }
 0x219   : > { %2385 = vmatprep.subr.mxu1 %v2013_v32  ;;  %2276 = vmatprep.subr.mxu0 %v1877_v35  ;;  %v1976_v32 = vld [vmem:[#allocation7 + $0x8d0] sm:$0xff]  ;;  %v9766_v35 = vsel %vm1776_vm8, %v1811_v60, %v1818_v15 }
 0x21a   : > { %2101 = vmatmul.mubr.f32.gmra.mxu1 %v9707_v36  ;;  %8674 = vmatmul.mubr.msk.f32.gmra.mxu0 %vm782_vm5, %v9714_v39  ;;  %v9774_v48 = vsel %vm1776_vm8, %v1814_v7, %v1820_v30  ;;  %v1993_v7 = vld [vmem:[#allocation7 + $0x958] sm:$0xff] }
 0x21b   : > { %2106 = vmatprep.mubr.f32.mxu1 %v9717_v40  ;;  %2277 = vmatpush1.msra.mxu0 %v1876_v47  ;;  %v1826_v47 = vrot.slane %v9638_v6, 1  ;;  %v1969_v6 = vld [vmem:[#allocation7 + $0x898] sm:$0xff] }
 0x21c   : > { %2219 = vmatprep.mubr.f32.mxu0 %v12328_v1  ;;  %2278 = vmatprep.subr.mxu0 %v1873_v34  ;;  %v2004_v34 = vld [vmem:[#allocation7 + $0x9b0] sm:$0xff]  ;;  %v1953_v30 = vld [vmem:[#allocation7 + $0x818] sm:$0xff] }
 0x21d   : > { %2386 = vmatpush1.msra.mxu1 %v2012_v53  ;;  %2279 = vmatpush1.msra.mxu0 %v1872_v28  ;;  %v2001_v53 = vld [vmem:[#allocation7 + $0x998] sm:$0xff]  ;;  %v1822_v28 = vrot.slane %v1699_v37, 1  ;;  %v9783_v60 = vsel %vm1776_vm8, %v1825_v46, %v1826_v47  ;;  %v2789_v37 = vld [vmem:[#allocation7 + $0xbe8] sm:$0xff]  ;;  %v2788_v46 = vld [vmem:[#allocation7 + $0xbe0] sm:$0xff] }
 0x21e   : > { %2107 = vmatmul.mubr.f32.gmra.mxu1 %v9725_v62  ;;  %2280 = vmatprep.subr.mxu0 %v1869_v24  ;;  %v2000_v24 = vld [vmem:[#allocation7 + $0x990] sm:$0xff] }
 0x21f   : > { %8675 = vmatmul.mubr.msk.f32.gmra.mxu0 %vm782_vm5, %v9729_v51  ;;  %2112 = vmatprep.mubr.f32.mxu1 %v9732_v57 }
 0x220   : > { %2281 = vmatpush1.msra.mxu0 %v1868_v56  ;;  %2225 = vmatprep.mubr.f32.mxu0 %v12328_v1  ;;  %v1706_v56 = vld [vmem:[#allocation2 + $0x110] sm:$0x1] }
 0x221   : > { %2282 = vmatprep.subr.mxu0 %v1865_v63  ;;  %2387 = vmatprep.subr.mxu1 %v2009_v23  ;;  %v1997_v63 = vld [vmem:[#allocation7 + $0x978] sm:$0xff]  ;;  %v1833_v38 = vrot.slane %v1706_v56, 1  ;;  %v9804_v23 = vsel %vm1776_vm8, %v1829_v55, %v1835_v59  ;;  %v1936_v55 = vld [vmem:[#allocation7 + $0x790] sm:$0xff]  ;;  %v2776_v56 = vld [vmem:[#allocation7 + $0xb80] sm:$0xff] }
 0x222   : > { %2283 = vmatpush1.msra.mxu0 %v1864_v10  ;;  %2113 = vmatmul.mubr.f32.gmra.mxu1 %v9739_v2  ;;  %v9786_v10 = vsel %vm1776_vm8, %v1822_v28, %v1823_v49  ;;  %v2781_v28 = vld [vmem:[#allocation7 + $0xba8] sm:$0xff] }
 0x223   : > { %2284 = vmatprep.subr.mxu0 %v1861_v50  ;;  %8676 = vmatmul.mubr.msk.f32.gmra.mxu0 %vm782_vm5, %v9744_v4  ;;  %v1996_v50 = vld [vmem:[#allocation7 + $0x970] sm:$0xff]  ;;  %v9797_v15 = vsel %vm1776_vm8, %v1826_v47, %v1833_v38  ;;  %v1945_v47 = vld [vmem:[#allocation7 + $0x7d8] sm:$0xff]  ;;  %v2769_v38 = vld [vmem:[#allocation7 + $0xb48] sm:$0xff] }
 0x224   : > { %2285 = vmatpush1.msra.mxu0 %v1860_v11  ;;  %2118 = vmatprep.mubr.f32.mxu1 %v9749_v12  ;;  %v1961_v11 = vld [vmem:[#allocation7 + $0x858] sm:$0xff]  ;;  %v2761_v59 = vld [vmem:[#allocation7 + $0xb08] sm:$0xff] }
 0x225   : > { %2286 = vmatprep.subr.mxu0 %v1857_v52  ;;  %2231 = vmatprep.mubr.f32.mxu0 %v12328_v1  ;;  %v1992_v52 = vld [vmem:[#allocation7 + $0x950] sm:$0xff] }
 0x226   : > { %2287 = vmatpush1.msra.mxu0 %v1856_v13  ;;  %2119 = vmatmul.mubr.f32.gmra.mxu1 %v9755_v19  ;;  %v1960_v13 = vld [vmem:[#allocation7 + $0x850] sm:$0xff] }
 0x227   : > { %2288 = vmatprep.subr.mxu0 %v1981_v61  ;;  %8677 = vmatmul.mubr.msk.f32.gmra.mxu0 %vm782_vm5, %v9759_v20  ;;  %v1989_v61 = vld [vmem:[#allocation7 + $0x938] sm:$0xff] }
 0x228   : > { %2289 = vmatpush2.msra.mxu0 %v1980_v21  ;;  %2388 = vmatpush1.msra.mxu1 %v2008_v29  ;;  %v9800_v21 = vsel %vm1776_vm8, %v1823_v49, %v1831_v9  ;;  %v1985_v29 = vld [vmem:[#allocation7 + $0x918] sm:$0xff]  ;;  %v1940_v49 = vld [vmem:[#allocation7 + $0x7b0] sm:$0xff] }
 0x229   : > { %2290 = vmatprep.subr.mxu0 %v1977_v27  ;;  %2124 = vmatprep.mubr.f32.mxu1 %v9766_v35  ;;  %v1956_v27 = vld [vmem:[#allocation7 + $0x830] sm:$0xff] }
 0x22a   : > { %2291 = vmatpush2.msra.mxu0 %v1976_v32  ;;  %2237 = vmatprep.mubr.f32.mxu0 %v12328_v1  ;;  %v1952_v32 = vld [vmem:[#allocation7 + $0x810] sm:$0xff] }
 0x22b   : > { %2292 = vmatprep.subr.mxu0 %v1973_v31  ;;  %2389 = vmatprep.subr.mxu1 %v2005_v42  ;;  %v1949_v31 = vld [vmem:[#allocation7 + $0x7f8] sm:$0xff]  ;;  %v1948_v42 = vld [vmem:[#allocation7 + $0x7f0] sm:$0xff] }
 0x22c   : > { %2125 = vmatmul.mubr.f32.gmra.mxu1 %v9769_v45  ;;  %8678 = vmatmul.mubr.msk.f32.gmra.mxu0 %vm782_vm5, %v9774_v48  ;;  %v1924_v9 = vld [vmem:[#allocation7 + $0x730] sm:$0xff] }
 0x22d   : > { %2390 = vmatpush1.msra.mxu1 %v2004_v34  ;;  %2293 = vmatpush2.msra.mxu0 %v1972_v44  ;;  %v1944_v34 = vld [vmem:[#allocation7 + $0x7d0] sm:$0xff]  ;;  %v2784_v44 = vld [vmem:[#allocation7 + $0xbc0] sm:$0xff] }
 0x22e   : > { %2391 = vmatprep.subr.mxu1 %v2001_v53  ;;  %2294 = vmatprep.subr.mxu0 %v1969_v6  ;;  %v1941_v53 = vld [vmem:[#allocation7 + $0x7b8] sm:$0xff]  ;;  %v2780_v6 = vld [vmem:[#allocation7 + $0xba0] sm:$0xff] }
 0x22f   : > { %2392 = vmatpush1.msra.mxu1 %v2000_v24  ;;  %2295 = vmatpush2.msra.mxu0 %v1968_v58  ;;  %v1937_v24 = vld [vmem:[#allocation7 + $0x798] sm:$0xff] }
 0x230   : > { %2130 = vmatprep.mubr.f32.mxu1 %v9783_v60  ;;  %2243 = vmatprep.mubr.f32.mxu0 %v12328_v1  ;;  %v1933_v58 = vld [vmem:[#allocation7 + $0x778] sm:$0xff] }
 0x231   : > { %2296 = vmatprep.subr.mxu0 %v1965_v8  ;;  %2393 = vmatprep.subr.mxu1 %v1997_v63  ;;  %v1932_v8 = vld [vmem:[#allocation7 + $0x770] sm:$0xff]  ;;  %v1929_v63 = vld [vmem:[#allocation7 + $0x758] sm:$0xff] }
 0x232   : > { %2131 = vmatmul.mubr.f32.gmra.mxu1 %v9786_v10  ;;  %8679 = vmatmul.mubr.msk.f32.gmra.mxu0 %vm782_vm5, %v9790_v3 }
 0x233   : > { %2394 = vmatpush1.msra.mxu1 %v1996_v50  ;;  %2297 = vmatpush2.msra.mxu0 %v1964_v5  ;;  %v2768_v50 = vld [vmem:[#allocation7 + $0xb40] sm:$0xff]  ;;  %v1925_v5 = vld [vmem:[#allocation7 + $0x738] sm:$0xff] }
 0x234   : > { %2395 = vmatprep.subr.mxu1 %v1993_v7  ;;  %2298 = vmatprep.subr.mxu0 %v1961_v11  ;;  %v2765_v7 = vld [vmem:[#allocation7 + $0xb28] sm:$0xff]  ;;  %v2764_v11 = vld [vmem:[#allocation7 + $0xb20] sm:$0xff] }
 0x235   : > { %2396 = vmatpush1.msra.mxu1 %v1992_v52  ;;  %2299 = vmatpush2.msra.mxu0 %v1960_v13  ;;  %v1921_v52 = vld [vmem:[#allocation7 + $0x718] sm:$0xff]  ;;  %v1920_v13 = vld [vmem:[#allocation7 + $0x710] sm:$0xff] }
 0x236   : > { %2136 = vmatprep.mubr.f32.mxu1 %v9797_v15  ;;  %2249 = vmatprep.mubr.f32.mxu0 %v12328_v1 }
 0x237   : > { %2300 = vmatprep.subr.mxu0 %v1957_v17  ;;  %2397 = vmatprep.subr.mxu1 %v1989_v61  ;;  %v2760_v17 = vld [vmem:[#allocation7 + $0xb00] sm:$0xff]  ;;  %v2757_v61 = vld [vmem:[#allocation7 + $0xae8] sm:$0xff] }
 0x238   : > { %2137 = vmatmul.mubr.f32.gmra.mxu1 %v9800_v21  ;;  %8680 = vmatmul.mubr.msk.f32.gmra.mxu0 %vm782_vm5, %v9804_v23 }
 0x239   : > { %2398 = vmatpush1.msra.mxu1 %v1988_v26  ;;  %2301 = vmatpush2.msra.mxu0 %v1956_v27  ;;  %v2885_v26 = vld [vmem:[#allocation7 + $0xee8] sm:$0xff]  ;;  %v2756_v27 = vld [vmem:[#allocation7 + $0xae0] sm:$0xff] }
 0x23a   : > { %2399 = vmatprep.subr.mxu1 %v1985_v29  ;;  %2302 = vmatprep.subr.mxu0 %v1953_v30  ;;  %v2884_v29 = vld [vmem:[#allocation7 + $0xee0] sm:$0xff]  ;;  %v2753_v30 = vld [vmem:[#allocation7 + $0xac8] sm:$0xff] }
 0x23b   : > { %2400 = vmatpush1.msra.mxu1 %v1984_v33  ;;  %2303 = vmatpush2.msra.mxu0 %v1952_v32  ;;  %v2752_v33 = vld [vmem:[#allocation7 + $0xac0] sm:$0xff]  ;;  %v2749_v32 = vld [vmem:[#allocation7 + $0xaa8] sm:$0xff] }
 0x23c   : > { %2433 = vmatprep.mubr.f32.mxu1 %v12328_v1  ;;  %2304 = vmatprep.subr.mxu0 %v1949_v31  ;;  %v2881_v31 = vld [vmem:[#allocation7 + $0xec8] sm:$0xff] }
 0x23d   : > { %2904 = vmatprep.subr.mxu1 %v2789_v37  ;;  %2305 = vmatpush2.msra.mxu0 %v1948_v42  ;;  %v2748_v37 = vld [vmem:[#allocation7 + $0xaa0] sm:$0xff]  ;;  %v2745_v42 = vld [vmem:[#allocation7 + $0xa88] sm:$0xff] }
 0x23e   : > { %8681 = vmatmul.mubr.msk.f32.vlgmr.msra.gmra.mxu1 %vm782_vm5, %v9686_v25  ;;  %2306 = vmatprep.subr.mxu0 %v1945_v47  ;;  %v2773_v25 = vld [vmem:[#allocation7 + $0xb68] sm:$0xff]  ;;  %v2740_v47 = vld [vmem:[#allocation7 + $0xa60] sm:$0xff] }
 0x23f   : > { %2905 = vmatpush1.msra.mxu1 %v2788_v46  ;;  %2307 = vmatpush2.msra.mxu0 %v1944_v34  ;;  %v2741_v46 = vld [vmem:[#allocation7 + $0xa68] sm:$0xff] }
 0x240   : > { %2906 = vmatprep.subr.mxu1 %v2785_v22  ;;  %2308 = vmatprep.subr.mxu0 %v1941_v53  ;;  %v2737_v22 = vld [vmem:[#allocation7 + $0xa48] sm:$0xff] }
 0x241   : > { %2907 = vmatpush1.msra.mxu1 %v2784_v44  ;;  %2309 = vmatpush2.msra.mxu0 %v1940_v49  ;;  %v2733_v34 = vld [vmem:[#allocation7 + $0xa28] sm:$0xff]  ;;  %v2732_v44 = vld [vmem:[#allocation7 + $0xa20] sm:$0xff] }
 0x242   : > { %2908 = vmatprep.subr.mxu1 %v2781_v28  ;;  %2310 = vmatprep.subr.mxu0 %v1937_v24  ;;  %v2729_v53 = vld [vmem:[#allocation7 + $0xa08] sm:$0xff]  ;;  %v2852_v49 = vld [vmem:[#allocation7 + $0xde0] sm:$0xff] }
 0x243   : > { %2909 = vmatpush1.msra.mxu1 %v2780_v6  ;;  %2311 = vmatpush2.msra.mxu0 %v1936_v55  ;;  %v2853_v28 = vld [vmem:[#allocation7 + $0xde8] sm:$0xff] }
 0x244   : > { %2910 = vmatprep.subr.mxu1 %v2777_v54  ;;  %2312 = vmatprep.subr.mxu0 %v1933_v58  ;;  %v2849_v6 = vld [vmem:[#allocation7 + $0xdc8] sm:$0xff]  ;;  %v2844_v54 = vld [vmem:[#allocation7 + $0xda0] sm:$0xff] }
 0x245   : > { %2911 = vmatpush1.msra.mxu1 %v2776_v56  ;;  %2313 = vmatpush2.msra.mxu0 %v1932_v8  ;;  %v2845_v24 = vld [vmem:[#allocation7 + $0xda8] sm:$0xff]  ;;  %v2840_v56 = vld [vmem:[#allocation7 + $0xd80] sm:$0xff] }
 0x246   : > { %2912 = vmatprep.subr.mxu1 %v2773_v25  ;;  %2314 = vmatprep.subr.mxu0 %v1929_v63  ;;  %v9837_v55 = vpop.f32.mrf.mxu1  ;;  %v2861_v25 = vld [vmem:[#allocation7 + $0xe28] sm:$0xff]  ;;  %v2860_v8 = vld [vmem:[#allocation7 + $0xe20] sm:$0xff]  ;;  %v2548_v63 = vld [vmem:[#allocation2 + $0x10] sm:$0xfc] }
 0x247   : > { %2913 = vmatpush1.msra.mxu1 %v2772_v41  ;;  %2315 = vmatpush2.msra.mxu0 %v1928_v43 }
 0x248   : > { %2914 = vmatprep.subr.mxu1 %v2769_v38  ;;  %2316 = vmatprep.subr.mxu0 %v1925_v5  ;;  %v9842_v58 = vpop.f32.mrf.mxu1  ;;  %v9851_v38 = vld [vmem:[#allocation2 + $0x28] sm:$0xff]  ;;  %v2828_v5 = vld [vmem:[#allocation7 + $0xd20] sm:$0xff] }
 0x249   : > { %2915 = vmatpush1.msra.mxu1 %v2768_v50  ;;  %2317 = vmatpush2.msra.mxu0 %v1924_v9  ;;  %12361 = vst [vmem:[#allocation20_spill] sm:$0xff] %v9842_v58  ;;  %v2829_v50 = vld [vmem:[#allocation7 + $0xd28] sm:$0xff]  ;;  %v2856_v9 = vld [vmem:[#allocation7 + $0xe00] sm:$0xff]  ;;  %v2814_v58 = vld [vmem:[#allocation7 + $0xcb0] sm:$0xff] }
 0x24a   : > { %2916 = vmatprep.subr.mxu1 %v2765_v7  ;;  %2318 = vmatprep.subr.mxu0 %v1921_v52  ;;  %v2657_v7 = vrot.slane %v2548_v63, 2 }
 0x24b   : > { %2917 = vmatpush1.msra.mxu1 %v2764_v11  ;;  %2319 = vmatpush2.msra.mxu0 %v1920_v13  ;;  %v2825_v11 = vld [vmem:[#allocation7 + $0xd08] sm:$0xff] }
 0x24c   : > { %2918 = vmatprep.subr.mxu1 %v2761_v59  ;;  %2320 = vmatprep.mubr.f32.mxu0 %v9694_v14  ;;  %v2880_v14 = vld [vmem:[#allocation7 + $0xec0] sm:$0xff]  ;;  %v2791_v59 = vld [vmem:[#allocation7 + $0xbf8] sm:$0xff]  ;;  %v2821_v13 = vld [vmem:[#allocation7 + $0xce8] sm:$0xff] }
 0x24d   : > { %2919 = vmatpush1.msra.mxu1 %v2760_v17  ;;  %2321 = vmatmul.mubr.f32.vlgmr.msra.gmra.mxu0 %v9697_v16  ;;  %v2744_v16 = vld [vmem:[#allocation7 + $0xa80] sm:$0xff] }
 0x24e   : > { %2920 = vmatprep.subr.mxu1 %v2757_v61  ;;  %3033 = vmatprep.subr.mxu0 %v2885_v26  ;;  %v2820_v61 = vld [vmem:[#allocation7 + $0xce0] sm:$0xff]  ;;  %v2817_v26 = vld [vmem:[#allocation7 + $0xcc8] sm:$0xff] }
 0x24f   : > { %2921 = vmatpush1.msra.mxu1 %v2756_v27  ;;  %3034 = vmatpush1.msra.mxu0 %v2884_v29  ;;  %v2787_v27 = vld [vmem:[#allocation7 + $0xbd8] sm:$0xff]  ;;  %v2816_v29 = vld [vmem:[#allocation7 + $0xcc0] sm:$0xff] }
 0x250   : > { %2922 = vmatprep.subr.mxu1 %v2753_v30  ;;  %2326 = vmatprep.mubr.f32.mxu0 %v9700_v18  ;;  %v2877_v18 = vld [vmem:[#allocation7 + $0xea8] sm:$0xff] }
 0x251   : > { %2439 = vmatprep.mubr.f32.mxu1 %v12328_v1  ;;  %2923 = vmatpush1.msra.mxu1 %v2752_v33  ;;  %v2786_v33 = vld [vmem:[#allocation7 + $0xbd0] sm:$0xff] }
 0x252   : > { %2327 = vmatmul.mubr.f32.gmra.mxu0 %v9707_v36  ;;  %8682 = vmatmul.mubr.msk.f32.gmra.mxu1 %vm782_vm5, %v9714_v39  ;;  %v2876_v36 = vld [vmem:[#allocation7 + $0xea0] sm:$0xff] }
 0x253   : > { %2924 = vmatprep.subr.mxu1 %v2749_v32  ;;  %3035 = vmatprep.subr.mxu0 %v2881_v31  ;;  %v2736_v39 = vld [vmem:[#allocation7 + $0xa40] sm:$0xff]  ;;  %v2813_v32 = vld [vmem:[#allocation7 + $0xca8] sm:$0xff]  ;;  %v2783_v31 = vld [vmem:[#allocation7 + $0xbb8] sm:$0xff] }
 0x254   : > { %2925 = vmatpush1.msra.mxu1 %v2748_v37  ;;  %3036 = vmatpush1.msra.mxu0 %v2880_v14  ;;  %v2812_v37 = vld [vmem:[#allocation7 + $0xca0] sm:$0xff]  ;;  %v2782_v14 = vld [vmem:[#allocation7 + $0xbb0] sm:$0xff] }
 0x255   : > { %2926 = vmatprep.subr.mxu1 %v2745_v42  ;;  %2332 = vmatprep.mubr.f32.mxu0 %v9717_v40  ;;  %v2873_v40 = vld [vmem:[#allocation7 + $0xe88] sm:$0xff] }
 0x256   : > { %2445 = vmatprep.mubr.f32.mxu1 %v12328_v1  ;;  %2927 = vmatpush1.msra.mxu1 %v2744_v16  ;;  %v2809_v42 = vld [vmem:[#allocation7 + $0xc88] sm:$0xff]  ;;  %v2779_v16 = vld [vmem:[#allocation7 + $0xb98] sm:$0xff] }
 0x257   : > { %2333 = vmatmul.mubr.f32.gmra.mxu0 %v9725_v62  ;;  %8683 = vmatmul.mubr.msk.f32.gmra.mxu1 %vm782_vm5, %v9729_v51  ;;  %v2872_v62 = vld [vmem:[#allocation7 + $0xe80] sm:$0xff] }
 0x258   : > { %2928 = vmatprep.subr.mxu1 %v2741_v46  ;;  %3037 = vmatprep.subr.mxu0 %v2877_v18  ;;  %v2728_v51 = vld [vmem:[#allocation7 + $0xa00] sm:$0xff]  ;;  %v2778_v46 = vld [vmem:[#allocation7 + $0xb90] sm:$0xff] }
 0x259   : > { %2929 = vmatpush1.msra.mxu1 %v2740_v47  ;;  %3038 = vmatpush1.msra.mxu0 %v2876_v36  ;;  %v2808_v18 = vld [vmem:[#allocation7 + $0xc80] sm:$0xff] }
 0x25a   : > { %2930 = vmatprep.subr.mxu1 %v2737_v22  ;;  %2338 = vmatprep.mubr.f32.mxu0 %v9732_v57  ;;  %v2869_v57 = vld [vmem:[#allocation7 + $0xe68] sm:$0xff]  ;;  %v2775_v22 = vld [vmem:[#allocation7 + $0xb78] sm:$0xff] }
 0x25b   : > { %2451 = vmatprep.mubr.f32.mxu1 %v12328_v1  ;;  %2931 = vmatpush1.msra.mxu1 %v2736_v39  ;;  %v2805_v39 = vld [vmem:[#allocation7 + $0xc68] sm:$0xff] }
 0x25c   : > { %2339 = vmatmul.mubr.f32.gmra.mxu0 %v9739_v2  ;;  %8684 = vmatmul.mubr.msk.f32.gmra.mxu1 %vm782_vm5, %v9744_v4  ;;  %v2868_v2 = vld [vmem:[#allocation7 + $0xe60] sm:$0xff] }
 0x25d   : > { %2932 = vmatprep.subr.mxu1 %v2733_v34  ;;  %3039 = vmatprep.subr.mxu0 %v2873_v40  ;;  %v2848_v4 = vld [vmem:[#allocation7 + $0xdc0] sm:$0xff]  ;;  %v2774_v34 = vld [vmem:[#allocation7 + $0xb70] sm:$0xff] }
 0x25e   : > { %2933 = vmatpush1.msra.mxu1 %v2732_v44  ;;  %3040 = vmatpush1.msra.mxu0 %v2872_v62  ;;  %v2804_v44 = vld [vmem:[#allocation7 + $0xc60] sm:$0xff]  ;;  %v2547_v62 = vld [vmem:[#allocation2 + $0x8] sm:$0xfc] }
 0x25f   : > { %2934 = vmatprep.subr.mxu1 %v2729_v53  ;;  %2344 = vmatprep.mubr.f32.mxu0 %v9749_v12  ;;  %v2865_v12 = vld [vmem:[#allocation7 + $0xe48] sm:$0xff]  ;;  %v2550_v53 = vld [vmem:[#allocation2 + $0x20] sm:$0xff] }
 0x260   : > { %2457 = vmatprep.mubr.f32.mxu1 %v12328_v1  ;;  %2935 = vmatpush1.msra.mxu1 %v2728_v51 }
 0x261   : > { %2345 = vmatmul.mubr.f32.gmra.mxu0 %v9755_v19  ;;  %8685 = vmatmul.mubr.msk.f32.gmra.mxu1 %vm782_vm5, %v9759_v20  ;;  %v2864_v19 = vld [vmem:[#allocation7 + $0xe40] sm:$0xff]  ;;  %v2841_v20 = vld [vmem:[#allocation7 + $0xd88] sm:$0xff] }
 0x262   : > { %2936 = vmatprep.subr.mxu1 %v2853_v28  ;;  %3041 = vmatprep.subr.mxu0 %v2869_v57  ;;  %v2801_v28 = vld [vmem:[#allocation7 + $0xc48] sm:$0xff]  ;;  %v2546_v57 = vld [vmem:[#allocation2] sm:$0xfc] }
 0x263   : > { %2937 = vmatpush2.msra.mxu1 %v2852_v49  ;;  %3042 = vmatpush1.msra.mxu0 %v2868_v2  ;;  %v9882_v49 = vld [vmem:[#allocation2 + $0x18] sm:$0xff] }
 0x264   : > { %2938 = vmatprep.subr.mxu1 %v2849_v6  ;;  %2350 = vmatprep.mubr.f32.mxu0 %v9766_v35  ;;  %v2837_v35 = vld [vmem:[#allocation7 + $0xd68] sm:$0xff]  ;;  %v2771_v2 = vld [vmem:[#allocation7 + $0xb58] sm:$0xff]  ;;  %v2800_v6 = vld [vmem:[#allocation7 + $0xc40] sm:$0xff]  ;;  %v2652_v63 = vrot.slane %v9882_v49, 2 }
 0x265   : > { %2463 = vmatprep.mubr.f32.mxu1 %v12328_v1  ;;  %2939 = vmatpush2.msra.mxu1 %v2848_v4  ;;  %v2553_v4 = vld [vmem:[#allocation2 + $0x38] sm:$0x3] }
 0x266   : > { %2351 = vmatmul.mubr.f32.gmra.mxu0 %v9769_v45  ;;  %8686 = vmatmul.mubr.msk.f32.gmra.mxu1 %vm782_vm5, %v9774_v48  ;;  %v2836_v45 = vld [vmem:[#allocation7 + $0xd60] sm:$0xff]  ;;  %v2833_v48 = vld [vmem:[#allocation7 + $0xd48] sm:$0xff] }
 0x267   : > { %2940 = vmatprep.subr.mxu1 %v2845_v24  ;;  %3043 = vmatprep.subr.mxu0 %v2865_v12 }
 0x268   : > { %2941 = vmatpush2.msra.mxu1 %v2844_v54  ;;  %3044 = vmatpush1.msra.mxu0 %v2864_v19  ;;  %v2770_v54 = vld [vmem:[#allocation7 + $0xb50] sm:$0xff]  ;;  %v2797_v19 = vld [vmem:[#allocation7 + $0xc28] sm:$0xff] }
 0x269   : > { %2942 = vmatprep.subr.mxu1 %v2841_v20  ;;  %2356 = vmatprep.mubr.f32.mxu0 %v9783_v60  ;;  %v2832_v60 = vld [vmem:[#allocation7 + $0xd40] sm:$0xff]  ;;  %v2654_v20 = vrot.slane %v2547_v62, 2  ;;  %v2751_v62 = vld [vmem:[#allocation7 + $0xab8] sm:$0xff] }
 0x26a   : > { %2469 = vmatprep.mubr.f32.mxu1 %v12328_v1  ;;  %2943 = vmatpush2.msra.mxu1 %v2840_v56  ;;  %v2655_v56 = vrot.slane %v2550_v53, 2 }
 0x26b   : > { %2357 = vmatmul.mubr.f32.gmra.mxu0 %v9786_v10  ;;  %v9847_v41 = vpop.f32.mrf.mxu1  ;;  %8687 = vmatmul.mubr.msk.f32.gmra.mxu1 %vm782_vm5, %v9790_v3  ;;  %v2857_v10 = vld [vmem:[#allocation7 + $0xe08] sm:$0xff]  ;;  %v2658_v3 = vrot.slane %v9851_v38, 2  ;;  %v2750_v38 = vld [vmem:[#allocation7 + $0xab0] sm:$0xff] }
 0x26c   : > { %2944 = vmatprep.subr.mxu1 %v2837_v35  ;;  %3045 = vmatprep.subr.mxu0 %v2861_v25  ;;  %v2766_v25 = vld [vmem:[#allocation7 + $0xb30] sm:$0xff] }
 0x26d   : > { %2945 = vmatpush2.msra.mxu1 %v2836_v45  ;;  %v9853_v43 = vpop.f32.mrf.mxu1  ;;  %3046 = vmatpush1.msra.mxu0 %v2860_v8  ;;  %v2796_v45 = vld [vmem:[#allocation7 + $0xc20] sm:$0xff]  ;;  %v2763_v8 = vld [vmem:[#allocation7 + $0xb18] sm:$0xff] }
 0x26e   : > { %12362 = vst [vmem:[#allocation21_spill] sm:$0xff] %v9853_v43  ;;  %2946 = vmatprep.subr.mxu1 %v2833_v48  ;;  %2362 = vmatprep.mubr.f32.mxu0 %v9797_v15  ;;  %v2824_v15 = vld [vmem:[#allocation7 + $0xd00] sm:$0xff]  ;;  %v2651_v48 = vrot.slane %v2546_v57, 2  ;;  %v2819_v43 = vld [vmem:[#allocation7 + $0xcd8] sm:$0xff] }
 0x26f   : > { %2475 = vmatprep.mubr.f32.mxu1 %v12328_v1  ;;  %2947 = vmatpush2.msra.mxu1 %v2832_v60 }
 0x270   : > { %2363 = vmatmul.mubr.f32.gmra.mxu0 %v9800_v21  ;;  %v9859_v52 = vpop.f32.mrf.mxu1  ;;  %8688 = vmatmul.mubr.msk.f32.gmra.mxu1 %vm782_vm5, %v9804_v23  ;;  %v9868_v21 = vsel %vm2650_vm9, %v2657_v7, %v2658_v3  ;;  %v2790_v23 = vld [vmem:[#allocation7 + $0xbf0] sm:$0xff]  ;;  %v2554_v7 = vld [vmem:[#allocation2 + $0x40] sm:$0x3] }
 0x271   : > { %2948 = vmatprep.subr.mxu1 %v2829_v50  ;;  %3047 = vmatprep.subr.mxu0 %v2857_v10  ;;  %v2793_v50 = vld [vmem:[#allocation7 + $0xc08] sm:$0xff]  ;;  %v2662_v10 = vrot.slane %v2553_v4, 2 }
 0x272   : > { %2949 = vmatpush2.msra.mxu1 %v2828_v5  ;;  %v9863_v17 = vpop.f32.mrf.mxu1  ;;  %3048 = vmatpush1.msra.mxu0 %v2856_v9  ;;  %v2552_v5 = vld [vmem:[#allocation2 + $0x30] sm:$0x3]  ;;  %v2556_v9 = vld [vmem:[#allocation2 + $0x50] sm:$0xfc] }
 0x273   : > { %12363 = vst [vmem:[#allocation22_spill] sm:$0xff] %v9863_v17  ;;  %2950 = vmatprep.subr.mxu1 %v2825_v11  ;;  %3081 = vmatprep.mubr.f32.mxu0 %v12328_v1  ;;  %v9892_v11 = vld [vmem:[#allocation2 + $0x68] sm:$0xff] }
 0x274   : > { %2951 = vmatpush2.msra.mxu1 %v2824_v15  ;;  %3130 = vmatprep.subr.mxu0 %v2791_v59  ;;  %v2762_v59 = vld [vmem:[#allocation7 + $0xb10] sm:$0xff] }
 0x275   : > { %2952 = vmatprep.subr.mxu1 %v2821_v13  ;;  %v9871_v30 = vpop.f32.mrf.mxu1  ;;  %8689 = vmatmul.mubr.msk.f32.vlgmr.msra.gmra.mxu0 %vm782_vm5, %v9868_v21  ;;  %v9897_v13 = vsel %vm2650_vm9, %v2654_v20, %v2655_v56  ;;  %v2563_v20 = vld [vmem:[#allocation2 + $0x88] sm:$0x3] }
 0x276   : > { %2953 = vmatpush2.msra.mxu1 %v2820_v61  ;;  %3131 = vmatpush1.msra.mxu0 %v2790_v23  ;;  %v2759_v23 = vld [vmem:[#allocation7 + $0xaf8] sm:$0xff] }
 0x277   : > { %2954 = vmatprep.subr.mxu1 %v2817_v26  ;;  %3132 = vmatprep.subr.mxu0 %v2787_v27  ;;  %v9875_v36 = vpop.f32.mrf.mxu1  ;;  %v9900_v26 = vsel %vm2650_vm9, %v2651_v48, %v2652_v63  ;;  %v2660_v27 = vrot.slane %v2552_v5, 2  ;;  %v2886_v48 = vld [vmem:[#allocation7 + $0xef0] sm:$0xff] }
 0x278   : > { %2955 = vmatpush2.msra.mxu1 %v2816_v29  ;;  %3133 = vmatpush1.msra.mxu0 %v2786_v33  ;;  %v1222_v47 = vpop.f32.mrf.mxu0  ;;  %12364 = vst [vmem:[#allocation23_spill] sm:$0xff] %v9875_v36  ;;  %v2664_v29 = vrot.slane %v2554_v7, 2  ;;  %v2679_v7 = vrot.slane %v2563_v20, 2 }
 0x279   : > { %2956 = vmatprep.subr.mxu1 %v2813_v32  ;;  %3134 = vmatprep.subr.mxu0 %v2783_v31  ;;  %v9878_v40 = vadd.f32 %v9837_v55, %v1222_v47  ;;  %v2767_v55 = vld [vmem:[#allocation7 + $0xb38] sm:$0xff]  ;;  %v2758_v32 = vld [vmem:[#allocation7 + $0xaf0] sm:$0xff]  ;;  %v9906_v31 = vsel %vm2650_vm9, %v2655_v56, %v2662_v10  ;;  %v9921_v53 = vsel %vm2650_vm9, %v2652_v63, %v2660_v27 }
 0x27a   : > { %2957 = vmatpush2.msra.mxu1 %v2812_v37  ;;  %3135 = vmatpush1.msra.mxu0 %v2782_v14  ;;  %v9880_v51 = vpop.f32.mrf.mxu0  ;;  %v9884_v12 = vpop.f32.mrf.mxu1  ;;  %v2669_v37 = vrot.slane %v2556_v9, 2  ;;  %v2670_v14 = vrot.slane %v9892_v11, 2  ;;  %v9914_v47 = vld [vmem:[#allocation2 + $0x70] sm:$0xff]  ;;  %v2743_v10 = vld [vmem:[#allocation7 + $0xa78] sm:$0xff]  ;;  %v9954_v9 = vld [vmem:[#allocation2 + $0xa8] sm:$0xff] }
 0x27b   : > { %2958 = vmatprep.subr.mxu1 %v2809_v42  ;;  %12365 = vst [vmem:[#allocation24_spill] sm:$0xff] %v9880_v51  ;;  %3136 = vmatprep.subr.mxu0 %v2779_v16  ;;  %v2555_v42 = vld [vmem:[#allocation2 + $0x48] sm:$0xfc]  ;;  %v9909_v16 = vld [vmem:[#allocation2 + $0x60] sm:$0xff] }
 0x27c   : > { %2959 = vmatpush2.msra.mxu1 %v2808_v18  ;;  %3137 = vmatpush1.msra.mxu0 %v2778_v46  ;;  %v9894_v15 = vpop.f32.mrf.mxu1  ;;  %v2755_v18 = vld [vmem:[#allocation7 + $0xad8] sm:$0xff]  ;;  %v2666_v57 = vrot.slane %v2555_v42, 2  ;;  %v2667_v49 = vrot.slane %v9909_v16, 2 }
 0x27d   : > { %2960 = vmatprep.subr.mxu1 %v2805_v39  ;;  %v1228_v24 = vpop.f32.mrf.mxu0  ;;  %3138 = vmatprep.subr.mxu0 %v2775_v22  ;;  %12367 = vst [vmem:[#allocation26_spill] sm:$0xff] %v9894_v15  ;;  %v2754_v39 = vld [vmem:[#allocation7 + $0xad0] sm:$0xff]  ;;  %v2739_v16 = vld [vmem:[#allocation7 + $0xa58] sm:$0xff] }
 0x27e   : > { %2961 = vmatpush2.msra.mxu1 %v2804_v44  ;;  %v9887_v35 = vadd.f32 %v9847_v41, %v1228_v24  ;;  %3139 = vmatpush1.msra.mxu0 %v2774_v34  ;;  %v2792_v41 = vld [vmem:[#allocation7 + $0xc00] sm:$0xff]  ;;  %v2887_v44 = vld [vmem:[#allocation7 + $0xef8] sm:$0xff]  ;;  %v2673_v24 = vrot.slane %v9914_v47, 2  ;;  %v9948_v63 = vsel %vm2650_vm9, %v2666_v57, %v2667_v49  ;;  %v2571_v57 = vld [vmem:[#allocation2 + $0xc8] sm:$0x3] }
 0x27f   : > { %2962 = vmatprep.subr.mxu1 %v2801_v28  ;;  %v9890_v60 = vpop.f32.mrf.mxu0  ;;  %3140 = vmatprep.subr.mxu0 %v2771_v2  ;;  %v9916_v22 = vpop.f32.mrf.mxu1  ;;  %v2562_v34 = vld [vmem:[#allocation2 + $0x80] sm:$0x3]  ;;  %v9926_v28 = vsel %vm2650_vm9, %v2658_v3, %v2664_v29  ;;  %v2747_v3 = vld [vmem:[#allocation7 + $0xa98] sm:$0xff]  ;;  %v2566_v29 = vld [vmem:[#allocation2 + $0xa0] sm:$0xfc] }
 0x280   : > { %12366 = vst [vmem:[#allocation25_spill] sm:$0xff] %v9890_v60  ;;  %2963 = vmatpush2.msra.mxu1 %v2800_v6  ;;  %3141 = vmatpush1.msra.mxu0 %v2770_v54  ;;  %v9931_v6 = vsel %vm2650_vm9, %v2669_v37, %v2670_v14  ;;  %v2561_v54 = vld [vmem:[#allocation2 + $0x78] sm:$0x3] }
 0x281   : > { %2964 = vmatprep.subr.mxu1 %v2797_v19  ;;  %3142 = vmatprep.subr.mxu0 %v2767_v55  ;;  %v2677_v19 = vrot.slane %v2562_v34, 2  ;;  %v9976_v34 = vsel %vm2650_vm9, %v2673_v24, %v2679_v7  ;;  %v2851_v7 = vld [vmem:[#allocation7 + $0xdd8] sm:$0xff] }
 0x282   : > { %2965 = vmatpush2.msra.mxu1 %v2796_v45  ;;  %v1234_v61 = vpop.f32.mrf.mxu0  ;;  %3143 = vmatpush1.msra.mxu0 %v2766_v25  ;;  %v9939_v25 = vpop.f32.mrf.mxu1  ;;  %v2565_v45 = vld [vmem:[#allocation2 + $0x98] sm:$0xfc] }
 0x283   : > { %2966 = vmatprep.subr.mxu1 %v2793_v50  ;;  %v9903_v33 = vadd.f32 %v9859_v52, %v1234_v61  ;;  %3144 = vmatprep.subr.mxu0 %v2763_v8  ;;  %v2557_v52 = vld [vmem:[#allocation2 + $0x58] sm:$0xfc]  ;;  %12370 = vst [vmem:[#allocation29_spill] sm:$0xff] %v9939_v25  ;;  %v9942_v8 = vld [vmem:[#allocation2 + $0xb0] sm:$0xff]  ;;  %v2675_v50 = vrot.slane %v2561_v54, 2  ;;  %v9957_v61 = vsel %vm2650_vm9, %v2670_v14, %v2677_v19 }
 0x284   : > { %2967 = vmatpush2.msra.mxu1 %v2792_v41  ;;  %v9911_v46 = vpop.f32.mrf.mxu0  ;;  %3145 = vmatpush1.msra.mxu0 %v2762_v59  ;;  %v2672_v4 = vrot.slane %v2557_v52, 2  ;;  %v2564_v41 = vld [vmem:[#allocation2 + $0x90] sm:$0xfc]  ;;  %v2685_v27 = vrot.slane %v9942_v8, 2  ;;  %v1371_v42 = vpop.f32.mrf.mxu1 }
 0x285   : > { %12368 = vst [vmem:[#allocation27_spill] sm:$0xff] %v9911_v46  ;;  %2968 = vmatprep.mubr.f32.mxu1 %v9897_v13  ;;  %3146 = vmatprep.subr.mxu0 %v2759_v23  ;;  %v2742_v59 = vld [vmem:[#allocation7 + $0xa70] sm:$0xff]  ;;  %v2684_v23 = vrot.slane %v2565_v45, 2  ;;  %v9971_v52 = vsel %vm2650_vm9, %v2667_v49, %v2675_v50  ;;  %v2681_v47 = vrot.slane %v2564_v41, 2  ;;  %v2692_v45 = vrot.slane %v2571_v57, 2  ;;  %v2855_v50 = vld [vmem:[#allocation7 + $0xdf8] sm:$0xff] }
 0x286   : > { %2969 = vmatmul.mubr.f32.vlgmr.msra.gmra.mxu1 %v9900_v26  ;;  %3147 = vmatpush1.msra.mxu0 %v2758_v32  ;;  %v9952_v5 = vsel %vm2650_vm9, %v2672_v4, %v2673_v24  ;;  %v9960_v32 = vld [vmem:[#allocation2 + $0xb8] sm:$0xff]  ;;  %v2738_v14 = vld [vmem:[#allocation7 + $0xa50] sm:$0xff]  ;;  %v9985_v54 = vpop.f32.mrf.mxu1 }
 0x287   : > { %2974 = vmatprep.mubr.f32.mxu1 %v9906_v31  ;;  %v1240_v2 = vpop.f32.mrf.mxu0  ;;  %3148 = vmatprep.subr.mxu0 %v2755_v18  ;;  %v9983_v49 = vsel %vm2650_vm9, %v2684_v23, %v2685_v27  ;;  %12372 = vst [vmem:[#allocation31_spill] sm:$0xff] %v9985_v54  ;;  %v2731_v24 = vld [vmem:[#allocation7 + $0xa18] sm:$0xff]  ;;  %v2730_v19 = vld [vmem:[#allocation7 + $0xa10] sm:$0xff] }
 0x288   : > { %3087 = vmatprep.mubr.f32.mxu0 %v12328_v1  ;;  %v9935_v55 = vadd.f32 %v9871_v30, %v1240_v2  ;;  %3149 = vmatpush1.msra.mxu0 %v2754_v39  ;;  %v2746_v30 = vld [vmem:[#allocation7 + $0xa90] sm:$0xff]  ;;  %v2682_v39 = vrot.slane %v9954_v9, 2  ;;  %v2883_v41 = vld [vmem:[#allocation7 + $0xed8] sm:$0xff] }
 0x289   : > { %3259 = vmatprep.subr.mxu1 %v2887_v44  ;;  %v9937_v56 = vpop.f32.mrf.mxu0  ;;  %3150 = vmatprep.subr.mxu0 %v2751_v62  ;;  %v2687_v44 = vrot.slane %v2566_v29, 2  ;;  %v2688_v62 = vrot.slane %v9960_v32, 2  ;;  %v2734_v2 = vld [vmem:[#allocation7 + $0xa30] sm:$0xff]  ;;  %v2574_v32 = vld [vmem:[#allocation2 + $0xe0] sm:$0xfc]  ;;  %v2847_v57 = vld [vmem:[#allocation7 + $0xdb8] sm:$0xff] }
 0x28a   : > { %12369 = vst [vmem:[#allocation28_spill] sm:$0xff] %v9937_v56  ;;  %2975 = vmatmul.mubr.f32.gmra.mxu1 %v9921_v53  ;;  %8690 = vmatmul.mubr.msk.f32.gmra.mxu0 %vm782_vm5, %v9926_v28  ;;  %v9994_v20 = vsel %vm2650_vm9, %v2681_v47, %v2682_v39  ;;  %v2882_v23 = vld [vmem:[#allocation7 + $0xed0] sm:$0xff] }
 0x28b   : > { %2980 = vmatprep.mubr.f32.mxu1 %v9931_v6  ;;  %3151 = vmatpush1.msra.mxu0 %v2750_v38  ;;  %v2570_v38 = vld [vmem:[#allocation2 + $0xc0] sm:$0x3]  ;;  %v2850_v47 = vld [vmem:[#allocation7 + $0xdd0] sm:$0xff] }
 0x28c   : > { %3093 = vmatprep.mubr.f32.mxu0 %v12328_v1  ;;  %v1246_v11 = vpop.f32.mrf.mxu0  ;;  %3152 = vmatprep.subr.mxu0 %v2747_v3  ;;  %v2690_v9 = vrot.slane %v2570_v38, 2  ;;  %v2699_v38 = vrot.slane %v2574_v32, 2  ;;  %v2843_v32 = vld [vmem:[#allocation7 + $0xd98] sm:$0xff] }
 0x28d   : > { %3260 = vmatpush1.msra.mxu1 %v2886_v48  ;;  %v9963_v37 = vadd.f32 %v9884_v12, %v1246_v11  ;;  %3153 = vmatpush1.msra.mxu0 %v2746_v30  ;;  %v2735_v12 = vld [vmem:[#allocation7 + $0xa38] sm:$0xff]  ;;  %v2572_v48 = vld [vmem:[#allocation2 + $0xd0] sm:$0x3] }
 0x28e   : > { %2981 = vmatmul.mubr.f32.gmra.mxu1 %v9948_v63  ;;  %v9966_v18 = vpop.f32.mrf.mxu0  ;;  %3154 = vmatprep.subr.mxu0 %v2743_v10  ;;  %v10000_v10 = vsel %vm2650_vm9, %v2687_v44, %v2688_v62  ;;  %v2694_v29 = vrot.slane %v2572_v48, 2 }
 0x28f   : > { %12371 = vst [vmem:[#allocation30_spill] sm:$0xff] %v9966_v18  ;;  %8691 = vmatmul.mubr.msk.f32.gmra.mxu0 %vm782_vm5, %v9952_v5  ;;  %2986 = vmatprep.mubr.f32.mxu1 %v9957_v61 }
 0x290   : > { %3155 = vmatpush1.msra.mxu0 %v2742_v59  ;;  %3099 = vmatprep.mubr.f32.mxu0 %v12328_v1  ;;  %v1377_v59 = vpop.f32.mrf.mxu1 }
 0x291   : > { %3156 = vmatprep.subr.mxu0 %v2739_v16  ;;  %v1252_v4 = vpop.f32.mrf.mxu0  ;;  %v10004_v16 = vld [vmem:[#allocation2 + $0xf8] sm:$0xff]  ;;  %3261 = vmatprep.subr.mxu1 %v2883_v41 }
 0x292   : > { %3157 = vmatpush1.msra.mxu0 %v2738_v14  ;;  %2987 = vmatmul.mubr.f32.gmra.mxu1 %v9971_v52  ;;  %v9989_v3 = vadd.f32 %v9916_v22, %v1252_v4  ;;  %v2854_v22 = vld [vmem:[#allocation7 + $0xdf0] sm:$0xff]  ;;  %v2700_v8 = vrot.slane %v10004_v16, 2  ;;  %v10025_v48 = vpop.f32.mrf.mxu1  ;;  %v2875_v41 = vld [vmem:[#allocation7 + $0xe98] sm:$0xff] }
 0x293   : > { %3158 = vmatprep.subr.mxu0 %v2735_v12  ;;  %8692 = vmatmul.mubr.msk.f32.gmra.mxu0 %vm782_vm5, %v9976_v34  ;;  %v9996_v30 = vpop.f32.mrf.mxu0  ;;  %v10013_v12 = vsel %vm2650_vm9, %v2685_v27, %v2692_v45  ;;  %v10017_v4 = vld [vmem:[#allocation2 + $0xf0] sm:$0xff]  ;;  %v10023_v27 = vld [vmem:[#allocation2 + $0x100] sm:$0xff]  ;;  %12375 = vst [vmem:[#allocation34_spill] sm:$0xff] %v10025_v48 }
 0x294   : > { %12373 = vst [vmem:[#allocation32_spill] sm:$0xff] %v9996_v30  ;;  %3159 = vmatpush1.msra.mxu0 %v2734_v2  ;;  %2992 = vmatprep.mubr.f32.mxu1 %v9983_v49  ;;  %v2573_v2 = vld [vmem:[#allocation2 + $0xd8] sm:$0xfc]  ;;  %v2874_v16 = vld [vmem:[#allocation7 + $0xe90] sm:$0xff] }
 0x295   : > { %3160 = vmatprep.subr.mxu0 %v2731_v24  ;;  %3105 = vmatprep.mubr.f32.mxu0 %v12328_v1  ;;  %v1258_v11 = vpop.f32.mrf.mxu0  ;;  %v10020_v24 = vsel %vm2650_vm9, %v2682_v39, %v2690_v9  ;;  %v2846_v39 = vld [vmem:[#allocation7 + $0xdb0] sm:$0xff]  ;;  %v2696_v9 = vrot.slane %v2573_v2, 2  ;;  %v1448_v2 = vpop.f32.mrf.mxu1 }
 0x296   : > { %3161 = vmatpush1.msra.mxu0 %v2730_v19  ;;  %2993 = vmatmul.mubr.f32.gmra.mxu1 %v9994_v20  ;;  %v10006_v14 = vadd.f32 %v1371_v42, %v1258_v11  ;;  %v2879_v42 = vld [vmem:[#allocation7 + $0xeb8] sm:$0xff]  ;;  %v2575_v19 = vld [vmem:[#allocation2 + $0xe8] sm:$0xfc]  ;;  %v2697_v11 = vrot.slane %v10017_v4, 2 }
 0x297   : > { %3162 = vmatprep.subr.mxu0 %v2855_v50  ;;  %8693 = vmatmul.mubr.msk.f32.gmra.mxu0 %vm782_vm5, %v10000_v10  ;;  %v10015_v44 = vpop.f32.mrf.mxu0  ;;  %v10029_v50 = vsel %vm2650_vm9, %v2688_v62, %v2694_v29  ;;  %v2702_v62 = vrot.slane %v2575_v19, 2  ;;  %v2703_v29 = vrot.slane %v10023_v27, 2  ;;  %v2871_v19 = vld [vmem:[#allocation7 + $0xe78] sm:$0xff] }
 0x298   : > { %12374 = vst [vmem:[#allocation33_spill] sm:$0xff] %v10015_v44  ;;  %3163 = vmatpush2.msra.mxu0 %v2854_v22  ;;  %3262 = vmatpush1.msra.mxu1 %v2882_v23  ;;  %v2878_v22 = vld [vmem:[#allocation7 + $0xeb0] sm:$0xff]  ;;  %v10047_v27 = vsel %vm2650_vm9, %v2696_v9, %v2697_v11  ;;  %v2835_v9 = vld [vmem:[#allocation7 + $0xd58] sm:$0xff] }
 0x299   : > { %3164 = vmatprep.subr.mxu0 %v2851_v7  ;;  %v1264_v45 = vpop.f32.mrf.mxu0  ;;  %2998 = vmatprep.mubr.f32.mxu1 %v10013_v12 }
 0x29a   : > { %3165 = vmatpush2.msra.mxu0 %v2850_v47  ;;  %v10031_v7 = vadd.f32 %v1377_v59, %v1264_v45  ;;  %3111 = vmatprep.mubr.f32.mxu0 %v12328_v1  ;;  %v2580_v59 = vld [vmem:[#allocation2 + $0x110] sm:$0x3]  ;;  %v2579_v45 = vld [vmem:[#allocation2 + $0x108] sm:$0x3] }
 0x29b   : > { %3166 = vmatprep.subr.mxu0 %v2847_v57  ;;  %v10035_v23 = vpop.f32.mrf.mxu0  ;;  %3263 = vmatprep.subr.mxu1 %v2879_v42  ;;  %v2842_v47 = vld [vmem:[#allocation7 + $0xd90] sm:$0xff]  ;;  %v10042_v57 = vsel %vm2650_vm9, %v2699_v38, %v2700_v8  ;;  %v2839_v42 = vld [vmem:[#allocation7 + $0xd78] sm:$0xff]  ;;  %v2707_v1 = vrot.slane %v2580_v59, 2  ;;  %v10053_v38 = vsel %vm2650_vm9, %v2702_v62, %v2703_v29 }
 0x29c   : > { %12376 = vst [vmem:[#allocation35_spill] sm:$0xff] %v10035_v23  ;;  %2999 = vmatmul.mubr.f32.gmra.mxu1 %v10020_v24  ;;  %8694 = vmatmul.mubr.msk.f32.gmra.mxu0 %vm782_vm5, %v10029_v50  ;;  %v2866_v59 = vld [vmem:[#allocation7 + $0xe50] sm:$0xff] }
 0x29d   : > { %3264 = vmatpush1.msra.mxu1 %v2878_v22  ;;  %v1561_v4 = vpop.f32.mrf.mxu0  ;;  %3167 = vmatpush2.msra.mxu0 %v2846_v39  ;;  %v2581_v22 = vld [vmem:[#allocation2 + $0x118] sm:$0x3]  ;;  %v2870_v39 = vld [vmem:[#allocation7 + $0xe70] sm:$0xff]  ;;  %v10062_v36 = vsel %vm2650_vm9, %v2700_v8, %v2707_v1 }
 0x29e   : > { %3265 = vmatprep.subr.mxu1 %v2875_v41  ;;  %v10044_v0 = vadd.f32 %v1561_v4, %v1448_v2  ;;  %3168 = vmatprep.subr.mxu0 %v2843_v32  ;;  %v12377_v41 = vmov 0.0   ;;  %v2838_v32 = vld [vmem:[#allocation7 + $0xd70] sm:$0xff]  ;;  %v2705_v2 = vrot.slane %v2579_v45, 2  ;;  %v10056_v4 = vpop.f32.mrf.mxu1  ;;  %v2831_v45 = vld [vmem:[#allocation7 + $0xd38] sm:$0xff] }
 0x29f   : > { %3266 = vmatpush1.msra.mxu1 %v2874_v16  ;;  %v10049_v15 = vpop.f32.mrf.mxu0  ;;  %3169 = vmatpush2.msra.mxu0 %v2842_v47  ;;  %v2867_v16 = vld [vmem:[#allocation7 + $0xe58] sm:$0xff]  ;;  %v2709_v47 = vrot.slane %v2581_v22, 2  ;;  %v2834_v62 = vld [vmem:[#allocation7 + $0xd50] sm:$0xff] }
 0x2a0   : > { %3004 = vmatprep.mubr.f32.mxu1 %v10042_v57  ;;  %3117 = vmatprep.mubr.f32.mxu0 %v12377_v41  ;;  %v2863_v22 = vld [vmem:[#allocation7 + $0xe38] sm:$0xff]  ;;  %v10069_v17 = vsel %vm2650_vm9, %v2697_v11, %v2705_v2  ;;  %v2862_v8 = vld [vmem:[#allocation7 + $0xe30] sm:$0xff] }
 0x2a1   : > { %3170 = vmatprep.subr.mxu0 %v2839_v42  ;;  %3267 = vmatprep.subr.mxu1 %v2871_v19  ;;  %v10075_v1 = vsel %vm2650_vm9, %v2703_v29, %v2709_v47  ;;  %v2827_v11 = vld [vmem:[#allocation7 + $0xd18] sm:$0xff] }
 0x2a2   : > { %3005 = vmatmul.mubr.f32.gmra.mxu1 %v10047_v27  ;;  %v1567_v18 = vpop.f32.mrf.mxu0  ;;  %8695 = vmatmul.mubr.msk.f32.gmra.mxu0 %vm782_vm5, %v10053_v38  ;;  %v1454_v42 = vpop.f32.mrf.mxu1  ;;  %v2823_v47 = vld [vmem:[#allocation7 + $0xcf8] sm:$0xff] }
 0x2a3   : > { %3268 = vmatpush1.msra.mxu1 %v2870_v39  ;;  %3171 = vmatpush2.msra.mxu0 %v2838_v32  ;;  %v10064_v56 = vadd.f32 %v1567_v18, %v1454_v42  ;;  %v2830_v18 = vld [vmem:[#allocation7 + $0xd30] sm:$0xff]  ;;  %v2859_v39 = vld [vmem:[#allocation7 + $0xe18] sm:$0xff] }
 0x2a4   : > { %3269 = vmatprep.subr.mxu1 %v2867_v16  ;;  %v10066_v19 = vpop.f32.mrf.mxu0  ;;  %3172 = vmatprep.subr.mxu0 %v2835_v9  ;;  %v10071_v46 = vpop.f32.mrf.mxu1  ;;  %v2858_v16 = vld [vmem:[#allocation7 + $0xe10] sm:$0xff] }
 0x2a5   : > { %12378 = vst [vmem:[#allocation36_spill] sm:$0xff] %v10066_v19  ;;  %3270 = vmatpush1.msra.mxu1 %v2866_v59  ;;  %12379 = vst [vmem:[#allocation37_spill] sm:$0xff] %v10071_v46  ;;  %3173 = vmatpush2.msra.mxu0 %v2834_v62  ;;  %v2826_v9 = vld [vmem:[#allocation7 + $0xd10] sm:$0xff]  ;;  %v3539_v62 = vld [vmem:[#allocation7 + $0x10e8] sm:$0xff] }
 0x2a6   : > { %3010 = vmatprep.mubr.f32.mxu1 %v10062_v36  ;;  %3123 = vmatprep.mubr.f32.mxu0 %v12377_v41 }
 0x2a7   : > { %3174 = vmatprep.subr.mxu0 %v2831_v45  ;;  %v1573_v32 = vpop.f32.mrf.mxu0  ;;  %3271 = vmatprep.subr.mxu1 %v2863_v22  ;;  %v1460_v2 = vpop.f32.mrf.mxu1  ;;  %v2822_v45 = vld [vmem:[#allocation7 + $0xcf0] sm:$0xff]  ;;  %v3538_v22 = vld [vmem:[#allocation7 + $0x10e0] sm:$0xff] }
 0x2a8   : > { %3011 = vmatmul.mubr.f32.gmra.mxu1 %v10069_v17  ;;  %8696 = vmatmul.mubr.msk.f32.gmra.mxu0 %vm782_vm5, %v10075_v1  ;;  %v10081_v29 = vadd.f32 %v1573_v32, %v1460_v2  ;;  %v3535_v32 = vld [vmem:[#allocation7 + $0x10c8] sm:$0xff]  ;;  %v2818_v2 = vld [vmem:[#allocation7 + $0xcd0] sm:$0xff] }
 0x2a9   : > { %3272 = vmatpush1.msra.mxu1 %v2862_v8  ;;  %v10083_v59 = vpop.f32.mrf.mxu0  ;;  %3175 = vmatpush2.msra.mxu0 %v2830_v18  ;;  %v10085_v42 = vpop.f32.mrf.mxu1  ;;  %v3534_v18 = vld [vmem:[#allocation7 + $0x10c0] sm:$0xff] }
 0x2aa   : > { %12380 = vst [vmem:[#allocation38_spill] sm:$0xff] %v10083_v59  ;;  %3273 = vmatprep.subr.mxu1 %v2859_v39  ;;  %12381 = vst [vmem:[#allocation39_spill] sm:$0xff] %v10085_v42  ;;  %3176 = vmatprep.subr.mxu0 %v2827_v11  ;;  %v2815_v39 = vld [vmem:[#allocation7 + $0xcb8] sm:$0xff]  ;;  %v3612_v59 = vld [vmem:[#allocation7 + $0x1330] sm:$0xff] }
 0x2ab   : > { %3274 = vmatpush1.msra.mxu1 %v2858_v16  ;;  %3177 = vmatpush2.msra.mxu0 %v2826_v9  ;;  %v3531_v9 = vld [vmem:[#allocation7 + $0x10a8] sm:$0xff]  ;;  %v3572_v42 = vld [vmem:[#allocation7 + $0x11f0] sm:$0xff] }
 0x2ac   : > { %3307 = vmatprep.mubr.f32.mxu1 %v12377_v41  ;;  %v1579_v8 = vpop.f32.mrf.mxu0  ;;  %3178 = vmatprep.subr.mxu0 %v2823_v47  ;;  %v1466_v60 = vpop.f32.mrf.mxu1  ;;  %v3530_v47 = vld [vmem:[#allocation7 + $0x10a0] sm:$0xff] }
 0x2ad   : > { %3662 = vmatprep.subr.mxu1 %v3539_v62  ;;  %3179 = vmatpush2.msra.mxu0 %v2822_v45  ;;  %v10090_v11 = vadd.f32 %v1579_v8, %v1466_v60  ;;  %v2811_v62 = vld [vmem:[#allocation7 + $0xc98] sm:$0xff]  ;;  %v3527_v45 = vld [vmem:[#allocation7 + $0x1088] sm:$0xff]  ;;  %v3526_v60 = vld [vmem:[#allocation7 + $0x1080] sm:$0xff] }
 0x2ae   : > { %8697 = vmatmul.mubr.msk.f32.vlgmr.msra.gmra.mxu1 %vm782_vm5, %v9868_v21  ;;  %v10092_v16 = vpop.f32.mrf.mxu0  ;;  %3180 = vmatprep.subr.mxu0 %v2819_v43  ;;  %v10094_v51 = vpop.f32.mrf.mxu1  ;;  %v2810_v21 = vld [vmem:[#allocation7 + $0xc90] sm:$0xff]  ;;  %v2807_v8 = vld [vmem:[#allocation7 + $0xc78] sm:$0xff]  ;;  %v3523_v43 = vld [vmem:[#allocation7 + $0x1068] sm:$0xff] }
 0x2af   : > { %12382 = vst [vmem:[#allocation40_spill] sm:$0xff] %v10092_v16  ;;  %3663 = vmatpush1.msra.mxu1 %v3538_v22  ;;  %12383 = vst [vmem:[#allocation41_spill] sm:$0xff] %v10094_v51  ;;  %3181 = vmatpush2.msra.mxu0 %v2818_v2  ;;  %v2806_v22 = vld [vmem:[#allocation7 + $0xc70] sm:$0xff]  ;;  %v3522_v2 = vld [vmem:[#allocation7 + $0x1060] sm:$0xff] }
 0x2b0   : > { %3664 = vmatprep.subr.mxu1 %v3535_v32  ;;  %3182 = vmatprep.subr.mxu0 %v2815_v39  ;;  %v10325_v16 = vld [vmem:[#allocation2 + $0x138] sm:$0xff] }
 0x2b1   : > { %3665 = vmatpush1.msra.mxu1 %v3534_v18  ;;  %v1585_v48 = vpop.f32.mrf.mxu0  ;;  %3183 = vmatpush2.msra.mxu0 %v2814_v58  ;;  %v1472_v23 = vpop.f32.mrf.mxu1  ;;  %v2803_v18 = vld [vmem:[#allocation7 + $0xc58] sm:$0xff]  ;;  %v3519_v58 = vld [vmem:[#allocation7 + $0x1048] sm:$0xff] }
 0x2b2   : > { %3666 = vmatprep.subr.mxu1 %v3531_v9  ;;  %3184 = vmatprep.subr.mxu0 %v2811_v62  ;;  %v10096_v54 = vadd.f32 %v1585_v48, %v1472_v23  ;;  %v2802_v9 = vld [vmem:[#allocation7 + $0xc50] sm:$0xff]  ;;  %v2799_v62 = vld [vmem:[#allocation7 + $0xc38] sm:$0xff]  ;;  %v3515_v48 = vld [vmem:[#allocation7 + $0x1028] sm:$0xff] }
 0x2b3   : > { %3667 = vmatpush1.msra.mxu1 %v3530_v47  ;;  %v10098_v32 = vpop.f32.mrf.mxu0  ;;  %3185 = vmatpush2.msra.mxu0 %v2810_v21  ;;  %v10100_v39 = vpop.f32.mrf.mxu1  ;;  %v3518_v47 = vld [vmem:[#allocation7 + $0x1040] sm:$0xff]  ;;  %v2798_v23 = vld [vmem:[#allocation7 + $0xc30] sm:$0xff]  ;;  %v2795_v21 = vld [vmem:[#allocation7 + $0xc18] sm:$0xff] }
 0x2b4   : > { %12384 = vst [vmem:[#allocation42_spill] sm:$0xff] %v10098_v32  ;;  %3668 = vmatprep.subr.mxu1 %v3527_v45  ;;  %12385 = vst [vmem:[#allocation43_spill] sm:$0xff] %v10100_v39  ;;  %3186 = vmatprep.subr.mxu0 %v2807_v8  ;;  %v3514_v45 = vld [vmem:[#allocation7 + $0x1020] sm:$0xff]  ;;  %v3511_v8 = vld [vmem:[#allocation7 + $0x1008] sm:$0xff] }
 0x2b5   : > { %3669 = vmatpush1.msra.mxu1 %v3526_v60  ;;  %3187 = vmatpush2.msra.mxu0 %v2806_v22  ;;  %v3613_v39 = vld [vmem:[#allocation7 + $0x1338] sm:$0xff] }
 0x2b6   : > { %3670 = vmatprep.subr.mxu1 %v3523_v43  ;;  %v1591_v44 = vpop.f32.mrf.mxu0  ;;  %3188 = vmatprep.subr.mxu0 %v2803_v18  ;;  %v1478_v25 = vpop.f32.mrf.mxu1  ;;  %v2794_v43 = vld [vmem:[#allocation7 + $0xc10] sm:$0xff]  ;;  %v3507_v18 = vld [vmem:[#allocation7 + $0xfe8] sm:$0xff] }
 0x2b7   : > { %3671 = vmatpush1.msra.mxu1 %v3522_v2  ;;  %3189 = vmatpush2.msra.mxu0 %v2802_v9  ;;  %v10102_v30 = vadd.f32 %v1591_v44, %v1478_v25  ;;  %v3510_v2 = vld [vmem:[#allocation7 + $0x1000] sm:$0xff]  ;;  %v3635_v9 = vld [vmem:[#allocation7 + $0x13e8] sm:$0xff] }
 0x2b8   : > { %3672 = vmatprep.subr.mxu1 %v3519_v58  ;;  %v10104_v60 = vpop.f32.mrf.mxu0  ;;  %3190 = vmatprep.subr.mxu0 %v2799_v62  ;;  %v10106_v22 = vpop.f32.mrf.mxu1  ;;  %v3506_v25 = vld [vmem:[#allocation7 + $0xfe0] sm:$0xff]  ;;  %v3503_v62 = vld [vmem:[#allocation7 + $0xfc8] sm:$0xff] }
 0x2b9   : > { %12386 = vst [vmem:[#allocation44_spill] sm:$0xff] %v10104_v60  ;;  %3673 = vmatpush1.msra.mxu1 %v3518_v47  ;;  %12387 = vst [vmem:[#allocation45_spill] sm:$0xff] %v10106_v22  ;;  %3191 = vmatpush2.msra.mxu0 %v2798_v23  ;;  %v3634_v47 = vld [vmem:[#allocation7 + $0x13e0] sm:$0xff] }
 0x2ba   : > { %3674 = vmatprep.subr.mxu1 %v3515_v48  ;;  %3192 = vmatprep.subr.mxu0 %v2795_v21  ;;  %v3502_v23 = vld [vmem:[#allocation7 + $0xfc0] sm:$0xff] }
 0x2bb   : > { %3675 = vmatpush1.msra.mxu1 %v3514_v45  ;;  %v1597_v58 = vpop.f32.mrf.mxu0  ;;  %3193 = vmatpush2.msra.mxu0 %v2794_v43  ;;  %v1484_v44 = vpop.f32.mrf.mxu1  ;;  %v3499_v45 = vld [vmem:[#allocation7 + $0xfa8] sm:$0xff] }
 0x2bc   : > { %3676 = vmatprep.subr.mxu1 %v3511_v8  ;;  %3194 = vmatprep.mubr.f32.mxu0 %v9897_v13  ;;  %v10109_v60 = vadd.f32 %v1597_v58, %v1484_v44  ;;  %v3631_v13 = vld [vmem:[#allocation7 + $0x13c8] sm:$0xff]  ;;  %v3498_v8 = vld [vmem:[#allocation7 + $0xfa0] sm:$0xff] }
 0x2bd   : > { %3677 = vmatpush1.msra.mxu1 %v3510_v2  ;;  %v10111_v22 = vpop.f32.mrf.mxu0  ;;  %3195 = vmatmul.mubr.f32.vlgmr.msra.gmra.mxu0 %v9900_v26  ;;  %v10114_v48 = vpop.f32.mrf.mxu1  ;;  %v3630_v26 = vld [vmem:[#allocation7 + $0x13c0] sm:$0xff]  ;;  %v3495_v2 = vld [vmem:[#allocation7 + $0xf88] sm:$0xff] }
 0x2be   : > { %12388 = vst [vmem:[#allocation46_spill] sm:$0xff] %v10111_v22  ;;  %3678 = vmatprep.subr.mxu1 %v3507_v18  ;;  %12389 = vst [vmem:[#allocation47_spill] sm:$0xff] %v10114_v48  ;;  %3791 = vmatprep.subr.mxu0 %v3635_v9  ;;  %v3494_v58 = vld [vmem:[#allocation7 + $0xf80] sm:$0xff]  ;;  %v3627_v9 = vld [vmem:[#allocation7 + $0x13a8] sm:$0xff] }
 0x2bf   : > { %3679 = vmatpush1.msra.mxu1 %v3506_v25  ;;  %3792 = vmatpush1.msra.mxu0 %v3634_v47  ;;  %v3626_v25 = vld [vmem:[#allocation7 + $0x13a0] sm:$0xff]  ;;  %v3487_v44 = vld [vmem:[#allocation7 + $0xf48] sm:$0xff] }
 0x2c0   : > { %3680 = vmatprep.subr.mxu1 %v3503_v62  ;;  %v1603_v21 = vpop.f32.mrf.mxu0  ;;  %3200 = vmatprep.mubr.f32.mxu0 %v9906_v31  ;;  %v1490_v43 = vpop.f32.mrf.mxu1  ;;  %v3491_v31 = vld [vmem:[#allocation7 + $0xf68] sm:$0xff]  ;;  %v10319_v48 = vld [vmem:[#allocation2 + $0x140] sm:$0xff] }
 0x2c1   : > { %3313 = vmatprep.mubr.f32.mxu1 %v12377_v41  ;;  %3681 = vmatpush1.msra.mxu1 %v3502_v23  ;;  %v10119_v18 = vadd.f32 %v1603_v21, %v1490_v43  ;;  %v3483_v47 = vld [vmem:[#allocation7 + $0xf28] sm:$0xff]  ;;  %v3482_v23 = vld [vmem:[#allocation7 + $0xf20] sm:$0xff] }
 0x2c2   : > { %3201 = vmatmul.mubr.f32.gmra.mxu0 %v9921_v53  ;;  %8698 = vmatmul.mubr.msk.f32.gmra.mxu1 %vm782_vm5, %v9926_v28  ;;  %v3490_v53 = vld [vmem:[#allocation7 + $0xf60] sm:$0xff] }
 0x2c3   : > { %3682 = vmatprep.subr.mxu1 %v3499_v45  ;;  %3793 = vmatprep.subr.mxu0 %v3631_v13  ;;  %v3486_v28 = vld [vmem:[#allocation7 + $0xf40] sm:$0xff]  ;;  %v3479_v45 = vld [vmem:[#allocation7 + $0xf08] sm:$0xff] }
 0x2c4   : > { %3683 = vmatpush1.msra.mxu1 %v3498_v8  ;;  %3794 = vmatpush1.msra.mxu0 %v3630_v26  ;;  %v3478_v21 = vld [vmem:[#allocation7 + $0xf00] sm:$0xff]  ;;  %v3599_v26 = vld [vmem:[#allocation7 + $0x12c8] sm:$0xff] }
 0x2c5   : > { %3684 = vmatprep.subr.mxu1 %v3495_v2  ;;  %3206 = vmatprep.mubr.f32.mxu0 %v9931_v6  ;;  %v12390_v6 = vlaneseq  ;;  %v10137_v8 = vld [vmem:[#allocation9] sm:$0xf]  ;;  %v10142_v2 = vpop.f32.mrf.mxu0 }
 0x2c6   : > { %3319 = vmatprep.mubr.f32.mxu1 %v12377_v41  ;;  %3685 = vmatpush1.msra.mxu1 %v3494_v58  ;;  %v3602_v43 = vld [vmem:[#allocation7 + $0x12e0] sm:$0xff]  ;;  %12392 = vst [vmem:[#allocation49_spill] sm:$0xff] %v10142_v2 }
 0x2c7   : > { %3207 = vmatmul.mubr.f32.gmra.mxu0 %v9948_v63  ;;  %8699 = vmatmul.mubr.msk.f32.gmra.mxu1 %vm782_vm5, %v9952_v5  ;;  %v10129_v62 = vshrl.u32 %v12390_v6, 7  ;;  %v3623_v63 = vld [vmem:[#allocation7 + $0x1388] sm:$0xff]  ;;  %v3622_v5 = vld [vmem:[#allocation7 + $0x1380] sm:$0xff] }
 0x2c8   : > { %3686 = vmatprep.subr.mxu1 %v3491_v31  ;;  %3795 = vmatprep.subr.mxu0 %v3627_v9  ;;  %v3595_v31 = vld [vmem:[#allocation7 + $0x12a8] sm:$0xff]  ;;  %v10149_v9 = vpop.f32.mrf.mxu1  ;;  %v10304_v2 = vld [vmem:[#allocation2 + $0x120] sm:$0xff] }
 0x2c9   : > { %3687 = vmatpush1.msra.mxu1 %v3490_v53  ;;  %3796 = vmatpush1.msra.mxu0 %v3626_v25  ;;  %12391 = vst [vmem:[#allocation48_spill] sm:$0xff] %v10129_v62  ;;  %v866_v13 = vsub.s32 0, %v10129_v62  ;;  %12393 = vst [vmem:[#allocation50_spill] sm:$0xff] %v10149_v9  ;;  %v3594_v53 = vld [vmem:[#allocation7 + $0x12a0] sm:$0xff]  ;;  %v2209_v25 = vpop.f32.mrf.mxu0  ;;  %v3620_v9 = vld [vmem:[#allocation7 + $0x1370] sm:$0xff] }
 0x2ca   : > { %3688 = vmatprep.subr.mxu1 %v3487_v44  ;;  %3212 = vmatprep.mubr.f32.mxu0 %v9957_v61  ;;  %v3603_v61 = vld [vmem:[#allocation7 + $0x12e8] sm:$0xff] }
 0x2cb   : > { %3325 = vmatprep.mubr.f32.mxu1 %v12377_v41  ;;  %3689 = vmatpush1.msra.mxu1 %v3486_v28  ;;  %v10147_v58 = vrot.slane %v10137_v8, %v866_v13  ;;  %v3591_v44 = vld [vmem:[#allocation7 + $0x1288] sm:$0xff] }
 0x2cc   : > { %3213 = vmatmul.mubr.f32.gmra.mxu0 %v9971_v52  ;;  %8700 = vmatmul.mubr.msk.f32.gmra.mxu1 %vm782_vm5, %v9976_v34  ;;  %v3619_v52 = vld [vmem:[#allocation7 + $0x1368] sm:$0xff]  ;;  %v3618_v34 = vld [vmem:[#allocation7 + $0x1360] sm:$0xff] }
 0x2cd   : > { %3690 = vmatprep.subr.mxu1 %v3483_v47  ;;  %3797 = vmatprep.subr.mxu0 %v3623_v63  ;;  %v1608_v47 = vadd.f32 %v9878_v40, %v10147_v58  ;;  %v3611_v40 = vld [vmem:[#allocation7 + $0x1328] sm:$0xff] }
 0x2ce   : > { %3691 = vmatpush1.msra.mxu1 %v3482_v23  ;;  %3798 = vmatpush1.msra.mxu0 %v3622_v5  ;;  %v3587_v23 = vld [vmem:[#allocation7 + $0x1268] sm:$0xff] }
 0x2cf   : > { %3692 = vmatprep.subr.mxu1 %v3479_v45  ;;  %3218 = vmatprep.mubr.f32.mxu0 %v9983_v49  ;;  %v3598_v49 = vld [vmem:[#allocation7 + $0x12c0] sm:$0xff]  ;;  %v3583_v13 = vld [vmem:[#allocation7 + $0x1248] sm:$0xff] }
 0x2d0   : > { %3331 = vmatprep.mubr.f32.mxu1 %v12377_v41  ;;  %3693 = vmatpush1.msra.mxu1 %v3478_v21  ;;  %v3610_v21 = vld [vmem:[#allocation7 + $0x1320] sm:$0xff] }
 0x2d1   : > { %3219 = vmatmul.mubr.f32.gmra.mxu0 %v9994_v20  ;;  %8701 = vmatmul.mubr.msk.f32.gmra.mxu1 %vm782_vm5, %v10000_v10  ;;  %v3615_v20 = vld [vmem:[#allocation7 + $0x1348] sm:$0xff]  ;;  %v3614_v10 = vld [vmem:[#allocation7 + $0x1340] sm:$0xff] }
 0x2d2   : > { %3694 = vmatprep.subr.mxu1 %v3603_v61  ;;  %3799 = vmatprep.subr.mxu0 %v3619_v52  ;;  %v1612_v52 = vadd.f32 %v9887_v35, %v10147_v58  ;;  %v3607_v35 = vld [vmem:[#allocation7 + $0x1308] sm:$0xff] }
 0x2d3   : > { %3695 = vmatpush2.msra.mxu1 %v3602_v43  ;;  %3800 = vmatpush1.msra.mxu0 %v3618_v34  ;;  %v3582_v34 = vld [vmem:[#allocation7 + $0x1240] sm:$0xff] }
 0x2d4   : > { %3696 = vmatprep.subr.mxu1 %v3599_v26  ;;  %3224 = vmatprep.mubr.f32.mxu0 %v10013_v12  ;;  %v3590_v12 = vld [vmem:[#allocation7 + $0x1280] sm:$0xff] }
 0x2d5   : > { %3337 = vmatprep.mubr.f32.mxu1 %v12377_v41  ;;  %3697 = vmatpush2.msra.mxu1 %v3598_v49 }
 0x2d6   : > { %3225 = vmatmul.mubr.f32.gmra.mxu0 %v10020_v24  ;;  %v2096_v28 = vpop.f32.mrf.mxu1  ;;  %8702 = vmatmul.mubr.msk.f32.gmra.mxu1 %vm782_vm5, %v10029_v50  ;;  %v10160_v24 = vpop.f32.mrf.mxu0  ;;  %v3586_v50 = vld [vmem:[#allocation7 + $0x1260] sm:$0xff] }
 0x2d7   : > { %3698 = vmatprep.subr.mxu1 %v3595_v31  ;;  %v2210_v6 = vadd.f32 %v2209_v25, %v2096_v28  ;;  %3801 = vmatprep.subr.mxu0 %v3615_v20  ;;  %12395 = vst [vmem:[#allocation52_spill] sm:$0xff] %v10160_v24  ;;  %v3606_v25 = vld [vmem:[#allocation7 + $0x1300] sm:$0xff]  ;;  %v3629_v24 = vld [vmem:[#allocation7 + $0x13b8] sm:$0xff] }
 0x2d8   : > { %3699 = vmatpush2.msra.mxu1 %v3594_v53  ;;  %v10158_v63 = vpop.f32.mrf.mxu1  ;;  %3802 = vmatpush1.msra.mxu0 %v3614_v10  ;;  %v1616_v53 = vadd.f32 %v9903_v33, %v10147_v58  ;;  %v3575_v10 = vld [vmem:[#allocation7 + $0x1208] sm:$0xff] }
 0x2d9   : > { %12394 = vst [vmem:[#allocation51_spill] sm:$0xff] %v10158_v63  ;;  %3700 = vmatprep.subr.mxu1 %v3591_v44  ;;  %v10162_v5 = vadd.f32 %v2210_v6, %v1608_v47  ;;  %3230 = vmatprep.mubr.f32.mxu0 %v10042_v57  ;;  %v3541_v6 = vld [vmem:[#allocation7 + $0x10f8] sm:$0xff]  ;;  %v10287_v63 = vld [vmem:[#allocation2 + $0x100] sm:$0xff] }
 0x2da   : > { %3343 = vmatprep.mubr.f32.mxu1 %v12377_v41  ;;  %v2102_v45 = vpop.f32.mrf.mxu1  ;;  %3701 = vmatpush2.msra.mxu1 %v3590_v12  ;;  %v2215_v61 = vpop.f32.mrf.mxu0  ;;  %v3571_v12 = vld [vmem:[#allocation7 + $0x11e8] sm:$0xff] }
 0x2db   : > { %3231 = vmatmul.mubr.f32.gmra.mxu0 %v10047_v27  ;;  %8703 = vmatmul.mubr.msk.f32.gmra.mxu1 %vm782_vm5, %v10053_v38  ;;  %v2216_v43 = vadd.f32 %v2215_v61, %v2102_v45  ;;  %v3579_v27 = vld [vmem:[#allocation7 + $0x1228] sm:$0xff]  ;;  %v3578_v38 = vld [vmem:[#allocation7 + $0x1220] sm:$0xff]  ;;  %v3540_v45 = vld [vmem:[#allocation7 + $0x10f0] sm:$0xff] }
 0x2dc   : > { %3702 = vmatprep.subr.mxu1 %v3587_v23  ;;  %v10171_v57 = vpop.f32.mrf.mxu1  ;;  %3803 = vmatprep.subr.mxu0 %v3611_v40  ;;  %v10173_v26 = vpop.f32.mrf.mxu0  ;;  %v3570_v40 = vld [vmem:[#allocation7 + $0x11e0] sm:$0xff] }
 0x2dd   : > { %12396 = vst [vmem:[#allocation53_spill] sm:$0xff] %v10171_v57  ;;  %3703 = vmatpush2.msra.mxu1 %v3586_v50  ;;  %12397 = vst [vmem:[#allocation54_spill] sm:$0xff] %v10173_v26  ;;  %3804 = vmatpush1.msra.mxu0 %v3610_v21  ;;  %v10175_v49 = vadd.f32 %v2216_v43, %v1612_v52  ;;  %v3567_v21 = vld [vmem:[#allocation7 + $0x11c8] sm:$0xff]  ;;  %v3537_v52 = vld [vmem:[#allocation7 + $0x10d8] sm:$0xff]  ;;  %v874_v26 = vsub.s32 2, %v10129_v62 }
 0x2de   : > { %3704 = vmatprep.subr.mxu1 %v3583_v13  ;;  %v2108_v31 = vpop.f32.mrf.mxu1  ;;  %3236 = vmatprep.mubr.f32.mxu0 %v10062_v36  ;;  %v3574_v36 = vld [vmem:[#allocation7 + $0x1200] sm:$0xff]  ;;  %v10282_v57 = vld [vmem:[#allocation2 + $0xf8] sm:$0xff] }
 0x2df   : > { %3349 = vmatprep.mubr.f32.mxu1 %v12377_v41  ;;  %v2221_v20 = vpop.f32.mrf.mxu0  ;;  %3705 = vmatpush2.msra.mxu1 %v3582_v34  ;;  %v3566_v43 = vld [vmem:[#allocation7 + $0x11c0] sm:$0xff] }
 0x2e0   : > { %3237 = vmatmul.mubr.f32.gmra.mxu0 %v10069_v17  ;;  %v2222_v44 = vadd.f32 %v2221_v20, %v2108_v31  ;;  %v10182_v28 = vpop.f32.mrf.mxu1  ;;  %8704 = vmatmul.mubr.msk.f32.gmra.mxu1 %vm782_vm5, %v10075_v1  ;;  %v10190_v17 = vld [vmem:[#allocation2 + $0x58] sm:$0xff]  ;;  %v1620_v1 = vadd.f32 %v9935_v55, %v10147_v58  ;;  %v3563_v55 = vld [vmem:[#allocation7 + $0x11a8] sm:$0xff]  ;;  %v3562_v20 = vld [vmem:[#allocation7 + $0x11a0] sm:$0xff] }
 0x2e1   : > { %12398 = vst [vmem:[#allocation55_spill] sm:$0xff] %v10182_v28  ;;  %3706 = vmatprep.subr.mxu1 %v3579_v27  ;;  %v10186_v47 = vpop.f32.mrf.mxu0  ;;  %3805 = vmatprep.subr.mxu0 %v3607_v35  ;;  %v3536_v27 = vld [vmem:[#allocation7 + $0x10d0] sm:$0xff] }
 0x2e2   : > { %12399 = vst [vmem:[#allocation56_spill] sm:$0xff] %v10186_v47  ;;  %3707 = vmatpush2.msra.mxu1 %v3578_v38  ;;  %v10188_v33 = vadd.f32 %v2222_v44, %v1616_v53  ;;  %v2114_v23 = vpop.f32.mrf.mxu1  ;;  %3806 = vmatpush1.msra.mxu0 %v3606_v25  ;;  %v3533_v38 = vld [vmem:[#allocation7 + $0x10b8] sm:$0xff]  ;;  %v1624_v25 = vadd.f32 %v9963_v37, %v10147_v58  ;;  %v3559_v44 = vld [vmem:[#allocation7 + $0x1188] sm:$0xff]  ;;  %v3632_v28 = vld [vmem:[#allocation7 + $0x13d0] sm:$0xff] }
 0x2e3   : > { %3708 = vmatprep.subr.mxu1 %v3575_v10  ;;  %v2227_v50 = vpop.f32.mrf.mxu0  ;;  %3839 = vmatprep.mubr.f32.mxu0 %v12377_v41  ;;  %v3532_v10 = vld [vmem:[#allocation7 + $0x10b0] sm:$0xff]  ;;  %v3525_v37 = vld [vmem:[#allocation7 + $0x1078] sm:$0xff] }
 0x2e4   : > { %3709 = vmatpush2.msra.mxu1 %v3574_v36  ;;  %v2228_v13 = vadd.f32 %v2227_v50, %v2114_v23  ;;  %v10195_v61 = vpop.f32.mrf.mxu1  ;;  %3888 = vmatprep.subr.mxu0 %v3541_v6  ;;  %v3558_v23 = vld [vmem:[#allocation7 + $0x1180] sm:$0xff]  ;;  %v3528_v50 = vld [vmem:[#allocation7 + $0x1090] sm:$0xff]  ;;  %v3633_v47 = vld [vmem:[#allocation7 + $0x13d8] sm:$0xff] }
 0x2e5   : > { %12400 = vst [vmem:[#allocation57_spill] sm:$0xff] %v10195_v61  ;;  %3710 = vmatprep.subr.mxu1 %v3571_v12  ;;  %v10197_v34 = vpop.f32.mrf.mxu0  ;;  %8705 = vmatmul.mubr.msk.f32.vlgmr.msra.gmra.mxu0 %vm782_vm5, %v10190_v17  ;;  %v3529_v12 = vld [vmem:[#allocation7 + $0x1098] sm:$0xff]  ;;  %v10275_v61 = vld [vmem:[#allocation2 + $0xe8] sm:$0xff] }
 0x2e6   : > { %12401 = vst [vmem:[#allocation58_spill] sm:$0xff] %v10197_v34  ;;  %3711 = vmatpush2.msra.mxu1 %v3570_v40  ;;  %v10201_v31 = vadd.f32 %v2228_v13, %v1620_v1  ;;  %v2120_v35 = vpop.f32.mrf.mxu1  ;;  %3889 = vmatpush1.msra.mxu0 %v3540_v45  ;;  %v3555_v1 = vld [vmem:[#allocation7 + $0x1168] sm:$0xff]  ;;  %v3524_v13 = vld [vmem:[#allocation7 + $0x1070] sm:$0xff] }
 0x2e7   : > { %3712 = vmatprep.subr.mxu1 %v3567_v21  ;;  %v2233_v53 = vpop.f32.mrf.mxu0  ;;  %3890 = vmatprep.subr.mxu0 %v3537_v52  ;;  %v3554_v21 = vld [vmem:[#allocation7 + $0x1160] sm:$0xff]  ;;  %v3551_v52 = vld [vmem:[#allocation7 + $0x1148] sm:$0xff]  ;;  %v10249_v34 = vld [vmem:[#allocation2 + $0x90] sm:$0xff] }
 0x2e8   : > { %3713 = vmatpush2.msra.mxu1 %v3566_v43  ;;  %v2234_v36 = vadd.f32 %v2233_v53, %v2120_v35  ;;  %v10205_v6 = vpop.f32.mrf.mxu1  ;;  %3891 = vmatpush1.msra.mxu0 %v3536_v27  ;;  %v3521_v27 = vld [vmem:[#allocation7 + $0x1058] sm:$0xff]  ;;  %v3547_v53 = vld [vmem:[#allocation7 + $0x1128] sm:$0xff] }
 0x2e9   : > { %12402 = vst [vmem:[#allocation59_spill] sm:$0xff] %v10205_v6  ;;  %3714 = vmatprep.subr.mxu1 %v3563_v55  ;;  %v10207_v40 = vpop.f32.mrf.mxu0  ;;  %3892 = vmatprep.subr.mxu0 %v3533_v38  ;;  %v3550_v55 = vld [vmem:[#allocation7 + $0x1140] sm:$0xff]  ;;  %v1628_v38 = vadd.f32 %v9989_v3, %v10147_v58  ;;  %v3513_v3 = vld [vmem:[#allocation7 + $0x1018] sm:$0xff]  ;;  %v3496_v6 = vld [vmem:[#allocation7 + $0xf90] sm:$0xff] }
 0x2ea   : > { %12403 = vst [vmem:[#allocation60_spill] sm:$0xff] %v10207_v40  ;;  %3715 = vmatpush2.msra.mxu1 %v3562_v20  ;;  %v10209_v45 = vadd.f32 %v2234_v36, %v1624_v25  ;;  %3893 = vmatpush1.msra.mxu0 %v3532_v10  ;;  %v3520_v20 = vld [vmem:[#allocation7 + $0x1050] sm:$0xff]  ;;  %v3546_v36 = vld [vmem:[#allocation7 + $0x1120] sm:$0xff] }
 0x2eb   : > { %3716 = vmatprep.subr.mxu1 %v3559_v44  ;;  %3894 = vmatprep.subr.mxu0 %v3529_v12  ;;  %v3517_v44 = vld [vmem:[#allocation7 + $0x1038] sm:$0xff] }
 0x2ec   : > { %3717 = vmatpush2.msra.mxu1 %v3558_v23  ;;  %v2126_v43 = vpop.f32.mrf.mxu1  ;;  %3895 = vmatpush1.msra.mxu0 %v3528_v50  ;;  %v2239_v35 = vpop.f32.mrf.mxu0  ;;  %v3516_v23 = vld [vmem:[#allocation7 + $0x1030] sm:$0xff]  ;;  %v3543_v50 = vld [vmem:[#allocation7 + $0x1108] sm:$0xff] }
 0x2ed   : > { %3718 = vmatprep.subr.mxu1 %v3555_v1  ;;  %3896 = vmatprep.subr.mxu0 %v3525_v37  ;;  %v2240_v25 = vadd.f32 %v2239_v35, %v2126_v43  ;;  %v3542_v37 = vld [vmem:[#allocation7 + $0x1100] sm:$0xff]  ;;  %v10219_v43 = vld [vmem:[#allocation2 + $0x50] sm:$0xff]  ;;  %v10221_v35 = vld [vmem:[#allocation2 + $0x48] sm:$0xff] }
 0x2ee   : > { %3719 = vmatpush2.msra.mxu1 %v3554_v21  ;;  %v10213_v10 = vpop.f32.mrf.mxu1  ;;  %3897 = vmatpush1.msra.mxu0 %v3524_v13  ;;  %v10215_v12 = vpop.f32.mrf.mxu0  ;;  %v3512_v21 = vld [vmem:[#allocation7 + $0x1010] sm:$0xff] }
 0x2ef   : > { %12404 = vst [vmem:[#allocation61_spill] sm:$0xff] %v10213_v10  ;;  %3720 = vmatprep.subr.mxu1 %v3551_v52  ;;  %12405 = vst [vmem:[#allocation62_spill] sm:$0xff] %v10215_v12  ;;  %3898 = vmatprep.subr.mxu0 %v3521_v27  ;;  %v10217_v1 = vadd.f32 %v2240_v25, %v1628_v38  ;;  %v3509_v52 = vld [vmem:[#allocation7 + $0xff8] sm:$0xff]  ;;  %v3508_v38 = vld [vmem:[#allocation7 + $0xff0] sm:$0xff] }
 0x2f0   : > { %3721 = vmatpush2.msra.mxu1 %v3550_v55  ;;  %3899 = vmatpush1.msra.mxu0 %v3520_v20  ;;  %v1632_v55 = vadd.f32 %v10006_v14, %v10147_v58  ;;  %v10225_v20 = vld [vmem:[#allocation2 + $0x68] sm:$0xff] }
 0x2f1   : > { %3722 = vmatprep.subr.mxu1 %v3547_v53  ;;  %3900 = vmatprep.subr.mxu0 %v3517_v44  ;;  %v3505_v44 = vld [vmem:[#allocation7 + $0xfd8] sm:$0xff] }
 0x2f2   : > { %3723 = vmatpush2.msra.mxu1 %v3546_v36  ;;  %v2132_v13 = vpop.f32.mrf.mxu1  ;;  %3901 = vmatpush1.msra.mxu0 %v3516_v23  ;;  %v2245_v27 = vpop.f32.mrf.mxu0  ;;  %v3504_v23 = vld [vmem:[#allocation7 + $0xfd0] sm:$0xff] }
 0x2f3   : > { %3724 = vmatprep.subr.mxu1 %v3543_v50  ;;  %3902 = vmatprep.subr.mxu0 %v3513_v3  ;;  %v2246_v53 = vadd.f32 %v2245_v27, %v2132_v13  ;;  %v3637_v50 = vld [vmem:[#allocation7 + $0x13f8] sm:$0xff]  ;;  %v3500_v27 = vld [vmem:[#allocation7 + $0xfb0] sm:$0xff] }
 0x2f4   : > { %3725 = vmatpush2.msra.mxu1 %v3542_v37  ;;  %v10227_v25 = vpop.f32.mrf.mxu1  ;;  %3903 = vmatpush1.msra.mxu0 %v3512_v21  ;;  %v10230_v36 = vpop.f32.mrf.mxu0  ;;  %v3501_v3 = vld [vmem:[#allocation7 + $0xfb8] sm:$0xff]  ;;  %v10236_v37 = vld [vmem:[#allocation2 + $0x60] sm:$0xff]  ;;  %v10239_v21 = vld [vmem:[#allocation2 + $0x70] sm:$0xff] }
 0x2f5   : > { %12406 = vst [vmem:[#allocation63_spill] sm:$0xff] %v10227_v25  ;;  %3726 = vmatprep.mubr.f32.mxu1 %v10219_v43  ;;  %12407 = vst [vmem:[#allocation64_spill] sm:$0xff] %v10230_v36  ;;  %3904 = vmatprep.subr.mxu0 %v3509_v52  ;;  %v10233_v14 = vadd.f32 %v2246_v53, %v1632_v55  ;;  %v10241_v13 = vld [vmem:[#allocation2 + $0x98] sm:$0xff]  ;;  %v1636_v55 = vadd.f32 %v10031_v7, %v10147_v58  ;;  %v3636_v53 = vld [vmem:[#allocation7 + $0x13f0] sm:$0xff] }
 0x2f6   : > { %3727 = vmatmul.mubr.f32.vlgmr.msra.gmra.mxu1 %v10221_v35  ;;  %3905 = vmatpush1.msra.mxu0 %v3508_v38  ;;  %v3497_v38 = vld [vmem:[#allocation7 + $0xf98] sm:$0xff]  ;;  %v3492_v58 = vld [vmem:[#allocation7 + $0xf70] sm:$0xff]  ;;  %v10290_v36 = vrot.slane %v10137_v8, %v874_v26  ;;  %v10300_v26 = vld [vmem:[#allocation2 + $0x128] sm:$0xff] }
 0x2f7   : > { %3732 = vmatprep.mubr.f32.mxu1 %v10225_v20  ;;  %3906 = vmatprep.subr.mxu0 %v3505_v44  ;;  %v3592_v8 = vld [vmem:[#allocation7 + $0x1290] sm:$0xff] }
 0x2f8   : > { %3845 = vmatprep.mubr.f32.mxu0 %v12377_v41  ;;  %v2138_v52 = vpop.f32.mrf.mxu1  ;;  %3907 = vmatpush1.msra.mxu0 %v3504_v23  ;;  %v2251_v40 = vpop.f32.mrf.mxu0  ;;  %v3493_v23 = vld [vmem:[#allocation7 + $0xf78] sm:$0xff] }
 0x2f9   : > { %4017 = vmatprep.subr.mxu1 %v3637_v50  ;;  %3908 = vmatprep.subr.mxu0 %v3501_v3  ;;  %v2252_v44 = vadd.f32 %v2251_v40, %v2138_v52  ;;  %v10252_v50 = vld [vmem:[#allocation2 + $0xa0] sm:$0xff]  ;;  %v10256_v3 = vld [vmem:[#allocation2 + $0xb0] sm:$0xff]  ;;  %v3489_v40 = vld [vmem:[#allocation7 + $0xf58] sm:$0xff] }
 0x2fa   : > { %3733 = vmatmul.mubr.f32.gmra.mxu1 %v10236_v37  ;;  %8706 = vmatmul.mubr.msk.f32.gmra.mxu0 %vm782_vm5, %v10239_v21  ;;  %v3488_v52 = vld [vmem:[#allocation7 + $0xf50] sm:$0xff]  ;;  %v10293_v25 = vpop.f32.mrf.mxu1 }
 0x2fb   : > { %3738 = vmatprep.mubr.f32.mxu1 %v10241_v13  ;;  %3909 = vmatpush1.msra.mxu0 %v3500_v27  ;;  %v10254_v7 = vadd.f32 %v2252_v44, %v1636_v55  ;;  %v10261_v27 = vld [vmem:[#allocation2 + $0xa8] sm:$0xff]  ;;  %v3485_v55 = vld [vmem:[#allocation7 + $0xf38] sm:$0xff]  ;;  %12408 = vst [vmem:[#allocation65_spill] sm:$0xff] %v10293_v25 }
 0x2fc   : > { %3851 = vmatprep.mubr.f32.mxu0 %v12377_v41  ;;  %3910 = vmatprep.subr.mxu0 %v3497_v38  ;;  %v10264_v38 = vld [vmem:[#allocation2 + $0xb8] sm:$0xff] }
 0x2fd   : > { %4018 = vmatpush1.msra.mxu1 %v3636_v53  ;;  %3911 = vmatpush1.msra.mxu0 %v3496_v6  ;;  %v3484_v6 = vld [vmem:[#allocation7 + $0xf30] sm:$0xff]  ;;  %v10267_v53 = vld [vmem:[#allocation2 + $0xe0] sm:$0xff]  ;;  %v3481_v44 = vld [vmem:[#allocation7 + $0xf18] sm:$0xff] }
 0x2fe   : > { %3739 = vmatmul.mubr.f32.gmra.mxu1 %v10249_v34  ;;  %3912 = vmatprep.subr.mxu0 %v3493_v23  ;;  %v3480_v23 = vld [vmem:[#allocation7 + $0xf10] sm:$0xff]  ;;  %v2435_v12 = vpop.f32.mrf.mxu1  ;;  %v3621_v25 = vld [vmem:[#allocation7 + $0x1378] sm:$0xff] }
 0x2ff   : > { %8707 = vmatmul.mubr.msk.f32.gmra.mxu0 %vm782_vm5, %v10252_v50  ;;  %3744 = vmatprep.mubr.f32.mxu1 %v10256_v3 }
 0x300   : > { %3913 = vmatpush1.msra.mxu0 %v3492_v58  ;;  %3857 = vmatprep.mubr.f32.mxu0 %v12377_v41  ;;  %v10272_v58 = vld [vmem:[#allocation2 + $0xd8] sm:$0xff] }
 0x301   : > { %3914 = vmatprep.subr.mxu0 %v3489_v40  ;;  %v3605_v40 = vld [vmem:[#allocation7 + $0x12f8] sm:$0xff]  ;;  %4019 = vmatprep.subr.mxu1 %v3633_v47 }
 0x302   : > { %3915 = vmatpush1.msra.mxu0 %v3488_v52  ;;  %3745 = vmatmul.mubr.f32.gmra.mxu1 %v10261_v27  ;;  %v3604_v52 = vld [vmem:[#allocation7 + $0x12f0] sm:$0xff]  ;;  %v3625_v47 = vld [vmem:[#allocation7 + $0x1398] sm:$0xff] }
 0x303   : > { %3916 = vmatprep.subr.mxu0 %v3485_v55  ;;  %8708 = vmatmul.mubr.msk.f32.gmra.mxu0 %vm782_vm5, %v10264_v38  ;;  %v3601_v55 = vld [vmem:[#allocation7 + $0x12d8] sm:$0xff] }
 0x304   : > { %3917 = vmatpush1.msra.mxu0 %v3484_v6  ;;  %3750 = vmatprep.mubr.f32.mxu1 %v10267_v53  ;;  %v3600_v6 = vld [vmem:[#allocation7 + $0x12d0] sm:$0xff] }
 0x305   : > { %3918 = vmatprep.subr.mxu0 %v3481_v44  ;;  %3863 = vmatprep.mubr.f32.mxu0 %v12377_v41  ;;  %v3597_v44 = vld [vmem:[#allocation7 + $0x12b8] sm:$0xff] }
 0x306   : > { %3919 = vmatpush1.msra.mxu0 %v3480_v23  ;;  %3751 = vmatmul.mubr.f32.gmra.mxu1 %v10272_v58  ;;  %v10284_v23 = vld [vmem:[#allocation2 + $0xf0] sm:$0xff] }
 0x307   : > { %3920 = vmatprep.subr.mxu0 %v3605_v40  ;;  %8709 = vmatmul.mubr.msk.f32.gmra.mxu0 %vm782_vm5, %v10275_v61  ;;  %v3628_v40 = vld [vmem:[#allocation7 + $0x13b0] sm:$0xff] }
 0x308   : > { %3921 = vmatpush2.msra.mxu0 %v3604_v52  ;;  %4020 = vmatpush1.msra.mxu1 %v3632_v28  ;;  %v3596_v52 = vld [vmem:[#allocation7 + $0x12b0] sm:$0xff]  ;;  %v3593_v28 = vld [vmem:[#allocation7 + $0x1298] sm:$0xff] }
 0x309   : > { %3922 = vmatprep.subr.mxu0 %v3601_v55  ;;  %3756 = vmatprep.mubr.f32.mxu1 %v10282_v57  ;;  %v3624_v55 = vld [vmem:[#allocation7 + $0x1390] sm:$0xff] }
 0x30a   : > { %3923 = vmatpush2.msra.mxu0 %v3600_v6  ;;  %3869 = vmatprep.mubr.f32.mxu0 %v12377_v41  ;;  %v10296_v6 = vpop.f32.mrf.mxu0 }
 0x30b   : > { %3924 = vmatprep.subr.mxu0 %v3597_v44  ;;  %4021 = vmatprep.subr.mxu1 %v3629_v24  ;;  %12409 = vst [vmem:[#allocation66_spill] sm:$0xff] %v10296_v6  ;;  %v3589_v44 = vld [vmem:[#allocation7 + $0x1278] sm:$0xff]  ;;  %v1610_v24 = vadd.f32 %v10044_v0, %v10290_v36 }
 0x30c   : > { %3757 = vmatmul.mubr.f32.gmra.mxu1 %v10284_v23  ;;  %8710 = vmatmul.mubr.msk.f32.gmra.mxu0 %vm782_vm5, %v10287_v63 }
 0x30d   : > { %4022 = vmatpush1.msra.mxu1 %v3628_v40  ;;  %3925 = vmatpush2.msra.mxu0 %v3596_v52  ;;  %v2322_v10 = vpop.f32.mrf.mxu0  ;;  %v10307_v40 = vld [vmem:[#allocation2 + $0x130] sm:$0xff] }
 0x30e   : > { %4023 = vmatprep.subr.mxu1 %v3625_v47  ;;  %3926 = vmatprep.subr.mxu0 %v3593_v28  ;;  %v2436_v6 = vadd.f32 %v2435_v12, %v2322_v10  ;;  %v3588_v52 = vld [vmem:[#allocation7 + $0x1270] sm:$0xff]  ;;  %v3617_v47 = vld [vmem:[#allocation7 + $0x1358] sm:$0xff]  ;;  %v10314_v28 = vpop.f32.mrf.mxu1 }
 0x30f   : > { %4024 = vmatpush1.msra.mxu1 %v3624_v55  ;;  %3927 = vmatpush2.msra.mxu0 %v3592_v8  ;;  %v10309_v22 = vpop.f32.mrf.mxu0  ;;  %12410 = vst [vmem:[#allocation67_spill] sm:$0xff] %v10314_v28  ;;  %v3585_v10 = vld [vmem:[#allocation7 + $0x1258] sm:$0xff]  ;;  %v3616_v12 = vld [vmem:[#allocation7 + $0x1350] sm:$0xff] }
 0x310   : > { %3762 = vmatprep.mubr.f32.mxu1 %v10300_v26  ;;  %3875 = vmatprep.mubr.f32.mxu0 %v12377_v41  ;;  %v10312_v0 = vadd.f32 %v2436_v6, %v1610_v24  ;;  %v3584_v8 = vld [vmem:[#allocation7 + $0x1250] sm:$0xff]  ;;  %v1614_v6 = vadd.f32 %v10064_v56, %v10290_v36  ;;  %v3581_v24 = vld [vmem:[#allocation7 + $0x1238] sm:$0xff] }
 0x311   : > { %3928 = vmatprep.subr.mxu0 %v3589_v44  ;;  %4025 = vmatprep.subr.mxu1 %v3621_v25 }
 0x312   : > { %3763 = vmatmul.mubr.f32.gmra.mxu1 %v10304_v2  ;;  %v2328_v55 = vpop.f32.mrf.mxu0  ;;  %8711 = vmatmul.mubr.msk.f32.gmra.mxu0 %vm782_vm5, %v10307_v40  ;;  %v2441_v44 = vpop.f32.mrf.mxu1 }
 0x313   : > { %4026 = vmatpush1.msra.mxu1 %v3620_v9  ;;  %3929 = vmatpush2.msra.mxu0 %v3588_v52  ;;  %v2442_v25 = vadd.f32 %v2441_v44, %v2328_v55  ;;  %v10330_v9 = vld [vmem:[#allocation2 + $0x148] sm:$0xff]  ;;  %v3580_v52 = vld [vmem:[#allocation7 + $0x1230] sm:$0xff] }
 0x314   : > { %4027 = vmatprep.subr.mxu1 %v3617_v47  ;;  %v10323_v32 = vpop.f32.mrf.mxu0  ;;  %3930 = vmatprep.subr.mxu0 %v3585_v10  ;;  %v10327_v51 = vpop.f32.mrf.mxu1  ;;  %v3609_v47 = vld [vmem:[#allocation7 + $0x1318] sm:$0xff]  ;;  %v3608_v55 = vld [vmem:[#allocation7 + $0x1310] sm:$0xff] }
 0x315   : > { %12411 = vst [vmem:[#allocation68_spill] sm:$0xff] %v10323_v32  ;;  %4028 = vmatpush1.msra.mxu1 %v3616_v12  ;;  %12412 = vst [vmem:[#allocation69_spill] sm:$0xff] %v10327_v51  ;;  %3931 = vmatpush2.msra.mxu0 %v3584_v8  ;;  %v10332_v56 = vadd.f32 %v2442_v25, %v1614_v6  ;;  %v3577_v12 = vld [vmem:[#allocation7 + $0x1218] sm:$0xff]  ;;  %v1618_v8 = vadd.f32 %v10081_v29, %v10290_v36  ;;  %v3576_v6 = vld [vmem:[#allocation7 + $0x1210] sm:$0xff] }
 0x316   : > { %3768 = vmatprep.mubr.f32.mxu1 %v10319_v48  ;;  %3881 = vmatprep.mubr.f32.mxu0 %v12377_v41  ;;  %v4419_v29 = vld [vmem:[#allocation7 + $0x15e0] sm:$0xff] }
 0x317   : > { %3932 = vmatprep.subr.mxu0 %v3581_v24  ;;  %v2334_v10 = vpop.f32.mrf.mxu0  ;;  %4029 = vmatprep.subr.mxu1 %v3613_v39  ;;  %v2447_v44 = vpop.f32.mrf.mxu1  ;;  %v3573_v24 = vld [vmem:[#allocation7 + $0x11f8] sm:$0xff]  ;;  %v4420_v39 = vld [vmem:[#allocation7 + $0x15e8] sm:$0xff] }
 0x318   : > { %3769 = vmatmul.mubr.f32.gmra.mxu1 %v10325_v16  ;;  %8712 = vmatmul.mubr.msk.f32.gmra.mxu0 %vm782_vm5, %v10330_v9  ;;  %v2448_v25 = vadd.f32 %v2447_v44, %v2334_v10  ;;  %v4416_v10 = vld [vmem:[#allocation7 + $0x15c8] sm:$0xff]  ;;  %v1622_v44 = vadd.f32 %v10090_v11, %v10290_v36 }
 0x319   : > { %4030 = vmatpush1.msra.mxu1 %v3612_v59  ;;  %v10340_v51 = vpop.f32.mrf.mxu0  ;;  %3933 = vmatpush2.msra.mxu0 %v3580_v52  ;;  %v10342_v32 = vpop.f32.mrf.mxu1  ;;  %v3569_v59 = vld [vmem:[#allocation7 + $0x11d8] sm:$0xff]  ;;  %v3568_v52 = vld [vmem:[#allocation7 + $0x11d0] sm:$0xff] }
 0x31a   : > { %12413 = vst [vmem:[#allocation70_spill] sm:$0xff] %v10340_v51  ;;  %4031 = vmatprep.subr.mxu1 %v3609_v47  ;;  %12414 = vst [vmem:[#allocation71_spill] sm:$0xff] %v10342_v32  ;;  %3934 = vmatprep.subr.mxu0 %v3577_v12  ;;  %v10344_v19 = vadd.f32 %v2448_v25, %v1618_v8  ;;  %v4415_v12 = vld [vmem:[#allocation7 + $0x15c0] sm:$0xff]  ;;  %v4412_v25 = vld [vmem:[#allocation7 + $0x15a8] sm:$0xff] }
 0x31b   : > { %4032 = vmatpush1.msra.mxu1 %v3608_v55  ;;  %3935 = vmatpush2.msra.mxu0 %v3576_v6  ;;  %v3565_v55 = vld [vmem:[#allocation7 + $0x11b8] sm:$0xff]  ;;  %v4411_v32 = vld [vmem:[#allocation7 + $0x15a0] sm:$0xff] }
 0x31c   : > { %4065 = vmatprep.mubr.f32.mxu1 %v12377_v41  ;;  %v2340_v46 = vpop.f32.mrf.mxu0  ;;  %3936 = vmatprep.subr.mxu0 %v3573_v24  ;;  %v2453_v47 = vpop.f32.mrf.mxu1  ;;  %v3564_v24 = vld [vmem:[#allocation7 + $0x11b0] sm:$0xff]  ;;  %v3561_v51 = vld [vmem:[#allocation7 + $0x1198] sm:$0xff] }
 0x31d   : > { %4535 = vmatprep.subr.mxu1 %v4420_v39  ;;  %3937 = vmatpush2.msra.mxu0 %v3572_v42  ;;  %v2454_v8 = vadd.f32 %v2453_v47, %v2340_v46  ;;  %v4408_v42 = vld [vmem:[#allocation7 + $0x1588] sm:$0xff]  ;;  %v4407_v46 = vld [vmem:[#allocation7 + $0x1580] sm:$0xff]  ;;  %v1626_v47 = vadd.f32 %v10096_v54, %v10290_v36  ;;  %v3549_v54 = vld [vmem:[#allocation7 + $0x1138] sm:$0xff] }
 0x31e   : > { %8713 = vmatmul.mubr.msk.f32.vlgmr.msra.gmra.mxu1 %vm782_vm5, %v10190_v17  ;;  %v10351_v6 = vpop.f32.mrf.mxu0  ;;  %3938 = vmatprep.subr.mxu0 %v3569_v59  ;;  %v10353_v39 = vpop.f32.mrf.mxu1  ;;  %v3560_v17 = vld [vmem:[#allocation7 + $0x1190] sm:$0xff] }
 0x31f   : > { %12415 = vst [vmem:[#allocation72_spill] sm:$0xff] %v10351_v6  ;;  %4536 = vmatpush1.msra.mxu1 %v4419_v29  ;;  %12416 = vst [vmem:[#allocation73_spill] sm:$0xff] %v10353_v39  ;;  %3939 = vmatpush2.msra.mxu0 %v3568_v52  ;;  %v10355_v11 = vadd.f32 %v2454_v8, %v1622_v44  ;;  %v3557_v29 = vld [vmem:[#allocation7 + $0x1178] sm:$0xff]  ;;  %v3556_v52 = vld [vmem:[#allocation7 + $0x1170] sm:$0xff] }
 0x320   : > { %4537 = vmatprep.subr.mxu1 %v4416_v10  ;;  %3940 = vmatprep.subr.mxu0 %v3565_v55  ;;  %v4404_v10 = vld [vmem:[#allocation7 + $0x1568] sm:$0xff]  ;;  %v3553_v55 = vld [vmem:[#allocation7 + $0x1158] sm:$0xff] }
 0x321   : > { %4538 = vmatpush1.msra.mxu1 %v4415_v12  ;;  %v2346_v28 = vpop.f32.mrf.mxu0  ;;  %3941 = vmatpush2.msra.mxu0 %v3564_v24  ;;  %v2459_v59 = vpop.f32.mrf.mxu1  ;;  %v4403_v12 = vld [vmem:[#allocation7 + $0x1560] sm:$0xff]  ;;  %v3552_v24 = vld [vmem:[#allocation7 + $0x1150] sm:$0xff] }
 0x322   : > { %4539 = vmatprep.subr.mxu1 %v4412_v25  ;;  %3942 = vmatprep.subr.mxu0 %v3561_v51  ;;  %v2460_v39 = vadd.f32 %v2459_v59, %v2346_v28  ;;  %v4400_v25 = vld [vmem:[#allocation7 + $0x1548] sm:$0xff]  ;;  %v4399_v51 = vld [vmem:[#allocation7 + $0x1540] sm:$0xff]  ;;  %v1630_v59 = vadd.f32 %v10102_v30, %v10290_v36 }
 0x323   : > { %4540 = vmatpush1.msra.mxu1 %v4411_v32  ;;  %v10359_v44 = vpop.f32.mrf.mxu0  ;;  %3943 = vmatpush2.msra.mxu0 %v3560_v17  ;;  %v10361_v8 = vpop.f32.mrf.mxu1  ;;  %v4396_v28 = vld [vmem:[#allocation7 + $0x1528] sm:$0xff] }
 0x324   : > { %12417 = vst [vmem:[#allocation74_spill] sm:$0xff] %v10359_v44  ;;  %4541 = vmatprep.subr.mxu1 %v4408_v42  ;;  %12418 = vst [vmem:[#allocation75_spill] sm:$0xff] %v10361_v8  ;;  %3944 = vmatprep.subr.mxu0 %v3557_v29  ;;  %v10363_v6 = vadd.f32 %v2460_v39, %v1626_v47  ;;  %v3548_v42 = vld [vmem:[#allocation7 + $0x1130] sm:$0xff]  ;;  %v3545_v29 = vld [vmem:[#allocation7 + $0x1118] sm:$0xff] }
 0x325   : > { %4542 = vmatpush1.msra.mxu1 %v4407_v46  ;;  %3945 = vmatpush2.msra.mxu0 %v3556_v52  ;;  %v4395_v46 = vld [vmem:[#allocation7 + $0x1520] sm:$0xff]  ;;  %v4392_v47 = vld [vmem:[#allocation7 + $0x1508] sm:$0xff]  ;;  %v4494_v44 = vld [vmem:[#allocation7 + $0x1838] sm:$0xff] }
 0x326   : > { %4543 = vmatprep.subr.mxu1 %v4404_v10  ;;  %v2352_v32 = vpop.f32.mrf.mxu0  ;;  %3946 = vmatprep.subr.mxu0 %v3553_v55  ;;  %v2465_v17 = vpop.f32.mrf.mxu1  ;;  %v3544_v10 = vld [vmem:[#allocation7 + $0x1110] sm:$0xff]  ;;  %v4388_v30 = vld [vmem:[#allocation7 + $0x14e8] sm:$0xff] }
 0x327   : > { %4544 = vmatpush1.msra.mxu1 %v4403_v12  ;;  %3947 = vmatpush2.msra.mxu0 %v3552_v24  ;;  %v2466_v8 = vadd.f32 %v2465_v17, %v2352_v32  ;;  %v4391_v12 = vld [vmem:[#allocation7 + $0x1500] sm:$0xff]  ;;  %v4516_v24 = vld [vmem:[#allocation7 + $0x18e8] sm:$0xff] }
 0x328   : > { %4545 = vmatprep.subr.mxu1 %v4400_v25  ;;  %v10367_v39 = vpop.f32.mrf.mxu0  ;;  %3948 = vmatprep.subr.mxu0 %v3549_v54  ;;  %v10369_v52 = vpop.f32.mrf.mxu1  ;;  %v4387_v32 = vld [vmem:[#allocation7 + $0x14e0] sm:$0xff] }
 0x329   : > { %12419 = vst [vmem:[#allocation76_spill] sm:$0xff] %v10367_v39  ;;  %4546 = vmatpush1.msra.mxu1 %v4399_v51  ;;  %12420 = vst [vmem:[#allocation77_spill] sm:$0xff] %v10369_v52  ;;  %3949 = vmatpush2.msra.mxu0 %v3548_v42  ;;  %v10371_v55 = vadd.f32 %v2466_v8, %v1630_v59  ;;  %v1634_v51 = vadd.f32 %v10109_v60, %v10290_v36  ;;  %v4515_v54 = vld [vmem:[#allocation7 + $0x18e0] sm:$0xff]  ;;  %v4380_v60 = vld [vmem:[#allocation7 + $0x14a8] sm:$0xff] }
 0x32a   : > { %4547 = vmatprep.subr.mxu1 %v4396_v28  ;;  %3950 = vmatprep.subr.mxu0 %v3545_v29  ;;  %v4384_v28 = vld [vmem:[#allocation7 + $0x14c8] sm:$0xff] }
 0x32b   : > { %4548 = vmatpush1.msra.mxu1 %v4395_v46  ;;  %v2358_v25 = vpop.f32.mrf.mxu0  ;;  %3951 = vmatpush2.msra.mxu0 %v3544_v10  ;;  %v2471_v17 = vpop.f32.mrf.mxu1  ;;  %v4383_v46 = vld [vmem:[#allocation7 + $0x14c0] sm:$0xff] }
 0x32c   : > { %4549 = vmatprep.subr.mxu1 %v4392_v47  ;;  %3952 = vmatprep.mubr.f32.mxu0 %v10219_v43  ;;  %v2472_v42 = vadd.f32 %v2471_v17, %v2358_v25  ;;  %v4512_v47 = vld [vmem:[#allocation7 + $0x18c8] sm:$0xff]  ;;  %v4379_v10 = vld [vmem:[#allocation7 + $0x14a0] sm:$0xff] }
 0x32d   : > { %4550 = vmatpush1.msra.mxu1 %v4391_v12  ;;  %v10376_v8 = vpop.f32.mrf.mxu0  ;;  %3953 = vmatmul.mubr.f32.vlgmr.msra.gmra.mxu0 %v10221_v35  ;;  %v10379_v59 = vpop.f32.mrf.mxu1  ;;  %v1638_v35 = vadd.f32 %v10119_v18, %v10290_v36  ;;  %v4376_v25 = vld [vmem:[#allocation7 + $0x1488] sm:$0xff]  ;;  %v4371_v36 = vld [vmem:[#allocation7 + $0x1460] sm:$0xff] }
 0x32e   : > { %12421 = vst [vmem:[#allocation78_spill] sm:$0xff] %v10376_v8  ;;  %4551 = vmatprep.subr.mxu1 %v4388_v30  ;;  %12422 = vst [vmem:[#allocation79_spill] sm:$0xff] %v10379_v59  ;;  %4664 = vmatprep.subr.mxu0 %v4516_v24  ;;  %v10381_v29 = vadd.f32 %v2472_v42, %v1634_v51  ;;  %v4511_v30 = vld [vmem:[#allocation7 + $0x18c0] sm:$0xff]  ;;  %v4372_v17 = vld [vmem:[#allocation7 + $0x1468] sm:$0xff] }
 0x32f   : > { %4552 = vmatpush1.msra.mxu1 %v4387_v32  ;;  %4665 = vmatpush1.msra.mxu0 %v4515_v54  ;;  %v4508_v18 = vld [vmem:[#allocation7 + $0x18a8] sm:$0xff]  ;;  %v4367_v54 = vld [vmem:[#allocation7 + $0x1440] sm:$0xff] }
 0x330   : > { %4553 = vmatprep.subr.mxu1 %v4384_v28  ;;  %v2364_v43 = vpop.f32.mrf.mxu0  ;;  %3958 = vmatprep.mubr.f32.mxu0 %v10225_v20  ;;  %v2477_v12 = vpop.f32.mrf.mxu1  ;;  %v4375_v20 = vld [vmem:[#allocation7 + $0x1480] sm:$0xff]  ;;  %v4368_v51 = vld [vmem:[#allocation7 + $0x1448] sm:$0xff] }
 0x331   : > { %4071 = vmatprep.mubr.f32.mxu1 %v12377_v41  ;;  %4554 = vmatpush1.msra.mxu1 %v4383_v46  ;;  %v2478_v24 = vadd.f32 %v2477_v12, %v2364_v43  ;;  %v4364_v28 = vld [vmem:[#allocation7 + $0x1428] sm:$0xff]  ;;  %v4363_v42 = vld [vmem:[#allocation7 + $0x1420] sm:$0xff] }
 0x332   : > { %3959 = vmatmul.mubr.f32.gmra.mxu0 %v10236_v37  ;;  %8714 = vmatmul.mubr.msk.f32.gmra.mxu1 %vm782_vm5, %v10239_v21  ;;  %v4507_v37 = vld [vmem:[#allocation7 + $0x18a0] sm:$0xff]  ;;  %v4360_v46 = vld [vmem:[#allocation7 + $0x1408] sm:$0xff]  ;;  %v10409_v12 = vpop.f32.mrf.mxu1 }
 0x333   : > { %4555 = vmatprep.subr.mxu1 %v4380_v60  ;;  %4666 = vmatprep.subr.mxu0 %v4512_v47  ;;  %v10390_v32 = vadd.f32 %v2478_v24, %v1638_v35  ;;  %v4484_v60 = vld [vmem:[#allocation7 + $0x17e8] sm:$0xff]  ;;  %v4483_v43 = vld [vmem:[#allocation7 + $0x17e0] sm:$0xff]  ;;  %12424 = vst [vmem:[#allocation81_spill] sm:$0xff] %v10409_v12  ;;  %v4207_v12 = vld [vmem:[#allocation2 + $0x130] sm:$0xfe] }
 0x334   : > { %4556 = vmatpush1.msra.mxu1 %v4379_v10  ;;  %4667 = vmatpush1.msra.mxu0 %v4511_v30  ;;  %v4480_v47 = vld [vmem:[#allocation7 + $0x17c8] sm:$0xff]  ;;  %v10405_v10 = vpop.f32.mrf.mxu0  ;;  %v4475_v35 = vld [vmem:[#allocation7 + $0x17a0] sm:$0xff] }
 0x335   : > { %4557 = vmatprep.subr.mxu1 %v4376_v25  ;;  %3964 = vmatprep.mubr.f32.mxu0 %v10241_v13  ;;  %v4504_v13 = vld [vmem:[#allocation7 + $0x1888] sm:$0xff]  ;;  %12423 = vst [vmem:[#allocation80_spill] sm:$0xff] %v10405_v10  ;;  %v4213_v8 = vld [vmem:[#allocation2 + $0x160] sm:$0x1] }
 0x336   : > { %4077 = vmatprep.mubr.f32.mxu1 %v12377_v41  ;;  %4558 = vmatpush1.msra.mxu1 %v4375_v20  ;;  %v3083_v30 = vpop.f32.mrf.mxu0  ;;  %v4472_v25 = vld [vmem:[#allocation7 + $0x1788] sm:$0xff] }
 0x337   : > { %3965 = vmatmul.mubr.f32.gmra.mxu0 %v10249_v34  ;;  %8715 = vmatmul.mubr.msk.f32.gmra.mxu1 %vm782_vm5, %v10252_v50  ;;  %v4503_v34 = vld [vmem:[#allocation7 + $0x1880] sm:$0xff]  ;;  %v10585_v10 = vld [vmem:[#allocation2 + $0x148] sm:$0xff] }
 0x338   : > { %4559 = vmatprep.subr.mxu1 %v4372_v17  ;;  %4668 = vmatprep.subr.mxu0 %v4508_v18  ;;  %v4359_v50 = vld [vmem:[#allocation7 + $0x1400] sm:$0xff]  ;;  %v4468_v18 = vld [vmem:[#allocation7 + $0x1768] sm:$0xff] }
 0x339   : > { %4560 = vmatpush1.msra.mxu1 %v4371_v36  ;;  %4669 = vmatpush1.msra.mxu0 %v4507_v37  ;;  %v4471_v17 = vld [vmem:[#allocation7 + $0x1780] sm:$0xff]  ;;  %v10418_v36 = vpop.f32.mrf.mxu0 }
 0x33a   : > { %4561 = vmatprep.subr.mxu1 %v4368_v51  ;;  %3970 = vmatprep.mubr.f32.mxu0 %v10256_v3  ;;  %v4500_v3 = vld [vmem:[#allocation7 + $0x1868] sm:$0xff]  ;;  %12426 = vst [vmem:[#allocation83_spill] sm:$0xff] %v10418_v36  ;;  %v4467_v37 = vld [vmem:[#allocation7 + $0x1760] sm:$0xff]  ;;  %v4373_v36 = vld [vmem:[#allocation7 + $0x1470] sm:$0xff] }
 0x33b   : > { %4083 = vmatprep.mubr.f32.mxu1 %v12377_v41  ;;  %4562 = vmatpush1.msra.mxu1 %v4367_v54  ;;  %v4491_v54 = vld [vmem:[#allocation7 + $0x1820] sm:$0xff] }
 0x33c   : > { %3971 = vmatmul.mubr.f32.gmra.mxu0 %v10261_v27  ;;  %8716 = vmatmul.mubr.msk.f32.gmra.mxu1 %vm782_vm5, %v10264_v38  ;;  %v4499_v27 = vld [vmem:[#allocation7 + $0x1860] sm:$0xff] }
 0x33d   : > { %4563 = vmatprep.subr.mxu1 %v4364_v28  ;;  %4670 = vmatprep.subr.mxu0 %v4504_v13  ;;  %v4479_v38 = vld [vmem:[#allocation7 + $0x17c0] sm:$0xff]  ;;  %v4464_v28 = vld [vmem:[#allocation7 + $0x1748] sm:$0xff] }
 0x33e   : > { %4564 = vmatpush1.msra.mxu1 %v4363_v42  ;;  %4671 = vmatpush1.msra.mxu0 %v4503_v34  ;;  %v4180_v42 = vld [vmem:[#allocation2 + $0x58] sm:$0xfe] }
 0x33f   : > { %4565 = vmatprep.subr.mxu1 %v4360_v46  ;;  %3976 = vmatprep.mubr.f32.mxu0 %v10267_v53  ;;  %v4476_v53 = vld [vmem:[#allocation7 + $0x17a8] sm:$0xff] }
 0x340   : > { %4089 = vmatprep.mubr.f32.mxu1 %v12377_v41  ;;  %4566 = vmatpush1.msra.mxu1 %v4359_v50  ;;  %v4460_v50 = vld [vmem:[#allocation7 + $0x1728] sm:$0xff] }
 0x341   : > { %3977 = vmatmul.mubr.f32.gmra.mxu0 %v10272_v58  ;;  %8717 = vmatmul.mubr.msk.f32.gmra.mxu1 %vm782_vm5, %v10275_v61  ;;  %v4496_v58 = vld [vmem:[#allocation7 + $0x1848] sm:$0xff]  ;;  %v4495_v61 = vld [vmem:[#allocation7 + $0x1840] sm:$0xff] }
 0x342   : > { %4567 = vmatprep.subr.mxu1 %v4484_v60  ;;  %4672 = vmatprep.subr.mxu0 %v4500_v3  ;;  %v4459_v3 = vld [vmem:[#allocation7 + $0x1720] sm:$0xff] }
 0x343   : > { %4568 = vmatpush2.msra.mxu1 %v4483_v43  ;;  %4673 = vmatpush1.msra.mxu0 %v4499_v27  ;;  %v4288_v43 = vrot.slane %v4180_v42, 1  ;;  %v12330_v27 = vrot.slane %v10239_v21, 1 }
 0x344   : > { %4569 = vmatprep.subr.mxu1 %v4480_v47  ;;  %3982 = vmatprep.mubr.f32.mxu0 %v10282_v57 }
 0x345   : > { %4095 = vmatprep.mubr.f32.mxu1 %v12377_v41  ;;  %4570 = vmatpush2.msra.mxu1 %v4479_v38  ;;  %v4487_v38 = vld [vmem:[#allocation7 + $0x1800] sm:$0xff] }
 0x346   : > { %3983 = vmatmul.mubr.f32.gmra.mxu0 %v10284_v23  ;;  %v2970_v24 = vpop.f32.mrf.mxu1  ;;  %8718 = vmatmul.mubr.msk.f32.gmra.mxu1 %vm782_vm5, %v10287_v63  ;;  %v4492_v63 = vld [vmem:[#allocation7 + $0x1828] sm:$0xff] }
 0x347   : > { %4571 = vmatprep.subr.mxu1 %v4476_v53  ;;  %v3084_v20 = vadd.f32 %v3083_v30, %v2970_v24  ;;  %4674 = vmatprep.subr.mxu0 %v4496_v58  ;;  %v4456_v53 = vld [vmem:[#allocation7 + $0x1708] sm:$0xff]  ;;  %v4422_v30 = vld [vmem:[#allocation7 + $0x15f8] sm:$0xff]  ;;  %v10451_v24 = vsel %vm1776_vm8, %v4288_v43, %v12330_v27  ;;  %v4427_v27 = vld [vmem:[#allocation7 + $0x1620] sm:$0xff] }
 0x348   : > { %4572 = vmatpush2.msra.mxu1 %v4475_v35  ;;  %v10416_v57 = vpop.f32.mrf.mxu1  ;;  %4675 = vmatpush1.msra.mxu0 %v4495_v61  ;;  %v4452_v61 = vld [vmem:[#allocation7 + $0x16e8] sm:$0xff] }
 0x349   : > { %12425 = vst [vmem:[#allocation82_spill] sm:$0xff] %v10416_v57  ;;  %4573 = vmatprep.subr.mxu1 %v4472_v25  ;;  %v10421_v23 = vadd.f32 %v3084_v20, %v10162_v5  ;;  %3988 = vmatprep.mubr.f32.mxu0 %v10300_v26  ;;  %v4463_v26 = vld [vmem:[#allocation7 + $0x1740] sm:$0xff]  ;;  %v4440_v43 = vld [vmem:[#allocation7 + $0x1688] sm:$0xff] }
 0x34a   : > { %4101 = vmatprep.mubr.f32.mxu1 %v12377_v41  ;;  %v2976_v51 = vpop.f32.mrf.mxu1  ;;  %4574 = vmatpush2.msra.mxu1 %v4471_v17  ;;  %v3089_v13 = vpop.f32.mrf.mxu0  ;;  %v4421_v17 = vld [vmem:[#allocation7 + $0x15f0] sm:$0xff]  ;;  %v4198_v57 = vld [vmem:[#allocation2 + $0xe8] sm:$0xfe] }
 0x34b   : > { %3989 = vmatmul.mubr.f32.gmra.mxu0 %v10304_v2  ;;  %8719 = vmatmul.mubr.msk.f32.gmra.mxu1 %vm782_vm5, %v10307_v40  ;;  %v3090_v5 = vadd.f32 %v3089_v13, %v2976_v51  ;;  %v4488_v40 = vld [vmem:[#allocation7 + $0x1808] sm:$0xff]  ;;  %v4447_v51 = vld [vmem:[#allocation7 + $0x16c0] sm:$0xff] }
 0x34c   : > { %4575 = vmatprep.subr.mxu1 %v4468_v18  ;;  %v10428_v34 = vpop.f32.mrf.mxu1  ;;  %4676 = vmatprep.subr.mxu0 %v4492_v63  ;;  %v10430_v46 = vpop.f32.mrf.mxu0  ;;  %v4448_v18 = vld [vmem:[#allocation7 + $0x16c8] sm:$0xff] }
 0x34d   : > { %12427 = vst [vmem:[#allocation84_spill] sm:$0xff] %v10428_v34  ;;  %4576 = vmatpush2.msra.mxu1 %v4467_v37  ;;  %12428 = vst [vmem:[#allocation85_spill] sm:$0xff] %v10430_v46  ;;  %4677 = vmatpush1.msra.mxu0 %v4491_v54  ;;  %v10433_v2 = vadd.f32 %v3090_v5, %v10175_v49  ;;  %v4444_v13 = vld [vmem:[#allocation7 + $0x16a8] sm:$0xff]  ;;  %v4196_v34 = vld [vmem:[#allocation2 + $0xd8] sm:$0xfe] }
 0x34e   : > { %4577 = vmatprep.subr.mxu1 %v4464_v28  ;;  %v2982_v60 = vpop.f32.mrf.mxu1  ;;  %3994 = vmatprep.mubr.f32.mxu0 %v10319_v48  ;;  %v4455_v48 = vld [vmem:[#allocation7 + $0x1700] sm:$0xff]  ;;  %v4417_v28 = vld [vmem:[#allocation7 + $0x15d0] sm:$0xff] }
 0x34f   : > { %4107 = vmatprep.mubr.f32.mxu1 %v12377_v41  ;;  %v3095_v47 = vpop.f32.mrf.mxu0  ;;  %4578 = vmatpush2.msra.mxu1 %v4463_v26  ;;  %v4414_v26 = vld [vmem:[#allocation7 + $0x15b8] sm:$0xff] }
 0x350   : > { %3995 = vmatmul.mubr.f32.gmra.mxu0 %v10325_v16  ;;  %v3096_v58 = vadd.f32 %v3095_v47, %v2982_v60  ;;  %v10439_v35 = vpop.f32.mrf.mxu1  ;;  %8720 = vmatmul.mubr.msk.f32.gmra.mxu1 %vm782_vm5, %v10330_v9  ;;  %v4451_v9 = vld [vmem:[#allocation7 + $0x16e0] sm:$0xff] }
 0x351   : > { %12429 = vst [vmem:[#allocation86_spill] sm:$0xff] %v10439_v35  ;;  %4579 = vmatprep.subr.mxu1 %v4460_v50  ;;  %v10443_v49 = vpop.f32.mrf.mxu0  ;;  %4678 = vmatprep.subr.mxu0 %v4488_v40  ;;  %v4443_v50 = vld [vmem:[#allocation7 + $0x16a0] sm:$0xff]  ;;  %v4413_v40 = vld [vmem:[#allocation7 + $0x15b0] sm:$0xff] }
 0x352   : > { %12430 = vst [vmem:[#allocation87_spill] sm:$0xff] %v10443_v49  ;;  %4580 = vmatpush2.msra.mxu1 %v4459_v3  ;;  %v10446_v25 = vadd.f32 %v3096_v58, %v10188_v33  ;;  %v2988_v16 = vpop.f32.mrf.mxu1  ;;  %4679 = vmatpush1.msra.mxu0 %v4487_v38  ;;  %v4418_v33 = vld [vmem:[#allocation7 + $0x15d8] sm:$0xff]  ;;  %v4439_v58 = vld [vmem:[#allocation7 + $0x1680] sm:$0xff] }
 0x353   : > { %4581 = vmatprep.subr.mxu1 %v4456_v53  ;;  %v3101_v20 = vpop.f32.mrf.mxu0  ;;  %4712 = vmatprep.mubr.f32.mxu0 %v12377_v41  ;;  %v4410_v3 = vld [vmem:[#allocation7 + $0x1598] sm:$0xff]  ;;  %v4409_v53 = vld [vmem:[#allocation7 + $0x1590] sm:$0xff]  ;;  %v4193_v35 = vld [vmem:[#allocation2 + $0xc0] sm:$0x1] }
 0x354   : > { %4582 = vmatpush2.msra.mxu1 %v4455_v48  ;;  %v3102_v63 = vadd.f32 %v3101_v20, %v2988_v16  ;;  %v10454_v37 = vpop.f32.mrf.mxu1  ;;  %4761 = vmatprep.subr.mxu0 %v4422_v30  ;;  %v4436_v30 = vld [vmem:[#allocation7 + $0x1668] sm:$0xff]  ;;  %v4435_v16 = vld [vmem:[#allocation7 + $0x1660] sm:$0xff] }
 0x355   : > { %12431 = vst [vmem:[#allocation88_spill] sm:$0xff] %v10454_v37  ;;  %4583 = vmatprep.subr.mxu1 %v4452_v61  ;;  %v10456_v54 = vpop.f32.mrf.mxu0  ;;  %8721 = vmatmul.mubr.msk.f32.vlgmr.msra.gmra.mxu0 %vm782_vm5, %v10451_v24  ;;  %v4405_v61 = vld [vmem:[#allocation7 + $0x1570] sm:$0xff]  ;;  %v4432_v20 = vld [vmem:[#allocation7 + $0x1648] sm:$0xff] }
 0x356   : > { %12432 = vst [vmem:[#allocation89_spill] sm:$0xff] %v10456_v54  ;;  %4584 = vmatpush2.msra.mxu1 %v4451_v9  ;;  %v10461_v42 = vadd.f32 %v3102_v63, %v10201_v31  ;;  %v2994_v5 = vpop.f32.mrf.mxu1  ;;  %4762 = vmatpush1.msra.mxu0 %v4421_v17  ;;  %v4406_v31 = vld [vmem:[#allocation7 + $0x1578] sm:$0xff]  ;;  %v4179_v17 = vld [vmem:[#allocation2 + $0x50] sm:$0xfe]  ;;  %v4178_v63 = vld [vmem:[#allocation2 + $0x48] sm:$0xfe] }
 0x357   : > { %4585 = vmatprep.subr.mxu1 %v4448_v18  ;;  %v3107_v60 = vpop.f32.mrf.mxu0  ;;  %4763 = vmatprep.subr.mxu0 %v4418_v33  ;;  %v4182_v18 = vld [vmem:[#allocation2 + $0x68] sm:$0xff]  ;;  %v10470_v33 = vld [vmem:[#allocation2 + $0x60] sm:$0xff] }
 0x358   : > { %4586 = vmatpush2.msra.mxu1 %v4447_v51  ;;  %v3108_v47 = vadd.f32 %v3107_v60, %v2994_v5  ;;  %v10463_v38 = vpop.f32.mrf.mxu1  ;;  %4764 = vmatpush1.msra.mxu0 %v4417_v28  ;;  %v4185_v51 = vld [vmem:[#allocation2 + $0x80] sm:$0x1]  ;;  %v4428_v60 = vld [vmem:[#allocation7 + $0x1628] sm:$0xff] }
 0x359   : > { %12433 = vst [vmem:[#allocation90_spill] sm:$0xff] %v10463_v38  ;;  %4587 = vmatprep.subr.mxu1 %v4444_v13  ;;  %v10465_v48 = vpop.f32.mrf.mxu0  ;;  %4765 = vmatprep.subr.mxu0 %v4414_v26  ;;  %v4402_v13 = vld [vmem:[#allocation7 + $0x1558] sm:$0xff]  ;;  %v4431_v5 = vld [vmem:[#allocation7 + $0x1640] sm:$0xff]  ;;  %v4293_v38 = vrot.slane %v4185_v51, 1  ;;  %v10492_v37 = vld [vmem:[#allocation2 + $0xa8] sm:$0xff] }
 0x35a   : > { %12434 = vst [vmem:[#allocation91_spill] sm:$0xff] %v10465_v48  ;;  %4588 = vmatpush2.msra.mxu1 %v4443_v50  ;;  %v10468_v9 = vadd.f32 %v3108_v47, %v10209_v45  ;;  %4766 = vmatpush1.msra.mxu0 %v4413_v40  ;;  %v4401_v45 = vld [vmem:[#allocation7 + $0x1550] sm:$0xff]  ;;  %v4398_v50 = vld [vmem:[#allocation7 + $0x1538] sm:$0xff]  ;;  %v4285_v40 = vrot.slane %v4179_v17, 1 }
 0x35b   : > { %4589 = vmatprep.subr.mxu1 %v4440_v43  ;;  %4767 = vmatprep.subr.mxu0 %v4410_v3  ;;  %v4286_v43 = vrot.slane %v4182_v18, 1  ;;  %v4394_v48 = vld [vmem:[#allocation7 + $0x1518] sm:$0xff] }
 0x35c   : > { %4590 = vmatpush2.msra.mxu1 %v4439_v58  ;;  %v3000_v28 = vpop.f32.mrf.mxu1  ;;  %4768 = vmatpush1.msra.mxu0 %v4409_v53  ;;  %v3113_v26 = vpop.f32.mrf.mxu0  ;;  %v4397_v58 = vld [vmem:[#allocation7 + $0x1530] sm:$0xff]  ;;  %v4282_v53 = vrot.slane %v4178_v63, 1  ;;  %v4184_v17 = vld [vmem:[#allocation2 + $0x78] sm:$0x1] }
 0x35d   : > { %4591 = vmatprep.subr.mxu1 %v4436_v30  ;;  %4769 = vmatprep.subr.mxu0 %v4406_v31  ;;  %v3114_v47 = vadd.f32 %v3113_v26, %v3000_v28  ;;  %v4283_v30 = vrot.slane %v10470_v33, 1  ;;  %v4424_v31 = vld [vmem:[#allocation7 + $0x1608] sm:$0xff]  ;;  %v10480_v28 = vld [vmem:[#allocation2 + $0xb0] sm:$0xff]  ;;  %v10483_v33 = vsel %vm1776_vm8, %v4285_v40, %v4286_v43  ;;  %v10489_v26 = vsel %vm1776_vm8, %v4286_v43, %v4293_v38  ;;  %v4189_v38 = vld [vmem:[#allocation2 + $0xa0] sm:$0xfe] }
 0x35e   : > { %4592 = vmatpush2.msra.mxu1 %v4435_v16  ;;  %v10472_v3 = vpop.f32.mrf.mxu1  ;;  %4770 = vmatpush1.msra.mxu0 %v4405_v61  ;;  %v10475_v54 = vpop.f32.mrf.mxu0  ;;  %v4423_v16 = vld [vmem:[#allocation7 + $0x1600] sm:$0xff]  ;;  %v4186_v61 = vld [vmem:[#allocation2 + $0x88] sm:$0x1]  ;;  %v4393_v63 = vld [vmem:[#allocation7 + $0x1510] sm:$0xff]  ;;  %v4301_v40 = vrot.slane %v10480_v28, 1 }
 0x35f   : > { %12435 = vst [vmem:[#allocation92_spill] sm:$0xff] %v10472_v3  ;;  %4593 = vmatprep.subr.mxu1 %v4432_v20  ;;  %12436 = vst [vmem:[#allocation93_spill] sm:$0xff] %v10475_v54  ;;  %4771 = vmatprep.subr.mxu0 %v4402_v13  ;;  %v10478_v18 = vadd.f32 %v3114_v47, %v10217_v1  ;;  %v4188_v20 = vld [vmem:[#allocation2 + $0x98] sm:$0xfe]  ;;  %v4389_v1 = vld [vmem:[#allocation7 + $0x14f0] sm:$0xff] }
 0x360   : > { %4594 = vmatpush2.msra.mxu1 %v4431_v5  ;;  %4772 = vmatpush1.msra.mxu0 %v4401_v45  ;;  %v4390_v13 = vld [vmem:[#allocation7 + $0x14f8] sm:$0xff]  ;;  %v10486_v5 = vsel %vm1776_vm8, %v4282_v53, %v4283_v30  ;;  %v4291_v45 = vrot.slane %v4184_v17, 1  ;;  %v4187_v47 = vld [vmem:[#allocation2 + $0x90] sm:$0xfe] }
 0x361   : > { %4595 = vmatprep.subr.mxu1 %v4428_v60  ;;  %4773 = vmatprep.subr.mxu0 %v4398_v50  ;;  %v4300_v50 = vrot.slane %v4188_v20, 1  ;;  %v4386_v53 = vld [vmem:[#allocation7 + $0x14d8] sm:$0xff] }
 0x362   : > { %4596 = vmatpush2.msra.mxu1 %v4427_v27  ;;  %v3006_v51 = vpop.f32.mrf.mxu1  ;;  %4774 = vmatpush1.msra.mxu0 %v4397_v58  ;;  %v3119_v60 = vpop.f32.mrf.mxu0  ;;  %v4295_v27 = vrot.slane %v4186_v61, 1  ;;  %v10497_v43 = vld [vmem:[#allocation2 + $0xb8] sm:$0xff] }
 0x363   : > { %4597 = vmatprep.subr.mxu1 %v4424_v31  ;;  %4775 = vmatprep.subr.mxu0 %v4394_v48  ;;  %v3120_v58 = vadd.f32 %v3119_v60, %v3006_v51  ;;  %v4385_v48 = vld [vmem:[#allocation7 + $0x14d0] sm:$0xff]  ;;  %v4518_v61 = vld [vmem:[#allocation7 + $0x18f8] sm:$0xff]  ;;  %v4297_v51 = vrot.slane %v4187_v47, 1  ;;  %v4298_v60 = vrot.slane %v10492_v37, 1 }
 0x364   : > { %4598 = vmatpush2.msra.mxu1 %v4423_v16  ;;  %v10494_v31 = vpop.f32.mrf.mxu1  ;;  %4776 = vmatpush1.msra.mxu0 %v4393_v63  ;;  %v10499_v17 = vpop.f32.mrf.mxu0  ;;  %v4194_v16 = vld [vmem:[#allocation2 + $0xc8] sm:$0x1]  ;;  %v4382_v28 = vld [vmem:[#allocation7 + $0x14b8] sm:$0xff]  ;;  %v10507_v63 = vsel %vm1776_vm8, %v4283_v30, %v4291_v45  ;;  %v4381_v45 = vld [vmem:[#allocation7 + $0x14b0] sm:$0xff] }
 0x365   : > { %12437 = vst [vmem:[#allocation94_spill] sm:$0xff] %v10494_v31  ;;  %4599 = vmatprep.mubr.f32.mxu1 %v10483_v33  ;;  %12438 = vst [vmem:[#allocation95_spill] sm:$0xff] %v10499_v17  ;;  %4777 = vmatprep.subr.mxu0 %v4390_v13  ;;  %v10503_v20 = vadd.f32 %v3120_v58, %v10233_v14  ;;  %v12439_v13 = vrot.slane %v10239_v21, 1  ;;  %v10517_v14 = vsel %vm1776_vm8, %v4300_v50, %v4301_v40  ;;  %v4378_v47 = vld [vmem:[#allocation7 + $0x1498] sm:$0xff]  ;;  %v4197_v21 = vld [vmem:[#allocation2 + $0xe0] sm:$0xfe] }
 0x366   : > { %4600 = vmatmul.mubr.f32.vlgmr.msra.gmra.mxu1 %v10486_v5  ;;  %4778 = vmatpush1.msra.mxu0 %v4389_v1  ;;  %v4303_v1 = vrot.slane %v4189_v38, 1  ;;  %v4304_v58 = vrot.slane %v10497_v43, 1  ;;  %v4308_v37 = vrot.slane %v4194_v16, 1  ;;  %v4517_v50 = vld [vmem:[#allocation7 + $0x18f0] sm:$0xff]  ;;  %v10527_v43 = vsel %vm1776_vm8, %v4297_v51, %v4298_v60  ;;  %v4374_v16 = vld [vmem:[#allocation7 + $0x1478] sm:$0xff]  ;;  %v10542_v17 = vld [vmem:[#allocation2 + $0x100] sm:$0xff] }
 0x367   : > { %4605 = vmatprep.mubr.f32.mxu1 %v10489_v26  ;;  %4779 = vmatprep.subr.mxu0 %v4386_v53  ;;  %v10514_v49 = vsel %vm1776_vm8, %v12439_v13, %v4295_v27  ;;  %v4195_v53 = vld [vmem:[#allocation2 + $0xd0] sm:$0x1]  ;;  %v10521_v27 = vld [vmem:[#allocation2 + $0xf8] sm:$0xff] }
 0x368   : > { %4718 = vmatprep.mubr.f32.mxu0 %v12377_v41  ;;  %v3012_v30 = vpop.f32.mrf.mxu1  ;;  %4780 = vmatpush1.msra.mxu0 %v4385_v48  ;;  %v3125_v46 = vpop.f32.mrf.mxu0  ;;  %v4377_v38 = vld [vmem:[#allocation7 + $0x1490] sm:$0xff]  ;;  %v4306_v48 = vrot.slane %v4193_v35, 1  ;;  %v10539_v51 = vsel %vm1776_vm8, %v4301_v40, %v4308_v37  ;;  %v4315_v35 = vrot.slane %v4197_v21, 1  ;;  %v4312_v40 = vrot.slane %v4196_v34, 1  ;;  %v4202_v34 = vld [vmem:[#allocation2 + $0x108] sm:$0x1] }
 0x369   : > { %4890 = vmatprep.subr.mxu1 %v4518_v61  ;;  %4781 = vmatprep.subr.mxu0 %v4382_v28  ;;  %v3126_v13 = vadd.f32 %v3125_v46, %v3012_v30  ;;  %v10531_v61 = vsel %vm1776_vm8, %v4303_v1, %v4304_v58  ;;  %v4310_v28 = vrot.slane %v4195_v53, 1  ;;  %v10533_v46 = vld [vmem:[#allocation2 + $0xf0] sm:$0xff]  ;;  %v4370_v1 = vld [vmem:[#allocation7 + $0x1458] sm:$0xff] }
 0x36a   : > { %4606 = vmatmul.mubr.f32.gmra.mxu1 %v10507_v63  ;;  %8722 = vmatmul.mubr.msk.f32.gmra.mxu0 %vm782_vm5, %v10514_v49  ;;  %v4313_v37 = vrot.slane %v10533_v46, 1  ;;  %v4366_v53 = vld [vmem:[#allocation7 + $0x1438] sm:$0xff]  ;;  %v4485_v46 = vld [vmem:[#allocation7 + $0x17f0] sm:$0xff] }
 0x36b   : > { %4611 = vmatprep.mubr.f32.mxu1 %v10517_v14  ;;  %4782 = vmatpush1.msra.mxu0 %v4381_v45  ;;  %v10536_v30 = vadd.f32 %v3126_v13, %v10254_v7  ;;  %v4316_v45 = vrot.slane %v10521_v27, 1  ;;  %v4369_v7 = vld [vmem:[#allocation7 + $0x1450] sm:$0xff]  ;;  %v10553_v21 = vsel %vm1776_vm8, %v4304_v58, %v4310_v28  ;;  %v4318_v27 = vrot.slane %v4198_v57, 1  ;;  %v4478_v31 = vld [vmem:[#allocation7 + $0x17b8] sm:$0xff] }
 0x36c   : > { %4724 = vmatprep.mubr.f32.mxu0 %v12377_v41  ;;  %4783 = vmatprep.subr.mxu0 %v4378_v47  ;;  %v10548_v47 = vsel %vm1776_vm8, %v4298_v60, %v4306_v48  ;;  %v4203_v13 = vld [vmem:[#allocation2 + $0x110] sm:$0x1]  ;;  %v4204_v48 = vld [vmem:[#allocation2 + $0x118] sm:$0x1] }
 0x36d   : > { %4891 = vmatpush1.msra.mxu1 %v4517_v50  ;;  %4784 = vmatpush1.msra.mxu0 %v4377_v38  ;;  %v4319_v50 = vrot.slane %v10542_v17, 1  ;;  %v4365_v38 = vld [vmem:[#allocation7 + $0x1430] sm:$0xff]  ;;  %v10558_v60 = vsel %vm1776_vm8, %v4315_v35, %v4316_v45  ;;  %v10564_v17 = vsel %vm1776_vm8, %v4312_v40, %v4313_v37  ;;  %v4323_v58 = vrot.slane %v4203_v13, 1  ;;  %v4482_v35 = vld [vmem:[#allocation7 + $0x17d8] sm:$0xff]  ;;  %v4206_v13 = vld [vmem:[#allocation2 + $0x128] sm:$0xfe] }
 0x36e   : > { %4612 = vmatmul.mubr.f32.gmra.mxu1 %v10527_v43  ;;  %4785 = vmatprep.subr.mxu0 %v4374_v16  ;;  %v4361_v57 = vld [vmem:[#allocation7 + $0x1410] sm:$0xff]  ;;  %v4486_v16 = vld [vmem:[#allocation7 + $0x17f8] sm:$0xff] }
 0x36f   : > { %8723 = vmatmul.mubr.msk.f32.gmra.mxu0 %vm782_vm5, %v10531_v61  ;;  %4617 = vmatprep.mubr.f32.mxu1 %v10539_v51  ;;  %v10568_v28 = vsel %vm1776_vm8, %v4318_v27, %v4319_v50  ;;  %v4513_v40 = vld [vmem:[#allocation7 + $0x18d0] sm:$0xff] }
 0x370   : > { %4786 = vmatpush1.msra.mxu0 %v4373_v36  ;;  %4730 = vmatprep.mubr.f32.mxu0 %v12377_v41  ;;  %v4362_v36 = vld [vmem:[#allocation7 + $0x1418] sm:$0xff]  ;;  %v4481_v27 = vld [vmem:[#allocation7 + $0x17d0] sm:$0xff] }
 0x371   : > { %4787 = vmatprep.subr.mxu0 %v4370_v1  ;;  %v4514_v1 = vld [vmem:[#allocation7 + $0x18d8] sm:$0xff] }
 0x372   : > { %4788 = vmatpush1.msra.mxu0 %v4369_v7  ;;  %4618 = vmatmul.mubr.f32.gmra.mxu1 %v10548_v47  ;;  %v4321_v7 = vrot.slane %v4202_v34, 1  ;;  %v4205_v34 = vld [vmem:[#allocation2 + $0x120] sm:$0xfe] }
 0x373   : > { %4789 = vmatprep.subr.mxu0 %v4366_v53  ;;  %8724 = vmatmul.mubr.msk.f32.gmra.mxu0 %vm782_vm5, %v10553_v21  ;;  %v4325_v53 = vrot.slane %v4204_v48, 1  ;;  %v4510_v48 = vld [vmem:[#allocation7 + $0x18b8] sm:$0xff] }
 0x374   : > { %4790 = vmatpush1.msra.mxu0 %v4365_v38  ;;  %4623 = vmatprep.mubr.f32.mxu1 %v10558_v60  ;;  %v10572_v38 = vld [vmem:[#allocation2 + $0x140] sm:$0xff]  ;;  %v10582_v54 = vsel %vm1776_vm8, %v4313_v37, %v4321_v7  ;;  %v4327_v37 = vrot.slane %v4205_v34, 1  ;;  %v10593_v7 = vpop.f32.mrf.mxu1 }
 0x375   : > { %4791 = vmatprep.subr.mxu0 %v4362_v36  ;;  %4736 = vmatprep.mubr.f32.mxu0 %v12377_v41  ;;  %v10577_v36 = vsel %vm1776_vm8, %v4316_v45, %v4323_v58  ;;  %v4331_v3 = vrot.slane %v10572_v38, 1  ;;  %v10589_v45 = vsel %vm1776_vm8, %v4319_v50, %v4325_v53  ;;  %v4509_v58 = vld [vmem:[#allocation7 + $0x18b0] sm:$0xff]  ;;  %12440 = vst [vmem:[#allocation96_spill] sm:$0xff] %v10593_v7  ;;  %v4333_v38 = vrot.slane %v4207_v12, 1  ;;  %v4212_v53 = vld [vmem:[#allocation2 + $0x158] sm:$0x1] }
 0x376   : > { %4792 = vmatpush1.msra.mxu0 %v4361_v57  ;;  %4624 = vmatmul.mubr.f32.gmra.mxu1 %v10564_v17  ;;  %v10579_v57 = vld [vmem:[#allocation2 + $0x138] sm:$0xff]  ;;  %v4334_v50 = vrot.slane %v10585_v10, 1  ;;  %v4211_v7 = vld [vmem:[#allocation2 + $0x150] sm:$0x1] }
 0x377   : > { %4793 = vmatprep.subr.mxu0 %v4486_v16  ;;  %8725 = vmatmul.mubr.msk.f32.gmra.mxu0 %vm782_vm5, %v10568_v28  ;;  %v4330_v16 = vrot.slane %v4206_v13, 1  ;;  %v4505_v13 = vld [vmem:[#allocation7 + $0x1890] sm:$0xff]  ;;  %v4502_v10 = vld [vmem:[#allocation7 + $0x1878] sm:$0xff] }
 0x378   : > { %4794 = vmatpush2.msra.mxu0 %v4485_v46  ;;  %4892 = vmatprep.subr.mxu1 %v4514_v1  ;;  %v4477_v46 = vld [vmem:[#allocation7 + $0x17b0] sm:$0xff]  ;;  %v4328_v1 = vrot.slane %v10579_v57, 1  ;;  %v3309_v57 = vpop.f32.mrf.mxu1 }
 0x379   : > { %4795 = vmatprep.subr.mxu0 %v4482_v35  ;;  %4893 = vmatpush1.msra.mxu1 %v4513_v40  ;;  %v4506_v35 = vld [vmem:[#allocation7 + $0x1898] sm:$0xff]  ;;  %v10602_v34 = vsel %vm1776_vm8, %v4330_v16, %v4331_v3  ;;  %v10609_v16 = vsel %vm1776_vm8, %v4333_v38, %v4334_v50  ;;  %v4497_v38 = vld [vmem:[#allocation7 + $0x1850] sm:$0xff] }
 0x37a   : > { %4796 = vmatpush2.msra.mxu0 %v4481_v27  ;;  %4629 = vmatprep.mubr.f32.mxu1 %v10577_v36  ;;  %v4474_v40 = vld [vmem:[#allocation7 + $0x1798] sm:$0xff]  ;;  %v10597_v27 = vpop.f32.mrf.mxu0  ;;  %v10605_v12 = vsel %vm1776_vm8, %v4327_v37, %v4328_v1 }
 0x37b   : > { %4742 = vmatprep.mubr.f32.mxu0 %v12377_v41  ;;  %4797 = vmatprep.subr.mxu0 %v4478_v31  ;;  %12441 = vst [vmem:[#allocation97_spill] sm:$0xff] %v10597_v27  ;;  %v4473_v31 = vld [vmem:[#allocation7 + $0x1790] sm:$0xff]  ;;  %v4338_v27 = vrot.slane %v4212_v53, 1  ;;  %v10617_v53 = vpop.f32.mrf.mxu1 }
 0x37c   : > { %4894 = vmatprep.subr.mxu1 %v4510_v48  ;;  %4630 = vmatmul.mubr.f32.gmra.mxu1 %v10582_v54  ;;  %v4470_v48 = vld [vmem:[#allocation7 + $0x1778] sm:$0xff]  ;;  %12443 = vst [vmem:[#allocation99_spill] sm:$0xff] %v10617_v53 }
 0x37d   : > { %8726 = vmatmul.mubr.msk.f32.gmra.mxu0 %vm782_vm5, %v10589_v45  ;;  %4895 = vmatpush1.msra.mxu1 %v4509_v58  ;;  %v3196_v59 = vpop.f32.mrf.mxu0  ;;  %v4501_v58 = vld [vmem:[#allocation7 + $0x1870] sm:$0xff]  ;;  %v10623_v39 = vsel %vm1776_vm8, %v4331_v3, %v4338_v27 }
 0x37e   : > { %4798 = vmatpush2.msra.mxu0 %v4477_v46  ;;  %4896 = vmatprep.subr.mxu1 %v4506_v35  ;;  %v3310_v52 = vadd.f32 %v3309_v57, %v3196_v59  ;;  %v4469_v35 = vld [vmem:[#allocation7 + $0x1770] sm:$0xff]  ;;  %v4466_v59 = vld [vmem:[#allocation7 + $0x1758] sm:$0xff] }
 0x37f   : > { %4799 = vmatprep.subr.mxu0 %v4474_v40  ;;  %4897 = vmatpush1.msra.mxu1 %v4505_v13  ;;  %v10611_v46 = vpop.f32.mrf.mxu0  ;;  %v4498_v40 = vld [vmem:[#allocation7 + $0x1858] sm:$0xff]  ;;  %v4336_v13 = vrot.slane %v4211_v7, 1  ;;  %v4493_v27 = vld [vmem:[#allocation7 + $0x1830] sm:$0xff] }
 0x380   : > { %4800 = vmatpush2.msra.mxu0 %v4473_v31  ;;  %4635 = vmatprep.mubr.f32.mxu1 %v10602_v34  ;;  %12442 = vst [vmem:[#allocation98_spill] sm:$0xff] %v10611_v46  ;;  %v10615_v37 = vadd.f32 %v3310_v52, %v10312_v0  ;;  %v4340_v31 = vrot.slane %v4213_v8, 1  ;;  %v4462_v0 = vld [vmem:[#allocation7 + $0x1738] sm:$0xff] }
 0x381   : > { %4748 = vmatprep.mubr.f32.mxu0 %v12377_v41  ;;  %4801 = vmatprep.subr.mxu0 %v4470_v48  ;;  %v4465_v48 = vld [vmem:[#allocation7 + $0x1750] sm:$0xff]  ;;  %v10628_v8 = vsel %vm1776_vm8, %v4328_v1, %v4336_v13  ;;  %v4458_v1 = vld [vmem:[#allocation7 + $0x1718] sm:$0xff] }
 0x382   : > { %4898 = vmatprep.subr.mxu1 %v4502_v10  ;;  %4636 = vmatmul.mubr.f32.gmra.mxu1 %v10605_v12  ;;  %v3202_v57 = vpop.f32.mrf.mxu0  ;;  %v3315_v7 = vpop.f32.mrf.mxu1  ;;  %v10634_v3 = vsel %vm1776_vm8, %v4334_v50, %v4340_v31  ;;  %v4489_v13 = vld [vmem:[#allocation7 + $0x1810] sm:$0xff] }
 0x383   : > { %8727 = vmatmul.mubr.msk.f32.gmra.mxu0 %vm782_vm5, %v10609_v16  ;;  %4899 = vmatpush1.msra.mxu1 %v4501_v58  ;;  %v3316_v52 = vadd.f32 %v3315_v7, %v3202_v57  ;;  %v4457_v50 = vld [vmem:[#allocation7 + $0x1710] sm:$0xff]  ;;  %v4454_v57 = vld [vmem:[#allocation7 + $0x16f8] sm:$0xff] }
 0x384   : > { %4802 = vmatpush2.msra.mxu0 %v4469_v35  ;;  %4900 = vmatprep.subr.mxu1 %v4498_v40  ;;  %v10625_v10 = vpop.f32.mrf.mxu0  ;;  %v10630_v53 = vpop.f32.mrf.mxu1  ;;  %v4461_v35 = vld [vmem:[#allocation7 + $0x1730] sm:$0xff]  ;;  %v4490_v40 = vld [vmem:[#allocation7 + $0x1818] sm:$0xff] }
 0x385   : > { %12444 = vst [vmem:[#allocation100_spill] sm:$0xff] %v10625_v10  ;;  %4803 = vmatprep.subr.mxu0 %v4466_v59  ;;  %4901 = vmatpush1.msra.mxu1 %v4497_v38  ;;  %12445 = vst [vmem:[#allocation101_spill] sm:$0xff] %v10630_v53  ;;  %v10637_v58 = vadd.f32 %v3316_v52, %v10332_v56  ;;  %v5292_v52 = vld [vmem:[#allocation7 + $0x1ae0] sm:$0xff]  ;;  %v4441_v53 = vld [vmem:[#allocation7 + $0x1690] sm:$0xff] }
 0x386   : > { %4804 = vmatpush2.msra.mxu0 %v4465_v48  ;;  %4641 = vmatprep.mubr.f32.mxu1 %v10623_v39  ;;  %v5293_v48 = vld [vmem:[#allocation7 + $0x1ae8] sm:$0xff] }
 0x387   : > { %4754 = vmatprep.mubr.f32.mxu0 %v12377_v41  ;;  %4805 = vmatprep.subr.mxu0 %v4462_v0  ;;  %v3208_v59 = vpop.f32.mrf.mxu0  ;;  %v3321_v38 = vpop.f32.mrf.mxu1 }
 0x388   : > { %4902 = vmatprep.subr.mxu1 %v4494_v44  ;;  %4642 = vmatmul.mubr.f32.gmra.mxu1 %v10628_v8  ;;  %v3322_v31 = vadd.f32 %v3321_v38, %v3208_v59  ;;  %v4453_v44 = vld [vmem:[#allocation7 + $0x16f0] sm:$0xff] }
 0x389   : > { %8728 = vmatmul.mubr.msk.f32.gmra.mxu0 %vm782_vm5, %v10634_v3  ;;  %4903 = vmatpush1.msra.mxu1 %v4493_v27  ;;  %v10643_v56 = vpop.f32.mrf.mxu0  ;;  %v10645_v7 = vpop.f32.mrf.mxu1  ;;  %v4450_v27 = vld [vmem:[#allocation7 + $0x16d8] sm:$0xff] }
 0x38a   : > { %12446 = vst [vmem:[#allocation102_spill] sm:$0xff] %v10643_v56  ;;  %4806 = vmatpush2.msra.mxu0 %v4461_v35  ;;  %4904 = vmatprep.subr.mxu1 %v4490_v40  ;;  %12447 = vst [vmem:[#allocation103_spill] sm:$0xff] %v10645_v7  ;;  %v10648_v0 = vadd.f32 %v3322_v31, %v10344_v19  ;;  %v5289_v35 = vld [vmem:[#allocation7 + $0x1ac8] sm:$0xff]  ;;  %v4449_v40 = vld [vmem:[#allocation7 + $0x16d0] sm:$0xff] }
 0x38b   : > { %4807 = vmatprep.subr.mxu0 %v4458_v1  ;;  %4905 = vmatpush1.msra.mxu1 %v4489_v13  ;;  %v5288_v1 = vld [vmem:[#allocation7 + $0x1ac0] sm:$0xff]  ;;  %v4446_v13 = vld [vmem:[#allocation7 + $0x16b8] sm:$0xff]  ;;  %v4445_v31 = vld [vmem:[#allocation7 + $0x16b0] sm:$0xff] }
 0x38c   : > { %4808 = vmatpush2.msra.mxu0 %v4457_v50  ;;  %4938 = vmatprep.mubr.f32.mxu1 %v12377_v41  ;;  %v3214_v59 = vpop.f32.mrf.mxu0  ;;  %v3327_v38 = vpop.f32.mrf.mxu1  ;;  %v5285_v50 = vld [vmem:[#allocation7 + $0x1aa8] sm:$0xff] }
 0x38d   : > { %4809 = vmatprep.subr.mxu0 %v4454_v57  ;;  %5408 = vmatprep.subr.mxu1 %v5293_v48  ;;  %v3328_v7 = vadd.f32 %v3327_v38, %v3214_v59  ;;  %v5284_v57 = vld [vmem:[#allocation7 + $0x1aa0] sm:$0xff]  ;;  %v4442_v48 = vld [vmem:[#allocation7 + $0x1698] sm:$0xff] }
 0x38e   : > { %4810 = vmatpush2.msra.mxu0 %v4453_v44  ;;  %8729 = vmatmul.mubr.msk.f32.vlgmr.msra.gmra.mxu1 %vm782_vm5, %v10451_v24  ;;  %v10653_v19 = vpop.f32.mrf.mxu0  ;;  %v10655_v56 = vpop.f32.mrf.mxu1  ;;  %v5281_v24 = vld [vmem:[#allocation7 + $0x1a88] sm:$0xff] }
 0x38f   : > { %12448 = vst [vmem:[#allocation104_spill] sm:$0xff] %v10653_v19  ;;  %5409 = vmatpush1.msra.mxu1 %v5292_v52  ;;  %4811 = vmatprep.subr.mxu0 %v4450_v27  ;;  %12449 = vst [vmem:[#allocation105_spill] sm:$0xff] %v10655_v56  ;;  %v10658_v44 = vadd.f32 %v3328_v7, %v10355_v11  ;;  %v5280_v52 = vld [vmem:[#allocation7 + $0x1a80] sm:$0xff]  ;;  %v4438_v27 = vld [vmem:[#allocation7 + $0x1678] sm:$0xff] }
 0x390   : > { %5410 = vmatprep.subr.mxu1 %v5289_v35  ;;  %4812 = vmatpush2.msra.mxu0 %v4449_v40  ;;  %v5277_v56 = vld [vmem:[#allocation7 + $0x1a68] sm:$0xff]  ;;  %v4437_v35 = vld [vmem:[#allocation7 + $0x1670] sm:$0xff]  ;;  %v5276_v11 = vld [vmem:[#allocation7 + $0x1a60] sm:$0xff] }
 0x391   : > { %5411 = vmatpush1.msra.mxu1 %v5288_v1  ;;  %4813 = vmatprep.subr.mxu0 %v4446_v13  ;;  %v3220_v59 = vpop.f32.mrf.mxu0  ;;  %v3333_v38 = vpop.f32.mrf.mxu1  ;;  %v4434_v7 = vld [vmem:[#allocation7 + $0x1658] sm:$0xff]  ;;  %v5273_v13 = vld [vmem:[#allocation7 + $0x1a48] sm:$0xff] }
 0x392   : > { %5412 = vmatprep.subr.mxu1 %v5285_v50  ;;  %4814 = vmatpush2.msra.mxu0 %v4445_v31  ;;  %v3334_v40 = vadd.f32 %v3333_v38, %v3220_v59  ;;  %v4433_v50 = vld [vmem:[#allocation7 + $0x1650] sm:$0xff] }
 0x393   : > { %5413 = vmatpush1.msra.mxu1 %v5284_v57  ;;  %4815 = vmatprep.subr.mxu0 %v4442_v48  ;;  %v10660_v19 = vpop.f32.mrf.mxu0  ;;  %v10662_v1 = vpop.f32.mrf.mxu1  ;;  %v5272_v57 = vld [vmem:[#allocation7 + $0x1a40] sm:$0xff]  ;;  %v4430_v48 = vld [vmem:[#allocation7 + $0x1638] sm:$0xff] }
 0x394   : > { %12450 = vst [vmem:[#allocation106_spill] sm:$0xff] %v10660_v19  ;;  %5414 = vmatprep.subr.mxu1 %v5281_v24  ;;  %4816 = vmatpush2.msra.mxu0 %v4441_v53  ;;  %12451 = vst [vmem:[#allocation107_spill] sm:$0xff] %v10662_v1  ;;  %v10665_v31 = vadd.f32 %v3334_v40, %v10363_v6  ;;  %v5269_v24 = vld [vmem:[#allocation7 + $0x1a28] sm:$0xff]  ;;  %v4429_v53 = vld [vmem:[#allocation7 + $0x1630] sm:$0xff] }
 0x395   : > { %5415 = vmatpush1.msra.mxu1 %v5280_v52  ;;  %4817 = vmatprep.subr.mxu0 %v4438_v27  ;;  %v5268_v1 = vld [vmem:[#allocation7 + $0x1a20] sm:$0xff]  ;;  %v4426_v52 = vld [vmem:[#allocation7 + $0x1618] sm:$0xff]  ;;  %v5265_v6 = vld [vmem:[#allocation7 + $0x1a08] sm:$0xff] }
 0x396   : > { %5416 = vmatprep.subr.mxu1 %v5277_v56  ;;  %4818 = vmatpush2.msra.mxu0 %v4437_v35  ;;  %v3226_v59 = vpop.f32.mrf.mxu0  ;;  %v3339_v38 = vpop.f32.mrf.mxu1  ;;  %v4425_v56 = vld [vmem:[#allocation7 + $0x1610] sm:$0xff]  ;;  %v5264_v40 = vld [vmem:[#allocation7 + $0x1a00] sm:$0xff] }
 0x397   : > { %5417 = vmatpush1.msra.mxu1 %v5276_v11  ;;  %4819 = vmatprep.subr.mxu0 %v4434_v7  ;;  %v3340_v27 = vadd.f32 %v3339_v38, %v3226_v59  ;;  %v5261_v7 = vld [vmem:[#allocation7 + $0x19e8] sm:$0xff]  ;;  %v5260_v59 = vld [vmem:[#allocation7 + $0x19e0] sm:$0xff] }
 0x398   : > { %5418 = vmatprep.subr.mxu1 %v5273_v13  ;;  %4820 = vmatpush2.msra.mxu0 %v4433_v50  ;;  %v10667_v19 = vpop.f32.mrf.mxu0  ;;  %v10669_v35 = vpop.f32.mrf.mxu1  ;;  %v5389_v50 = vld [vmem:[#allocation7 + $0x1de8] sm:$0xff] }
 0x399   : > { %12452 = vst [vmem:[#allocation108_spill] sm:$0xff] %v10667_v19  ;;  %5419 = vmatpush1.msra.mxu1 %v5272_v57  ;;  %4821 = vmatprep.subr.mxu0 %v4430_v48  ;;  %12453 = vst [vmem:[#allocation109_spill] sm:$0xff] %v10669_v35  ;;  %v10672_v11 = vadd.f32 %v3340_v27, %v10371_v55  ;;  %v5388_v48 = vld [vmem:[#allocation7 + $0x1de0] sm:$0xff]  ;;  %v5257_v38 = vld [vmem:[#allocation7 + $0x19c8] sm:$0xff] }
 0x39a   : > { %5420 = vmatprep.subr.mxu1 %v5269_v24  ;;  %4822 = vmatpush2.msra.mxu0 %v4429_v53  ;;  %v5086_v35 = vld [vmem:[#allocation2 + $0x160] sm:$0x3] }
 0x39b   : > { %5421 = vmatpush1.msra.mxu1 %v5268_v1  ;;  %4823 = vmatprep.subr.mxu0 %v4426_v52  ;;  %v3232_v13 = vpop.f32.mrf.mxu0  ;;  %v3345_v57 = vpop.f32.mrf.mxu1  ;;  %v5256_v1 = vld [vmem:[#allocation7 + $0x19c0] sm:$0xff] }
 0x39c   : > { %5422 = vmatprep.subr.mxu1 %v5265_v6  ;;  %4824 = vmatpush2.msra.mxu0 %v4425_v56  ;;  %v3346_v24 = vadd.f32 %v3345_v57, %v3232_v13  ;;  %v5385_v6 = vld [vmem:[#allocation7 + $0x1dc8] sm:$0xff]  ;;  %v5252_v56 = vld [vmem:[#allocation7 + $0x19a0] sm:$0xff] }
 0x39d   : > { %4825 = vmatprep.mubr.f32.mxu0 %v10483_v33  ;;  %5423 = vmatpush1.msra.mxu1 %v5264_v40  ;;  %v10675_v53 = vpop.f32.mrf.mxu0  ;;  %v10678_v55 = vpop.f32.mrf.mxu1  ;;  %v5253_v33 = vld [vmem:[#allocation7 + $0x19a8] sm:$0xff]  ;;  %v5384_v40 = vld [vmem:[#allocation7 + $0x1dc0] sm:$0xff] }
 0x39e   : > { %12454 = vst [vmem:[#allocation110_spill] sm:$0xff] %v10675_v53  ;;  %4826 = vmatmul.mubr.f32.vlgmr.msra.gmra.mxu0 %v10486_v5  ;;  %5424 = vmatprep.subr.mxu1 %v5261_v7  ;;  %12455 = vst [vmem:[#allocation111_spill] sm:$0xff] %v10678_v55  ;;  %v10681_v52 = vadd.f32 %v3346_v24, %v10381_v29  ;;  %v5249_v7 = vld [vmem:[#allocation7 + $0x1988] sm:$0xff]  ;;  %v5248_v29 = vld [vmem:[#allocation7 + $0x1980] sm:$0xff] }
 0x39f   : > { %5537 = vmatprep.subr.mxu0 %v5389_v50  ;;  %5425 = vmatpush1.msra.mxu1 %v5260_v59  ;;  %v5245_v50 = vld [vmem:[#allocation7 + $0x1968] sm:$0xff]  ;;  %v5244_v59 = vld [vmem:[#allocation7 + $0x1960] sm:$0xff] }
 0x3a0   : > { %5538 = vmatpush1.msra.mxu0 %v5388_v48  ;;  %5426 = vmatprep.subr.mxu1 %v5257_v38  ;;  %v3238_v27 = vpop.f32.mrf.mxu0  ;;  %v3351_v5 = vpop.f32.mrf.mxu1  ;;  %v5241_v57 = vld [vmem:[#allocation7 + $0x1948] sm:$0xff]  ;;  %v5236_v38 = vld [vmem:[#allocation7 + $0x1920] sm:$0xff] }
 0x3a1   : > { %4831 = vmatprep.mubr.f32.mxu0 %v10489_v26  ;;  %4944 = vmatprep.mubr.f32.mxu1 %v12377_v41  ;;  %v3352_v13 = vadd.f32 %v3351_v5, %v3238_v27  ;;  %v5237_v48 = vld [vmem:[#allocation7 + $0x1928] sm:$0xff]  ;;  %v5348_v5 = vld [vmem:[#allocation7 + $0x1ca0] sm:$0xff] }
 0x3a2   : > { %5427 = vmatpush1.msra.mxu1 %v5256_v1  ;;  %4832 = vmatmul.mubr.f32.gmra.mxu0 %v10507_v63  ;;  %v5381_v63 = vld [vmem:[#allocation7 + $0x1da8] sm:$0xff] }
 0x3a3   : > { %8730 = vmatmul.mubr.msk.f32.gmra.mxu1 %vm782_vm5, %v10514_v49  ;;  %5428 = vmatprep.subr.mxu1 %v5253_v33  ;;  %v10689_v26 = vadd.f32 %v3352_v13, %v10390_v32  ;;  %v5380_v49 = vld [vmem:[#allocation7 + $0x1da0] sm:$0xff]  ;;  %v5233_v24 = vld [vmem:[#allocation7 + $0x1908] sm:$0xff] }
 0x3a4   : > { %5539 = vmatprep.subr.mxu0 %v5385_v6  ;;  %5429 = vmatpush1.msra.mxu1 %v5252_v56  ;;  %v5240_v32 = vld [vmem:[#allocation7 + $0x1940] sm:$0xff]  ;;  %v5357_v1 = vld [vmem:[#allocation7 + $0x1ce8] sm:$0xff]  ;;  %v10704_v6 = vpop.f32.mrf.mxu0  ;;  %v10708_v56 = vpop.f32.mrf.mxu1 }
 0x3a5   : > { %5540 = vmatpush1.msra.mxu0 %v5384_v40  ;;  %5430 = vmatprep.subr.mxu1 %v5249_v7  ;;  %v5356_v33 = vld [vmem:[#allocation7 + $0x1ce0] sm:$0xff]  ;;  %v5353_v27 = vld [vmem:[#allocation7 + $0x1cc8] sm:$0xff]  ;;  %12456 = vst [vmem:[#allocation112_spill] sm:$0xff] %v10704_v6  ;;  %12457 = vst [vmem:[#allocation113_spill] sm:$0xff] %v10708_v56 }
 0x3a6   : > { %4837 = vmatprep.mubr.f32.mxu0 %v10517_v14  ;;  %4950 = vmatprep.mubr.f32.mxu1 %v12377_v41  ;;  %v5377_v14 = vld [vmem:[#allocation7 + $0x1d88] sm:$0xff]  ;;  %v3841_v40 = vpop.f32.mrf.mxu0  ;;  %v5080_v6 = vld [vmem:[#allocation2 + $0x130] sm:$0xfc] }
 0x3a7   : > { %5431 = vmatpush1.msra.mxu1 %v5248_v29  ;;  %4838 = vmatmul.mubr.f32.gmra.mxu0 %v10527_v43  ;;  %v5376_v43 = vld [vmem:[#allocation7 + $0x1d80] sm:$0xff]  ;;  %v5345_v7 = vld [vmem:[#allocation7 + $0x1c88] sm:$0xff] }
 0x3a8   : > { %8731 = vmatmul.mubr.msk.f32.gmra.mxu1 %vm782_vm5, %v10531_v61  ;;  %5432 = vmatprep.subr.mxu1 %v5245_v50  ;;  %v5232_v61 = vld [vmem:[#allocation7 + $0x1900] sm:$0xff]  ;;  %v10886_v55 = vld [vmem:[#allocation2 + $0x148] sm:$0xff] }
 0x3a9   : > { %5541 = vmatprep.subr.mxu0 %v5381_v63  ;;  %5433 = vmatpush1.msra.mxu1 %v5244_v59  ;;  %v5344_v50 = vld [vmem:[#allocation7 + $0x1c80] sm:$0xff]  ;;  %v5341_v63 = vld [vmem:[#allocation7 + $0x1c68] sm:$0xff]  ;;  %v10717_v59 = vpop.f32.mrf.mxu0 }
 0x3aa   : > { %5542 = vmatpush1.msra.mxu0 %v5380_v49  ;;  %5434 = vmatprep.subr.mxu1 %v5241_v57  ;;  %12459 = vst [vmem:[#allocation115_spill] sm:$0xff] %v10717_v59  ;;  %v5340_v49 = vld [vmem:[#allocation7 + $0x1c60] sm:$0xff]  ;;  %v5069_v59 = vld [vmem:[#allocation2 + $0xd8] sm:$0xfc] }
 0x3ab   : > { %4843 = vmatprep.mubr.f32.mxu0 %v10539_v51  ;;  %4956 = vmatprep.mubr.f32.mxu1 %v12377_v41  ;;  %v5373_v51 = vld [vmem:[#allocation7 + $0x1d68] sm:$0xff] }
 0x3ac   : > { %5435 = vmatpush1.msra.mxu1 %v5240_v32  ;;  %4844 = vmatmul.mubr.f32.gmra.mxu0 %v10548_v47  ;;  %v5372_v47 = vld [vmem:[#allocation7 + $0x1d60] sm:$0xff] }
 0x3ad   : > { %8732 = vmatmul.mubr.msk.f32.gmra.mxu1 %vm782_vm5, %v10553_v21  ;;  %5436 = vmatprep.subr.mxu1 %v5237_v48  ;;  %v5352_v21 = vld [vmem:[#allocation7 + $0x1cc0] sm:$0xff]  ;;  %v5337_v48 = vld [vmem:[#allocation7 + $0x1c48] sm:$0xff] }
 0x3ae   : > { %5543 = vmatprep.subr.mxu0 %v5377_v14  ;;  %5437 = vmatpush1.msra.mxu1 %v5236_v38  ;;  %v5364_v32 = vld [vmem:[#allocation7 + $0x1d20] sm:$0xff]  ;;  %v5053_v38 = vld [vmem:[#allocation2 + $0x58] sm:$0xfc] }
 0x3af   : > { %5544 = vmatpush1.msra.mxu0 %v5376_v43  ;;  %5438 = vmatprep.subr.mxu1 %v5233_v24  ;;  %v5336_v24 = vld [vmem:[#allocation7 + $0x1c40] sm:$0xff] }
 0x3b0   : > { %4849 = vmatprep.mubr.f32.mxu0 %v10558_v60  ;;  %4962 = vmatprep.mubr.f32.mxu1 %v12377_v41  ;;  %v5349_v60 = vld [vmem:[#allocation7 + $0x1ca8] sm:$0xff] }
 0x3b1   : > { %5439 = vmatpush1.msra.mxu1 %v5232_v61  ;;  %4850 = vmatmul.mubr.f32.gmra.mxu0 %v10564_v17  ;;  %v5369_v17 = vld [vmem:[#allocation7 + $0x1d48] sm:$0xff] }
 0x3b2   : > { %8733 = vmatmul.mubr.msk.f32.gmra.mxu1 %vm782_vm5, %v10568_v28  ;;  %5440 = vmatprep.subr.mxu1 %v5357_v1  ;;  %v5368_v28 = vld [vmem:[#allocation7 + $0x1d40] sm:$0xff] }
 0x3b3   : > { %5545 = vmatprep.subr.mxu0 %v5373_v51  ;;  %5441 = vmatpush2.msra.mxu1 %v5356_v33  ;;  %v5332_v33 = vld [vmem:[#allocation7 + $0x1c20] sm:$0xff] }
 0x3b4   : > { %5546 = vmatpush1.msra.mxu0 %v5372_v47  ;;  %5442 = vmatprep.subr.mxu1 %v5353_v27  ;;  %v5161_v47 = vrot.slane %v5053_v38, 2  ;;  %v5317_v38 = vld [vmem:[#allocation7 + $0x1ba8] sm:$0xff] }
 0x3b5   : > { %4855 = vmatprep.mubr.f32.mxu0 %v10577_v36  ;;  %4968 = vmatprep.mubr.f32.mxu1 %v12377_v41 }
 0x3b6   : > { %5443 = vmatpush2.msra.mxu1 %v5352_v21  ;;  %4856 = vmatmul.mubr.f32.gmra.mxu0 %v10582_v54  ;;  %v3728_v13 = vpop.f32.mrf.mxu1 }
 0x3b7   : > { %8734 = vmatmul.mubr.msk.f32.gmra.mxu1 %vm782_vm5, %v10589_v45  ;;  %5444 = vmatprep.subr.mxu1 %v5349_v60  ;;  %v3842_v29 = vadd.f32 %v3841_v40, %v3728_v13  ;;  %v5365_v45 = vld [vmem:[#allocation7 + $0x1d28] sm:$0xff]  ;;  %v5360_v60 = vld [vmem:[#allocation7 + $0x1d00] sm:$0xff] }
 0x3b8   : > { %5547 = vmatprep.subr.mxu0 %v5369_v17  ;;  %5445 = vmatpush2.msra.mxu1 %v5348_v5  ;;  %v10715_v36 = vpop.f32.mrf.mxu1  ;;  %v5329_v17 = vld [vmem:[#allocation7 + $0x1c08] sm:$0xff] }
 0x3b9   : > { %12458 = vst [vmem:[#allocation114_spill] sm:$0xff] %v10715_v36  ;;  %5548 = vmatpush1.msra.mxu0 %v5368_v28  ;;  %5446 = vmatprep.subr.mxu1 %v5345_v7  ;;  %v10720_v54 = vadd.f32 %v3842_v29, %v10421_v23  ;;  %v10727_v23 = vld [vmem:[#allocation2 + $0x70] sm:$0xff]  ;;  %v5295_v28 = vld [vmem:[#allocation7 + $0x1af8] sm:$0xff]  ;;  %v5325_v7 = vld [vmem:[#allocation7 + $0x1be8] sm:$0xff] }
 0x3ba   : > { %4861 = vmatprep.mubr.f32.mxu0 %v10602_v34  ;;  %4974 = vmatprep.mubr.f32.mxu1 %v12377_v41  ;;  %v3734_v57 = vpop.f32.mrf.mxu1  ;;  %v3847_v14 = vpop.f32.mrf.mxu0  ;;  %v12331_v27 = vrot.slane %v10727_v23, 2  ;;  %v5246_v36 = vld [vmem:[#allocation7 + $0x1970] sm:$0xff] }
 0x3bb   : > { %5447 = vmatpush2.msra.mxu1 %v5344_v50  ;;  %4862 = vmatmul.mubr.f32.gmra.mxu0 %v10605_v12  ;;  %v3848_v43 = vadd.f32 %v3847_v14, %v3734_v57  ;;  %v5333_v12 = vld [vmem:[#allocation7 + $0x1c28] sm:$0xff]  ;;  %v5290_v14 = vld [vmem:[#allocation7 + $0x1ad0] sm:$0xff] }
 0x3bc   : > { %8735 = vmatmul.mubr.msk.f32.gmra.mxu1 %vm782_vm5, %v10609_v16  ;;  %5448 = vmatprep.subr.mxu1 %v5341_v63  ;;  %v10729_v34 = vpop.f32.mrf.mxu1  ;;  %v10731_v61 = vpop.f32.mrf.mxu0  ;;  %v5361_v16 = vld [vmem:[#allocation7 + $0x1d08] sm:$0xff]  ;;  %v10752_v29 = vsel %vm2650_vm9, %v5161_v47, %v12331_v27  ;;  %v5294_v63 = vld [vmem:[#allocation7 + $0x1af0] sm:$0xff]  ;;  %v5283_v47 = vld [vmem:[#allocation7 + $0x1a98] sm:$0xff] }
 0x3bd   : > { %12460 = vst [vmem:[#allocation116_spill] sm:$0xff] %v10729_v34  ;;  %5549 = vmatprep.subr.mxu0 %v5365_v45  ;;  %5449 = vmatpush2.msra.mxu1 %v5340_v49  ;;  %12461 = vst [vmem:[#allocation117_spill] sm:$0xff] %v10731_v61  ;;  %v10734_v1 = vadd.f32 %v3848_v43, %v10433_v2  ;;  %v5321_v45 = vld [vmem:[#allocation7 + $0x1bc8] sm:$0xff]  ;;  %v5066_v61 = vld [vmem:[#allocation2 + $0xc0] sm:$0x3] }
 0x3be   : > { %5550 = vmatpush1.msra.mxu0 %v5364_v32  ;;  %5450 = vmatprep.subr.mxu1 %v5337_v48  ;;  %v3740_v51 = vpop.f32.mrf.mxu1  ;;  %v5320_v32 = vld [vmem:[#allocation7 + $0x1bc0] sm:$0xff] }
 0x3bf   : > { %4867 = vmatprep.mubr.f32.mxu0 %v10623_v39  ;;  %4980 = vmatprep.mubr.f32.mxu1 %v12377_v41  ;;  %v3853_v21 = vpop.f32.mrf.mxu0  ;;  %v5328_v39 = vld [vmem:[#allocation7 + $0x1c00] sm:$0xff] }
 0x3c0   : > { %5451 = vmatpush2.msra.mxu1 %v5336_v24  ;;  %4868 = vmatmul.mubr.f32.gmra.mxu0 %v10628_v8  ;;  %v3854_v5 = vadd.f32 %v3853_v21, %v3740_v51  ;;  %v10740_v40 = vpop.f32.mrf.mxu1  ;;  %v5316_v51 = vld [vmem:[#allocation7 + $0x1ba0] sm:$0xff]  ;;  %v5313_v21 = vld [vmem:[#allocation7 + $0x1b88] sm:$0xff] }
 0x3c1   : > { %12462 = vst [vmem:[#allocation118_spill] sm:$0xff] %v10740_v40  ;;  %8736 = vmatmul.mubr.msk.f32.gmra.mxu1 %vm782_vm5, %v10634_v3  ;;  %5452 = vmatprep.subr.mxu1 %v5333_v12  ;;  %v10744_v2 = vpop.f32.mrf.mxu0  ;;  %v5324_v3 = vld [vmem:[#allocation7 + $0x1be0] sm:$0xff]  ;;  %v5287_v12 = vld [vmem:[#allocation7 + $0x1ab8] sm:$0xff] }
 0x3c2   : > { %12463 = vst [vmem:[#allocation119_spill] sm:$0xff] %v10744_v2  ;;  %5551 = vmatprep.subr.mxu0 %v5361_v16  ;;  %5453 = vmatpush2.msra.mxu1 %v5332_v33  ;;  %v10747_v13 = vadd.f32 %v3854_v5, %v10446_v25  ;;  %v3746_v8 = vpop.f32.mrf.mxu1  ;;  %v5291_v25 = vld [vmem:[#allocation7 + $0x1ad8] sm:$0xff]  ;;  %v5286_v33 = vld [vmem:[#allocation7 + $0x1ab0] sm:$0xff]  ;;  %v10793_v2 = vld [vmem:[#allocation2 + $0xa8] sm:$0xff] }
 0x3c3   : > { %5552 = vmatpush1.msra.mxu0 %v5360_v60  ;;  %5454 = vmatprep.subr.mxu1 %v5329_v17  ;;  %v3859_v50 = vpop.f32.mrf.mxu0  ;;  %v5282_v5 = vld [vmem:[#allocation7 + $0x1a90] sm:$0xff] }
 0x3c4   : > { %5455 = vmatpush2.msra.mxu1 %v5328_v39  ;;  %5585 = vmatprep.mubr.f32.mxu0 %v12377_v41  ;;  %v3860_v49 = vadd.f32 %v3859_v50, %v3746_v8  ;;  %v10755_v57 = vpop.f32.mrf.mxu1  ;;  %v5312_v39 = vld [vmem:[#allocation7 + $0x1b80] sm:$0xff]  ;;  %v5278_v8 = vld [vmem:[#allocation7 + $0x1a70] sm:$0xff] }
 0x3c5   : > { %12464 = vst [vmem:[#allocation120_spill] sm:$0xff] %v10755_v57  ;;  %5634 = vmatprep.subr.mxu0 %v5295_v28  ;;  %5456 = vmatprep.subr.mxu1 %v5325_v7  ;;  %v10757_v48 = vpop.f32.mrf.mxu0  ;;  %v5309_v7 = vld [vmem:[#allocation7 + $0x1b68] sm:$0xff] }
 0x3c6   : > { %12465 = vst [vmem:[#allocation121_spill] sm:$0xff] %v10757_v48  ;;  %8737 = vmatmul.mubr.msk.f32.vlgmr.msra.gmra.mxu0 %vm782_vm5, %v10752_v29  ;;  %5457 = vmatpush2.msra.mxu1 %v5324_v3  ;;  %v10762_v43 = vadd.f32 %v3860_v49, %v10461_v42  ;;  %v3752_v24 = vpop.f32.mrf.mxu1  ;;  %v5279_v42 = vld [vmem:[#allocation7 + $0x1a78] sm:$0xff]  ;;  %v5308_v3 = vld [vmem:[#allocation7 + $0x1b60] sm:$0xff]  ;;  %v5055_v49 = vld [vmem:[#allocation2 + $0x68] sm:$0xff] }
 0x3c7   : > { %5635 = vmatpush1.msra.mxu0 %v5294_v63  ;;  %5458 = vmatprep.subr.mxu1 %v5321_v45  ;;  %v3865_v16 = vpop.f32.mrf.mxu0  ;;  %v5305_v63 = vld [vmem:[#allocation7 + $0x1b48] sm:$0xff]  ;;  %v5052_v45 = vld [vmem:[#allocation2 + $0x50] sm:$0xfc] }
 0x3c8   : > { %5636 = vmatprep.subr.mxu0 %v5291_v25  ;;  %5459 = vmatpush2.msra.mxu1 %v5320_v32  ;;  %v3866_v60 = vadd.f32 %v3865_v16, %v3752_v24  ;;  %v10764_v17 = vpop.f32.mrf.mxu1  ;;  %v5051_v25 = vld [vmem:[#allocation2 + $0x48] sm:$0xfc]  ;;  %v10771_v32 = vld [vmem:[#allocation2 + $0x60] sm:$0xff]  ;;  %v5275_v24 = vld [vmem:[#allocation7 + $0x1a58] sm:$0xff] }
 0x3c9   : > { %12466 = vst [vmem:[#allocation122_spill] sm:$0xff] %v10764_v17  ;;  %5637 = vmatpush1.msra.mxu0 %v5290_v14  ;;  %5460 = vmatprep.subr.mxu1 %v5317_v38  ;;  %v10766_v28 = vpop.f32.mrf.mxu0  ;;  %v5058_v14 = vld [vmem:[#allocation2 + $0x80] sm:$0x3]  ;;  %v5271_v16 = vld [vmem:[#allocation7 + $0x1a38] sm:$0xff] }
 0x3ca   : > { %12467 = vst [vmem:[#allocation123_spill] sm:$0xff] %v10766_v28  ;;  %5638 = vmatprep.subr.mxu0 %v5287_v12  ;;  %5461 = vmatpush2.msra.mxu1 %v5316_v51  ;;  %v10769_v50 = vadd.f32 %v3866_v60, %v10468_v9  ;;  %v5304_v12 = vld [vmem:[#allocation7 + $0x1b40] sm:$0xff]  ;;  %v5274_v9 = vld [vmem:[#allocation7 + $0x1a50] sm:$0xff]  ;;  %v5159_v60 = vrot.slane %v5055_v49, 2  ;;  %v5267_v17 = vld [vmem:[#allocation7 + $0x1a18] sm:$0xff]  ;;  %v5166_v48 = vrot.slane %v5058_v14, 2 }
 0x3cb   : > { %5639 = vmatpush1.msra.mxu0 %v5286_v33  ;;  %5462 = vmatprep.subr.mxu1 %v5313_v21  ;;  %v5301_v33 = vld [vmem:[#allocation7 + $0x1b28] sm:$0xff]  ;;  %v5158_v21 = vrot.slane %v5052_v45, 2  ;;  %v5300_v28 = vld [vmem:[#allocation7 + $0x1b20] sm:$0xff]  ;;  %v5057_v45 = vld [vmem:[#allocation2 + $0x78] sm:$0x3] }
 0x3cc   : > { %5640 = vmatprep.subr.mxu0 %v5283_v47  ;;  %5463 = vmatpush2.msra.mxu1 %v5312_v39  ;;  %v3758_v38 = vpop.f32.mrf.mxu1  ;;  %v3871_v51 = vpop.f32.mrf.mxu0  ;;  %v5270_v39 = vld [vmem:[#allocation7 + $0x1a30] sm:$0xff] }
 0x3cd   : > { %5641 = vmatpush1.msra.mxu0 %v5282_v5  ;;  %5464 = vmatprep.subr.mxu1 %v5309_v7  ;;  %v3872_v27 = vadd.f32 %v3871_v51, %v3758_v38  ;;  %v5155_v5 = vrot.slane %v5051_v25, 2  ;;  %v5156_v7 = vrot.slane %v10771_v32, 2  ;;  %v10781_v38 = vld [vmem:[#allocation2 + $0xb0] sm:$0xff]  ;;  %v10784_v32 = vsel %vm2650_vm9, %v5158_v21, %v5159_v60 }
 0x3ce   : > { %5642 = vmatprep.subr.mxu0 %v5279_v42  ;;  %5465 = vmatpush2.msra.mxu1 %v5308_v3  ;;  %v10773_v47 = vpop.f32.mrf.mxu1  ;;  %v10776_v57 = vpop.f32.mrf.mxu0  ;;  %v5297_v42 = vld [vmem:[#allocation7 + $0x1b08] sm:$0xff]  ;;  %v5296_v3 = vld [vmem:[#allocation7 + $0x1b00] sm:$0xff]  ;;  %v5266_v25 = vld [vmem:[#allocation7 + $0x1a10] sm:$0xff]  ;;  %v5164_v51 = vrot.slane %v5057_v45, 2 }
 0x3cf   : > { %12468 = vst [vmem:[#allocation124_spill] sm:$0xff] %v10773_v47  ;;  %5643 = vmatpush1.msra.mxu0 %v5278_v8  ;;  %5466 = vmatprep.subr.mxu1 %v5305_v63  ;;  %12469 = vst [vmem:[#allocation125_spill] sm:$0xff] %v10776_v57  ;;  %v10779_v49 = vadd.f32 %v3872_v27, %v10478_v18  ;;  %v5059_v8 = vld [vmem:[#allocation2 + $0x88] sm:$0x3]  ;;  %v5061_v63 = vld [vmem:[#allocation2 + $0x98] sm:$0xfc]  ;;  %v10790_v27 = vsel %vm2650_vm9, %v5159_v60, %v5166_v48 }
 0x3d0   : > { %5644 = vmatprep.subr.mxu0 %v5275_v24  ;;  %5467 = vmatpush2.msra.mxu1 %v5304_v12  ;;  %v5263_v24 = vld [vmem:[#allocation7 + $0x19f8] sm:$0xff]  ;;  %v10787_v12 = vsel %vm2650_vm9, %v5155_v5, %v5156_v7  ;;  %v5262_v18 = vld [vmem:[#allocation7 + $0x19f0] sm:$0xff]  ;;  %v5062_v48 = vld [vmem:[#allocation2 + $0xa0] sm:$0xfc] }
 0x3d1   : > { %5645 = vmatpush1.msra.mxu0 %v5274_v9  ;;  %5468 = vmatprep.subr.mxu1 %v5301_v33  ;;  %v5174_v33 = vrot.slane %v10781_v38, 2  ;;  %v5060_v21 = vld [vmem:[#allocation2 + $0x90] sm:$0xfc]  ;;  %v5259_v5 = vld [vmem:[#allocation7 + $0x19d8] sm:$0xff] }
 0x3d2   : > { %5646 = vmatprep.subr.mxu0 %v5271_v16  ;;  %5469 = vmatpush2.msra.mxu1 %v5300_v28  ;;  %v3764_v14 = vpop.f32.mrf.mxu1  ;;  %v3877_v9 = vpop.f32.mrf.mxu0  ;;  %v5168_v28 = vrot.slane %v5059_v8, 2  ;;  %v5173_v16 = vrot.slane %v5061_v63, 2  ;;  %v10798_v60 = vld [vmem:[#allocation2 + $0xb8] sm:$0xff] }
 0x3d3   : > { %5647 = vmatpush1.msra.mxu0 %v5270_v39  ;;  %5470 = vmatprep.subr.mxu1 %v5297_v42  ;;  %v3878_v39 = vadd.f32 %v3877_v9, %v3764_v14  ;;  %v5391_v8 = vld [vmem:[#allocation7 + $0x1df8] sm:$0xff]  ;;  %v5170_v14 = vrot.slane %v5060_v21, 2  ;;  %v5171_v9 = vrot.slane %v10793_v2, 2 }
 0x3d4   : > { %5648 = vmatprep.subr.mxu0 %v5267_v17  ;;  %5471 = vmatpush2.msra.mxu1 %v5296_v3  ;;  %v10795_v42 = vpop.f32.mrf.mxu1  ;;  %v10800_v45 = vpop.f32.mrf.mxu0  ;;  %v5258_v17 = vld [vmem:[#allocation7 + $0x19d0] sm:$0xff]  ;;  %v5067_v3 = vld [vmem:[#allocation2 + $0xc8] sm:$0x3]  ;;  %v5255_v38 = vld [vmem:[#allocation7 + $0x19b8] sm:$0xff] }
 0x3d5   : > { %12470 = vst [vmem:[#allocation126_spill] sm:$0xff] %v10795_v42  ;;  %5649 = vmatpush1.msra.mxu0 %v5266_v25  ;;  %5472 = vmatprep.mubr.f32.mxu1 %v10784_v32  ;;  %12471 = vst [vmem:[#allocation127_spill] sm:$0xff] %v10800_v45  ;;  %v10804_v63 = vadd.f32 %v3878_v39, %v10503_v20  ;;  %v10808_v25 = vsel %vm2650_vm9, %v5156_v7, %v5164_v51  ;;  %v5177_v39 = vrot.slane %v10798_v60, 2  ;;  %v5254_v51 = vld [vmem:[#allocation7 + $0x19b0] sm:$0xff]  ;;  %v5251_v21 = vld [vmem:[#allocation7 + $0x1998] sm:$0xff] }
 0x3d6   : > { %5650 = vmatprep.subr.mxu0 %v5263_v24  ;;  %5473 = vmatmul.mubr.f32.vlgmr.msra.gmra.mxu1 %v10787_v12  ;;  %v12472_v24 = vrot.slane %v10727_v23, 2  ;;  %v10818_v20 = vsel %vm2650_vm9, %v5173_v16, %v5174_v33  ;;  %v5181_v2 = vrot.slane %v5067_v3, 2  ;;  %v5070_v23 = vld [vmem:[#allocation2 + $0xe0] sm:$0xfc]  ;;  %v5390_v16 = vld [vmem:[#allocation7 + $0x1df0] sm:$0xff]  ;;  %v10828_v60 = vsel %vm2650_vm9, %v5170_v14, %v5171_v9  ;;  %v5247_v3 = vld [vmem:[#allocation7 + $0x1978] sm:$0xff] }
 0x3d7   : > { %5651 = vmatpush1.msra.mxu0 %v5262_v18  ;;  %5478 = vmatprep.mubr.f32.mxu1 %v10790_v27  ;;  %v5176_v18 = vrot.slane %v5062_v48, 2  ;;  %v5250_v48 = vld [vmem:[#allocation7 + $0x1990] sm:$0xff]  ;;  %v5071_v45 = vld [vmem:[#allocation2 + $0xe8] sm:$0xfc]  ;;  %v10843_v42 = vld [vmem:[#allocation2 + $0x100] sm:$0xff] }
 0x3d8   : > { %5652 = vmatprep.subr.mxu0 %v5259_v5  ;;  %5591 = vmatprep.mubr.f32.mxu0 %v12377_v41  ;;  %v10815_v40 = vsel %vm2650_vm9, %v12472_v24, %v5168_v28  ;;  %v3770_v7 = vpop.f32.mrf.mxu1  ;;  %v5068_v5 = vld [vmem:[#allocation2 + $0xd0] sm:$0x3]  ;;  %v3883_v34 = vpop.f32.mrf.mxu0  ;;  %v10822_v28 = vld [vmem:[#allocation2 + $0xf8] sm:$0xff]  ;;  %v10840_v14 = vsel %vm2650_vm9, %v5174_v33, %v5181_v2  ;;  %v5185_v33 = vrot.slane %v5069_v59, 2  ;;  %v5075_v59 = vld [vmem:[#allocation2 + $0x108] sm:$0x3] }
 0x3d9   : > { %5653 = vmatpush1.msra.mxu0 %v5258_v17  ;;  %5763 = vmatprep.subr.mxu1 %v5391_v8  ;;  %v3884_v24 = vadd.f32 %v3883_v34, %v3770_v7  ;;  %v5179_v17 = vrot.slane %v5066_v61, 2  ;;  %v10832_v8 = vsel %vm2650_vm9, %v5176_v18, %v5177_v39  ;;  %v10834_v34 = vld [vmem:[#allocation2 + $0xf0] sm:$0xff]  ;;  %v5188_v61 = vrot.slane %v5070_v23, 2  ;;  %v5243_v18 = vld [vmem:[#allocation7 + $0x1958] sm:$0xff] }
 0x3da   : > { %5654 = vmatprep.subr.mxu0 %v5255_v38  ;;  %5479 = vmatmul.mubr.f32.gmra.mxu1 %v10808_v25  ;;  %v5183_v38 = vrot.slane %v5068_v5, 2  ;;  %v5186_v2 = vrot.slane %v10834_v34, 2  ;;  %v5239_v5 = vld [vmem:[#allocation7 + $0x1938] sm:$0xff]  ;;  %v5358_v34 = vld [vmem:[#allocation7 + $0x1cf0] sm:$0xff] }
 0x3db   : > { %8738 = vmatmul.mubr.msk.f32.gmra.mxu0 %vm782_vm5, %v10815_v40  ;;  %5484 = vmatprep.mubr.f32.mxu1 %v10818_v20  ;;  %v10837_v7 = vadd.f32 %v3884_v24, %v10536_v30  ;;  %v5242_v30 = vld [vmem:[#allocation7 + $0x1950] sm:$0xff]  ;;  %v5351_v57 = vld [vmem:[#allocation7 + $0x1cb8] sm:$0xff] }
 0x3dc   : > { %5655 = vmatpush1.msra.mxu0 %v5254_v51  ;;  %5597 = vmatprep.mubr.f32.mxu0 %v12377_v41  ;;  %v5189_v51 = vrot.slane %v10822_v28, 2  ;;  %v10854_v23 = vsel %vm2650_vm9, %v5177_v39, %v5183_v38  ;;  %v5191_v28 = vrot.slane %v5071_v45, 2  ;;  %v5076_v24 = vld [vmem:[#allocation2 + $0x110] sm:$0x3] }
 0x3dd   : > { %5656 = vmatprep.subr.mxu0 %v5251_v21  ;;  %5764 = vmatpush1.msra.mxu1 %v5390_v16  ;;  %v10849_v21 = vsel %vm2650_vm9, %v5171_v9, %v5179_v17  ;;  %v5192_v16 = vrot.slane %v10843_v42, 2  ;;  %v5234_v45 = vld [vmem:[#allocation7 + $0x1910] sm:$0xff]  ;;  %v10865_v42 = vsel %vm2650_vm9, %v5185_v33, %v5186_v2  ;;  %v5196_v39 = vrot.slane %v5076_v24, 2  ;;  %v5077_v17 = vld [vmem:[#allocation2 + $0x118] sm:$0x3] }
 0x3de   : > { %5657 = vmatpush1.msra.mxu0 %v5250_v48  ;;  %5485 = vmatmul.mubr.f32.gmra.mxu1 %v10828_v60  ;;  %v5238_v48 = vld [vmem:[#allocation7 + $0x1930] sm:$0xff]  ;;  %v10859_v9 = vsel %vm2650_vm9, %v5188_v61, %v5189_v51  ;;  %v5355_v61 = vld [vmem:[#allocation7 + $0x1cd8] sm:$0xff]  ;;  %v5079_v24 = vld [vmem:[#allocation2 + $0x128] sm:$0xfc] }
 0x3df   : > { %5658 = vmatprep.subr.mxu0 %v5247_v3  ;;  %8739 = vmatmul.mubr.msk.f32.gmra.mxu0 %vm782_vm5, %v10832_v8  ;;  %v5359_v3 = vld [vmem:[#allocation7 + $0x1cf8] sm:$0xff]  ;;  %v10869_v38 = vsel %vm2650_vm9, %v5191_v28, %v5192_v16  ;;  %v5386_v33 = vld [vmem:[#allocation7 + $0x1dd0] sm:$0xff] }
 0x3e0   : > { %5659 = vmatpush1.msra.mxu0 %v5246_v36  ;;  %5490 = vmatprep.mubr.f32.mxu1 %v10840_v14  ;;  %v5235_v36 = vld [vmem:[#allocation7 + $0x1918] sm:$0xff]  ;;  %v5354_v28 = vld [vmem:[#allocation7 + $0x1cd0] sm:$0xff] }
 0x3e1   : > { %5660 = vmatprep.subr.mxu0 %v5243_v18  ;;  %5603 = vmatprep.mubr.f32.mxu0 %v12377_v41  ;;  %v5387_v18 = vld [vmem:[#allocation7 + $0x1dd8] sm:$0xff] }
 0x3e2   : > { %5661 = vmatpush1.msra.mxu0 %v5242_v30  ;;  %5491 = vmatmul.mubr.f32.gmra.mxu1 %v10849_v21  ;;  %v5194_v30 = vrot.slane %v5075_v59, 2  ;;  %v5078_v59 = vld [vmem:[#allocation2 + $0x120] sm:$0xfc] }
 0x3e3   : > { %5662 = vmatprep.subr.mxu0 %v5239_v5  ;;  %8740 = vmatmul.mubr.msk.f32.gmra.mxu0 %vm782_vm5, %v10854_v23  ;;  %v5198_v5 = vrot.slane %v5077_v17, 2  ;;  %v5383_v17 = vld [vmem:[#allocation7 + $0x1db8] sm:$0xff] }
 0x3e4   : > { %5663 = vmatpush1.msra.mxu0 %v5238_v48  ;;  %5496 = vmatprep.mubr.f32.mxu1 %v10859_v9  ;;  %v10873_v48 = vld [vmem:[#allocation2 + $0x140] sm:$0xff]  ;;  %v10883_v47 = vsel %vm2650_vm9, %v5186_v2, %v5194_v30  ;;  %v5200_v2 = vrot.slane %v5078_v59, 2  ;;  %v10894_v30 = vpop.f32.mrf.mxu1 }
 0x3e5   : > { %5664 = vmatprep.subr.mxu0 %v5235_v36  ;;  %5609 = vmatprep.mubr.f32.mxu0 %v12377_v41  ;;  %v10878_v36 = vsel %vm2650_vm9, %v5189_v51, %v5196_v39  ;;  %v5204_v56 = vrot.slane %v10873_v48, 2  ;;  %v10890_v51 = vsel %vm2650_vm9, %v5192_v16, %v5198_v5  ;;  %v5382_v39 = vld [vmem:[#allocation7 + $0x1db0] sm:$0xff]  ;;  %12473 = vst [vmem:[#allocation128_spill] sm:$0xff] %v10894_v30  ;;  %v5206_v48 = vrot.slane %v5080_v6, 2  ;;  %v5085_v5 = vld [vmem:[#allocation2 + $0x158] sm:$0x3] }
 0x3e6   : > { %5665 = vmatpush1.msra.mxu0 %v5234_v45  ;;  %5497 = vmatmul.mubr.f32.gmra.mxu1 %v10865_v42  ;;  %v10880_v45 = vld [vmem:[#allocation2 + $0x138] sm:$0xff]  ;;  %v5207_v16 = vrot.slane %v10886_v55, 2  ;;  %v5084_v30 = vld [vmem:[#allocation2 + $0x150] sm:$0x3] }
 0x3e7   : > { %5666 = vmatprep.subr.mxu0 %v5359_v3  ;;  %8741 = vmatmul.mubr.msk.f32.gmra.mxu0 %vm782_vm5, %v10869_v38  ;;  %v5203_v3 = vrot.slane %v5079_v24, 2  ;;  %v5378_v24 = vld [vmem:[#allocation7 + $0x1d90] sm:$0xff]  ;;  %v5375_v55 = vld [vmem:[#allocation7 + $0x1d78] sm:$0xff] }
 0x3e8   : > { %5667 = vmatpush2.msra.mxu0 %v5358_v34  ;;  %5765 = vmatprep.subr.mxu1 %v5387_v18  ;;  %v5350_v34 = vld [vmem:[#allocation7 + $0x1cb0] sm:$0xff]  ;;  %v5201_v18 = vrot.slane %v10880_v45, 2  ;;  %v4067_v45 = vpop.f32.mrf.mxu1 }
 0x3e9   : > { %5668 = vmatprep.subr.mxu0 %v5355_v61  ;;  %5766 = vmatpush1.msra.mxu1 %v5386_v33  ;;  %v5379_v61 = vld [vmem:[#allocation7 + $0x1d98] sm:$0xff]  ;;  %v10903_v59 = vsel %vm2650_vm9, %v5203_v3, %v5204_v56  ;;  %v10910_v3 = vsel %vm2650_vm9, %v5206_v48, %v5207_v16  ;;  %v5370_v48 = vld [vmem:[#allocation7 + $0x1d50] sm:$0xff] }
 0x3ea   : > { %5669 = vmatpush2.msra.mxu0 %v5354_v28  ;;  %5502 = vmatprep.mubr.f32.mxu1 %v10878_v36  ;;  %v5347_v33 = vld [vmem:[#allocation7 + $0x1c98] sm:$0xff]  ;;  %v10898_v28 = vpop.f32.mrf.mxu0  ;;  %v10906_v6 = vsel %vm2650_vm9, %v5200_v2, %v5201_v18 }
 0x3eb   : > { %5615 = vmatprep.mubr.f32.mxu0 %v12377_v41  ;;  %5670 = vmatprep.subr.mxu0 %v5351_v57  ;;  %12474 = vst [vmem:[#allocation129_spill] sm:$0xff] %v10898_v28  ;;  %v5346_v57 = vld [vmem:[#allocation7 + $0x1c90] sm:$0xff]  ;;  %v5211_v28 = vrot.slane %v5085_v5, 2  ;;  %v10918_v5 = vpop.f32.mrf.mxu1 }
 0x3ec   : > { %5767 = vmatprep.subr.mxu1 %v5383_v17  ;;  %5503 = vmatmul.mubr.f32.gmra.mxu1 %v10883_v47  ;;  %v5343_v17 = vld [vmem:[#allocation7 + $0x1c78] sm:$0xff]  ;;  %12476 = vst [vmem:[#allocation131_spill] sm:$0xff] %v10918_v5 }
 0x3ed   : > { %8742 = vmatmul.mubr.msk.f32.gmra.mxu0 %vm782_vm5, %v10890_v51  ;;  %5768 = vmatpush1.msra.mxu1 %v5382_v39  ;;  %v3954_v53 = vpop.f32.mrf.mxu0  ;;  %v5374_v39 = vld [vmem:[#allocation7 + $0x1d70] sm:$0xff]  ;;  %v10924_v10 = vsel %vm2650_vm9, %v5204_v56, %v5211_v28  ;;  %v5367_v5 = vld [vmem:[#allocation7 + $0x1d38] sm:$0xff] }
 0x3ee   : > { %5671 = vmatpush2.msra.mxu0 %v5350_v34  ;;  %5769 = vmatprep.subr.mxu1 %v5379_v61  ;;  %v4068_v19 = vadd.f32 %v4067_v45, %v3954_v53  ;;  %v5342_v61 = vld [vmem:[#allocation7 + $0x1c70] sm:$0xff]  ;;  %v5339_v53 = vld [vmem:[#allocation7 + $0x1c58] sm:$0xff] }
 0x3ef   : > { %5672 = vmatprep.subr.mxu0 %v5347_v33  ;;  %5770 = vmatpush1.msra.mxu1 %v5378_v24  ;;  %v10912_v34 = vpop.f32.mrf.mxu0  ;;  %v5371_v33 = vld [vmem:[#allocation7 + $0x1d58] sm:$0xff]  ;;  %v5209_v24 = vrot.slane %v5084_v30, 2  ;;  %v5366_v28 = vld [vmem:[#allocation7 + $0x1d30] sm:$0xff] }
 0x3f0   : > { %5673 = vmatpush2.msra.mxu0 %v5346_v57  ;;  %5508 = vmatprep.mubr.f32.mxu1 %v10903_v59  ;;  %12475 = vst [vmem:[#allocation130_spill] sm:$0xff] %v10912_v34  ;;  %v10916_v2 = vadd.f32 %v4068_v19, %v10615_v37  ;;  %v5213_v57 = vrot.slane %v5086_v35, 2  ;;  %v5335_v37 = vld [vmem:[#allocation7 + $0x1c38] sm:$0xff] }
 0x3f1   : > { %5621 = vmatprep.mubr.f32.mxu0 %v12377_v41  ;;  %5674 = vmatprep.subr.mxu0 %v5343_v17  ;;  %v5338_v17 = vld [vmem:[#allocation7 + $0x1c50] sm:$0xff]  ;;  %v10929_v35 = vsel %vm2650_vm9, %v5201_v18, %v5209_v24  ;;  %v5331_v18 = vld [vmem:[#allocation7 + $0x1c18] sm:$0xff] }
 0x3f2   : > { %5771 = vmatprep.subr.mxu1 %v5375_v55  ;;  %5509 = vmatmul.mubr.f32.gmra.mxu1 %v10906_v6  ;;  %v3960_v45 = vpop.f32.mrf.mxu0  ;;  %v4073_v30 = vpop.f32.mrf.mxu1  ;;  %v10935_v56 = vsel %vm2650_vm9, %v5207_v16, %v5213_v57  ;;  %v5362_v24 = vld [vmem:[#allocation7 + $0x1d10] sm:$0xff] }
 0x3f3   : > { %8743 = vmatmul.mubr.msk.f32.gmra.mxu0 %vm782_vm5, %v10910_v3  ;;  %5772 = vmatpush1.msra.mxu1 %v5374_v39  ;;  %v4074_v19 = vadd.f32 %v4073_v30, %v3960_v45  ;;  %v5330_v16 = vld [vmem:[#allocation7 + $0x1c10] sm:$0xff]  ;;  %v5327_v45 = vld [vmem:[#allocation7 + $0x1bf8] sm:$0xff] }
 0x3f4   : > { %5675 = vmatpush2.msra.mxu0 %v5342_v61  ;;  %5773 = vmatprep.subr.mxu1 %v5371_v33  ;;  %v10926_v55 = vpop.f32.mrf.mxu0  ;;  %v10931_v34 = vpop.f32.mrf.mxu1  ;;  %v5334_v61 = vld [vmem:[#allocation7 + $0x1c30] sm:$0xff]  ;;  %v5363_v33 = vld [vmem:[#allocation7 + $0x1d18] sm:$0xff] }
 0x3f5   : > { %12477 = vst [vmem:[#allocation132_spill] sm:$0xff] %v10926_v55  ;;  %5676 = vmatprep.subr.mxu0 %v5339_v53  ;;  %5774 = vmatpush1.msra.mxu1 %v5370_v48  ;;  %12478 = vst [vmem:[#allocation133_spill] sm:$0xff] %v10931_v34  ;;  %v10938_v39 = vadd.f32 %v4074_v19, %v10637_v58  ;;  %v6042_v19 = vld [vmem:[#allocation7 + $0x1fe0] sm:$0xff]  ;;  %v5314_v34 = vld [vmem:[#allocation7 + $0x1b90] sm:$0xff] }
 0x3f6   : > { %5677 = vmatpush2.msra.mxu0 %v5338_v17  ;;  %5514 = vmatprep.mubr.f32.mxu1 %v10924_v10  ;;  %v6043_v17 = vld [vmem:[#allocation7 + $0x1fe8] sm:$0xff]  ;;  %v6073_v55 = vld [vmem:[#allocation7 + $0x20d8] sm:$0xff] }
 0x3f7   : > { %5627 = vmatprep.mubr.f32.mxu0 %v12377_v41  ;;  %5678 = vmatprep.subr.mxu0 %v5335_v37  ;;  %v3966_v53 = vpop.f32.mrf.mxu0  ;;  %v4079_v48 = vpop.f32.mrf.mxu1 }
 0x3f8   : > { %5775 = vmatprep.subr.mxu1 %v5367_v5  ;;  %5515 = vmatmul.mubr.f32.gmra.mxu1 %v10929_v35  ;;  %v4080_v57 = vadd.f32 %v4079_v48, %v3966_v53  ;;  %v5326_v5 = vld [vmem:[#allocation7 + $0x1bf0] sm:$0xff] }
 0x3f9   : > { %8744 = vmatmul.mubr.msk.f32.gmra.mxu0 %vm782_vm5, %v10935_v56  ;;  %5776 = vmatpush1.msra.mxu1 %v5366_v28  ;;  %v10944_v58 = vpop.f32.mrf.mxu0  ;;  %v10946_v30 = vpop.f32.mrf.mxu1  ;;  %v5323_v28 = vld [vmem:[#allocation7 + $0x1bd8] sm:$0xff] }
 0x3fa   : > { %12479 = vst [vmem:[#allocation134_spill] sm:$0xff] %v10944_v58  ;;  %5679 = vmatpush2.msra.mxu0 %v5334_v61  ;;  %5777 = vmatprep.subr.mxu1 %v5363_v33  ;;  %12480 = vst [vmem:[#allocation135_spill] sm:$0xff] %v10946_v30  ;;  %v10949_v37 = vadd.f32 %v4080_v57, %v10648_v0  ;;  %v6039_v61 = vld [vmem:[#allocation7 + $0x1fc8] sm:$0xff]  ;;  %v5322_v33 = vld [vmem:[#allocation7 + $0x1bd0] sm:$0xff] }
 0x3fb   : > { %5680 = vmatprep.subr.mxu0 %v5331_v18  ;;  %5778 = vmatpush1.msra.mxu1 %v5362_v24  ;;  %v6038_v18 = vld [vmem:[#allocation7 + $0x1fc0] sm:$0xff]  ;;  %v5319_v24 = vld [vmem:[#allocation7 + $0x1bb8] sm:$0xff]  ;;  %v5318_v57 = vld [vmem:[#allocation7 + $0x1bb0] sm:$0xff] }
 0x3fc   : > { %5681 = vmatpush2.msra.mxu0 %v5330_v16  ;;  %5811 = vmatprep.mubr.f32.mxu1 %v12377_v41  ;;  %v3972_v53 = vpop.f32.mrf.mxu0  ;;  %v4085_v48 = vpop.f32.mrf.mxu1  ;;  %v6035_v16 = vld [vmem:[#allocation7 + $0x1fa8] sm:$0xff] }
 0x3fd   : > { %5682 = vmatprep.subr.mxu0 %v5327_v45  ;;  %6166 = vmatprep.subr.mxu1 %v6043_v17  ;;  %v4086_v30 = vadd.f32 %v4085_v48, %v3972_v53  ;;  %v6034_v45 = vld [vmem:[#allocation7 + $0x1fa0] sm:$0xff]  ;;  %v5315_v17 = vld [vmem:[#allocation7 + $0x1b98] sm:$0xff] }
 0x3fe   : > { %5683 = vmatpush2.msra.mxu0 %v5326_v5  ;;  %8745 = vmatmul.mubr.msk.f32.vlgmr.msra.gmra.mxu1 %vm782_vm5, %v10752_v29  ;;  %v10954_v0 = vpop.f32.mrf.mxu0  ;;  %v10956_v58 = vpop.f32.mrf.mxu1  ;;  %v6031_v29 = vld [vmem:[#allocation7 + $0x1f88] sm:$0xff] }
 0x3ff   : > { %12481 = vst [vmem:[#allocation136_spill] sm:$0xff] %v10954_v0  ;;  %6167 = vmatpush1.msra.mxu1 %v6042_v19  ;;  %5684 = vmatprep.subr.mxu0 %v5323_v28  ;;  %12482 = vst [vmem:[#allocation137_spill] sm:$0xff] %v10956_v58  ;;  %v10959_v5 = vadd.f32 %v4086_v30, %v10658_v44  ;;  %v6030_v19 = vld [vmem:[#allocation7 + $0x1f80] sm:$0xff]  ;;  %v5311_v28 = vld [vmem:[#allocation7 + $0x1b78] sm:$0xff] }
 0x400   : > { %6168 = vmatprep.subr.mxu1 %v6039_v61  ;;  %5685 = vmatpush2.msra.mxu0 %v5322_v33  ;;  %v6027_v58 = vld [vmem:[#allocation7 + $0x1f68] sm:$0xff]  ;;  %v5310_v61 = vld [vmem:[#allocation7 + $0x1b70] sm:$0xff]  ;;  %v6026_v44 = vld [vmem:[#allocation7 + $0x1f60] sm:$0xff] }
 0x401   : > { %6169 = vmatpush1.msra.mxu1 %v6038_v18  ;;  %5686 = vmatprep.subr.mxu0 %v5319_v24  ;;  %v3978_v53 = vpop.f32.mrf.mxu0  ;;  %v4091_v48 = vpop.f32.mrf.mxu1  ;;  %v5307_v30 = vld [vmem:[#allocation7 + $0x1b58] sm:$0xff]  ;;  %v6023_v24 = vld [vmem:[#allocation7 + $0x1f48] sm:$0xff] }
 0x402   : > { %6170 = vmatprep.subr.mxu1 %v6035_v16  ;;  %5687 = vmatpush2.msra.mxu0 %v5318_v57  ;;  %v4092_v33 = vadd.f32 %v4091_v48, %v3978_v53  ;;  %v5306_v16 = vld [vmem:[#allocation7 + $0x1b50] sm:$0xff] }
 0x403   : > { %6171 = vmatpush1.msra.mxu1 %v6034_v45  ;;  %5688 = vmatprep.subr.mxu0 %v5315_v17  ;;  %v10961_v0 = vpop.f32.mrf.mxu0  ;;  %v10963_v18 = vpop.f32.mrf.mxu1  ;;  %v6022_v45 = vld [vmem:[#allocation7 + $0x1f40] sm:$0xff]  ;;  %v5303_v17 = vld [vmem:[#allocation7 + $0x1b38] sm:$0xff] }
 0x404   : > { %12483 = vst [vmem:[#allocation138_spill] sm:$0xff] %v10961_v0  ;;  %6172 = vmatprep.subr.mxu1 %v6031_v29  ;;  %5689 = vmatpush2.msra.mxu0 %v5314_v34  ;;  %12484 = vst [vmem:[#allocation139_spill] sm:$0xff] %v10963_v18  ;;  %v10966_v57 = vadd.f32 %v4092_v33, %v10665_v31  ;;  %v6019_v29 = vld [vmem:[#allocation7 + $0x1f28] sm:$0xff]  ;;  %v5302_v34 = vld [vmem:[#allocation7 + $0x1b30] sm:$0xff] }
 0x405   : > { %6173 = vmatpush1.msra.mxu1 %v6030_v19  ;;  %5690 = vmatprep.subr.mxu0 %v5311_v28  ;;  %v6018_v18 = vld [vmem:[#allocation7 + $0x1f20] sm:$0xff]  ;;  %v5299_v19 = vld [vmem:[#allocation7 + $0x1b18] sm:$0xff]  ;;  %v6015_v31 = vld [vmem:[#allocation7 + $0x1f08] sm:$0xff] }
 0x406   : > { %6174 = vmatprep.subr.mxu1 %v6027_v58  ;;  %5691 = vmatpush2.msra.mxu0 %v5310_v61  ;;  %v3984_v53 = vpop.f32.mrf.mxu0  ;;  %v4097_v48 = vpop.f32.mrf.mxu1  ;;  %v5298_v58 = vld [vmem:[#allocation7 + $0x1b10] sm:$0xff]  ;;  %v6014_v33 = vld [vmem:[#allocation7 + $0x1f00] sm:$0xff] }
 0x407   : > { %6175 = vmatpush1.msra.mxu1 %v6026_v44  ;;  %5692 = vmatprep.subr.mxu0 %v5307_v30  ;;  %v4098_v28 = vadd.f32 %v4097_v48, %v3984_v53  ;;  %v6011_v30 = vld [vmem:[#allocation7 + $0x1ee8] sm:$0xff]  ;;  %v6010_v53 = vld [vmem:[#allocation7 + $0x1ee0] sm:$0xff] }
 0x408   : > { %6176 = vmatprep.subr.mxu1 %v6023_v24  ;;  %5693 = vmatpush2.msra.mxu0 %v5306_v16  ;;  %v10968_v0 = vpop.f32.mrf.mxu0  ;;  %v10970_v61 = vpop.f32.mrf.mxu1  ;;  %v6139_v16 = vld [vmem:[#allocation7 + $0x22e8] sm:$0xff] }
 0x409   : > { %12485 = vst [vmem:[#allocation140_spill] sm:$0xff] %v10968_v0  ;;  %6177 = vmatpush1.msra.mxu1 %v6022_v45  ;;  %5694 = vmatprep.subr.mxu0 %v5303_v17  ;;  %12486 = vst [vmem:[#allocation141_spill] sm:$0xff] %v10970_v61  ;;  %v10973_v44 = vadd.f32 %v4098_v28, %v10672_v11  ;;  %v6138_v17 = vld [vmem:[#allocation7 + $0x22e0] sm:$0xff]  ;;  %v6007_v48 = vld [vmem:[#allocation7 + $0x1ec8] sm:$0xff] }
 0x40a   : > { %6178 = vmatprep.subr.mxu1 %v6019_v29  ;;  %5695 = vmatpush2.msra.mxu0 %v5302_v34  ;;  %v6080_v61 = vld [vmem:[#allocation7 + $0x2110] sm:$0xff] }
 0x40b   : > { %6179 = vmatpush1.msra.mxu1 %v6018_v18  ;;  %5696 = vmatprep.subr.mxu0 %v5299_v19  ;;  %v3990_v24 = vpop.f32.mrf.mxu0  ;;  %v4103_v45 = vpop.f32.mrf.mxu1  ;;  %v6006_v18 = vld [vmem:[#allocation7 + $0x1ec0] sm:$0xff] }
 0x40c   : > { %6180 = vmatprep.subr.mxu1 %v6015_v31  ;;  %5697 = vmatpush2.msra.mxu0 %v5298_v58  ;;  %v4104_v29 = vadd.f32 %v4103_v45, %v3990_v24  ;;  %v6135_v31 = vld [vmem:[#allocation7 + $0x22c8] sm:$0xff]  ;;  %v6002_v58 = vld [vmem:[#allocation7 + $0x1ea0] sm:$0xff] }
 0x40d   : > { %5698 = vmatprep.mubr.f32.mxu0 %v10784_v32  ;;  %6181 = vmatpush1.msra.mxu1 %v6014_v33  ;;  %v10976_v34 = vpop.f32.mrf.mxu0  ;;  %v10979_v11 = vpop.f32.mrf.mxu1  ;;  %v6003_v32 = vld [vmem:[#allocation7 + $0x1ea8] sm:$0xff]  ;;  %v6134_v33 = vld [vmem:[#allocation7 + $0x22c0] sm:$0xff] }
 0x40e   : > { %12487 = vst [vmem:[#allocation142_spill] sm:$0xff] %v10976_v34  ;;  %5699 = vmatmul.mubr.f32.vlgmr.msra.gmra.mxu0 %v10787_v12  ;;  %6182 = vmatprep.subr.mxu1 %v6011_v30  ;;  %12488 = vst [vmem:[#allocation143_spill] sm:$0xff] %v10979_v11  ;;  %v10982_v19 = vadd.f32 %v4104_v29, %v10681_v52  ;;  %v5999_v30 = vld [vmem:[#allocation7 + $0x1e88] sm:$0xff]  ;;  %v5998_v52 = vld [vmem:[#allocation7 + $0x1e80] sm:$0xff] }
 0x40f   : > { %6295 = vmatprep.subr.mxu0 %v6139_v16  ;;  %6183 = vmatpush1.msra.mxu1 %v6010_v53  ;;  %v5995_v16 = vld [vmem:[#allocation7 + $0x1e68] sm:$0xff]  ;;  %v5994_v53 = vld [vmem:[#allocation7 + $0x1e60] sm:$0xff]  ;;  %v6116_v34 = vld [vmem:[#allocation7 + $0x2230] sm:$0xff] }
 0x410   : > { %6296 = vmatpush1.msra.mxu0 %v6138_v17  ;;  %6184 = vmatprep.subr.mxu1 %v6007_v48  ;;  %v3996_v28 = vpop.f32.mrf.mxu0  ;;  %v4109_v12 = vpop.f32.mrf.mxu1  ;;  %v5991_v45 = vld [vmem:[#allocation7 + $0x1e48] sm:$0xff]  ;;  %v5986_v48 = vld [vmem:[#allocation7 + $0x1e20] sm:$0xff] }
 0x411   : > { %5704 = vmatprep.mubr.f32.mxu0 %v10790_v27  ;;  %5817 = vmatprep.mubr.f32.mxu1 %v12377_v41  ;;  %v4110_v24 = vadd.f32 %v4109_v12, %v3996_v28  ;;  %v5987_v17 = vld [vmem:[#allocation7 + $0x1e28] sm:$0xff]  ;;  %v6098_v12 = vld [vmem:[#allocation7 + $0x21a0] sm:$0xff] }
 0x412   : > { %6185 = vmatpush1.msra.mxu1 %v6006_v18  ;;  %5705 = vmatmul.mubr.f32.gmra.mxu0 %v10808_v25  ;;  %v6131_v25 = vld [vmem:[#allocation7 + $0x22a8] sm:$0xff] }
 0x413   : > { %8746 = vmatmul.mubr.msk.f32.gmra.mxu1 %vm782_vm5, %v10815_v40  ;;  %6186 = vmatprep.subr.mxu1 %v6003_v32  ;;  %v10990_v27 = vadd.f32 %v4110_v24, %v10689_v26  ;;  %v6130_v40 = vld [vmem:[#allocation7 + $0x22a0] sm:$0xff]  ;;  %v5983_v29 = vld [vmem:[#allocation7 + $0x1e08] sm:$0xff] }
 0x414   : > { %6297 = vmatprep.subr.mxu0 %v6135_v31  ;;  %6187 = vmatpush1.msra.mxu1 %v6002_v58  ;;  %v5990_v26 = vld [vmem:[#allocation7 + $0x1e40] sm:$0xff]  ;;  %v6107_v18 = vld [vmem:[#allocation7 + $0x21e8] sm:$0xff]  ;;  %v11005_v31 = vpop.f32.mrf.mxu0  ;;  %v11009_v58 = vpop.f32.mrf.mxu1 }
 0x415   : > { %6298 = vmatpush1.msra.mxu0 %v6134_v33  ;;  %6188 = vmatprep.subr.mxu1 %v5999_v30  ;;  %v6106_v32 = vld [vmem:[#allocation7 + $0x21e0] sm:$0xff]  ;;  %v6103_v28 = vld [vmem:[#allocation7 + $0x21c8] sm:$0xff]  ;;  %12489 = vst [vmem:[#allocation144_spill] sm:$0xff] %v11005_v31  ;;  %12490 = vst [vmem:[#allocation145_spill] sm:$0xff] %v11009_v58 }
 0x416   : > { %5710 = vmatprep.mubr.f32.mxu0 %v10818_v20  ;;  %5823 = vmatprep.mubr.f32.mxu1 %v12377_v41  ;;  %v6127_v20 = vld [vmem:[#allocation7 + $0x2288] sm:$0xff]  ;;  %v4714_v33 = vpop.f32.mrf.mxu0  ;;  %v11170_v31 = vld [vmem:[#allocation2 + $0x180] sm:$0xff] }
 0x417   : > { %6189 = vmatpush1.msra.mxu1 %v5998_v52  ;;  %5711 = vmatmul.mubr.f32.gmra.mxu0 %v10828_v60  ;;  %v6126_v60 = vld [vmem:[#allocation7 + $0x2280] sm:$0xff]  ;;  %v6095_v30 = vld [vmem:[#allocation7 + $0x2188] sm:$0xff] }
 0x418   : > { %8747 = vmatmul.mubr.msk.f32.gmra.mxu1 %vm782_vm5, %v10832_v8  ;;  %6190 = vmatprep.subr.mxu1 %v5995_v16  ;;  %v5982_v8 = vld [vmem:[#allocation7 + $0x1e00] sm:$0xff] }
 0x419   : > { %6299 = vmatprep.subr.mxu0 %v6131_v25  ;;  %6191 = vmatpush1.msra.mxu1 %v5994_v53  ;;  %v6094_v16 = vld [vmem:[#allocation7 + $0x2180] sm:$0xff]  ;;  %v6091_v25 = vld [vmem:[#allocation7 + $0x2168] sm:$0xff]  ;;  %v11018_v53 = vpop.f32.mrf.mxu0 }
 0x41a   : > { %6300 = vmatpush1.msra.mxu0 %v6130_v40  ;;  %6192 = vmatprep.subr.mxu1 %v5991_v45  ;;  %12492 = vst [vmem:[#allocation147_spill] sm:$0xff] %v11018_v53  ;;  %v6090_v40 = vld [vmem:[#allocation7 + $0x2160] sm:$0xff] }
 0x41b   : > { %5716 = vmatprep.mubr.f32.mxu0 %v10840_v14  ;;  %5829 = vmatprep.mubr.f32.mxu1 %v12377_v41  ;;  %v6123_v14 = vld [vmem:[#allocation7 + $0x2268] sm:$0xff] }
 0x41c   : > { %6193 = vmatpush1.msra.mxu1 %v5990_v26  ;;  %5717 = vmatmul.mubr.f32.gmra.mxu0 %v10849_v21  ;;  %v6122_v21 = vld [vmem:[#allocation7 + $0x2260] sm:$0xff] }
 0x41d   : > { %8748 = vmatmul.mubr.msk.f32.gmra.mxu1 %vm782_vm5, %v10854_v23  ;;  %6194 = vmatprep.subr.mxu1 %v5987_v17  ;;  %v6102_v23 = vld [vmem:[#allocation7 + $0x21c0] sm:$0xff]  ;;  %v6087_v17 = vld [vmem:[#allocation7 + $0x2148] sm:$0xff] }
 0x41e   : > { %6301 = vmatprep.subr.mxu0 %v6127_v20  ;;  %6195 = vmatpush1.msra.mxu1 %v5986_v48  ;;  %v6114_v26 = vld [vmem:[#allocation7 + $0x2220] sm:$0xff] }
 0x41f   : > { %6302 = vmatpush1.msra.mxu0 %v6126_v60  ;;  %6196 = vmatprep.subr.mxu1 %v5983_v29  ;;  %v6083_v29 = vld [vmem:[#allocation7 + $0x2128] sm:$0xff] }
 0x420   : > { %5722 = vmatprep.mubr.f32.mxu0 %v10859_v9  ;;  %5835 = vmatprep.mubr.f32.mxu1 %v12377_v41  ;;  %v6099_v9 = vld [vmem:[#allocation7 + $0x21a8] sm:$0xff] }
 0x421   : > { %6197 = vmatpush1.msra.mxu1 %v5982_v8  ;;  %5723 = vmatmul.mubr.f32.gmra.mxu0 %v10865_v42  ;;  %v6119_v42 = vld [vmem:[#allocation7 + $0x2248] sm:$0xff] }
 0x422   : > { %8749 = vmatmul.mubr.msk.f32.gmra.mxu1 %vm782_vm5, %v10869_v38  ;;  %6198 = vmatprep.subr.mxu1 %v6107_v18  ;;  %v6118_v38 = vld [vmem:[#allocation7 + $0x2240] sm:$0xff] }
 0x423   : > { %6303 = vmatprep.subr.mxu0 %v6123_v14  ;;  %6199 = vmatpush2.msra.mxu1 %v6106_v32  ;;  %v6082_v18 = vld [vmem:[#allocation7 + $0x2120] sm:$0xff] }
 0x424   : > { %6304 = vmatpush1.msra.mxu0 %v6122_v21  ;;  %6200 = vmatprep.subr.mxu1 %v6103_v28  ;;  %v6110_v32 = vld [vmem:[#allocation7 + $0x2200] sm:$0xff]  ;;  %v6079_v21 = vld [vmem:[#allocation7 + $0x2108] sm:$0xff] }
 0x425   : > { %5728 = vmatprep.mubr.f32.mxu0 %v10878_v36  ;;  %5841 = vmatprep.mubr.f32.mxu1 %v12377_v41 }
 0x426   : > { %6201 = vmatpush2.msra.mxu1 %v6102_v23  ;;  %5729 = vmatmul.mubr.f32.gmra.mxu0 %v10883_v47  ;;  %v4601_v24 = vpop.f32.mrf.mxu1 }
 0x427   : > { %8750 = vmatmul.mubr.msk.f32.gmra.mxu1 %vm782_vm5, %v10890_v51  ;;  %6202 = vmatprep.subr.mxu1 %v6099_v9  ;;  %v4715_v52 = vadd.f32 %v4714_v33, %v4601_v24  ;;  %v6115_v51 = vld [vmem:[#allocation7 + $0x2228] sm:$0xff]  ;;  %v11047_v33 = vld [vmem:[#allocation2 + $0xa0] sm:$0xff] }
 0x428   : > { %6305 = vmatprep.subr.mxu0 %v6119_v42  ;;  %6203 = vmatpush2.msra.mxu1 %v6098_v12  ;;  %v11016_v36 = vpop.f32.mrf.mxu1  ;;  %v6075_v42 = vld [vmem:[#allocation7 + $0x20e8] sm:$0xff] }
 0x429   : > { %12491 = vst [vmem:[#allocation146_spill] sm:$0xff] %v11016_v36  ;;  %6306 = vmatpush1.msra.mxu0 %v6118_v38  ;;  %6204 = vmatprep.subr.mxu1 %v6095_v30  ;;  %v11021_v47 = vadd.f32 %v4715_v52, %v10720_v54  ;;  %v6074_v38 = vld [vmem:[#allocation7 + $0x20e0] sm:$0xff]  ;;  %v6071_v24 = vld [vmem:[#allocation7 + $0x20c8] sm:$0xff] }
 0x42a   : > { %5734 = vmatprep.mubr.f32.mxu0 %v10903_v59  ;;  %5847 = vmatprep.mubr.f32.mxu1 %v12377_v41  ;;  %v4607_v45 = vpop.f32.mrf.mxu1  ;;  %v4720_v20 = vpop.f32.mrf.mxu0  ;;  %v6086_v59 = vld [vmem:[#allocation7 + $0x2140] sm:$0xff] }
 0x42b   : > { %6205 = vmatpush2.msra.mxu1 %v6094_v16  ;;  %5735 = vmatmul.mubr.f32.gmra.mxu0 %v10906_v6  ;;  %v4721_v48 = vadd.f32 %v4720_v20, %v4607_v45  ;;  %v6067_v45 = vld [vmem:[#allocation7 + $0x20a8] sm:$0xff]  ;;  %v6037_v20 = vld [vmem:[#allocation7 + $0x1fb8] sm:$0xff] }
 0x42c   : > { %8751 = vmatmul.mubr.msk.f32.gmra.mxu1 %vm782_vm5, %v10910_v3  ;;  %6206 = vmatprep.subr.mxu1 %v6091_v25  ;;  %v11028_v54 = vpop.f32.mrf.mxu1  ;;  %v11030_v60 = vpop.f32.mrf.mxu0  ;;  %v6111_v3 = vld [vmem:[#allocation7 + $0x2208] sm:$0xff]  ;;  %v6041_v25 = vld [vmem:[#allocation7 + $0x1fd8] sm:$0xff] }
 0x42d   : > { %12493 = vst [vmem:[#allocation148_spill] sm:$0xff] %v11028_v54  ;;  %6307 = vmatprep.subr.mxu0 %v6115_v51  ;;  %6207 = vmatpush2.msra.mxu1 %v6090_v40  ;;  %12494 = vst [vmem:[#allocation149_spill] sm:$0xff] %v11030_v60  ;;  %v11033_v6 = vadd.f32 %v4721_v48, %v10734_v1  ;;  %v6078_v1 = vld [vmem:[#allocation7 + $0x2100] sm:$0xff]  ;;  %v6040_v40 = vld [vmem:[#allocation7 + $0x1fd0] sm:$0xff] }
 0x42e   : > { %6308 = vmatpush1.msra.mxu0 %v6114_v26  ;;  %6208 = vmatprep.subr.mxu1 %v6087_v17  ;;  %v4613_v8 = vpop.f32.mrf.mxu1  ;;  %v6066_v48 = vld [vmem:[#allocation7 + $0x20a0] sm:$0xff]  ;;  %v6129_v60 = vld [vmem:[#allocation7 + $0x2298] sm:$0xff] }
 0x42f   : > { %5740 = vmatprep.mubr.f32.mxu0 %v10924_v10  ;;  %5853 = vmatprep.mubr.f32.mxu1 %v12377_v41  ;;  %v4726_v14 = vpop.f32.mrf.mxu0  ;;  %v6045_v10 = vld [vmem:[#allocation7 + $0x1ff8] sm:$0xff] }
 0x430   : > { %6209 = vmatpush2.msra.mxu1 %v6086_v59  ;;  %5741 = vmatmul.mubr.f32.gmra.mxu0 %v10929_v35  ;;  %v4727_v28 = vadd.f32 %v4726_v14, %v4613_v8  ;;  %v11038_v23 = vpop.f32.mrf.mxu1  ;;  %v6063_v8 = vld [vmem:[#allocation7 + $0x2088] sm:$0xff]  ;;  %v6033_v14 = vld [vmem:[#allocation7 + $0x1f98] sm:$0xff] }
 0x431   : > { %12495 = vst [vmem:[#allocation150_spill] sm:$0xff] %v11038_v23  ;;  %8752 = vmatmul.mubr.msk.f32.gmra.mxu1 %vm782_vm5, %v10935_v56  ;;  %6210 = vmatprep.subr.mxu1 %v6083_v29  ;;  %v11042_v9 = vpop.f32.mrf.mxu0  ;;  %v6044_v56 = vld [vmem:[#allocation7 + $0x1ff0] sm:$0xff] }
 0x432   : > { %12496 = vst [vmem:[#allocation151_spill] sm:$0xff] %v11042_v9  ;;  %6309 = vmatprep.subr.mxu0 %v6111_v3  ;;  %6211 = vmatpush2.msra.mxu1 %v6082_v18  ;;  %v11045_v12 = vadd.f32 %v4727_v28, %v10747_v13  ;;  %v4619_v35 = vpop.f32.mrf.mxu1  ;;  %v6070_v13 = vld [vmem:[#allocation7 + $0x20c0] sm:$0xff]  ;;  %v6036_v29 = vld [vmem:[#allocation7 + $0x1fb0] sm:$0xff]  ;;  %v6059_v28 = vld [vmem:[#allocation7 + $0x2068] sm:$0xff] }
 0x433   : > { %6310 = vmatpush1.msra.mxu0 %v6110_v32  ;;  %6212 = vmatprep.subr.mxu1 %v6079_v21  ;;  %v4732_v30 = vpop.f32.mrf.mxu0  ;;  %v6062_v32 = vld [vmem:[#allocation7 + $0x2080] sm:$0xff]  ;;  %v11135_v9 = vld [vmem:[#allocation2 + $0x138] sm:$0xff]  ;;  %v6100_v23 = vld [vmem:[#allocation7 + $0x21b0] sm:$0xff] }
 0x434   : > { %6213 = vmatpush2.msra.mxu1 %v6078_v1  ;;  %6343 = vmatprep.mubr.f32.mxu0 %v12377_v41  ;;  %v4733_v52 = vadd.f32 %v4732_v30, %v4619_v35  ;;  %v11050_v16 = vpop.f32.mrf.mxu1  ;;  %v6028_v35 = vld [vmem:[#allocation7 + $0x1f70] sm:$0xff] }
 0x435   : > { %12497 = vst [vmem:[#allocation152_spill] sm:$0xff] %v11050_v16  ;;  %6392 = vmatprep.subr.mxu0 %v6045_v10  ;;  %6214 = vmatprep.subr.mxu1 %v6075_v42  ;;  %v11052_v51 = vpop.f32.mrf.mxu0  ;;  %v6029_v10 = vld [vmem:[#allocation7 + $0x1f78] sm:$0xff]  ;;  %v6058_v42 = vld [vmem:[#allocation7 + $0x2060] sm:$0xff] }
 0x436   : > { %12498 = vst [vmem:[#allocation153_spill] sm:$0xff] %v11052_v51  ;;  %8753 = vmatmul.mubr.msk.f32.vlgmr.msra.gmra.mxu0 %vm782_vm5, %v11047_v33  ;;  %6215 = vmatpush2.msra.mxu1 %v6074_v38  ;;  %v11057_v26 = vadd.f32 %v4733_v52, %v10762_v43  ;;  %v4625_v17 = vpop.f32.mrf.mxu1  ;;  %v6032_v43 = vld [vmem:[#allocation7 + $0x1f90] sm:$0xff]  ;;  %v6055_v38 = vld [vmem:[#allocation7 + $0x2048] sm:$0xff]  ;;  %v11133_v51 = vld [vmem:[#allocation2 + $0x140] sm:$0xff] }
 0x437   : > { %6393 = vmatpush1.msra.mxu0 %v6044_v56  ;;  %6216 = vmatprep.subr.mxu1 %v6071_v24  ;;  %v4738_v59 = vpop.f32.mrf.mxu0  ;;  %v6025_v56 = vld [vmem:[#allocation7 + $0x1f58] sm:$0xff]  ;;  %v6054_v24 = vld [vmem:[#allocation7 + $0x2040] sm:$0xff] }
 0x438   : > { %6394 = vmatprep.subr.mxu0 %v6041_v25  ;;  %6217 = vmatpush2.msra.mxu1 %v6070_v13  ;;  %v4739_v3 = vadd.f32 %v4738_v59, %v4625_v17  ;;  %v11059_v18 = vpop.f32.mrf.mxu1  ;;  %v6024_v25 = vld [vmem:[#allocation7 + $0x1f50] sm:$0xff]  ;;  %v6051_v13 = vld [vmem:[#allocation7 + $0x2028] sm:$0xff]  ;;  %v6050_v17 = vld [vmem:[#allocation7 + $0x2020] sm:$0xff] }
 0x439   : > { %12499 = vst [vmem:[#allocation154_spill] sm:$0xff] %v11059_v18  ;;  %6395 = vmatpush1.msra.mxu0 %v6040_v40  ;;  %6218 = vmatprep.subr.mxu1 %v6067_v45  ;;  %v11061_v21 = vpop.f32.mrf.mxu0  ;;  %v6021_v45 = vld [vmem:[#allocation7 + $0x1f38] sm:$0xff]  ;;  %v6047_v59 = vld [vmem:[#allocation7 + $0x2008] sm:$0xff]  ;;  %v6136_v18 = vld [vmem:[#allocation7 + $0x22d0] sm:$0xff] }
 0x43a   : > { %12500 = vst [vmem:[#allocation155_spill] sm:$0xff] %v11061_v21  ;;  %6396 = vmatprep.subr.mxu0 %v6037_v20  ;;  %6219 = vmatpush2.msra.mxu1 %v6066_v48  ;;  %v11064_v1 = vadd.f32 %v4739_v3, %v10769_v50  ;;  %v6020_v48 = vld [vmem:[#allocation7 + $0x1f30] sm:$0xff]  ;;  %v6046_v3 = vld [vmem:[#allocation7 + $0x2000] sm:$0xff]  ;;  %v6137_v21 = vld [vmem:[#allocation7 + $0x22d8] sm:$0xff] }
 0x43b   : > { %6397 = vmatpush1.msra.mxu0 %v6036_v29  ;;  %6220 = vmatprep.subr.mxu1 %v6063_v8  ;;  %v6017_v8 = vld [vmem:[#allocation7 + $0x1f18] sm:$0xff] }
 0x43c   : > { %6398 = vmatprep.subr.mxu0 %v6033_v14  ;;  %6221 = vmatpush2.msra.mxu1 %v6062_v32  ;;  %v4631_v30 = vpop.f32.mrf.mxu1  ;;  %v6016_v14 = vld [vmem:[#allocation7 + $0x1f10] sm:$0xff]  ;;  %v11073_v32 = vld [vmem:[#allocation2 + $0x98] sm:$0xff] }
 0x43d   : > { %6399 = vmatpush1.msra.mxu0 %v6032_v43  ;;  %6222 = vmatprep.subr.mxu1 %v6059_v28  ;;  %v4744_v52 = vpop.f32.mrf.mxu0  ;;  %v6013_v28 = vld [vmem:[#allocation7 + $0x1ef8] sm:$0xff] }
 0x43e   : > { %6400 = vmatprep.subr.mxu0 %v6029_v10  ;;  %6223 = vmatpush2.msra.mxu1 %v6058_v42  ;;  %v4745_v50 = vadd.f32 %v4744_v52, %v4631_v30  ;;  %v11066_v40 = vpop.f32.mrf.mxu1  ;;  %v11075_v10 = vld [vmem:[#allocation2 + $0x90] sm:$0xff]  ;;  %v6101_v16 = vld [vmem:[#allocation7 + $0x21b8] sm:$0xff] }
 0x43f   : > { %12501 = vst [vmem:[#allocation156_spill] sm:$0xff] %v11066_v40  ;;  %6401 = vmatpush1.msra.mxu0 %v6028_v35  ;;  %6224 = vmatprep.subr.mxu1 %v6055_v38  ;;  %v11068_v20 = vpop.f32.mrf.mxu0  ;;  %v11077_v35 = vld [vmem:[#allocation2 + $0xb0] sm:$0xff]  ;;  %v11166_v40 = vld [vmem:[#allocation2 + $0x188] sm:$0xff] }
 0x440   : > { %12502 = vst [vmem:[#allocation157_spill] sm:$0xff] %v11068_v20  ;;  %6402 = vmatprep.subr.mxu0 %v6025_v56  ;;  %6225 = vmatpush2.msra.mxu1 %v6054_v24  ;;  %v11071_v29 = vadd.f32 %v4745_v50, %v10779_v49  ;;  %v6012_v49 = vld [vmem:[#allocation7 + $0x1ef0] sm:$0xff]  ;;  %v6009_v56 = vld [vmem:[#allocation7 + $0x1ed8] sm:$0xff] }
 0x441   : > { %6403 = vmatpush1.msra.mxu0 %v6024_v25  ;;  %6226 = vmatprep.subr.mxu1 %v6051_v13  ;;  %v6008_v52 = vld [vmem:[#allocation7 + $0x1ed0] sm:$0xff]  ;;  %v6141_v25 = vld [vmem:[#allocation7 + $0x22f8] sm:$0xff] }
 0x442   : > { %6404 = vmatprep.subr.mxu0 %v6021_v45  ;;  %6227 = vmatpush2.msra.mxu1 %v6050_v17  ;;  %v4637_v43 = vpop.f32.mrf.mxu1  ;;  %v6005_v50 = vld [vmem:[#allocation7 + $0x1eb8] sm:$0xff]  ;;  %v11089_v45 = vld [vmem:[#allocation2 + $0xa8] sm:$0xff]  ;;  %v6088_v20 = vld [vmem:[#allocation7 + $0x2150] sm:$0xff] }
 0x443   : > { %6405 = vmatpush1.msra.mxu0 %v6020_v48  ;;  %6228 = vmatprep.subr.mxu1 %v6047_v59  ;;  %v4750_v42 = vpop.f32.mrf.mxu0  ;;  %v11092_v17 = vld [vmem:[#allocation2 + $0xb8] sm:$0xff]  ;;  %v11094_v48 = vld [vmem:[#allocation2 + $0xe0] sm:$0xff] }
 0x444   : > { %6406 = vmatprep.subr.mxu0 %v6017_v8  ;;  %6229 = vmatpush2.msra.mxu1 %v6046_v3  ;;  %v4751_v38 = vadd.f32 %v4750_v42, %v4637_v43  ;;  %v11079_v30 = vpop.f32.mrf.mxu1  ;;  %v6004_v8 = vld [vmem:[#allocation7 + $0x1eb0] sm:$0xff]  ;;  %v11100_v42 = vld [vmem:[#allocation2 + $0xd8] sm:$0xff] }
 0x445   : > { %12503 = vst [vmem:[#allocation158_spill] sm:$0xff] %v11079_v30  ;;  %6407 = vmatpush1.msra.mxu0 %v6016_v14  ;;  %6230 = vmatprep.mubr.f32.mxu1 %v11073_v32  ;;  %v11082_v24 = vpop.f32.mrf.mxu0  ;;  %v6140_v14 = vld [vmem:[#allocation7 + $0x22f0] sm:$0xff] }
 0x446   : > { %12504 = vst [vmem:[#allocation159_spill] sm:$0xff] %v11082_v24  ;;  %6408 = vmatprep.subr.mxu0 %v6013_v28  ;;  %6231 = vmatmul.mubr.f32.vlgmr.msra.gmra.mxu1 %v11075_v10  ;;  %v11086_v13 = vadd.f32 %v4751_v38, %v10804_v63  ;;  %v6001_v63 = vld [vmem:[#allocation7 + $0x1e98] sm:$0xff]  ;;  %v6000_v28 = vld [vmem:[#allocation7 + $0x1e90] sm:$0xff]  ;;  %v11103_v38 = vld [vmem:[#allocation2 + $0xe8] sm:$0xff] }
 0x447   : > { %6409 = vmatpush1.msra.mxu0 %v6012_v49  ;;  %6236 = vmatprep.mubr.f32.mxu1 %v11077_v35  ;;  %v5997_v49 = vld [vmem:[#allocation7 + $0x1e78] sm:$0xff] }
 0x448   : > { %6410 = vmatprep.subr.mxu0 %v6009_v56  ;;  %6349 = vmatprep.mubr.f32.mxu0 %v12377_v41  ;;  %v4643_v59 = vpop.f32.mrf.mxu1 }
 0x449   : > { %6411 = vmatpush1.msra.mxu0 %v6008_v52  ;;  %6521 = vmatprep.subr.mxu1 %v6141_v25  ;;  %v4756_v3 = vpop.f32.mrf.mxu0  ;;  %v5996_v52 = vld [vmem:[#allocation7 + $0x1e70] sm:$0xff]  ;;  %v11108_v25 = vld [vmem:[#allocation2 + $0xf8] sm:$0xff] }
 0x44a   : > { %6412 = vmatprep.subr.mxu0 %v6005_v50  ;;  %6237 = vmatmul.mubr.f32.gmra.mxu1 %v11089_v45  ;;  %v4757_v43 = vadd.f32 %v4756_v3, %v4643_v59  ;;  %v5993_v50 = vld [vmem:[#allocation7 + $0x1e58] sm:$0xff]  ;;  %v5992_v59 = vld [vmem:[#allocation7 + $0x1e50] sm:$0xff]  ;;  %v11116_v3 = vld [vmem:[#allocation2 + $0x100] sm:$0xff]  ;;  %v11141_v54 = vpop.f32.mrf.mxu1 }
 0x44b   : > { %8754 = vmatmul.mubr.msk.f32.gmra.mxu0 %vm782_vm5, %v11092_v17  ;;  %6242 = vmatprep.mubr.f32.mxu1 %v11094_v48  ;;  %12505 = vst [vmem:[#allocation160_spill] sm:$0xff] %v11141_v54  ;;  %v11150_v54 = vld [vmem:[#allocation2 + $0x168] sm:$0xff] }
 0x44c   : > { %6413 = vmatpush1.msra.mxu0 %v6004_v8  ;;  %6355 = vmatprep.mubr.f32.mxu0 %v12377_v41  ;;  %v11106_v56 = vadd.f32 %v4757_v43, %v10837_v7  ;;  %v11113_v8 = vld [vmem:[#allocation2 + $0xf0] sm:$0xff]  ;;  %v5989_v7 = vld [vmem:[#allocation7 + $0x1e38] sm:$0xff] }
 0x44d   : > { %6414 = vmatprep.subr.mxu0 %v6001_v63  ;;  %6522 = vmatpush1.msra.mxu1 %v6140_v14  ;;  %v5988_v63 = vld [vmem:[#allocation7 + $0x1e30] sm:$0xff]  ;;  %v11119_v14 = vld [vmem:[#allocation2 + $0x128] sm:$0xff]  ;;  %v5985_v43 = vld [vmem:[#allocation7 + $0x1e18] sm:$0xff] }
 0x44e   : > { %6415 = vmatpush1.msra.mxu0 %v6000_v28  ;;  %6243 = vmatmul.mubr.f32.gmra.mxu1 %v11100_v42  ;;  %v5984_v28 = vld [vmem:[#allocation7 + $0x1e10] sm:$0xff]  ;;  %v4940_v53 = vpop.f32.mrf.mxu1 }
 0x44f   : > { %6416 = vmatprep.subr.mxu0 %v5997_v49  ;;  %8755 = vmatmul.mubr.msk.f32.gmra.mxu0 %vm782_vm5, %v11103_v38  ;;  %v11124_v49 = vld [vmem:[#allocation2 + $0x120] sm:$0xff] }
 0x450   : > { %6417 = vmatpush1.msra.mxu0 %v5996_v52  ;;  %6248 = vmatprep.mubr.f32.mxu1 %v11108_v25  ;;  %v6109_v52 = vld [vmem:[#allocation7 + $0x21f8] sm:$0xff] }
 0x451   : > { %6418 = vmatprep.subr.mxu0 %v5993_v50  ;;  %6361 = vmatprep.mubr.f32.mxu0 %v12377_v41  ;;  %v11127_v50 = vld [vmem:[#allocation2 + $0x130] sm:$0xff] }
 0x452   : > { %6419 = vmatpush1.msra.mxu0 %v5992_v59  ;;  %6249 = vmatmul.mubr.f32.gmra.mxu1 %v11113_v8  ;;  %v6108_v59 = vld [vmem:[#allocation7 + $0x21f0] sm:$0xff] }
 0x453   : > { %6420 = vmatprep.subr.mxu0 %v5989_v7  ;;  %8756 = vmatmul.mubr.msk.f32.gmra.mxu0 %vm782_vm5, %v11116_v3  ;;  %v6105_v7 = vld [vmem:[#allocation7 + $0x21d8] sm:$0xff] }
 0x454   : > { %6421 = vmatpush1.msra.mxu0 %v5988_v63  ;;  %6254 = vmatprep.mubr.f32.mxu1 %v11119_v14  ;;  %v6104_v63 = vld [vmem:[#allocation7 + $0x21d0] sm:$0xff] }
 0x455   : > { %6422 = vmatprep.subr.mxu0 %v5985_v43  ;;  %6367 = vmatprep.mubr.f32.mxu0 %v12377_v41  ;;  %v6133_v43 = vld [vmem:[#allocation7 + $0x22b8] sm:$0xff] }
 0x456   : > { %6423 = vmatpush1.msra.mxu0 %v5984_v28  ;;  %6255 = vmatmul.mubr.f32.gmra.mxu1 %v11124_v49  ;;  %v11138_v28 = vld [vmem:[#allocation2 + $0x148] sm:$0xff] }
 0x457   : > { %6424 = vmatprep.subr.mxu0 %v6109_v52  ;;  %8757 = vmatmul.mubr.msk.f32.gmra.mxu0 %vm782_vm5, %v11127_v50  ;;  %v6132_v52 = vld [vmem:[#allocation7 + $0x22b0] sm:$0xff] }
 0x458   : > { %6425 = vmatpush2.msra.mxu0 %v6108_v59  ;;  %6523 = vmatprep.subr.mxu1 %v6137_v21  ;;  %v6128_v21 = vld [vmem:[#allocation7 + $0x2290] sm:$0xff]  ;;  %v11144_v59 = vpop.f32.mrf.mxu0 }
 0x459   : > { %6426 = vmatprep.subr.mxu0 %v6105_v7  ;;  %6524 = vmatpush1.msra.mxu1 %v6136_v18  ;;  %v6097_v18 = vld [vmem:[#allocation7 + $0x2198] sm:$0xff]  ;;  %12506 = vst [vmem:[#allocation161_spill] sm:$0xff] %v11144_v59  ;;  %v6096_v7 = vld [vmem:[#allocation7 + $0x2190] sm:$0xff] }
 0x45a   : > { %6427 = vmatpush2.msra.mxu0 %v6104_v63  ;;  %6260 = vmatprep.mubr.f32.mxu1 %v11133_v51  ;;  %v11148_v63 = vld [vmem:[#allocation2 + $0x170] sm:$0xff]  ;;  %v11153_v59 = vld [vmem:[#allocation2 + $0x178] sm:$0xff] }
 0x45b   : > { %6373 = vmatprep.mubr.f32.mxu0 %v12377_v41  ;;  %6428 = vmatprep.subr.mxu0 %v6101_v16  ;;  %v6093_v16 = vld [vmem:[#allocation7 + $0x2178] sm:$0xff] }
 0x45c   : > { %6525 = vmatprep.subr.mxu1 %v6133_v43  ;;  %6261 = vmatmul.mubr.f32.gmra.mxu1 %v11135_v9  ;;  %v6125_v43 = vld [vmem:[#allocation7 + $0x2278] sm:$0xff] }
 0x45d   : > { %8758 = vmatmul.mubr.msk.f32.gmra.mxu0 %vm782_vm5, %v11138_v28  ;;  %6526 = vmatpush1.msra.mxu1 %v6132_v52  ;;  %v6124_v52 = vld [vmem:[#allocation7 + $0x2270] sm:$0xff] }
 0x45e   : > { %6429 = vmatpush2.msra.mxu0 %v6100_v23  ;;  %6527 = vmatprep.subr.mxu1 %v6129_v60  ;;  %v4827_v36 = vpop.f32.mrf.mxu0  ;;  %v6092_v60 = vld [vmem:[#allocation7 + $0x2170] sm:$0xff]  ;;  %v6121_v23 = vld [vmem:[#allocation7 + $0x2258] sm:$0xff] }
 0x45f   : > { %6430 = vmatprep.subr.mxu0 %v6097_v18  ;;  %6528 = vmatpush1.msra.mxu1 %v6128_v21  ;;  %v4941_v24 = vadd.f32 %v4940_v53, %v4827_v36  ;;  %v11161_v21 = vpop.f32.mrf.mxu1  ;;  %v6089_v36 = vld [vmem:[#allocation7 + $0x2158] sm:$0xff]  ;;  %v6120_v53 = vld [vmem:[#allocation7 + $0x2250] sm:$0xff] }
 0x460   : > { %6431 = vmatpush2.msra.mxu0 %v6096_v7  ;;  %6266 = vmatprep.mubr.f32.mxu1 %v11148_v63  ;;  %v11155_v30 = vpop.f32.mrf.mxu0  ;;  %12508 = vst [vmem:[#allocation163_spill] sm:$0xff] %v11161_v21  ;;  %v6064_v21 = vld [vmem:[#allocation7 + $0x2090] sm:$0xff] }
 0x461   : > { %12507 = vst [vmem:[#allocation162_spill] sm:$0xff] %v11155_v30  ;;  %6379 = vmatprep.mubr.f32.mxu0 %v12377_v41  ;;  %6432 = vmatprep.subr.mxu0 %v6093_v16  ;;  %v11159_v18 = vadd.f32 %v4941_v24, %v10916_v2  ;;  %v6085_v2 = vld [vmem:[#allocation7 + $0x2138] sm:$0xff] }
 0x462   : > { %6529 = vmatprep.subr.mxu1 %v6125_v43  ;;  %6267 = vmatmul.mubr.f32.gmra.mxu1 %v11150_v54  ;;  %v4833_v7 = vpop.f32.mrf.mxu0  ;;  %v6117_v43 = vld [vmem:[#allocation7 + $0x2238] sm:$0xff] }
 0x463   : > { %8759 = vmatmul.mubr.msk.f32.gmra.mxu0 %vm782_vm5, %v11153_v59  ;;  %6530 = vmatpush1.msra.mxu1 %v6124_v52  ;;  %v4946_v16 = vpop.f32.mrf.mxu1  ;;  %v11175_v52 = vld [vmem:[#allocation2 + $0x190] sm:$0xff] }
 0x464   : > { %6433 = vmatpush2.msra.mxu0 %v6092_v60  ;;  %6531 = vmatprep.subr.mxu1 %v6121_v23  ;;  %v4947_v24 = vadd.f32 %v4946_v16, %v4833_v7  ;;  %v11168_v58 = vpop.f32.mrf.mxu0  ;;  %v6084_v23 = vld [vmem:[#allocation7 + $0x2130] sm:$0xff]  ;;  %v6081_v7 = vld [vmem:[#allocation7 + $0x2118] sm:$0xff] }
 0x465   : > { %12509 = vst [vmem:[#allocation164_spill] sm:$0xff] %v11168_v58  ;;  %6434 = vmatprep.subr.mxu0 %v6089_v36  ;;  %6532 = vmatpush1.msra.mxu1 %v6120_v53  ;;  %v11172_v11 = vpop.f32.mrf.mxu1  ;;  %v6113_v36 = vld [vmem:[#allocation7 + $0x2218] sm:$0xff]  ;;  %v6112_v16 = vld [vmem:[#allocation7 + $0x2210] sm:$0xff] }
 0x466   : > { %12510 = vst [vmem:[#allocation165_spill] sm:$0xff] %v11172_v11  ;;  %6435 = vmatpush2.msra.mxu0 %v6088_v20  ;;  %6272 = vmatprep.mubr.f32.mxu1 %v11166_v40  ;;  %v11178_v60 = vadd.f32 %v4947_v24, %v10938_v39  ;;  %v6924_v24 = vld [vmem:[#allocation7 + $0x24e8] sm:$0xff] }
 0x467   : > { %6385 = vmatprep.mubr.f32.mxu0 %v12377_v41  ;;  %6436 = vmatprep.subr.mxu0 %v6085_v2  ;;  %v4839_v53 = vpop.f32.mrf.mxu0  ;;  %v6077_v2 = vld [vmem:[#allocation7 + $0x20f8] sm:$0xff] }
 0x468   : > { %6533 = vmatprep.subr.mxu1 %v6117_v43  ;;  %6273 = vmatmul.mubr.f32.gmra.mxu1 %v11170_v31  ;;  %v4952_v20 = vpop.f32.mrf.mxu1  ;;  %v6076_v43 = vld [vmem:[#allocation7 + $0x20f0] sm:$0xff] }
 0x469   : > { %8760 = vmatmul.mubr.msk.f32.gmra.mxu0 %vm782_vm5, %v11175_v52  ;;  %6534 = vmatpush1.msra.mxu1 %v6116_v34  ;;  %v4953_v0 = vadd.f32 %v4952_v20, %v4839_v53  ;;  %v11184_v39 = vpop.f32.mrf.mxu0  ;;  %v6923_v34 = vld [vmem:[#allocation7 + $0x24e0] sm:$0xff] }
 0x46a   : > { %12511 = vst [vmem:[#allocation166_spill] sm:$0xff] %v11184_v39  ;;  %6437 = vmatpush2.msra.mxu0 %v6084_v23  ;;  %6535 = vmatprep.subr.mxu1 %v6113_v36  ;;  %v11186_v11 = vpop.f32.mrf.mxu1  ;;  %v6920_v23 = vld [vmem:[#allocation7 + $0x24c8] sm:$0xff]  ;;  %v6072_v36 = vld [vmem:[#allocation7 + $0x20d0] sm:$0xff] }
 0x46b   : > { %12512 = vst [vmem:[#allocation167_spill] sm:$0xff] %v11186_v11  ;;  %6438 = vmatprep.subr.mxu0 %v6081_v7  ;;  %6536 = vmatpush1.msra.mxu1 %v6112_v16  ;;  %v11189_v58 = vadd.f32 %v4953_v0, %v10949_v37  ;;  %v6919_v7 = vld [vmem:[#allocation7 + $0x24c0] sm:$0xff]  ;;  %v6069_v16 = vld [vmem:[#allocation7 + $0x20b8] sm:$0xff]  ;;  %v6916_v0 = vld [vmem:[#allocation7 + $0x24a8] sm:$0xff] }
 0x46c   : > { %6439 = vmatpush2.msra.mxu0 %v6080_v61  ;;  %6569 = vmatprep.mubr.f32.mxu1 %v12377_v41  ;;  %v4845_v53 = vpop.f32.mrf.mxu0  ;;  %v6068_v61 = vld [vmem:[#allocation7 + $0x20b0] sm:$0xff] }
 0x46d   : > { %6440 = vmatprep.subr.mxu0 %v6077_v2  ;;  %7039 = vmatprep.subr.mxu1 %v6924_v24  ;;  %v4958_v20 = vpop.f32.mrf.mxu1  ;;  %v6915_v2 = vld [vmem:[#allocation7 + $0x24a0] sm:$0xff]  ;;  %v6065_v24 = vld [vmem:[#allocation7 + $0x2098] sm:$0xff] }
 0x46e   : > { %6441 = vmatpush2.msra.mxu0 %v6076_v43  ;;  %8761 = vmatmul.mubr.msk.f32.vlgmr.msra.gmra.mxu1 %vm782_vm5, %v11047_v33  ;;  %v4959_v11 = vadd.f32 %v4958_v20, %v4845_v53  ;;  %v11194_v37 = vpop.f32.mrf.mxu0  ;;  %v6912_v33 = vld [vmem:[#allocation7 + $0x2488] sm:$0xff] }
 0x46f   : > { %12513 = vst [vmem:[#allocation168_spill] sm:$0xff] %v11194_v37  ;;  %7040 = vmatpush1.msra.mxu1 %v6923_v34  ;;  %6442 = vmatprep.subr.mxu0 %v6073_v55  ;;  %v11196_v39 = vpop.f32.mrf.mxu1  ;;  %v6911_v34 = vld [vmem:[#allocation7 + $0x2480] sm:$0xff]  ;;  %v6061_v55 = vld [vmem:[#allocation7 + $0x2078] sm:$0xff] }
 0x470   : > { %12514 = vst [vmem:[#allocation169_spill] sm:$0xff] %v11196_v39  ;;  %7041 = vmatprep.subr.mxu1 %v6920_v23  ;;  %6443 = vmatpush2.msra.mxu0 %v6072_v36  ;;  %v11199_v43 = vadd.f32 %v4959_v11, %v10959_v5  ;;  %v6908_v39 = vld [vmem:[#allocation7 + $0x2468] sm:$0xff]  ;;  %v6060_v23 = vld [vmem:[#allocation7 + $0x2070] sm:$0xff]  ;;  %v6907_v5 = vld [vmem:[#allocation7 + $0x2460] sm:$0xff] }
 0x471   : > { %7042 = vmatpush1.msra.mxu1 %v6919_v7  ;;  %6444 = vmatprep.subr.mxu0 %v6069_v16  ;;  %v4851_v53 = vpop.f32.mrf.mxu0  ;;  %v6057_v11 = vld [vmem:[#allocation7 + $0x2058] sm:$0xff]  ;;  %v6904_v16 = vld [vmem:[#allocation7 + $0x2448] sm:$0xff] }
 0x472   : > { %7043 = vmatprep.subr.mxu1 %v6916_v0  ;;  %6445 = vmatpush2.msra.mxu0 %v6068_v61  ;;  %v4964_v20 = vpop.f32.mrf.mxu1  ;;  %v6056_v0 = vld [vmem:[#allocation7 + $0x2050] sm:$0xff] }
 0x473   : > { %7044 = vmatpush1.msra.mxu1 %v6915_v2  ;;  %6446 = vmatprep.subr.mxu0 %v6065_v24  ;;  %v4965_v36 = vadd.f32 %v4964_v20, %v4851_v53  ;;  %v11201_v37 = vpop.f32.mrf.mxu0  ;;  %v6903_v2 = vld [vmem:[#allocation7 + $0x2440] sm:$0xff]  ;;  %v6053_v24 = vld [vmem:[#allocation7 + $0x2038] sm:$0xff] }
 0x474   : > { %12515 = vst [vmem:[#allocation170_spill] sm:$0xff] %v11201_v37  ;;  %7045 = vmatprep.subr.mxu1 %v6912_v33  ;;  %6447 = vmatpush2.msra.mxu0 %v6064_v21  ;;  %v11203_v7 = vpop.f32.mrf.mxu1  ;;  %v6900_v33 = vld [vmem:[#allocation7 + $0x2428] sm:$0xff]  ;;  %v6052_v21 = vld [vmem:[#allocation7 + $0x2030] sm:$0xff] }
 0x475   : > { %12516 = vst [vmem:[#allocation171_spill] sm:$0xff] %v11203_v7  ;;  %7046 = vmatpush1.msra.mxu1 %v6911_v34  ;;  %6448 = vmatprep.subr.mxu0 %v6061_v55  ;;  %v11206_v61 = vadd.f32 %v4965_v36, %v10966_v57  ;;  %v6899_v7 = vld [vmem:[#allocation7 + $0x2420] sm:$0xff]  ;;  %v6049_v34 = vld [vmem:[#allocation7 + $0x2018] sm:$0xff]  ;;  %v6896_v57 = vld [vmem:[#allocation7 + $0x2408] sm:$0xff] }
 0x476   : > { %7047 = vmatprep.subr.mxu1 %v6908_v39  ;;  %6449 = vmatpush2.msra.mxu0 %v6060_v23  ;;  %v4857_v53 = vpop.f32.mrf.mxu0  ;;  %v6048_v39 = vld [vmem:[#allocation7 + $0x2010] sm:$0xff]  ;;  %v6895_v36 = vld [vmem:[#allocation7 + $0x2400] sm:$0xff] }
 0x477   : > { %7048 = vmatpush1.msra.mxu1 %v6907_v5  ;;  %6450 = vmatprep.subr.mxu0 %v6057_v11  ;;  %v4970_v20 = vpop.f32.mrf.mxu1  ;;  %v6892_v11 = vld [vmem:[#allocation7 + $0x23e8] sm:$0xff] }
 0x478   : > { %7049 = vmatprep.subr.mxu1 %v6904_v16  ;;  %6451 = vmatpush2.msra.mxu0 %v6056_v0  ;;  %v4971_v55 = vadd.f32 %v4970_v20, %v4857_v53  ;;  %v11208_v37 = vpop.f32.mrf.mxu0  ;;  %v7020_v0 = vld [vmem:[#allocation7 + $0x27e8] sm:$0xff]  ;;  %v6891_v53 = vld [vmem:[#allocation7 + $0x23e0] sm:$0xff] }
 0x479   : > { %12517 = vst [vmem:[#allocation172_spill] sm:$0xff] %v11208_v37  ;;  %7050 = vmatpush1.msra.mxu1 %v6903_v2  ;;  %6452 = vmatprep.subr.mxu0 %v6053_v24  ;;  %v11210_v23 = vpop.f32.mrf.mxu1  ;;  %v7019_v24 = vld [vmem:[#allocation7 + $0x27e0] sm:$0xff]  ;;  %v6888_v20 = vld [vmem:[#allocation7 + $0x23c8] sm:$0xff] }
 0x47a   : > { %12518 = vst [vmem:[#allocation173_spill] sm:$0xff] %v11210_v23  ;;  %7051 = vmatprep.subr.mxu1 %v6900_v33  ;;  %6453 = vmatpush2.msra.mxu0 %v6052_v21  ;;  %v11213_v5 = vadd.f32 %v4971_v55, %v10973_v44  ;;  %v6717_v23 = vld [vmem:[#allocation2 + $0x1a8] sm:$0x1] }
 0x47b   : > { %7052 = vmatpush1.msra.mxu1 %v6899_v7  ;;  %6454 = vmatprep.subr.mxu0 %v6049_v34  ;;  %v4863_v16 = vpop.f32.mrf.mxu0  ;;  %v6887_v7 = vld [vmem:[#allocation7 + $0x23c0] sm:$0xff] }
 0x47c   : > { %7053 = vmatprep.subr.mxu1 %v6896_v57  ;;  %6455 = vmatpush2.msra.mxu0 %v6048_v39  ;;  %v4976_v2 = vpop.f32.mrf.mxu1  ;;  %v7016_v57 = vld [vmem:[#allocation7 + $0x27c8] sm:$0xff]  ;;  %v6883_v39 = vld [vmem:[#allocation7 + $0x23a0] sm:$0xff] }
 0x47d   : > { %6456 = vmatprep.mubr.f32.mxu0 %v11073_v32  ;;  %7054 = vmatpush1.msra.mxu1 %v6895_v36  ;;  %v4977_v33 = vadd.f32 %v4976_v2, %v4863_v16  ;;  %v11216_v21 = vpop.f32.mrf.mxu0  ;;  %v6884_v32 = vld [vmem:[#allocation7 + $0x23a8] sm:$0xff]  ;;  %v7015_v36 = vld [vmem:[#allocation7 + $0x27c0] sm:$0xff] }
 0x47e   : > { %12519 = vst [vmem:[#allocation174_spill] sm:$0xff] %v11216_v21  ;;  %6457 = vmatmul.mubr.f32.vlgmr.msra.gmra.mxu0 %v11075_v10  ;;  %7055 = vmatprep.subr.mxu1 %v6892_v11  ;;  %v11219_v44 = vpop.f32.mrf.mxu1  ;;  %v6880_v11 = vld [vmem:[#allocation7 + $0x2388] sm:$0xff]  ;;  %v7011_v2 = vld [vmem:[#allocation7 + $0x27a0] sm:$0xff] }
 0x47f   : > { %12520 = vst [vmem:[#allocation175_spill] sm:$0xff] %v11219_v44  ;;  %7168 = vmatprep.subr.mxu0 %v7020_v0  ;;  %7056 = vmatpush1.msra.mxu1 %v6891_v53  ;;  %v11222_v34 = vadd.f32 %v4977_v33, %v10982_v19  ;;  %v6879_v19 = vld [vmem:[#allocation7 + $0x2380] sm:$0xff]  ;;  %v6876_v0 = vld [vmem:[#allocation7 + $0x2368] sm:$0xff]  ;;  %v11425_v44 = vld [vmem:[#allocation2 + $0x190] sm:$0xff] }
 0x480   : > { %7169 = vmatpush1.msra.mxu0 %v7019_v24  ;;  %7057 = vmatprep.subr.mxu1 %v6888_v20  ;;  %v4869_v55 = vpop.f32.mrf.mxu0  ;;  %v6875_v53 = vld [vmem:[#allocation7 + $0x2360] sm:$0xff]  ;;  %v6872_v24 = vld [vmem:[#allocation7 + $0x2348] sm:$0xff] }
 0x481   : > { %6462 = vmatprep.mubr.f32.mxu0 %v11077_v35  ;;  %6575 = vmatprep.mubr.f32.mxu1 %v12377_v41  ;;  %v4982_v10 = vpop.f32.mrf.mxu1  ;;  %v6868_v20 = vld [vmem:[#allocation7 + $0x2328] sm:$0xff]  ;;  %v6867_v33 = vld [vmem:[#allocation7 + $0x2320] sm:$0xff] }
 0x482   : > { %7058 = vmatpush1.msra.mxu1 %v6887_v7  ;;  %6463 = vmatmul.mubr.f32.gmra.mxu0 %v11089_v45  ;;  %v4983_v16 = vadd.f32 %v4982_v10, %v4869_v55  ;;  %v7012_v45 = vld [vmem:[#allocation7 + $0x27a8] sm:$0xff]  ;;  %v6987_v55 = vld [vmem:[#allocation7 + $0x26e0] sm:$0xff] }
 0x483   : > { %8762 = vmatmul.mubr.msk.f32.gmra.mxu1 %vm782_vm5, %v11092_v17  ;;  %7059 = vmatprep.subr.mxu1 %v6884_v32  ;;  %v6864_v7 = vld [vmem:[#allocation7 + $0x2308] sm:$0xff]  ;;  %v11249_v10 = vpop.f32.mrf.mxu1 }
 0x484   : > { %7170 = vmatprep.subr.mxu0 %v7016_v57  ;;  %7060 = vmatpush1.msra.mxu1 %v6883_v39  ;;  %v11230_v35 = vadd.f32 %v4983_v16, %v10990_v27  ;;  %v6871_v27 = vld [vmem:[#allocation7 + $0x2340] sm:$0xff]  ;;  %v6988_v32 = vld [vmem:[#allocation7 + $0x26e8] sm:$0xff]  ;;  %v11245_v39 = vpop.f32.mrf.mxu0  ;;  %12522 = vst [vmem:[#allocation177_spill] sm:$0xff] %v11249_v10 }
 0x485   : > { %7171 = vmatpush1.msra.mxu0 %v7015_v36  ;;  %7061 = vmatprep.subr.mxu1 %v6880_v11  ;;  %v6984_v57 = vld [vmem:[#allocation7 + $0x26c8] sm:$0xff]  ;;  %12521 = vst [vmem:[#allocation176_spill] sm:$0xff] %v11245_v39  ;;  %v6979_v36 = vld [vmem:[#allocation7 + $0x26a0] sm:$0xff]  ;;  %v6711_v39 = vld [vmem:[#allocation2 + $0x178] sm:$0xfe] }
 0x486   : > { %6468 = vmatprep.mubr.f32.mxu0 %v11094_v48  ;;  %6581 = vmatprep.mubr.f32.mxu1 %v12377_v41  ;;  %v7008_v48 = vld [vmem:[#allocation7 + $0x2788] sm:$0xff]  ;;  %v5587_v11 = vpop.f32.mrf.mxu0 }
 0x487   : > { %7062 = vmatpush1.msra.mxu1 %v6879_v19  ;;  %6469 = vmatmul.mubr.f32.gmra.mxu0 %v11100_v42  ;;  %v7007_v42 = vld [vmem:[#allocation7 + $0x2780] sm:$0xff]  ;;  %v6976_v16 = vld [vmem:[#allocation7 + $0x2688] sm:$0xff] }
 0x488   : > { %8763 = vmatmul.mubr.msk.f32.gmra.mxu1 %vm782_vm5, %v11103_v38  ;;  %7063 = vmatprep.subr.mxu1 %v6876_v0  ;;  %v6863_v38 = vld [vmem:[#allocation7 + $0x2300] sm:$0xff] }
 0x489   : > { %7172 = vmatprep.subr.mxu0 %v7012_v45  ;;  %7064 = vmatpush1.msra.mxu1 %v6875_v53  ;;  %v6975_v45 = vld [vmem:[#allocation7 + $0x2680] sm:$0xff]  ;;  %v6972_v53 = vld [vmem:[#allocation7 + $0x2668] sm:$0xff] }
 0x48a   : > { %7173 = vmatpush1.msra.mxu0 %v7011_v2  ;;  %7065 = vmatprep.subr.mxu1 %v6872_v24  ;;  %v11258_v2 = vpop.f32.mrf.mxu0  ;;  %v6971_v24 = vld [vmem:[#allocation7 + $0x2660] sm:$0xff] }
 0x48b   : > { %6474 = vmatprep.mubr.f32.mxu0 %v11108_v25  ;;  %6587 = vmatprep.mubr.f32.mxu1 %v12377_v41  ;;  %v7004_v25 = vld [vmem:[#allocation7 + $0x2768] sm:$0xff]  ;;  %12524 = vst [vmem:[#allocation179_spill] sm:$0xff] %v11258_v2  ;;  %v6700_v2 = vld [vmem:[#allocation2 + $0x120] sm:$0xfe] }
 0x48c   : > { %7066 = vmatpush1.msra.mxu1 %v6871_v27  ;;  %6475 = vmatmul.mubr.f32.gmra.mxu0 %v11113_v8  ;;  %v7003_v8 = vld [vmem:[#allocation7 + $0x2760] sm:$0xff] }
 0x48d   : > { %8764 = vmatmul.mubr.msk.f32.gmra.mxu1 %vm782_vm5, %v11116_v3  ;;  %7067 = vmatprep.subr.mxu1 %v6868_v20  ;;  %v6983_v3 = vld [vmem:[#allocation7 + $0x26c0] sm:$0xff] }
 0x48e   : > { %7174 = vmatprep.subr.mxu0 %v7008_v48  ;;  %7068 = vmatpush1.msra.mxu1 %v6867_v33  ;;  %v6995_v20 = vld [vmem:[#allocation7 + $0x2720] sm:$0xff]  ;;  %v6968_v48 = vld [vmem:[#allocation7 + $0x2648] sm:$0xff] }
 0x48f   : > { %7175 = vmatpush1.msra.mxu0 %v7007_v42  ;;  %7069 = vmatprep.subr.mxu1 %v6864_v7  ;;  %v6684_v42 = vld [vmem:[#allocation2 + $0xa0] sm:$0xfe] }
 0x490   : > { %6480 = vmatprep.mubr.f32.mxu0 %v11119_v14  ;;  %6593 = vmatprep.mubr.f32.mxu1 %v12377_v41  ;;  %v6980_v14 = vld [vmem:[#allocation7 + $0x26a8] sm:$0xff] }
 0x491   : > { %7070 = vmatpush1.msra.mxu1 %v6863_v38  ;;  %6481 = vmatmul.mubr.f32.gmra.mxu0 %v11124_v49  ;;  %v7000_v49 = vld [vmem:[#allocation7 + $0x2748] sm:$0xff] }
 0x492   : > { %8765 = vmatmul.mubr.msk.f32.gmra.mxu1 %vm782_vm5, %v11127_v50  ;;  %7071 = vmatprep.subr.mxu1 %v6988_v32  ;;  %v6999_v50 = vld [vmem:[#allocation7 + $0x2740] sm:$0xff]  ;;  %v6964_v32 = vld [vmem:[#allocation7 + $0x2628] sm:$0xff] }
 0x493   : > { %7176 = vmatprep.subr.mxu0 %v7004_v25  ;;  %7072 = vmatpush2.msra.mxu1 %v6987_v55  ;;  %v6963_v55 = vld [vmem:[#allocation7 + $0x2620] sm:$0xff] }
 0x494   : > { %7177 = vmatpush1.msra.mxu0 %v7003_v8  ;;  %7073 = vmatprep.subr.mxu1 %v6984_v57  ;;  %v6792_v8 = vrot.slane %v6684_v42, 1  ;;  %v12332_v57 = vrot.slane %v11092_v17, 1  ;;  %v6948_v42 = vld [vmem:[#allocation7 + $0x25a8] sm:$0xff] }
 0x495   : > { %6486 = vmatprep.mubr.f32.mxu0 %v11133_v51  ;;  %6599 = vmatprep.mubr.f32.mxu1 %v12377_v41 }
 0x496   : > { %7074 = vmatpush2.msra.mxu1 %v6983_v3  ;;  %6487 = vmatmul.mubr.f32.gmra.mxu0 %v11135_v9  ;;  %v5474_v19 = vpop.f32.mrf.mxu1 }
 0x497   : > { %8766 = vmatmul.mubr.msk.f32.gmra.mxu1 %vm782_vm5, %v11138_v28  ;;  %7075 = vmatprep.subr.mxu1 %v6980_v14  ;;  %v5588_v0 = vadd.f32 %v5587_v11, %v5474_v19  ;;  %v6996_v28 = vld [vmem:[#allocation7 + $0x2728] sm:$0xff]  ;;  %v6991_v14 = vld [vmem:[#allocation7 + $0x2700] sm:$0xff] }
 0x498   : > { %7178 = vmatprep.subr.mxu0 %v7000_v49  ;;  %7076 = vmatpush2.msra.mxu1 %v6979_v36  ;;  %v11256_v51 = vpop.f32.mrf.mxu1  ;;  %v6960_v49 = vld [vmem:[#allocation7 + $0x2608] sm:$0xff] }
 0x499   : > { %12523 = vst [vmem:[#allocation178_spill] sm:$0xff] %v11256_v51  ;;  %7179 = vmatpush1.msra.mxu0 %v6999_v50  ;;  %7077 = vmatprep.subr.mxu1 %v6976_v16  ;;  %v11261_v9 = vadd.f32 %v5588_v0, %v11021_v47  ;;  %v6926_v50 = vld [vmem:[#allocation7 + $0x24f8] sm:$0xff]  ;;  %v6956_v16 = vld [vmem:[#allocation7 + $0x25e8] sm:$0xff]  ;;  %v11291_v0 = vsel %vm1776_vm8, %v6792_v8, %v12332_v57  ;;  %v6877_v51 = vld [vmem:[#allocation7 + $0x2370] sm:$0xff] }
 0x49a   : > { %6492 = vmatprep.mubr.f32.mxu0 %v11148_v63  ;;  %6605 = vmatprep.mubr.f32.mxu1 %v12377_v41  ;;  %v5480_v27 = vpop.f32.mrf.mxu1  ;;  %v6967_v63 = vld [vmem:[#allocation7 + $0x2640] sm:$0xff]  ;;  %v6914_v8 = vld [vmem:[#allocation7 + $0x2498] sm:$0xff] }
 0x49b   : > { %7078 = vmatpush2.msra.mxu1 %v6975_v45  ;;  %6493 = vmatmul.mubr.f32.gmra.mxu0 %v11150_v54  ;;  %v5593_v33 = vpop.f32.mrf.mxu0 }
 0x49c   : > { %8767 = vmatmul.mubr.msk.f32.gmra.mxu1 %vm782_vm5, %v11153_v59  ;;  %7079 = vmatprep.subr.mxu1 %v6972_v53  ;;  %v5594_v47 = vadd.f32 %v5593_v33, %v5480_v27  ;;  %v11268_v7 = vpop.f32.mrf.mxu1  ;;  %v6992_v59 = vld [vmem:[#allocation7 + $0x2708] sm:$0xff]  ;;  %v6925_v53 = vld [vmem:[#allocation7 + $0x24f0] sm:$0xff] }
 0x49d   : > { %12525 = vst [vmem:[#allocation180_spill] sm:$0xff] %v11268_v7  ;;  %7180 = vmatprep.subr.mxu0 %v6996_v28  ;;  %7080 = vmatpush2.msra.mxu1 %v6971_v24  ;;  %v11270_v38 = vpop.f32.mrf.mxu0  ;;  %v6952_v28 = vld [vmem:[#allocation7 + $0x25c8] sm:$0xff]  ;;  %v6921_v33 = vld [vmem:[#allocation7 + $0x24d0] sm:$0xff] }
 0x49e   : > { %12526 = vst [vmem:[#allocation181_spill] sm:$0xff] %v11270_v38  ;;  %7181 = vmatpush1.msra.mxu0 %v6995_v20  ;;  %7081 = vmatprep.subr.mxu1 %v6968_v48  ;;  %v11273_v54 = vadd.f32 %v5594_v47, %v11033_v6  ;;  %v5486_v25 = vpop.f32.mrf.mxu1  ;;  %v6959_v6 = vld [vmem:[#allocation7 + $0x2600] sm:$0xff]  ;;  %v6697_v38 = vld [vmem:[#allocation2 + $0x108] sm:$0x1] }
 0x49f   : > { %6498 = vmatprep.mubr.f32.mxu0 %v11166_v40  ;;  %6611 = vmatprep.mubr.f32.mxu1 %v12377_v41  ;;  %v5599_v3 = vpop.f32.mrf.mxu0  ;;  %v6951_v20 = vld [vmem:[#allocation7 + $0x25c0] sm:$0xff] }
 0x4a0   : > { %7082 = vmatpush2.msra.mxu1 %v6967_v63  ;;  %6499 = vmatmul.mubr.f32.gmra.mxu0 %v11170_v31  ;;  %v5600_v36 = vadd.f32 %v5599_v3, %v5486_v25  ;;  %v11279_v11 = vpop.f32.mrf.mxu1  ;;  %v6947_v25 = vld [vmem:[#allocation7 + $0x25a0] sm:$0xff]  ;;  %v6944_v3 = vld [vmem:[#allocation7 + $0x2588] sm:$0xff] }
 0x4a1   : > { %12527 = vst [vmem:[#allocation182_spill] sm:$0xff] %v11279_v11  ;;  %8768 = vmatmul.mubr.msk.f32.gmra.mxu1 %vm782_vm5, %v11175_v52  ;;  %7083 = vmatprep.subr.mxu1 %v6964_v32  ;;  %v11283_v40 = vpop.f32.mrf.mxu0  ;;  %v6955_v52 = vld [vmem:[#allocation7 + $0x25e0] sm:$0xff]  ;;  %v6918_v32 = vld [vmem:[#allocation7 + $0x24b8] sm:$0xff] }
 0x4a2   : > { %12528 = vst [vmem:[#allocation183_spill] sm:$0xff] %v11283_v40  ;;  %7182 = vmatprep.subr.mxu0 %v6992_v59  ;;  %7084 = vmatpush2.msra.mxu1 %v6963_v55  ;;  %v11286_v19 = vadd.f32 %v5600_v36, %v11045_v12  ;;  %v5492_v31 = vpop.f32.mrf.mxu1  ;;  %v6922_v12 = vld [vmem:[#allocation7 + $0x24d8] sm:$0xff]  ;;  %v6917_v55 = vld [vmem:[#allocation7 + $0x24b0] sm:$0xff] }
 0x4a3   : > { %7183 = vmatpush1.msra.mxu0 %v6991_v14  ;;  %7085 = vmatprep.subr.mxu1 %v6960_v49  ;;  %v5605_v45 = vpop.f32.mrf.mxu0  ;;  %v6913_v36 = vld [vmem:[#allocation7 + $0x2490] sm:$0xff] }
 0x4a4   : > { %7086 = vmatpush2.msra.mxu1 %v6959_v6  ;;  %7216 = vmatprep.mubr.f32.mxu0 %v12377_v41  ;;  %v5606_v24 = vadd.f32 %v5605_v45, %v5492_v31  ;;  %v11294_v27 = vpop.f32.mrf.mxu1  ;;  %v6943_v6 = vld [vmem:[#allocation7 + $0x2580] sm:$0xff]  ;;  %v6909_v31 = vld [vmem:[#allocation7 + $0x2470] sm:$0xff] }
 0x4a5   : > { %12529 = vst [vmem:[#allocation184_spill] sm:$0xff] %v11294_v27  ;;  %7265 = vmatprep.subr.mxu0 %v6926_v50  ;;  %7087 = vmatprep.subr.mxu1 %v6956_v16  ;;  %v11296_v48 = vpop.f32.mrf.mxu0  ;;  %v6940_v16 = vld [vmem:[#allocation7 + $0x2568] sm:$0xff]  ;;  %v11332_v40 = vld [vmem:[#allocation2 + $0xf0] sm:$0xff] }
 0x4a6   : > { %12530 = vst [vmem:[#allocation185_spill] sm:$0xff] %v11296_v48  ;;  %8769 = vmatmul.mubr.msk.f32.vlgmr.msra.gmra.mxu0 %vm782_vm5, %v11291_v0  ;;  %7088 = vmatpush2.msra.mxu1 %v6955_v52  ;;  %v11301_v47 = vadd.f32 %v5606_v24, %v11057_v26  ;;  %v5498_v63 = vpop.f32.mrf.mxu1  ;;  %v6910_v26 = vld [vmem:[#allocation7 + $0x2478] sm:$0xff]  ;;  %v6939_v52 = vld [vmem:[#allocation7 + $0x2560] sm:$0xff]  ;;  %v6686_v24 = vld [vmem:[#allocation2 + $0xb0] sm:$0xff] }
 0x4a7   : > { %7266 = vmatpush1.msra.mxu0 %v6925_v53  ;;  %7089 = vmatprep.subr.mxu1 %v6952_v28  ;;  %v5611_v59 = vpop.f32.mrf.mxu0  ;;  %v6936_v53 = vld [vmem:[#allocation7 + $0x2548] sm:$0xff]  ;;  %v6683_v28 = vld [vmem:[#allocation2 + $0x98] sm:$0xfe] }
 0x4a8   : > { %7267 = vmatprep.subr.mxu0 %v6922_v12  ;;  %7090 = vmatpush2.msra.mxu1 %v6951_v20  ;;  %v5612_v14 = vadd.f32 %v5611_v59, %v5498_v63  ;;  %v11303_v49 = vpop.f32.mrf.mxu1  ;;  %v6682_v12 = vld [vmem:[#allocation2 + $0x90] sm:$0xfe]  ;;  %v11310_v20 = vld [vmem:[#allocation2 + $0xa8] sm:$0xff]  ;;  %v6906_v63 = vld [vmem:[#allocation7 + $0x2458] sm:$0xff] }
 0x4a9   : > { %12531 = vst [vmem:[#allocation186_spill] sm:$0xff] %v11303_v49  ;;  %7268 = vmatpush1.msra.mxu0 %v6921_v33  ;;  %7091 = vmatprep.subr.mxu1 %v6948_v42  ;;  %v11305_v50 = vpop.f32.mrf.mxu0  ;;  %v6689_v33 = vld [vmem:[#allocation2 + $0xc8] sm:$0x1]  ;;  %v6902_v59 = vld [vmem:[#allocation7 + $0x2438] sm:$0xff] }
 0x4aa   : > { %12532 = vst [vmem:[#allocation187_spill] sm:$0xff] %v11305_v50  ;;  %7269 = vmatprep.subr.mxu0 %v6918_v32  ;;  %7092 = vmatpush2.msra.mxu1 %v6947_v25  ;;  %v11308_v45 = vadd.f32 %v5612_v14, %v11064_v1  ;;  %v6935_v32 = vld [vmem:[#allocation7 + $0x2540] sm:$0xff]  ;;  %v6905_v1 = vld [vmem:[#allocation7 + $0x2450] sm:$0xff]  ;;  %v6790_v14 = vrot.slane %v6686_v24, 1  ;;  %v6898_v49 = vld [vmem:[#allocation7 + $0x2418] sm:$0xff]  ;;  %v6797_v48 = vrot.slane %v6689_v33, 1 }
 0x4ab   : > { %7270 = vmatpush1.msra.mxu0 %v6917_v55  ;;  %7093 = vmatprep.subr.mxu1 %v6944_v3  ;;  %v6932_v55 = vld [vmem:[#allocation7 + $0x2528] sm:$0xff]  ;;  %v6789_v3 = vrot.slane %v6683_v28, 1  ;;  %v6931_v50 = vld [vmem:[#allocation7 + $0x2520] sm:$0xff] }
 0x4ac   : > { %7271 = vmatprep.subr.mxu0 %v6914_v8  ;;  %7094 = vmatpush2.msra.mxu1 %v6943_v6  ;;  %v5504_v42 = vpop.f32.mrf.mxu1  ;;  %v6901_v6 = vld [vmem:[#allocation7 + $0x2430] sm:$0xff]  ;;  %v6688_v28 = vld [vmem:[#allocation2 + $0xc0] sm:$0x1] }
 0x4ad   : > { %7272 = vmatpush1.msra.mxu0 %v6913_v36  ;;  %7095 = vmatprep.subr.mxu1 %v6940_v16  ;;  %v5617_v25 = vpop.f32.mrf.mxu0  ;;  %v6786_v36 = vrot.slane %v6682_v12, 1  ;;  %v6787_v16 = vrot.slane %v11310_v20, 1  ;;  %v6897_v12 = vld [vmem:[#allocation7 + $0x2410] sm:$0xff]  ;;  %v11323_v20 = vsel %vm1776_vm8, %v6789_v3, %v6790_v14  ;;  %v6691_v3 = vld [vmem:[#allocation2 + $0xd8] sm:$0xfe] }
 0x4ae   : > { %7273 = vmatprep.subr.mxu0 %v6910_v26  ;;  %7096 = vmatpush2.msra.mxu1 %v6939_v52  ;;  %v5618_v57 = vadd.f32 %v5617_v25, %v5504_v42  ;;  %v11312_v8 = vpop.f32.mrf.mxu1  ;;  %v6928_v26 = vld [vmem:[#allocation7 + $0x2508] sm:$0xff]  ;;  %v6927_v52 = vld [vmem:[#allocation7 + $0x2500] sm:$0xff]  ;;  %v11320_v42 = vld [vmem:[#allocation2 + $0xf8] sm:$0xff]  ;;  %v6795_v25 = vrot.slane %v6688_v28, 1 }
 0x4af   : > { %12533 = vst [vmem:[#allocation188_spill] sm:$0xff] %v11312_v8  ;;  %7274 = vmatpush1.msra.mxu0 %v6909_v31  ;;  %7097 = vmatprep.subr.mxu1 %v6936_v53  ;;  %v11315_v27 = vpop.f32.mrf.mxu0  ;;  %v6690_v31 = vld [vmem:[#allocation2 + $0xd0] sm:$0x1]  ;;  %v6692_v53 = vld [vmem:[#allocation2 + $0xe0] sm:$0xfe] }
 0x4b0   : > { %12534 = vst [vmem:[#allocation189_spill] sm:$0xff] %v11315_v27  ;;  %7275 = vmatprep.subr.mxu0 %v6906_v63  ;;  %7098 = vmatpush2.msra.mxu1 %v6935_v32  ;;  %v11318_v24 = vadd.f32 %v5618_v57, %v11071_v29  ;;  %v6894_v63 = vld [vmem:[#allocation7 + $0x23f8] sm:$0xff]  ;;  %v11326_v32 = vsel %vm1776_vm8, %v6786_v36, %v6787_v16  ;;  %v6893_v29 = vld [vmem:[#allocation7 + $0x23f0] sm:$0xff] }
 0x4b1   : > { %7276 = vmatpush1.msra.mxu0 %v6905_v1  ;;  %7099 = vmatprep.subr.mxu1 %v6932_v55  ;;  %v11329_v57 = vsel %vm1776_vm8, %v6790_v14, %v6797_v48  ;;  %v6805_v55 = vrot.slane %v11320_v42, 1  ;;  %v6890_v36 = vld [vmem:[#allocation7 + $0x23d8] sm:$0xff]  ;;  %v6693_v48 = vld [vmem:[#allocation2 + $0xe8] sm:$0xfe]  ;;  %v11337_v14 = vld [vmem:[#allocation2 + $0x100] sm:$0xff] }
 0x4b2   : > { %7277 = vmatprep.subr.mxu0 %v6902_v59  ;;  %7100 = vmatpush2.msra.mxu1 %v6931_v50  ;;  %v5510_v33 = vpop.f32.mrf.mxu1  ;;  %v6799_v50 = vrot.slane %v6690_v31, 1  ;;  %v6804_v59 = vrot.slane %v6692_v53, 1  ;;  %v7022_v31 = vld [vmem:[#allocation7 + $0x27f8] sm:$0xff] }
 0x4b3   : > { %7278 = vmatpush1.msra.mxu0 %v6901_v6  ;;  %7101 = vmatprep.subr.mxu1 %v6928_v26  ;;  %v5623_v1 = vpop.f32.mrf.mxu0  ;;  %v6886_v42 = vld [vmem:[#allocation7 + $0x23b8] sm:$0xff] }
 0x4b4   : > { %7279 = vmatprep.subr.mxu0 %v6898_v49  ;;  %7102 = vmatpush2.msra.mxu1 %v6927_v52  ;;  %v5624_v6 = vadd.f32 %v5623_v1, %v5510_v33  ;;  %v11334_v26 = vpop.f32.mrf.mxu1  ;;  %v6889_v49 = vld [vmem:[#allocation7 + $0x23d0] sm:$0xff]  ;;  %v6801_v33 = vrot.slane %v6691_v3, 1  ;;  %v6802_v1 = vrot.slane %v11332_v40, 1  ;;  %v6882_v3 = vld [vmem:[#allocation7 + $0x2398] sm:$0xff] }
 0x4b5   : > { %12535 = vst [vmem:[#allocation190_spill] sm:$0xff] %v11334_v26  ;;  %7280 = vmatpush1.msra.mxu0 %v6897_v12  ;;  %7103 = vmatprep.mubr.f32.mxu1 %v11323_v20  ;;  %v11339_v28 = vpop.f32.mrf.mxu0  ;;  %v6698_v52 = vld [vmem:[#allocation2 + $0x110] sm:$0x1]  ;;  %v11347_v12 = vsel %vm1776_vm8, %v6787_v16, %v6795_v25  ;;  %v11382_v26 = vld [vmem:[#allocation2 + $0x148] sm:$0xff]  ;;  %v6982_v27 = vld [vmem:[#allocation7 + $0x26b8] sm:$0xff] }
 0x4b6   : > { %12536 = vst [vmem:[#allocation191_spill] sm:$0xff] %v11339_v28  ;;  %7281 = vmatprep.subr.mxu0 %v6894_v63  ;;  %7104 = vmatmul.mubr.f32.vlgmr.msra.gmra.mxu1 %v11326_v32  ;;  %v11343_v53 = vadd.f32 %v5624_v6, %v11086_v13  ;;  %v12537_v63 = vrot.slane %v11092_v17, 1  ;;  %v11357_v13 = vsel %vm1776_vm8, %v6804_v59, %v6805_v55  ;;  %v6808_v6 = vrot.slane %v11337_v14, 1  ;;  %v6885_v25 = vld [vmem:[#allocation7 + $0x23b0] sm:$0xff]  ;;  %v6701_v17 = vld [vmem:[#allocation2 + $0x128] sm:$0xfe] }
 0x4b7   : > { %7282 = vmatpush1.msra.mxu0 %v6893_v29  ;;  %7109 = vmatprep.mubr.f32.mxu1 %v11329_v57  ;;  %v6807_v29 = vrot.slane %v6693_v48, 1  ;;  %v6812_v40 = vrot.slane %v6698_v52, 1  ;;  %v7021_v59 = vld [vmem:[#allocation7 + $0x27f0] sm:$0xff]  ;;  %v11367_v14 = vsel %vm1776_vm8, %v6801_v33, %v6802_v1  ;;  %v6878_v52 = vld [vmem:[#allocation7 + $0x2378] sm:$0xff] }
 0x4b8   : > { %7283 = vmatprep.subr.mxu0 %v6890_v36  ;;  %7222 = vmatprep.mubr.f32.mxu0 %v12377_v41  ;;  %v11354_v11 = vsel %vm1776_vm8, %v12537_v63, %v6799_v50  ;;  %v5516_v16 = vpop.f32.mrf.mxu1  ;;  %v6699_v36 = vld [vmem:[#allocation2 + $0x118] sm:$0x1]  ;;  %v11361_v50 = vld [vmem:[#allocation2 + $0x140] sm:$0xff]  ;;  %v6881_v48 = vld [vmem:[#allocation7 + $0x2390] sm:$0xff] }
 0x4b9   : > { %7284 = vmatpush1.msra.mxu0 %v6889_v49  ;;  %7394 = vmatprep.subr.mxu1 %v7022_v31  ;;  %v5629_v7 = vpop.f32.mrf.mxu0  ;;  %v6810_v49 = vrot.slane %v6697_v38, 1  ;;  %v11371_v31 = vsel %vm1776_vm8, %v6807_v29, %v6808_v6  ;;  %v11379_v33 = vsel %vm1776_vm8, %v6805_v55, %v6812_v40  ;;  %v6819_v38 = vrot.slane %v6701_v17, 1  ;;  %v6702_v28 = vld [vmem:[#allocation2 + $0x130] sm:$0xfe]  ;;  %v6874_v29 = vld [vmem:[#allocation7 + $0x2358] sm:$0xff] }
 0x4ba   : > { %7285 = vmatprep.subr.mxu0 %v6886_v42  ;;  %7110 = vmatmul.mubr.f32.gmra.mxu1 %v11347_v12  ;;  %v5630_v63 = vadd.f32 %v5629_v7, %v5516_v16  ;;  %v6814_v42 = vrot.slane %v6699_v36, 1  ;;  %v11373_v7 = vld [vmem:[#allocation2 + $0x138] sm:$0xff]  ;;  %v6816_v55 = vrot.slane %v6700_v2, 1  ;;  %v6706_v2 = vld [vmem:[#allocation2 + $0x150] sm:$0x1] }
 0x4bb   : > { %8770 = vmatmul.mubr.msk.f32.gmra.mxu0 %vm782_vm5, %v11354_v11  ;;  %7115 = vmatprep.mubr.f32.mxu1 %v11357_v13  ;;  %v6817_v40 = vrot.slane %v11373_v7, 1  ;;  %v6870_v36 = vld [vmem:[#allocation7 + $0x2338] sm:$0xff]  ;;  %v6989_v7 = vld [vmem:[#allocation7 + $0x26f0] sm:$0xff] }
 0x4bc   : > { %7286 = vmatpush1.msra.mxu0 %v6885_v25  ;;  %7228 = vmatprep.mubr.f32.mxu0 %v12377_v41  ;;  %v11376_v16 = vadd.f32 %v5630_v63, %v11106_v56  ;;  %v6820_v25 = vrot.slane %v11361_v50, 1  ;;  %v6873_v56 = vld [vmem:[#allocation7 + $0x2350] sm:$0xff]  ;;  %v11393_v17 = vsel %vm1776_vm8, %v6808_v6, %v6814_v42  ;;  %v6822_v50 = vrot.slane %v6702_v28, 1  ;;  %v6707_v63 = vld [vmem:[#allocation2 + $0x158] sm:$0x1] }
 0x4bd   : > { %7287 = vmatprep.subr.mxu0 %v6882_v3  ;;  %7395 = vmatpush1.msra.mxu1 %v7021_v59  ;;  %v11388_v3 = vsel %vm1776_vm8, %v6802_v1, %v6810_v49  ;;  %v6823_v59 = vrot.slane %v11382_v26, 1  ;;  %v6865_v28 = vld [vmem:[#allocation7 + $0x2310] sm:$0xff]  ;;  %v11404_v26 = vsel %vm1776_vm8, %v6816_v55, %v6817_v40  ;;  %v6827_v6 = vrot.slane %v6707_v63, 1  ;;  %v6708_v49 = vld [vmem:[#allocation2 + $0x160] sm:$0x1] }
 0x4be   : > { %7288 = vmatpush1.msra.mxu0 %v6881_v48  ;;  %7116 = vmatmul.mubr.f32.gmra.mxu1 %v11367_v14  ;;  %v6869_v48 = vld [vmem:[#allocation7 + $0x2330] sm:$0xff]  ;;  %v11398_v1 = vsel %vm1776_vm8, %v6819_v38, %v6820_v25  ;;  %v6986_v38 = vld [vmem:[#allocation7 + $0x26d8] sm:$0xff] }
 0x4bf   : > { %7289 = vmatprep.subr.mxu0 %v6878_v52  ;;  %8771 = vmatmul.mubr.msk.f32.gmra.mxu0 %vm782_vm5, %v11371_v31  ;;  %v6990_v52 = vld [vmem:[#allocation7 + $0x26f8] sm:$0xff]  ;;  %v11408_v42 = vsel %vm1776_vm8, %v6822_v50, %v6823_v59  ;;  %v7017_v55 = vld [vmem:[#allocation7 + $0x27d0] sm:$0xff] }
 0x4c0   : > { %7290 = vmatpush1.msra.mxu0 %v6877_v51  ;;  %7121 = vmatprep.mubr.f32.mxu1 %v11379_v33  ;;  %v6866_v51 = vld [vmem:[#allocation7 + $0x2318] sm:$0xff]  ;;  %v6710_v63 = vld [vmem:[#allocation2 + $0x170] sm:$0xfe] }
 0x4c1   : > { %7291 = vmatprep.subr.mxu0 %v6874_v29  ;;  %7234 = vmatprep.mubr.f32.mxu0 %v12377_v41  ;;  %v7018_v29 = vld [vmem:[#allocation7 + $0x27d8] sm:$0xff]  ;;  %v6985_v50 = vld [vmem:[#allocation7 + $0x26d0] sm:$0xff] }
 0x4c2   : > { %7292 = vmatpush1.msra.mxu0 %v6873_v56  ;;  %7122 = vmatmul.mubr.f32.gmra.mxu1 %v11388_v3  ;;  %v6825_v56 = vrot.slane %v6706_v2, 1  ;;  %v6709_v2 = vld [vmem:[#allocation2 + $0x168] sm:$0xfe] }
 0x4c3   : > { %7293 = vmatprep.subr.mxu0 %v6870_v36  ;;  %8772 = vmatmul.mubr.msk.f32.gmra.mxu0 %vm782_vm5, %v11393_v17  ;;  %v6829_v36 = vrot.slane %v6708_v49, 1  ;;  %v7014_v49 = vld [vmem:[#allocation7 + $0x27b8] sm:$0xff] }
 0x4c4   : > { %7294 = vmatpush1.msra.mxu0 %v6869_v48  ;;  %7127 = vmatprep.mubr.f32.mxu1 %v11398_v1  ;;  %v11412_v48 = vld [vmem:[#allocation2 + $0x188] sm:$0xff]  ;;  %v11422_v8 = vsel %vm1776_vm8, %v6817_v40, %v6825_v56  ;;  %v6981_v40 = vld [vmem:[#allocation7 + $0x26b0] sm:$0xff] }
 0x4c5   : > { %7295 = vmatprep.subr.mxu0 %v6866_v51  ;;  %7240 = vmatprep.mubr.f32.mxu0 %v12377_v41  ;;  %v11417_v51 = vsel %vm1776_vm8, %v6820_v25, %v6827_v6  ;;  %v6835_v10 = vrot.slane %v11412_v48, 1  ;;  %v11429_v25 = vsel %vm1776_vm8, %v6823_v59, %v6829_v36  ;;  %v7013_v6 = vld [vmem:[#allocation7 + $0x27b0] sm:$0xff]  ;;  %v6837_v48 = vrot.slane %v6711_v39, 1  ;;  %v6716_v36 = vld [vmem:[#allocation2 + $0x1a0] sm:$0x1] }
 0x4c6   : > { %7296 = vmatpush1.msra.mxu0 %v6865_v28  ;;  %7128 = vmatmul.mubr.f32.gmra.mxu1 %v11404_v26  ;;  %v11419_v28 = vld [vmem:[#allocation2 + $0x180] sm:$0xff]  ;;  %v6838_v59 = vrot.slane %v11425_v44, 1  ;;  %v7006_v44 = vld [vmem:[#allocation7 + $0x2778] sm:$0xff] }
 0x4c7   : > { %7297 = vmatprep.subr.mxu0 %v6990_v52  ;;  %8773 = vmatmul.mubr.msk.f32.gmra.mxu0 %vm782_vm5, %v11408_v42  ;;  %v6834_v52 = vrot.slane %v6710_v63, 1  ;;  %v6832_v56 = vrot.slane %v11419_v28, 1  ;;  %v7009_v63 = vld [vmem:[#allocation7 + $0x2790] sm:$0xff]  ;;  %v6974_v28 = vld [vmem:[#allocation7 + $0x2678] sm:$0xff] }
 0x4c8   : > { %7298 = vmatpush2.msra.mxu0 %v6989_v7  ;;  %7396 = vmatprep.subr.mxu1 %v7018_v29  ;;  %v11431_v7 = vpop.f32.mrf.mxu1  ;;  %v6831_v29 = vrot.slane %v6709_v2, 1 }
 0x4c9   : > { %7299 = vmatprep.subr.mxu0 %v6986_v38  ;;  %7397 = vmatpush1.msra.mxu1 %v7017_v55  ;;  %12538 = vst [vmem:[#allocation192_spill] sm:$0xff] %v11431_v7  ;;  %v7010_v38 = vld [vmem:[#allocation7 + $0x2798] sm:$0xff]  ;;  %v11442_v2 = vsel %vm1776_vm8, %v6834_v52, %v6835_v10  ;;  %v11449_v52 = vsel %vm1776_vm8, %v6837_v48, %v6838_v59  ;;  %v6844_v48 = vrot.slane %v6717_v23, 1 }
 0x4ca   : > { %7300 = vmatpush2.msra.mxu0 %v6985_v50  ;;  %7133 = vmatprep.mubr.f32.mxu1 %v11417_v51  ;;  %v6978_v55 = vld [vmem:[#allocation7 + $0x2698] sm:$0xff]  ;;  %v11437_v50 = vpop.f32.mrf.mxu0  ;;  %v5813_v7 = vpop.f32.mrf.mxu1  ;;  %v11445_v39 = vsel %vm1776_vm8, %v6831_v29, %v6832_v56 }
 0x4cb   : > { %7246 = vmatprep.mubr.f32.mxu0 %v12377_v41  ;;  %7301 = vmatprep.subr.mxu0 %v6982_v27  ;;  %12539 = vst [vmem:[#allocation193_spill] sm:$0xff] %v11437_v50  ;;  %v6977_v27 = vld [vmem:[#allocation7 + $0x2690] sm:$0xff]  ;;  %v6842_v50 = vrot.slane %v6716_v36, 1 }
 0x4cc   : > { %7398 = vmatprep.subr.mxu1 %v7014_v49  ;;  %7134 = vmatmul.mubr.f32.gmra.mxu1 %v11422_v8  ;;  %v6715_v49 = vld [vmem:[#allocation2 + $0x198] sm:$0x1] }
 0x4cd   : > { %8774 = vmatmul.mubr.msk.f32.gmra.mxu0 %vm782_vm5, %v11429_v25  ;;  %7399 = vmatpush1.msra.mxu1 %v7013_v6  ;;  %v7005_v6 = vld [vmem:[#allocation7 + $0x2770] sm:$0xff]  ;;  %v6840_v30 = vrot.slane %v6715_v49, 1  ;;  %v11461_v46 = vsel %vm1776_vm8, %v6835_v10, %v6842_v50 }
 0x4ce   : > { %7302 = vmatpush2.msra.mxu0 %v6981_v40  ;;  %7400 = vmatprep.subr.mxu1 %v7010_v38  ;;  %v5700_v21 = vpop.f32.mrf.mxu0  ;;  %v5815_v40 = vpop.f32.mrf.mxu1  ;;  %v6997_v10 = vld [vmem:[#allocation7 + $0x2730] sm:$0xff] }
 0x4cf   : > { %7303 = vmatprep.subr.mxu0 %v6978_v55  ;;  %7401 = vmatpush1.msra.mxu1 %v7009_v63  ;;  %v5814_v37 = vadd.f32 %v5813_v7, %v5700_v21  ;;  %v6973_v55 = vld [vmem:[#allocation7 + $0x2670] sm:$0xff]  ;;  %v7002_v63 = vld [vmem:[#allocation7 + $0x2758] sm:$0xff]  ;;  %v11464_v23 = vsel %vm1776_vm8, %v6832_v56, %v6840_v30 }
 0x4d0   : > { %7304 = vmatpush2.msra.mxu0 %v6977_v27  ;;  %7139 = vmatprep.mubr.f32.mxu1 %v11442_v2  ;;  %v5702_v38 = vpop.f32.mrf.mxu0  ;;  %v6970_v21 = vld [vmem:[#allocation7 + $0x2658] sm:$0xff]  ;;  %v7001_v7 = vld [vmem:[#allocation7 + $0x2750] sm:$0xff] }
 0x4d1   : > { %7252 = vmatprep.mubr.f32.mxu0 %v12377_v41  ;;  %7305 = vmatprep.subr.mxu0 %v6974_v28  ;;  %v11453_v29 = vadd.f32 %v5814_v37, %v11159_v18  ;;  %v11455_v36 = vadd.f32 %v5815_v40, %v5702_v38  ;;  %v6969_v28 = vld [vmem:[#allocation7 + $0x2650] sm:$0xff]  ;;  %v6966_v18 = vld [vmem:[#allocation7 + $0x2638] sm:$0xff] }
 0x4d2   : > { %7402 = vmatprep.subr.mxu1 %v7006_v44  ;;  %7140 = vmatmul.mubr.f32.gmra.mxu1 %v11445_v39  ;;  %v5706_v27 = vpop.f32.mrf.mxu0  ;;  %v6998_v40 = vld [vmem:[#allocation7 + $0x2738] sm:$0xff] }
 0x4d3   : > { %8775 = vmatmul.mubr.msk.f32.gmra.mxu0 %vm782_vm5, %v11449_v52  ;;  %7403 = vmatpush1.msra.mxu1 %v7005_v6  ;;  %v5819_v49 = vpop.f32.mrf.mxu1  ;;  %v11468_v6 = vsel %vm1776_vm8, %v6838_v59, %v6844_v48  ;;  %v6962_v56 = vld [vmem:[#allocation7 + $0x2618] sm:$0xff] }
 0x4d4   : > { %7306 = vmatpush2.msra.mxu0 %v6973_v55  ;;  %7404 = vmatprep.subr.mxu1 %v7002_v63  ;;  %v5820_v37 = vadd.f32 %v5819_v49, %v5706_v27  ;;  %v5708_v44 = vpop.f32.mrf.mxu0  ;;  %v6965_v63 = vld [vmem:[#allocation7 + $0x2630] sm:$0xff]  ;;  %v7797_v49 = vld [vmem:[#allocation7 + $0x29e8] sm:$0xff] }
 0x4d5   : > { %7307 = vmatprep.subr.mxu0 %v6970_v21  ;;  %7405 = vmatpush1.msra.mxu1 %v7001_v7  ;;  %v5821_v38 = vpop.f32.mrf.mxu1  ;;  %v6994_v21 = vld [vmem:[#allocation7 + $0x2718] sm:$0xff]  ;;  %v6993_v7 = vld [vmem:[#allocation7 + $0x2710] sm:$0xff] }
 0x4d6   : > { %7308 = vmatpush2.msra.mxu0 %v6969_v28  ;;  %7145 = vmatprep.mubr.f32.mxu1 %v11461_v46  ;;  %v11471_v50 = vadd.f32 %v5820_v37, %v11178_v60  ;;  %v11473_v55 = vadd.f32 %v5821_v38, %v5708_v44  ;;  %v6961_v60 = vld [vmem:[#allocation7 + $0x2610] sm:$0xff]  ;;  %v6958_v28 = vld [vmem:[#allocation7 + $0x25f8] sm:$0xff]  ;;  %v7796_v38 = vld [vmem:[#allocation7 + $0x29e0] sm:$0xff] }
 0x4d7   : > { %7258 = vmatprep.mubr.f32.mxu0 %v12377_v41  ;;  %7309 = vmatprep.subr.mxu0 %v6966_v18  ;;  %v5712_v30 = vpop.f32.mrf.mxu0  ;;  %v6957_v37 = vld [vmem:[#allocation7 + $0x25f0] sm:$0xff] }
 0x4d8   : > { %12540 = vst [vmem:[#allocation194_spill] sm:$0xff] %v11471_v50  ;;  %12541 = vst [vmem:[#allocation195_spill] sm:$0xff] %v11473_v55  ;;  %7406 = vmatprep.subr.mxu1 %v6998_v40  ;;  %7146 = vmatmul.mubr.f32.gmra.mxu1 %v11464_v23  ;;  %v5825_v27 = vpop.f32.mrf.mxu1 }
 0x4d9   : > { %8776 = vmatmul.mubr.msk.f32.gmra.mxu0 %vm782_vm5, %v11468_v6  ;;  %7407 = vmatpush1.msra.mxu1 %v6997_v10  ;;  %v5826_v59 = vadd.f32 %v5825_v27, %v5712_v30  ;;  %v5714_v48 = vpop.f32.mrf.mxu0  ;;  %v6954_v10 = vld [vmem:[#allocation7 + $0x25d8] sm:$0xff] }
 0x4da   : > { %7310 = vmatpush2.msra.mxu0 %v6965_v63  ;;  %7408 = vmatprep.subr.mxu1 %v6994_v21  ;;  %v5827_v18 = vpop.f32.mrf.mxu1  ;;  %v7793_v63 = vld [vmem:[#allocation7 + $0x29c8] sm:$0xff]  ;;  %v6953_v21 = vld [vmem:[#allocation7 + $0x25d0] sm:$0xff] }
 0x4db   : > { %7311 = vmatprep.subr.mxu0 %v6962_v56  ;;  %7409 = vmatpush1.msra.mxu1 %v6993_v7  ;;  %v11480_v44 = vadd.f32 %v5826_v59, %v11189_v58  ;;  %v11482_v40 = vadd.f32 %v5827_v18, %v5714_v48  ;;  %v7792_v56 = vld [vmem:[#allocation7 + $0x29c0] sm:$0xff]  ;;  %v6950_v58 = vld [vmem:[#allocation7 + $0x25b8] sm:$0xff]  ;;  %v6949_v48 = vld [vmem:[#allocation7 + $0x25b0] sm:$0xff] }
 0x4dc   : > { %7312 = vmatpush2.msra.mxu0 %v6961_v60  ;;  %7442 = vmatprep.mubr.f32.mxu1 %v12377_v41  ;;  %v5718_v30 = vpop.f32.mrf.mxu0  ;;  %v7789_v60 = vld [vmem:[#allocation7 + $0x29a8] sm:$0xff] }
 0x4dd   : > { %12542 = vst [vmem:[#allocation196_spill] sm:$0xff] %v11480_v44  ;;  %12543 = vst [vmem:[#allocation197_spill] sm:$0xff] %v11482_v40  ;;  %7313 = vmatprep.subr.mxu0 %v6958_v28  ;;  %7912 = vmatprep.subr.mxu1 %v7797_v49  ;;  %v5831_v27 = vpop.f32.mrf.mxu1  ;;  %v7788_v28 = vld [vmem:[#allocation7 + $0x29a0] sm:$0xff]  ;;  %v6946_v49 = vld [vmem:[#allocation7 + $0x2598] sm:$0xff] }
 0x4de   : > { %7314 = vmatpush2.msra.mxu0 %v6957_v37  ;;  %8777 = vmatmul.mubr.msk.f32.vlgmr.msra.gmra.mxu1 %vm782_vm5, %v11291_v0  ;;  %v5832_v7 = vadd.f32 %v5831_v27, %v5718_v30  ;;  %v5720_v59 = vpop.f32.mrf.mxu0  ;;  %v7785_v0 = vld [vmem:[#allocation7 + $0x2988] sm:$0xff]  ;;  %v6945_v40 = vld [vmem:[#allocation7 + $0x2590] sm:$0xff] }
 0x4df   : > { %7913 = vmatpush1.msra.mxu1 %v7796_v38  ;;  %7315 = vmatprep.subr.mxu0 %v6954_v10  ;;  %v5833_v18 = vpop.f32.mrf.mxu1  ;;  %v7784_v38 = vld [vmem:[#allocation7 + $0x2980] sm:$0xff]  ;;  %v6942_v10 = vld [vmem:[#allocation7 + $0x2578] sm:$0xff] }
 0x4e0   : > { %7914 = vmatprep.subr.mxu1 %v7793_v63  ;;  %7316 = vmatpush2.msra.mxu0 %v6953_v21  ;;  %v11488_v44 = vadd.f32 %v5832_v7, %v11199_v43  ;;  %v11490_v37 = vadd.f32 %v5833_v18, %v5720_v59  ;;  %v7781_v63 = vld [vmem:[#allocation7 + $0x2968] sm:$0xff]  ;;  %v6941_v21 = vld [vmem:[#allocation7 + $0x2570] sm:$0xff]  ;;  %v7780_v43 = vld [vmem:[#allocation7 + $0x2960] sm:$0xff] }
 0x4e1   : > { %7915 = vmatpush1.msra.mxu1 %v7792_v56  ;;  %7317 = vmatprep.subr.mxu0 %v6950_v58  ;;  %v5724_v30 = vpop.f32.mrf.mxu0  ;;  %v6938_v7 = vld [vmem:[#allocation7 + $0x2558] sm:$0xff]  ;;  %v7777_v58 = vld [vmem:[#allocation7 + $0x2948] sm:$0xff]  ;;  %v6937_v59 = vld [vmem:[#allocation7 + $0x2550] sm:$0xff] }
 0x4e2   : > { %12544 = vst [vmem:[#allocation198_spill] sm:$0xff] %v11488_v44  ;;  %7916 = vmatprep.subr.mxu1 %v7789_v60  ;;  %7318 = vmatpush2.msra.mxu0 %v6949_v48  ;;  %v5837_v27 = vpop.f32.mrf.mxu1  ;;  %v7776_v18 = vld [vmem:[#allocation7 + $0x2940] sm:$0xff] }
 0x4e3   : > { %7917 = vmatpush1.msra.mxu1 %v7788_v28  ;;  %7319 = vmatprep.subr.mxu0 %v6946_v49  ;;  %v5838_v50 = vadd.f32 %v5837_v27, %v5724_v30  ;;  %v5726_v55 = vpop.f32.mrf.mxu0  ;;  %v6934_v28 = vld [vmem:[#allocation7 + $0x2538] sm:$0xff] }
 0x4e4   : > { %7918 = vmatprep.subr.mxu1 %v7785_v0  ;;  %7320 = vmatpush2.msra.mxu0 %v6945_v40  ;;  %v5839_v56 = vpop.f32.mrf.mxu1  ;;  %v7773_v40 = vld [vmem:[#allocation7 + $0x2928] sm:$0xff]  ;;  %v6933_v0 = vld [vmem:[#allocation7 + $0x2530] sm:$0xff] }
 0x4e5   : > { %7919 = vmatpush1.msra.mxu1 %v7784_v38  ;;  %7321 = vmatprep.subr.mxu0 %v6942_v10  ;;  %v11493_v60 = vadd.f32 %v5838_v50, %v11206_v61  ;;  %v11495_v48 = vadd.f32 %v5839_v56, %v5726_v55  ;;  %v7772_v38 = vld [vmem:[#allocation7 + $0x2920] sm:$0xff]  ;;  %v6930_v10 = vld [vmem:[#allocation7 + $0x2518] sm:$0xff]  ;;  %v7769_v61 = vld [vmem:[#allocation7 + $0x2908] sm:$0xff] }
 0x4e6   : > { %7920 = vmatprep.subr.mxu1 %v7781_v63  ;;  %7322 = vmatpush2.msra.mxu0 %v6941_v21  ;;  %v5730_v49 = vpop.f32.mrf.mxu0  ;;  %v6929_v50 = vld [vmem:[#allocation7 + $0x2510] sm:$0xff]  ;;  %v7768_v63 = vld [vmem:[#allocation7 + $0x2900] sm:$0xff] }
 0x4e7   : > { %7921 = vmatpush1.msra.mxu1 %v7780_v43  ;;  %7323 = vmatprep.subr.mxu0 %v6938_v7  ;;  %v5843_v30 = vpop.f32.mrf.mxu1  ;;  %v7765_v7 = vld [vmem:[#allocation7 + $0x28e8] sm:$0xff] }
 0x4e8   : > { %7922 = vmatprep.subr.mxu1 %v7777_v58  ;;  %7324 = vmatpush2.msra.mxu0 %v6937_v59  ;;  %v5844_v27 = vadd.f32 %v5843_v30, %v5730_v49  ;;  %v5732_v44 = vpop.f32.mrf.mxu0  ;;  %v7893_v58 = vld [vmem:[#allocation7 + $0x2ce8] sm:$0xff]  ;;  %v7764_v59 = vld [vmem:[#allocation7 + $0x28e0] sm:$0xff] }
 0x4e9   : > { %7923 = vmatpush1.msra.mxu1 %v7776_v18  ;;  %7325 = vmatprep.subr.mxu0 %v6934_v28  ;;  %v5845_v55 = vpop.f32.mrf.mxu1  ;;  %v7892_v28 = vld [vmem:[#allocation7 + $0x2ce0] sm:$0xff]  ;;  %v7761_v49 = vld [vmem:[#allocation7 + $0x28c8] sm:$0xff] }
 0x4ea   : > { %7924 = vmatprep.subr.mxu1 %v7773_v40  ;;  %7326 = vmatpush2.msra.mxu0 %v6933_v0  ;;  %v11498_v21 = vadd.f32 %v5844_v27, %v11213_v5  ;;  %v11500_v43 = vadd.f32 %v5845_v55, %v5732_v44  ;;  %v7760_v44 = vld [vmem:[#allocation7 + $0x28c0] sm:$0xff]  ;;  %v7889_v27 = vld [vmem:[#allocation7 + $0x2cc8] sm:$0xff] }
 0x4eb   : > { %7925 = vmatpush1.msra.mxu1 %v7772_v38  ;;  %7327 = vmatprep.subr.mxu0 %v6930_v10  ;;  %v5736_v56 = vpop.f32.mrf.mxu0  ;;  %v7753_v55 = vld [vmem:[#allocation7 + $0x2888] sm:$0xff] }
 0x4ec   : > { %7926 = vmatprep.subr.mxu1 %v7769_v61  ;;  %7328 = vmatpush2.msra.mxu0 %v6929_v50  ;;  %v5849_v18 = vpop.f32.mrf.mxu1  ;;  %v7888_v50 = vld [vmem:[#allocation7 + $0x2cc0] sm:$0xff] }
 0x4ed   : > { %7329 = vmatprep.mubr.f32.mxu0 %v11323_v20  ;;  %7927 = vmatpush1.msra.mxu1 %v7768_v63  ;;  %v5850_v40 = vadd.f32 %v5849_v18, %v5736_v56  ;;  %v5738_v0 = vpop.f32.mrf.mxu0  ;;  %v7757_v20 = vld [vmem:[#allocation7 + $0x28a8] sm:$0xff]  ;;  %v7748_v18 = vld [vmem:[#allocation7 + $0x2860] sm:$0xff] }
 0x4ee   : > { %7330 = vmatmul.mubr.f32.vlgmr.msra.gmra.mxu0 %v11326_v32  ;;  %7928 = vmatprep.subr.mxu1 %v7765_v7  ;;  %v5851_v5 = vpop.f32.mrf.mxu1  ;;  %v7756_v32 = vld [vmem:[#allocation7 + $0x28a0] sm:$0xff] }
 0x4ef   : > { %8041 = vmatprep.subr.mxu0 %v7893_v58  ;;  %7929 = vmatpush1.msra.mxu1 %v7764_v59  ;;  %v11505_v30 = vadd.f32 %v5850_v40, %v11222_v34  ;;  %v11507_v38 = vadd.f32 %v5851_v5, %v5738_v0  ;;  %v7885_v59 = vld [vmem:[#allocation7 + $0x2ca8] sm:$0xff]  ;;  %v7740_v40 = vld [vmem:[#allocation7 + $0x2820] sm:$0xff] }
 0x4f0   : > { %8042 = vmatpush1.msra.mxu0 %v7892_v28  ;;  %7930 = vmatprep.subr.mxu1 %v7761_v49  ;;  %v5742_v10 = vpop.f32.mrf.mxu0  ;;  %v7745_v28 = vld [vmem:[#allocation7 + $0x2848] sm:$0xff] }
 0x4f1   : > { %7335 = vmatprep.mubr.f32.mxu0 %v11329_v57  ;;  %7448 = vmatprep.mubr.f32.mxu1 %v12377_v41  ;;  %v5855_v61 = vpop.f32.mrf.mxu1  ;;  %v7752_v57 = vld [vmem:[#allocation7 + $0x2880] sm:$0xff]  ;;  %v7741_v49 = vld [vmem:[#allocation7 + $0x2828] sm:$0xff] }
 0x4f2   : > { %7931 = vmatpush1.msra.mxu1 %v7760_v44  ;;  %7336 = vmatmul.mubr.f32.gmra.mxu0 %v11347_v12  ;;  %v5856_v34 = vadd.f32 %v5855_v61, %v5742_v10  ;;  %v5744_v63 = vpop.f32.mrf.mxu0  ;;  %v7749_v12 = vld [vmem:[#allocation7 + $0x2868] sm:$0xff]  ;;  %v7860_v44 = vld [vmem:[#allocation7 + $0x2be0] sm:$0xff] }
 0x4f3   : > { %8778 = vmatmul.mubr.msk.f32.gmra.mxu1 %vm782_vm5, %v11354_v11  ;;  %7932 = vmatprep.subr.mxu1 %v7757_v20  ;;  %v5857_v7 = vpop.f32.mrf.mxu1  ;;  %v7884_v11 = vld [vmem:[#allocation7 + $0x2ca0] sm:$0xff]  ;;  %v7737_v0 = vld [vmem:[#allocation7 + $0x2808] sm:$0xff] }
 0x4f4   : > { %8043 = vmatprep.subr.mxu0 %v7889_v27  ;;  %7933 = vmatpush1.msra.mxu1 %v7756_v32  ;;  %v11515_v56 = vadd.f32 %v5856_v34, %v11230_v35  ;;  %v11517_v58 = vadd.f32 %v5857_v7, %v5744_v63  ;;  %v7744_v35 = vld [vmem:[#allocation7 + $0x2840] sm:$0xff]  ;;  %v7861_v5 = vld [vmem:[#allocation7 + $0x2be8] sm:$0xff] }
 0x4f5   : > { %8044 = vmatpush1.msra.mxu0 %v7888_v50  ;;  %7934 = vmatprep.subr.mxu1 %v7753_v55  ;;  %v7857_v20 = vld [vmem:[#allocation7 + $0x2bc8] sm:$0xff]  ;;  %v7852_v32 = vld [vmem:[#allocation7 + $0x2ba0] sm:$0xff] }
 0x4f6   : > { %7341 = vmatprep.mubr.f32.mxu0 %v11357_v13  ;;  %7454 = vmatprep.mubr.f32.mxu1 %v12377_v41  ;;  %v7881_v13 = vld [vmem:[#allocation7 + $0x2c88] sm:$0xff]  ;;  %v7848_v55 = vld [vmem:[#allocation7 + $0x2b80] sm:$0xff] }
 0x4f7   : > { %7935 = vmatpush1.msra.mxu1 %v7752_v57  ;;  %7342 = vmatmul.mubr.f32.gmra.mxu0 %v11367_v14  ;;  %v7880_v14 = vld [vmem:[#allocation7 + $0x2c80] sm:$0xff]  ;;  %v7853_v10 = vld [vmem:[#allocation7 + $0x2ba8] sm:$0xff] }
 0x4f8   : > { %8779 = vmatmul.mubr.msk.f32.gmra.mxu1 %vm782_vm5, %v11371_v31  ;;  %7936 = vmatprep.subr.mxu1 %v7749_v12  ;;  %v7736_v31 = vld [vmem:[#allocation7 + $0x2800] sm:$0xff]  ;;  %v7873_v27 = vld [vmem:[#allocation7 + $0x2c48] sm:$0xff] }
 0x4f9   : > { %8045 = vmatprep.subr.mxu0 %v7885_v59  ;;  %7937 = vmatpush1.msra.mxu1 %v7748_v18  ;;  %v7849_v61 = vld [vmem:[#allocation7 + $0x2b88] sm:$0xff]  ;;  %v7844_v57 = vld [vmem:[#allocation7 + $0x2b60] sm:$0xff] }
 0x4fa   : > { %8046 = vmatpush1.msra.mxu0 %v7884_v11  ;;  %7938 = vmatprep.subr.mxu1 %v7745_v28  ;;  %v7845_v63 = vld [vmem:[#allocation7 + $0x2b68] sm:$0xff]  ;;  %v7868_v59 = vld [vmem:[#allocation7 + $0x2c20] sm:$0xff]  ;;  %v11549_v28 = vld [vmem:[#allocation2 + $0xb8] sm:$0xff] }
 0x4fb   : > { %7347 = vmatprep.mubr.f32.mxu0 %v11379_v33  ;;  %7460 = vmatprep.mubr.f32.mxu1 %v12377_v41  ;;  %v7877_v33 = vld [vmem:[#allocation7 + $0x2c68] sm:$0xff] }
 0x4fc   : > { %7939 = vmatpush1.msra.mxu1 %v7744_v35  ;;  %7348 = vmatmul.mubr.f32.gmra.mxu0 %v11388_v3  ;;  %v7876_v3 = vld [vmem:[#allocation7 + $0x2c60] sm:$0xff]  ;;  %v7841_v18 = vld [vmem:[#allocation7 + $0x2b48] sm:$0xff] }
 0x4fd   : > { %8780 = vmatmul.mubr.msk.f32.gmra.mxu1 %vm782_vm5, %v11393_v17  ;;  %7940 = vmatprep.subr.mxu1 %v7741_v49  ;;  %v7856_v17 = vld [vmem:[#allocation7 + $0x2bc0] sm:$0xff] }
 0x4fe   : > { %8047 = vmatprep.subr.mxu0 %v7881_v13  ;;  %7941 = vmatpush1.msra.mxu1 %v7740_v40  ;;  %v7840_v49 = vld [vmem:[#allocation7 + $0x2b40] sm:$0xff]  ;;  %v7837_v40 = vld [vmem:[#allocation7 + $0x2b28] sm:$0xff] }
 0x4ff   : > { %8048 = vmatpush1.msra.mxu0 %v7880_v14  ;;  %7942 = vmatprep.subr.mxu1 %v7737_v0 }
 0x500   : > { %7353 = vmatprep.mubr.f32.mxu0 %v11398_v1  ;;  %7466 = vmatprep.mubr.f32.mxu1 %v12377_v41  ;;  %v6345_v1 = vpop.f32.mrf.mxu0 }
 0x501   : > { %7943 = vmatpush1.msra.mxu1 %v7736_v31  ;;  %7354 = vmatmul.mubr.f32.gmra.mxu0 %v11404_v26  ;;  %v7872_v26 = vld [vmem:[#allocation7 + $0x2c40] sm:$0xff] }
 0x502   : > { %8781 = vmatmul.mubr.msk.f32.gmra.mxu1 %vm782_vm5, %v11408_v42  ;;  %7944 = vmatprep.subr.mxu1 %v7861_v5  ;;  %v6347_v34 = vpop.f32.mrf.mxu0  ;;  %v7836_v31 = vld [vmem:[#allocation7 + $0x2b20] sm:$0xff] }
 0x503   : > { %8049 = vmatprep.subr.mxu0 %v7877_v33  ;;  %7945 = vmatpush2.msra.mxu1 %v7860_v44  ;;  %v7666_v33 = vrot.slane %v11549_v28, 2 }
 0x504   : > { %8050 = vmatpush1.msra.mxu0 %v7876_v3  ;;  %7946 = vmatprep.subr.mxu1 %v7857_v20  ;;  %v7864_v3 = vld [vmem:[#allocation7 + $0x2c00] sm:$0xff]  ;;  %v7833_v20 = vld [vmem:[#allocation7 + $0x2b08] sm:$0xff] }
 0x505   : > { %7359 = vmatprep.mubr.f32.mxu0 %v11417_v51  ;;  %7472 = vmatprep.mubr.f32.mxu1 %v12377_v41 }
 0x506   : > { %7947 = vmatpush2.msra.mxu1 %v7856_v17  ;;  %7360 = vmatmul.mubr.f32.gmra.mxu0 %v11422_v8  ;;  %v6232_v42 = vpop.f32.mrf.mxu1 }
 0x507   : > { %8782 = vmatmul.mubr.msk.f32.gmra.mxu1 %vm782_vm5, %v11429_v25  ;;  %7948 = vmatprep.subr.mxu1 %v7853_v10  ;;  %v6346_v50 = vadd.f32 %v6345_v1, %v6232_v42  ;;  %v7869_v25 = vld [vmem:[#allocation7 + $0x2c28] sm:$0xff]  ;;  %v7799_v1 = vld [vmem:[#allocation7 + $0x29f8] sm:$0xff] }
 0x508   : > { %8051 = vmatprep.subr.mxu0 %v7873_v27  ;;  %7949 = vmatpush2.msra.mxu1 %v7852_v32  ;;  %v6234_v51 = vpop.f32.mrf.mxu1  ;;  %v7829_v27 = vld [vmem:[#allocation7 + $0x2ae8] sm:$0xff] }
 0x509   : > { %8052 = vmatpush1.msra.mxu0 %v7872_v26  ;;  %7950 = vmatprep.subr.mxu1 %v7849_v61  ;;  %v11540_v7 = vadd.f32 %v6346_v50, %v11261_v9  ;;  %v11542_v8 = vadd.f32 %v6347_v34, %v6234_v51  ;;  %v7557_v9 = vld [vmem:[#allocation2 + $0xa0] sm:$0xfc]  ;;  %v7798_v50 = vld [vmem:[#allocation7 + $0x29f0] sm:$0xff]  ;;  %v7795_v51 = vld [vmem:[#allocation7 + $0x29d8] sm:$0xff] }
 0x50a   : > { %7365 = vmatprep.mubr.f32.mxu0 %v11442_v2  ;;  %7478 = vmatprep.mubr.f32.mxu1 %v12377_v41  ;;  %v6238_v12 = vpop.f32.mrf.mxu1  ;;  %v7665_v5 = vrot.slane %v7557_v9, 2  ;;  %v7791_v9 = vld [vmem:[#allocation7 + $0x29b8] sm:$0xff] }
 0x50b   : > { %12545 = vst [vmem:[#allocation199_spill] sm:$0xff] %v11540_v7  ;;  %12546 = vst [vmem:[#allocation200_spill] sm:$0xff] %v11542_v8  ;;  %7951 = vmatpush2.msra.mxu1 %v7848_v55  ;;  %7366 = vmatmul.mubr.f32.gmra.mxu0 %v11445_v39  ;;  %v6351_v11 = vpop.f32.mrf.mxu0  ;;  %v7825_v55 = vld [vmem:[#allocation7 + $0x2ac8] sm:$0xff]  ;;  %v12570_v7 = vld [vmem:[#allocation38_spill] sm:$0xff] }
 0x50c   : > { %8783 = vmatmul.mubr.msk.f32.gmra.mxu1 %vm782_vm5, %v11449_v52  ;;  %7952 = vmatprep.subr.mxu1 %v7845_v63  ;;  %v6352_v35 = vadd.f32 %v6351_v11, %v6238_v12  ;;  %v6240_v2 = vpop.f32.mrf.mxu1  ;;  %v7865_v52 = vld [vmem:[#allocation7 + $0x2c08] sm:$0xff]  ;;  %v11570_v61 = vsel %vm2650_vm9, %v7665_v5, %v7666_v33  ;;  %v7824_v63 = vld [vmem:[#allocation7 + $0x2ac0] sm:$0xff]  ;;  %v7783_v5 = vld [vmem:[#allocation7 + $0x2978] sm:$0xff] }
 0x50d   : > { %8053 = vmatprep.subr.mxu0 %v7869_v25  ;;  %7953 = vmatpush2.msra.mxu1 %v7844_v57  ;;  %v6353_v13 = vpop.f32.mrf.mxu0  ;;  %v7794_v57 = vld [vmem:[#allocation7 + $0x29d0] sm:$0xff]  ;;  %v7821_v12 = vld [vmem:[#allocation7 + $0x2aa8] sm:$0xff] }
 0x50e   : > { %8054 = vmatpush1.msra.mxu0 %v7868_v59  ;;  %7954 = vmatprep.subr.mxu1 %v7841_v18  ;;  %v11552_v39 = vadd.f32 %v6352_v35, %v11273_v54  ;;  %v11554_v14 = vadd.f32 %v6353_v13, %v6240_v2  ;;  %v6244_v0 = vpop.f32.mrf.mxu1  ;;  %v7820_v35 = vld [vmem:[#allocation7 + $0x2aa0] sm:$0xff]  ;;  %v7787_v13 = vld [vmem:[#allocation7 + $0x2998] sm:$0xff] }
 0x50f   : > { %7371 = vmatprep.mubr.f32.mxu0 %v11461_v46  ;;  %7484 = vmatprep.mubr.f32.mxu1 %v12377_v41  ;;  %v6357_v44 = vpop.f32.mrf.mxu0  ;;  %v7832_v46 = vld [vmem:[#allocation7 + $0x2b00] sm:$0xff] }
 0x510   : > { %12547 = vst [vmem:[#allocation201_spill] sm:$0xff] %v11552_v39  ;;  %12548 = vst [vmem:[#allocation202_spill] sm:$0xff] %v11554_v14  ;;  %7955 = vmatpush2.msra.mxu1 %v7840_v49  ;;  %7372 = vmatmul.mubr.f32.gmra.mxu0 %v11464_v23  ;;  %v6358_v54 = vadd.f32 %v6357_v44, %v6244_v0  ;;  %v6246_v17 = vpop.f32.mrf.mxu1  ;;  %v7790_v49 = vld [vmem:[#allocation7 + $0x29b0] sm:$0xff]  ;;  %v11708_v39 = vld [vmem:[#allocation2 + $0x180] sm:$0xff] }
 0x511   : > { %8784 = vmatmul.mubr.msk.f32.gmra.mxu1 %vm782_vm5, %v11468_v6  ;;  %7956 = vmatprep.subr.mxu1 %v7837_v40  ;;  %v6359_v10 = vpop.f32.mrf.mxu0  ;;  %v7828_v6 = vld [vmem:[#allocation7 + $0x2ae0] sm:$0xff]  ;;  %v7817_v40 = vld [vmem:[#allocation7 + $0x2a88] sm:$0xff] }
 0x512   : > { %8055 = vmatprep.subr.mxu0 %v7865_v52  ;;  %7957 = vmatpush2.msra.mxu1 %v7836_v31  ;;  %v11563_v32 = vadd.f32 %v6358_v54, %v11286_v19  ;;  %v11565_v26 = vadd.f32 %v6359_v10, %v6246_v17  ;;  %v6250_v23 = vpop.f32.mrf.mxu1  ;;  %v7786_v31 = vld [vmem:[#allocation7 + $0x2990] sm:$0xff]  ;;  %v7812_v54 = vld [vmem:[#allocation7 + $0x2a60] sm:$0xff]  ;;  %v7809_v10 = vld [vmem:[#allocation7 + $0x2a48] sm:$0xff] }
 0x513   : > { %8056 = vmatpush1.msra.mxu0 %v7864_v3  ;;  %7958 = vmatprep.subr.mxu1 %v7833_v20  ;;  %v6363_v42 = vpop.f32.mrf.mxu0  ;;  %v7813_v3 = vld [vmem:[#allocation7 + $0x2a68] sm:$0xff]  ;;  %v7782_v20 = vld [vmem:[#allocation7 + $0x2970] sm:$0xff]  ;;  %v12569_v14 = vld [vmem:[#allocation39_spill] sm:$0xff] }
 0x514   : > { %12549 = vst [vmem:[#allocation203_spill] sm:$0xff] %v11563_v32  ;;  %12550 = vst [vmem:[#allocation204_spill] sm:$0xff] %v11565_v26  ;;  %7959 = vmatpush2.msra.mxu1 %v7832_v46  ;;  %8089 = vmatprep.mubr.f32.mxu0 %v12377_v41  ;;  %v6364_v34 = vadd.f32 %v6363_v42, %v6250_v23  ;;  %v6252_v19 = vpop.f32.mrf.mxu1  ;;  %v7555_v23 = vld [vmem:[#allocation2 + $0x90] sm:$0xfc]  ;;  %v7562_v42 = vld [vmem:[#allocation2 + $0xc8] sm:$0x3] }
 0x515   : > { %8138 = vmatprep.subr.mxu0 %v7799_v1  ;;  %7960 = vmatprep.subr.mxu1 %v7829_v27  ;;  %v6365_v25 = vpop.f32.mrf.mxu0  ;;  %v7556_v1 = vld [vmem:[#allocation2 + $0x98] sm:$0xfc]  ;;  %v7559_v27 = vld [vmem:[#allocation2 + $0xb0] sm:$0xff] }
 0x516   : > { %8785 = vmatmul.mubr.msk.f32.vlgmr.msra.gmra.mxu0 %vm782_vm5, %v11570_v61  ;;  %7961 = vmatpush2.msra.mxu1 %v7828_v6  ;;  %v11576_v59 = vadd.f32 %v6364_v34, %v11301_v47  ;;  %v11578_v18 = vadd.f32 %v6365_v25, %v6252_v19  ;;  %v6256_v11 = vpop.f32.mrf.mxu1  ;;  %v7816_v47 = vld [vmem:[#allocation7 + $0x2a80] sm:$0xff]  ;;  %v11585_v6 = vld [vmem:[#allocation2 + $0xa8] sm:$0xff]  ;;  %v7778_v19 = vld [vmem:[#allocation7 + $0x2950] sm:$0xff]  ;;  %v7662_v25 = vrot.slane %v7556_v1, 2 }
 0x517   : > { %8139 = vmatpush1.msra.mxu0 %v7798_v50  ;;  %7962 = vmatprep.subr.mxu1 %v7825_v55  ;;  %v6369_v2 = vpop.f32.mrf.mxu0  ;;  %v7779_v55 = vld [vmem:[#allocation7 + $0x2958] sm:$0xff]  ;;  %v7808_v34 = vld [vmem:[#allocation7 + $0x2a40] sm:$0xff] }
 0x518   : > { %12551 = vst [vmem:[#allocation205_spill] sm:$0xff] %v11576_v59  ;;  %12552 = vst [vmem:[#allocation206_spill] sm:$0xff] %v11578_v18  ;;  %8140 = vmatprep.subr.mxu0 %v7795_v51  ;;  %7963 = vmatpush2.msra.mxu1 %v7824_v63  ;;  %v6370_v0 = vadd.f32 %v6369_v2, %v6256_v11  ;;  %v6258_v52 = vpop.f32.mrf.mxu1  ;;  %v7775_v51 = vld [vmem:[#allocation7 + $0x2938] sm:$0xff]  ;;  %v7805_v63 = vld [vmem:[#allocation7 + $0x2a28] sm:$0xff]  ;;  %v878_v59 = vsub.s32 3, %v10129_v62 }
 0x519   : > { %8141 = vmatpush1.msra.mxu0 %v7794_v57  ;;  %7964 = vmatprep.subr.mxu1 %v7821_v12  ;;  %v6371_v44 = vpop.f32.mrf.mxu0  ;;  %v7663_v57 = vrot.slane %v7559_v27, 2  ;;  %v7771_v2 = vld [vmem:[#allocation7 + $0x2918] sm:$0xff]  ;;  %v12591_v62 = vld [vmem:[#allocation132_spill] sm:$0xff] }
 0x51a   : > { %8142 = vmatprep.subr.mxu0 %v7791_v9  ;;  %7965 = vmatpush2.msra.mxu1 %v7820_v35  ;;  %v11581_v17 = vadd.f32 %v6370_v0, %v11308_v45  ;;  %v11583_v46 = vadd.f32 %v6371_v44, %v6258_v52  ;;  %v7774_v9 = vld [vmem:[#allocation7 + $0x2930] sm:$0xff]  ;;  %v7804_v35 = vld [vmem:[#allocation7 + $0x2a20] sm:$0xff]  ;;  %v7801_v52 = vld [vmem:[#allocation7 + $0x2a08] sm:$0xff] }
 0x51b   : > { %8143 = vmatpush1.msra.mxu0 %v7790_v49  ;;  %7966 = vmatprep.subr.mxu1 %v7817_v40  ;;  %v7659_v49 = vrot.slane %v7555_v23, 2  ;;  %v7670_v40 = vrot.slane %v7562_v42, 2  ;;  %v11596_v1 = vsel %vm2650_vm9, %v7662_v25, %v7663_v57  ;;  %v7767_v23 = vld [vmem:[#allocation7 + $0x28f8] sm:$0xff] }
 0x51c   : > { %12553 = vst [vmem:[#allocation207_spill] sm:$0xff] %v11581_v17  ;;  %12554 = vst [vmem:[#allocation208_spill] sm:$0xff] %v11583_v46  ;;  %8144 = vmatprep.subr.mxu0 %v7787_v13  ;;  %7967 = vmatpush2.msra.mxu1 %v7816_v47  ;;  %v6262_v50 = vpop.f32.mrf.mxu1  ;;  %v7660_v13 = vrot.slane %v11585_v6, 2  ;;  %v7561_v47 = vld [vmem:[#allocation2 + $0xc0] sm:$0x3]  ;;  %v7766_v6 = vld [vmem:[#allocation7 + $0x28f0] sm:$0xff] }
 0x51d   : > { %8145 = vmatpush1.msra.mxu0 %v7786_v31  ;;  %7968 = vmatprep.subr.mxu1 %v7813_v3  ;;  %v6375_v45 = vpop.f32.mrf.mxu0  ;;  %v7800_v31 = vld [vmem:[#allocation7 + $0x2a00] sm:$0xff]  ;;  %v7563_v3 = vld [vmem:[#allocation2 + $0xd0] sm:$0x3]  ;;  %v11602_v42 = vsel %vm2650_vm9, %v7663_v57, %v7670_v40  ;;  %v7895_v40 = vld [vmem:[#allocation7 + $0x2cf8] sm:$0xff] }
 0x51e   : > { %8146 = vmatprep.subr.mxu0 %v7783_v5  ;;  %7969 = vmatpush2.msra.mxu1 %v7812_v54  ;;  %v6376_v12 = vadd.f32 %v6375_v45, %v6262_v50  ;;  %v6264_v11 = vpop.f32.mrf.mxu1  ;;  %v11593_v54 = vld [vmem:[#allocation2 + $0xf8] sm:$0xff]  ;;  %v7668_v50 = vrot.slane %v7561_v47, 2  ;;  %v11608_v57 = vld [vmem:[#allocation2 + $0x100] sm:$0xff]  ;;  %v7575_v46 = vld [vmem:[#allocation2 + $0x130] sm:$0xfc] }
 0x51f   : > { %8147 = vmatpush1.msra.mxu0 %v7782_v20  ;;  %7970 = vmatprep.subr.mxu1 %v7809_v10  ;;  %v6377_v0 = vpop.f32.mrf.mxu0  ;;  %v7565_v20 = vld [vmem:[#allocation2 + $0xe0] sm:$0xfc]  ;;  %v7770_v10 = vld [vmem:[#allocation7 + $0x2910] sm:$0xff] }
 0x520   : > { %8148 = vmatprep.subr.mxu0 %v7779_v55  ;;  %7971 = vmatpush2.msra.mxu1 %v7808_v34  ;;  %v11589_v5 = vadd.f32 %v6376_v12, %v11318_v24  ;;  %v11591_v44 = vadd.f32 %v6377_v0, %v6264_v11  ;;  %v11599_v24 = vsel %vm2650_vm9, %v7659_v49, %v7660_v13  ;;  %v7672_v34 = vrot.slane %v7563_v3, 2  ;;  %v7763_v11 = vld [vmem:[#allocation7 + $0x28d8] sm:$0xff]  ;;  %v7571_v49 = vld [vmem:[#allocation2 + $0x110] sm:$0x3] }
 0x521   : > { %8149 = vmatpush1.msra.mxu0 %v7778_v19  ;;  %7972 = vmatprep.subr.mxu1 %v7805_v63  ;;  %v7677_v45 = vrot.slane %v7565_v20, 2  ;;  %v12333_v19 = vrot.slane %v11593_v54, 2  ;;  %v11605_v63 = vld [vmem:[#allocation2 + $0xf0] sm:$0xff]  ;;  %v11618_v47 = vsel %vm2650_vm9, %v7660_v13, %v7668_v50  ;;  %v7681_v13 = vrot.slane %v11608_v57, 2 }
 0x522   : > { %12555 = vst [vmem:[#allocation209_spill] sm:$0xff] %v11589_v5  ;;  %12556 = vst [vmem:[#allocation210_spill] sm:$0xff] %v11591_v44  ;;  %8150 = vmatprep.subr.mxu0 %v7775_v51  ;;  %7973 = vmatpush2.msra.mxu1 %v7804_v35  ;;  %v6268_v27 = vpop.f32.mrf.mxu1  ;;  %v7564_v51 = vld [vmem:[#allocation2 + $0xd8] sm:$0xfc]  ;;  %v7675_v20 = vrot.slane %v11605_v63, 2  ;;  %v7758_v50 = vld [vmem:[#allocation7 + $0x28b0] sm:$0xff] }
 0x523   : > { %8151 = vmatpush1.msra.mxu0 %v7774_v9  ;;  %7974 = vmatprep.subr.mxu1 %v7801_v52  ;;  %v6381_v55 = vpop.f32.mrf.mxu0  ;;  %v7566_v9 = vld [vmem:[#allocation2 + $0xe8] sm:$0xfc]  ;;  %v7674_v3 = vrot.slane %v7564_v51, 2  ;;  %v7685_v51 = vrot.slane %v7571_v49, 2  ;;  %v7572_v63 = vld [vmem:[#allocation2 + $0x118] sm:$0x3] }
 0x524   : > { %8152 = vmatprep.subr.mxu0 %v7771_v2  ;;  %7975 = vmatpush2.msra.mxu1 %v7800_v31  ;;  %v6382_v25 = vadd.f32 %v6381_v55, %v6268_v27  ;;  %v6270_v12 = vpop.f32.mrf.mxu1  ;;  %v7762_v2 = vld [vmem:[#allocation7 + $0x28d0] sm:$0xff]  ;;  %v7759_v31 = vld [vmem:[#allocation7 + $0x28b8] sm:$0xff]  ;;  %v7680_v27 = vrot.slane %v7566_v9, 2 }
 0x525   : > { %8153 = vmatpush1.msra.mxu0 %v7770_v10  ;;  %7976 = vmatprep.mubr.f32.mxu1 %v11596_v1  ;;  %v6383_v35 = vpop.f32.mrf.mxu0  ;;  %v11630_v10 = vsel %vm2650_vm9, %v7677_v45, %v12333_v19  ;;  %v7755_v55 = vld [vmem:[#allocation7 + $0x2898] sm:$0xff]  ;;  %v7894_v45 = vld [vmem:[#allocation7 + $0x2cf0] sm:$0xff]  ;;  %v11640_v9 = vsel %vm2650_vm9, %v7674_v3, %v7675_v20 }
 0x526   : > { %8154 = vmatprep.subr.mxu0 %v7767_v23  ;;  %7977 = vmatmul.mubr.f32.vlgmr.msra.gmra.mxu1 %v11599_v24  ;;  %v11612_v0 = vadd.f32 %v6382_v25, %v11343_v53  ;;  %v11614_v52 = vadd.f32 %v6383_v35, %v6270_v12  ;;  %v11625_v53 = vsel %vm2650_vm9, %v7666_v33, %v7672_v34  ;;  %v7570_v23 = vld [vmem:[#allocation2 + $0x108] sm:$0x3]  ;;  %v7574_v33 = vld [vmem:[#allocation2 + $0x128] sm:$0xfc]  ;;  %v11634_v34 = vld [vmem:[#allocation2 + $0x140] sm:$0xff] }
 0x527   : > { %8155 = vmatpush1.msra.mxu0 %v7766_v6  ;;  %7982 = vmatprep.mubr.f32.mxu1 %v11602_v42  ;;  %v7683_v57 = vrot.slane %v7570_v23, 2  ;;  %v11644_v49 = vsel %vm2650_vm9, %v7680_v27, %v7681_v13  ;;  %v7750_v3 = vld [vmem:[#allocation7 + $0x2870] sm:$0xff]  ;;  %v12561_v23 = vrot.slane %v11593_v54, 2  ;;  %v7692_v17 = vrot.slane %v7574_v33, 2 }
 0x528   : > { %12557 = vst [vmem:[#allocation211_spill] sm:$0xff] %v11612_v0  ;;  %12558 = vst [vmem:[#allocation212_spill] sm:$0xff] %v11614_v52  ;;  %8156 = vmatprep.subr.mxu0 %v7763_v11  ;;  %8095 = vmatprep.mubr.f32.mxu0 %v12377_v41  ;;  %v6274_v6 = vpop.f32.mrf.mxu1  ;;  %v7754_v11 = vld [vmem:[#allocation7 + $0x2890] sm:$0xff]  ;;  %v7693_v27 = vrot.slane %v11634_v34, 2 }
 0x529   : > { %8157 = vmatpush1.msra.mxu0 %v7762_v2  ;;  %8267 = vmatprep.subr.mxu1 %v7895_v40  ;;  %v6387_v28 = vpop.f32.mrf.mxu0  ;;  %v7751_v2 = vld [vmem:[#allocation7 + $0x2878] sm:$0xff]  ;;  %v7687_v40 = vrot.slane %v7572_v63, 2  ;;  %v11659_v63 = vld [vmem:[#allocation2 + $0x148] sm:$0xff]  ;;  %v7746_v54 = vld [vmem:[#allocation7 + $0x2850] sm:$0xff] }
 0x52a   : > { %8158 = vmatprep.subr.mxu0 %v7759_v31  ;;  %7983 = vmatmul.mubr.f32.gmra.mxu1 %v11618_v47  ;;  %v6388_v25 = vadd.f32 %v6387_v28, %v6274_v6  ;;  %v6276_v12 = vpop.f32.mrf.mxu1  ;;  %v7573_v31 = vld [vmem:[#allocation2 + $0x120] sm:$0xfc]  ;;  %v11646_v6 = vld [vmem:[#allocation2 + $0x138] sm:$0xff]  ;;  %v12576_v0 = vld [vmem:[#allocation69_spill] sm:$0xff] }
 0x52b   : > { %8786 = vmatmul.mubr.msk.f32.gmra.mxu0 %vm782_vm5, %v11625_v53  ;;  %7988 = vmatprep.mubr.f32.mxu1 %v11630_v10  ;;  %v6389_v35 = vpop.f32.mrf.mxu0  ;;  %v7689_v33 = vrot.slane %v7573_v31, 2  ;;  %v7690_v34 = vrot.slane %v11646_v6, 2  ;;  %v11678_v31 = vld [vmem:[#allocation9] sm:$0xf]  ;;  %v12587_v44 = vld [vmem:[#allocation101_spill] sm:$0xff] }
 0x52c   : > { %8159 = vmatpush1.msra.mxu0 %v7758_v50  ;;  %8101 = vmatprep.mubr.f32.mxu0 %v12377_v41  ;;  %v11649_v28 = vadd.f32 %v6388_v25, %v11376_v16  ;;  %v11651_v19 = vadd.f32 %v6389_v35, %v6276_v12  ;;  %v11656_v50 = vsel %vm2650_vm9, %v12561_v23, %v7685_v51  ;;  %v7747_v16 = vld [vmem:[#allocation7 + $0x2858] sm:$0xff]  ;;  %v7695_v12 = vrot.slane %v7575_v46, 2  ;;  %v7742_v35 = vld [vmem:[#allocation7 + $0x2830] sm:$0xff] }
 0x52d   : > { %8160 = vmatprep.subr.mxu0 %v7755_v55  ;;  %8268 = vmatpush1.msra.mxu1 %v7894_v45  ;;  %v7580_v55 = vld [vmem:[#allocation2 + $0x158] sm:$0x3]  ;;  %v11666_v51 = vsel %vm2650_vm9, %v7675_v20, %v7683_v57  ;;  %v11671_v25 = vsel %vm2650_vm9, %v7681_v13, %v7687_v40  ;;  %v11676_v20 = vsel %vm2650_vm9, %v7692_v17, %v7693_v27  ;;  %v7581_v40 = vld [vmem:[#allocation2 + $0x160] sm:$0x3]  ;;  %v7738_v17 = vld [vmem:[#allocation7 + $0x2810] sm:$0xff] }
 0x52e   : > { %12559 = vst [vmem:[#allocation213_spill] sm:$0xff] %v11649_v28  ;;  %12560 = vst [vmem:[#allocation214_spill] sm:$0xff] %v11651_v19  ;;  %8161 = vmatpush1.msra.mxu0 %v7754_v11  ;;  %7989 = vmatmul.mubr.f32.gmra.mxu1 %v11640_v9  ;;  %v7743_v45 = vld [vmem:[#allocation7 + $0x2838] sm:$0xff]  ;;  %v7696_v11 = vrot.slane %v11659_v63, 2  ;;  %v7700_v57 = vrot.slane %v7580_v55, 2  ;;  %v11681_v6 = vrot.slane %v11678_v31, %v878_v59  ;;  %v11691_v63 = vld [vmem:[#allocation2 + $0x188] sm:$0xff] }
 0x52f   : > { %8162 = vmatprep.subr.mxu0 %v7751_v2  ;;  %8787 = vmatmul.mubr.msk.f32.gmra.mxu0 %vm782_vm5, %v11644_v49  ;;  %12562 = vst [vmem:[#allocation215_spill] sm:$0xff] %v11676_v20  ;;  %v7579_v2 = vld [vmem:[#allocation2 + $0x150] sm:$0x3]  ;;  %12563 = vst [vmem:[#allocation216_spill] sm:$0xff] %v11678_v31  ;;  %v1564_v13 = vadd.f32 %v10049_v15, %v10056_v4  ;;  %v7739_v46 = vld [vmem:[#allocation7 + $0x2818] sm:$0xff]  ;;  %v7702_v18 = vrot.slane %v7581_v40, 2 }
 0x530   : > { %8163 = vmatpush1.msra.mxu0 %v7750_v3  ;;  %7994 = vmatprep.mubr.f32.mxu1 %v11656_v50  ;;  %v11689_v3 = vsel %vm2650_vm9, %v7689_v33, %v7690_v34  ;;  %v7583_v23 = vld [vmem:[#allocation2 + $0x170] sm:$0xfc]  ;;  %v12565_v59 = vld [vmem:[#allocation67_spill] sm:$0xff]  ;;  %v11697_v4 = vsel %vm2650_vm9, %v7695_v12, %v7696_v11  ;;  %v7698_v55 = vrot.slane %v7579_v2, 2  ;;  %v12572_v40 = vld [vmem:[#allocation40_spill] sm:$0xff] }
 0x531   : > { %8164 = vmatprep.subr.mxu0 %v7747_v16  ;;  %8107 = vmatprep.mubr.f32.mxu0 %v12377_v41  ;;  %12564 = vst [vmem:[#allocation217_spill] sm:$0xff] %v11689_v3  ;;  %v2438_v16 = vadd.f32 %v12565_v59, %v10309_v22  ;;  %v7863_v15 = vld [vmem:[#allocation7 + $0x2bf8] sm:$0xff]  ;;  %v1611_v32 = vadd.f32 %v1564_v13, %v11681_v6  ;;  %v12567_v22 = vld [vmem:[#allocation37_spill] sm:$0xff]  ;;  %v7707_v26 = vrot.slane %v7583_v23, 2  ;;  %v12575_v2 = vld [vmem:[#allocation68_spill] sm:$0xff] }
 0x532   : > { %8165 = vmatpush1.msra.mxu0 %v7746_v54  ;;  %7995 = vmatmul.mubr.f32.gmra.mxu1 %v11666_v51  ;;  %v7862_v54 = vld [vmem:[#allocation7 + $0x2bf0] sm:$0xff]  ;;  %v7859_v33 = vld [vmem:[#allocation7 + $0x2bd8] sm:$0xff]  ;;  %v2444_v52 = vadd.f32 %v12576_v0, %v12575_v2 }
 0x533   : > { %8166 = vmatprep.subr.mxu0 %v7743_v45  ;;  %8788 = vmatmul.mubr.msk.f32.gmra.mxu0 %vm782_vm5, %v11671_v25  ;;  %v11701_v45 = vsel %vm2650_vm9, %v7693_v27, %v7700_v57  ;;  %v7858_v12 = vld [vmem:[#allocation7 + $0x2bd0] sm:$0xff]  ;;  %v1576_v27 = vadd.f32 %v12570_v7, %v12569_v14  ;;  %v12574_v28 = vld [vmem:[#allocation99_spill] sm:$0xff]  ;;  %v11724_v14 = vsel %vm2650_vm9, %v7690_v34, %v7698_v55  ;;  %v12580_v55 = vrot.slane %v11691_v63, 2 }
 0x534   : > { %8167 = vmatpush1.msra.mxu0 %v7742_v35  ;;  %8000 = vmatprep.mubr.f32.mxu1 %v11676_v20  ;;  %12566 = vst [vmem:[#allocation67_spill] sm:$0xff] %v11701_v45  ;;  %v12568_v35 = vld [vmem:[#allocation36_spill] sm:$0xff]  ;;  %v12571_v57 = vld [vmem:[#allocation41_spill] sm:$0xff]  ;;  %v12573_v13 = vld [vmem:[#allocation98_spill] sm:$0xff] }
 0x535   : > { %8168 = vmatprep.subr.mxu0 %v7739_v46  ;;  %8113 = vmatprep.mubr.f32.mxu0 %v12377_v41  ;;  %v1570_v59 = vadd.f32 %v12568_v35, %v12567_v22  ;;  %v7582_v46 = vld [vmem:[#allocation2 + $0x168] sm:$0xfc]  ;;  %v1582_v8 = vadd.f32 %v12572_v40, %v12571_v57  ;;  %v3312_v19 = vadd.f32 %v12574_v28, %v12573_v13  ;;  %v7584_v23 = vld [vmem:[#allocation2 + $0x178] sm:$0xfc]  ;;  %v11718_v22 = vld [vmem:[#allocation2 + $0x190] sm:$0xff] }
 0x536   : > { %8169 = vmatpush1.msra.mxu0 %v7738_v17  ;;  %8001 = vmatmul.mubr.f32.gmra.mxu1 %v11689_v3  ;;  %v7891_v17 = vld [vmem:[#allocation7 + $0x2cd8] sm:$0xff]  ;;  %v2485_v35 = vadd.f32 %v2438_v16, %v1611_v32  ;;  %12577 = vst [vmem:[#allocation37_spill] sm:$0xff] %v11724_v14  ;;  %v7589_v28 = vld [vmem:[#allocation2 + $0x1a0] sm:$0x3]  ;;  %v11730_v13 = vsel %vm2650_vm9, %v7696_v11, %v7702_v18  ;;  %v7890_v32 = vld [vmem:[#allocation7 + $0x2cd0] sm:$0xff]  ;;  %v7704_v16 = vrot.slane %v7582_v46, 2 }
 0x537   : > { %8170 = vmatprep.subr.mxu0 %v7863_v15  ;;  %8789 = vmatmul.mubr.msk.f32.gmra.mxu0 %vm782_vm5, %v11697_v4  ;;  %v7855_v7 = vld [vmem:[#allocation7 + $0x2bb8] sm:$0xff]  ;;  %v7854_v34 = vld [vmem:[#allocation7 + $0x2bb0] sm:$0xff]  ;;  %v11737_v2 = vsel %vm2650_vm9, %v7707_v26, %v12580_v55  ;;  %v1619_v18 = vadd.f32 %v1576_v27, %v11681_v6  ;;  %v11745_v0 = vadd.f32 %v1582_v8, %v11681_v6 }
 0x538   : > { %8171 = vmatpush2.msra.mxu0 %v7862_v54  ;;  %8006 = vmatprep.mubr.f32.mxu1 %v11701_v45  ;;  %v12578_v15 = vld [vmem:[#allocation130_spill] sm:$0xff]  ;;  %v12579_v57 = vld [vmem:[#allocation131_spill] sm:$0xff]  ;;  %v1615_v54 = vadd.f32 %v1570_v59, %v11681_v6  ;;  %12581 = vst [vmem:[#allocation36_spill] sm:$0xff] %v11737_v2  ;;  %v3359_v11 = vadd.f32 %v3312_v19, %v2485_v35 }
 0x539   : > { %v4070_v40 = vadd.f32 %v12579_v57, %v12578_v15  ;;  %8172 = vmatprep.subr.mxu0 %v7859_v33  ;;  %8119 = vmatprep.mubr.f32.mxu0 %v12377_v41  ;;  %v7710_v33 = vrot.slane %v7584_v23, 2  ;;  %v12582_v57 = vld [vmem:[#allocation162_spill] sm:$0xff]  ;;  %v12583_v46 = vld [vmem:[#allocation163_spill] sm:$0xff]  ;;  %v12586_v15 = vld [vmem:[#allocation100_spill] sm:$0xff] }
 0x53a   : > { %8173 = vmatpush2.msra.mxu0 %v7858_v12  ;;  %8269 = vmatprep.subr.mxu1 %v7891_v17  ;;  %v4943_v5 = vadd.f32 %v12583_v46, %v12582_v57  ;;  %v7851_v59 = vld [vmem:[#allocation7 + $0x2b98] sm:$0xff]  ;;  %v7715_v12 = vrot.slane %v7589_v28, 2  ;;  %v3318_v27 = vadd.f32 %v12587_v44, %v12586_v15  ;;  %v7850_v19 = vld [vmem:[#allocation7 + $0x2b90] sm:$0xff]  ;;  %v6571_v57 = vpop.f32.mrf.mxu1  ;;  %v2489_v28 = vadd.f32 %v2444_v52, %v1615_v54 }
 0x53b   : > { %8174 = vmatprep.subr.mxu0 %v7855_v7  ;;  %8007 = vmatmul.mubr.f32.gmra.mxu1 %v11724_v14  ;;  %v7588_v17 = vld [vmem:[#allocation2 + $0x198] sm:$0x3]  ;;  %v12584_v26 = vld [vmem:[#allocation43_spill] sm:$0xff]  ;;  %v7590_v7 = vld [vmem:[#allocation2 + $0x1a8] sm:$0x3]  ;;  %v4117_v46 = vadd.f32 %v4070_v40, %v3359_v11  ;;  %v12593_v52 = vrot.slane %v11718_v22, 2 }
 0x53c   : > { %v12585_v55 = vld [vmem:[#allocation42_spill] sm:$0xff]  ;;  %8790 = vmatmul.mubr.msk.f32.gmra.mxu0 %vm782_vm5, %v11730_v13  ;;  %8270 = vmatpush1.msra.mxu1 %v7890_v32  ;;  %v12590_v15 = vld [vmem:[#allocation71_spill] sm:$0xff]  ;;  %v12592_v32 = vld [vmem:[#allocation133_spill] sm:$0xff] }
 0x53d   : > { %v11749_v23 = vadd.f32 %v12585_v55, %v12584_v26  ;;  %v7887_v35 = vld [vmem:[#allocation7 + $0x2cb8] sm:$0xff]  ;;  %8175 = vmatpush2.msra.mxu0 %v7854_v34  ;;  %8012 = vmatprep.mubr.f32.mxu1 %v11737_v2  ;;  %v12588_v26 = vrot.slane %v11708_v39, 2  ;;  %v4076_v14 = vadd.f32 %v12592_v32, %v12591_v62  ;;  %v11769_v40 = vsel %vm2650_vm9, %v7710_v33, %v12593_v52  ;;  %v7886_v54 = vld [vmem:[#allocation7 + $0x2cb0] sm:$0xff]  ;;  %v12597_v33 = vld [vmem:[#allocation164_spill] sm:$0xff] }
 0x53e   : > { %v7847_v8 = vld [vmem:[#allocation7 + $0x2b78] sm:$0xff]  ;;  %8176 = vmatprep.subr.mxu0 %v7851_v59  ;;  %8125 = vmatprep.mubr.f32.mxu0 %v12377_v41  ;;  %v7713_v34 = vrot.slane %v7588_v17, 2  ;;  %v6458_v11 = vpop.f32.mrf.mxu0  ;;  %v4990_v2 = vadd.f32 %v4943_v5, %v4117_v46  ;;  %v7717_v62 = vrot.slane %v7590_v7, 2  ;;  %v12598_v52 = vld [vmem:[#allocation165_spill] sm:$0xff]  ;;  %v6573_v17 = vpop.f32.mrf.mxu1  ;;  %v12599_v46 = vrot.slane %v11708_v39, 2  ;;  %v12604_v39 = vld [vmem:[#allocation72_spill] sm:$0xff] }
 0x53f   : > { %v11759_v55 = vsel %vm2650_vm9, %v7704_v16, %v12588_v26  ;;  %v12589_v44 = vld [vmem:[#allocation70_spill] sm:$0xff]  ;;  %8177 = vmatpush2.msra.mxu0 %v7850_v19  ;;  %8271 = vmatprep.subr.mxu1 %v7887_v35  ;;  %v12594_v26 = vrot.slane %v11691_v63, 2  ;;  %v6572_v59 = vadd.f32 %v6571_v57, %v6458_v11  ;;  %v12596_v45 = vld [vmem:[#allocation103_spill] sm:$0xff]  ;;  %v4949_v20 = vadd.f32 %v12598_v52, %v12597_v33 }
 0x540   : > { %v2450_v31 = vadd.f32 %v12590_v15, %v12589_v44  ;;  %v7846_v16 = vld [vmem:[#allocation7 + $0x2b70] sm:$0xff]  ;;  %v3363_v15 = vadd.f32 %v3318_v27, %v2489_v28  ;;  %8178 = vmatprep.subr.mxu0 %v7847_v8  ;;  %8013 = vmatmul.mubr.f32.gmra.mxu1 %v11759_v55  ;;  %v7843_v5 = vld [vmem:[#allocation7 + $0x2b58] sm:$0xff]  ;;  %v6460_v19 = vpop.f32.mrf.mxu0  ;;  %v5863_v63 = vadd.f32 %v11455_v36, %v4990_v2 }
 0x541   : > { %v11774_v44 = vsel %vm2650_vm9, %v12594_v26, %v7715_v12  ;;  %v12595_v32 = vld [vmem:[#allocation102_spill] sm:$0xff]  ;;  %8791 = vmatmul.mubr.msk.f32.gmra.mxu0 %vm782_vm5, %v11769_v40  ;;  %8272 = vmatpush1.msra.mxu1 %v7886_v54  ;;  %v11785_v35 = vadd.f32 %v6572_v59, %v11453_v29  ;;  %v11791_v36 = vsel %vm2650_vm9, %v12599_v46, %v7713_v34  ;;  %v12601_v54 = vld [vmem:[#allocation135_spill] sm:$0xff]  ;;  %v12602_v29 = vrot.slane %v11718_v22, 2  ;;  %v12605_v26 = vld [vmem:[#allocation73_spill] sm:$0xff] }
 0x542   : > { %v3324_v3 = vadd.f32 %v12596_v45, %v12595_v32  ;;  %v7842_v12 = vld [vmem:[#allocation7 + $0x2b50] sm:$0xff]  ;;  %v7883_v27 = vld [vmem:[#allocation7 + $0x2c98] sm:$0xff]  ;;  %v6574_v45 = vadd.f32 %v6573_v17, %v6460_v19  ;;  %v2493_v7 = vadd.f32 %v2450_v31, %v1619_v18  ;;  %v4121_v57 = vadd.f32 %v4076_v14, %v3363_v15  ;;  %8179 = vmatpush2.msra.mxu0 %v7846_v16  ;;  %v6464_v2 = vpop.f32.mrf.mxu0  ;;  %v12606_v17 = vld [vmem:[#allocation104_spill] sm:$0xff] }
 0x543   : > { %8018 = vmatprep.mubr.f32.mxu1 %v11774_v44  ;;  %v7839_v28 = vld [vmem:[#allocation7 + $0x2b38] sm:$0xff]  ;;  %8180 = vmatprep.subr.mxu0 %v7843_v5  ;;  %v11799_v31 = vsel %vm2650_vm9, %v12602_v29, %v7717_v62  ;;  %v7882_v14 = vld [vmem:[#allocation7 + $0x2c90] sm:$0xff]  ;;  %v6577_v16 = vpop.f32.mrf.mxu1  ;;  %v2456_v34 = vadd.f32 %v12605_v26, %v12604_v39 }
 0x544   : > { %v12600_v8 = vld [vmem:[#allocation134_spill] sm:$0xff]  ;;  %8131 = vmatprep.mubr.f32.mxu0 %v12377_v41  ;;  %v11801_v18 = vadd.f32 %v6574_v45, %v5863_v63  ;;  %v4994_v59 = vadd.f32 %v4949_v20, %v4121_v57  ;;  %8181 = vmatpush2.msra.mxu0 %v7842_v12  ;;  %v6578_v33 = vadd.f32 %v6577_v16, %v6464_v2  ;;  %v6466_v52 = vpop.f32.mrf.mxu0  ;;  %v12607_v22 = vld [vmem:[#allocation105_spill] sm:$0xff]  ;;  %v12609_v46 = vld [vmem:[#allocation167_spill] sm:$0xff] }
 0x545   : > { %v4082_v11 = vadd.f32 %v12601_v54, %v12600_v8  ;;  %8273 = vmatprep.subr.mxu1 %v7883_v27  ;;  %v7838_v15 = vld [vmem:[#allocation7 + $0x2b30] sm:$0xff]  ;;  %v7879_v32 = vld [vmem:[#allocation7 + $0x2c78] sm:$0xff]  ;;  %v3367_v5 = vadd.f32 %v3324_v3, %v2493_v7  ;;  %v3330_v19 = vadd.f32 %v12607_v22, %v12606_v17  ;;  %8182 = vmatprep.subr.mxu0 %v7839_v28  ;;  %v6579_v54 = vpop.f32.mrf.mxu1  ;;  %v12614_v16 = vld [vmem:[#allocation44_spill] sm:$0xff] }
 0x546   : > { %12603 = vst [vmem:[#allocation39_spill] sm:$0xff] %v11801_v18  ;;  %v12608_v62 = vld [vmem:[#allocation166_spill] sm:$0xff]  ;;  %8019 = vmatmul.mubr.f32.gmra.mxu1 %v11791_v36  ;;  %v12610_v20 = vld [vmem:[#allocation195_spill] sm:$0xff]  ;;  %8792 = vmatmul.mubr.msk.f32.gmra.mxu0 %vm782_vm5, %v11799_v31  ;;  %v6580_v2 = vadd.f32 %v6579_v54, %v6466_v52  ;;  %v1627_v28 = vadd.f32 %v11749_v23, %v11681_v6  ;;  %v12613_v29 = vld [vmem:[#allocation45_spill] sm:$0xff] }
 0x547   : > { %v4955_v8 = vadd.f32 %v12609_v46, %v12608_v62  ;;  %v7835_v63 = vld [vmem:[#allocation7 + $0x2b18] sm:$0xff]  ;;  %v7878_v45 = vld [vmem:[#allocation7 + $0x2c70] sm:$0xff]  ;;  %v5867_v12 = vadd.f32 %v12610_v20, %v4994_v59  ;;  %8274 = vmatpush1.msra.mxu1 %v7882_v14  ;;  %v1594_v39 = vadd.f32 %v12614_v16, %v12613_v29  ;;  %v4125_v26 = vadd.f32 %v4082_v11, %v3367_v5  ;;  %v6470_v22 = vpop.f32.mrf.mxu0  ;;  %v12615_v62 = vld [vmem:[#allocation136_spill] sm:$0xff] }
 0x548   : > { %v7834_v27 = vld [vmem:[#allocation7 + $0x2b10] sm:$0xff]  ;;  %v7875_v3 = vld [vmem:[#allocation7 + $0x2c58] sm:$0xff]  ;;  %8183 = vmatpush2.msra.mxu0 %v7838_v15  ;;  %8275 = vmatprep.subr.mxu1 %v7879_v32  ;;  %v2497_v14 = vadd.f32 %v2456_v34, %v11745_v0  ;;  %v6583_v23 = vpop.f32.mrf.mxu1 }
 0x549   : > { %v12611_v7 = vld [vmem:[#allocation194_spill] sm:$0xff]  ;;  %v12616_v46 = vld [vmem:[#allocation137_spill] sm:$0xff]  ;;  %8184 = vmatprep.subr.mxu0 %v7835_v63  ;;  %8276 = vmatpush1.msra.mxu1 %v7878_v45  ;;  %v11823_v54 = vadd.f32 %v6580_v2, %v5867_v12  ;;  %v12619_v29 = vld [vmem:[#allocation75_spill] sm:$0xff]  ;;  %v4998_v15 = vadd.f32 %v4955_v8, %v4125_v26  ;;  %v6584_v16 = vadd.f32 %v6583_v23, %v6470_v22  ;;  %v6472_v0 = vpop.f32.mrf.mxu0 }
 0x54a   : > { %v11814_v57 = vadd.f32 %v6578_v33, %v12611_v7  ;;  %v7831_v17 = vld [vmem:[#allocation7 + $0x2af8] sm:$0xff]  ;;  %v7874_v59 = vld [vmem:[#allocation7 + $0x2c50] sm:$0xff]  ;;  %v4088_v20 = vadd.f32 %v12616_v46, %v12615_v62  ;;  %8185 = vmatpush2.msra.mxu0 %v7834_v27  ;;  %8277 = vmatprep.subr.mxu1 %v7875_v3  ;;  %v3371_v34 = vadd.f32 %v3330_v19, %v2497_v14  ;;  %v12622_v46 = vld [vmem:[#allocation168_spill] sm:$0xff] }
 0x54b   : > { %v7830_v33 = vld [vmem:[#allocation7 + $0x2af0] sm:$0xff]  ;;  %v7871_v52 = vld [vmem:[#allocation7 + $0x2c38] sm:$0xff]  ;;  %12617 = vst [vmem:[#allocation41_spill] sm:$0xff] %v11823_v54  ;;  %8186 = vmatprep.subr.mxu0 %v7831_v17  ;;  %8278 = vmatpush1.msra.mxu1 %v7874_v59  ;;  %v6585_v54 = vpop.f32.mrf.mxu1  ;;  %v12625_v26 = vld [vmem:[#allocation196_spill] sm:$0xff] }
 0x54c   : > { %12612 = vst [vmem:[#allocation38_spill] sm:$0xff] %v11814_v57  ;;  %v12618_v7 = vld [vmem:[#allocation74_spill] sm:$0xff]  ;;  %v12621_v62 = vld [vmem:[#allocation107_spill] sm:$0xff]  ;;  %v12623_v45 = vld [vmem:[#allocation169_spill] sm:$0xff]  ;;  %8187 = vmatpush2.msra.mxu0 %v7830_v33  ;;  %8279 = vmatprep.subr.mxu1 %v7871_v52  ;;  %v11833_v22 = vadd.f32 %v6584_v16, %v12625_v26  ;;  %v6586_v19 = vadd.f32 %v6585_v54, %v6472_v0 }
 0x54d   : > { %v2462_v11 = vadd.f32 %v12619_v29, %v12618_v7  ;;  %v7827_v32 = vld [vmem:[#allocation7 + $0x2ad8] sm:$0xff]  ;;  %v7870_v5 = vld [vmem:[#allocation7 + $0x2c30] sm:$0xff]  ;;  %v4961_v18 = vadd.f32 %v12623_v45, %v12622_v46  ;;  %v4129_v17 = vadd.f32 %v4088_v20, %v3371_v34  ;;  %v6589_v54 = vpop.f32.mrf.mxu1  ;;  %v12630_v0 = vld [vmem:[#allocation76_spill] sm:$0xff]  ;;  %8315 = vmatprep.mubr.f32.mxu1 %v12377_v41  ;;  %8202 = vmatprep.mubr.f32.mxu0 %v11596_v1 }
 0x54e   : > { %v12620_v57 = vld [vmem:[#allocation106_spill] sm:$0xff]  ;;  %v12624_v7 = vld [vmem:[#allocation197_spill] sm:$0xff]  ;;  %v12626_v14 = vld [vmem:[#allocation47_spill] sm:$0xff]  ;;  %8188 = vmatprep.subr.mxu0 %v7827_v32  ;;  %8280 = vmatpush1.msra.mxu1 %v7870_v5 }
 0x54f   : > { %v3336_v63 = vadd.f32 %v12621_v62, %v12620_v57  ;;  %v7826_v12 = vld [vmem:[#allocation7 + $0x2ad0] sm:$0xff]  ;;  %v7867_v2 = vld [vmem:[#allocation7 + $0x2c18] sm:$0xff]  ;;  %v5871_v8 = vadd.f32 %v12624_v7, %v4998_v15  ;;  %v1631_v57 = vadd.f32 %v1594_v39, %v11681_v6  ;;  %v6476_v62 = vpop.f32.mrf.mxu0  ;;  %v2501_v46 = vadd.f32 %v2462_v11, %v1627_v28  ;;  %v12632_v28 = vld [vmem:[#allocation108_spill] sm:$0xff] }
 0x550   : > { %v7823_v27 = vld [vmem:[#allocation7 + $0x2ab8] sm:$0xff]  ;;  %v7866_v3 = vld [vmem:[#allocation7 + $0x2c10] sm:$0xff]  ;;  %8189 = vmatpush2.msra.mxu0 %v7826_v12  ;;  %8281 = vmatprep.subr.mxu1 %v7867_v2  ;;  %v5002_v26 = vadd.f32 %v4961_v18, %v4129_v17  ;;  %v6590_v32 = vadd.f32 %v6589_v54, %v6476_v62 }
 0x551   : > { %v12627_v23 = vld [vmem:[#allocation46_spill] sm:$0xff]  ;;  %v12629_v33 = vld [vmem:[#allocation139_spill] sm:$0xff]  ;;  %v11840_v16 = vadd.f32 %v6586_v19, %v5871_v8  ;;  %v12631_v39 = vld [vmem:[#allocation77_spill] sm:$0xff]  ;;  %8190 = vmatprep.subr.mxu0 %v7823_v27  ;;  %8282 = vmatpush1.msra.mxu1 %v7866_v3  ;;  %v6478_v5 = vpop.f32.mrf.mxu0  ;;  %v3375_v34 = vadd.f32 %v3336_v63, %v2501_v46  ;;  %v6591_v8 = vpop.f32.mrf.mxu1 }
 0x552   : > { %v1600_v29 = vadd.f32 %v12627_v23, %v12626_v14  ;;  %v7822_v59 = vld [vmem:[#allocation7 + $0x2ab0] sm:$0xff]  ;;  %v7819_v52 = vld [vmem:[#allocation7 + $0x2a98] sm:$0xff]  ;;  %v2468_v7 = vadd.f32 %v12631_v39, %v12630_v0  ;;  %v5875_v19 = vadd.f32 %v11490_v37, %v5002_v26  ;;  %v6592_v63 = vadd.f32 %v6591_v8, %v6478_v5  ;;  %8793 = vmatmul.mubr.msk.f32.vlgmr.msra.gmra.mxu1 %vm782_vm5, %v11570_v61  ;;  %v12645_v8 = vld [vmem:[#allocation172_spill] sm:$0xff] }
 0x553   : > { %v12628_v15 = vld [vmem:[#allocation138_spill] sm:$0xff]  ;;  %v12633_v11 = vld [vmem:[#allocation109_spill] sm:$0xff]  ;;  %v12635_v12 = vld [vmem:[#allocation171_spill] sm:$0xff]  ;;  %8191 = vmatpush2.msra.mxu0 %v7822_v59  ;;  %v6482_v59 = vpop.f32.mrf.mxu0  ;;  %8321 = vmatprep.mubr.f32.mxu1 %v12377_v41 }
 0x554   : > { %v4094_v45 = vadd.f32 %v12629_v33, %v12628_v15  ;;  %v7818_v20 = vld [vmem:[#allocation7 + $0x2a90] sm:$0xff]  ;;  %v3342_v14 = vadd.f32 %v12633_v11, %v12632_v28  ;;  %v7815_v2 = vld [vmem:[#allocation7 + $0x2a78] sm:$0xff]  ;;  %8192 = vmatprep.subr.mxu0 %v7819_v52  ;;  %v2505_v46 = vadd.f32 %v2468_v7, %v1631_v57  ;;  %v12637_v33 = vld [vmem:[#allocation140_spill] sm:$0xff]  ;;  %v11859_v1 = vadd.f32 %v6592_v63, %v5875_v19  ;;  %v6595_v52 = vpop.f32.mrf.mxu1 }
 0x555   : > { %v12634_v23 = vld [vmem:[#allocation170_spill] sm:$0xff]  ;;  %8193 = vmatpush2.msra.mxu0 %v7818_v20  ;;  %v12638_v54 = vld [vmem:[#allocation141_spill] sm:$0xff]  ;;  %v1635_v39 = vadd.f32 %v1600_v29, %v11681_v6  ;;  %v12640_v26 = vld [vmem:[#allocation79_spill] sm:$0xff]  ;;  %v6596_v5 = vadd.f32 %v6595_v52, %v6482_v59  ;;  %v6484_v57 = vpop.f32.mrf.mxu0 }
 0x556   : > { %v4967_v15 = vadd.f32 %v12635_v12, %v12634_v23  ;;  %v7814_v18 = vld [vmem:[#allocation7 + $0x2a70] sm:$0xff]  ;;  %v4133_v17 = vadd.f32 %v4094_v45, %v3375_v34  ;;  %v7811_v62 = vld [vmem:[#allocation7 + $0x2a58] sm:$0xff]  ;;  %v4100_v0 = vadd.f32 %v12638_v54, %v12637_v33  ;;  %8194 = vmatprep.subr.mxu0 %v7815_v2  ;;  %v3379_v11 = vadd.f32 %v3342_v14, %v2505_v46  ;;  %v6597_v63 = vpop.f32.mrf.mxu1 }
 0x557   : > { %v12636_v27 = vld [vmem:[#allocation198_spill] sm:$0xff]  ;;  %8195 = vmatpush2.msra.mxu0 %v7814_v18  ;;  %v12642_v34 = vld [vmem:[#allocation49_spill] sm:$0xff]  ;;  %v12644_v12 = vld [vmem:[#allocation111_spill] sm:$0xff]  ;;  %8794 = vmatmul.mubr.msk.f32.gmra.mxu1 %vm782_vm5, %v11625_v53  ;;  %v11874_v18 = vadd.f32 %v6596_v5, %v11493_v60  ;;  %v6598_v14 = vadd.f32 %v6597_v63, %v6484_v57  ;;  %v6488_v46 = vpop.f32.mrf.mxu0 }
 0x558   : > { %v11852_v3 = vadd.f32 %v6590_v32, %v12636_v27  ;;  %v7810_v37 = vld [vmem:[#allocation7 + $0x2a50] sm:$0xff]  ;;  %v5006_v32 = vadd.f32 %v4967_v15, %v4133_v17  ;;  %v7807_v61 = vld [vmem:[#allocation7 + $0x2a38] sm:$0xff]  ;;  %8196 = vmatprep.subr.mxu0 %v7811_v62  ;;  %v4137_v17 = vadd.f32 %v4100_v0, %v3379_v11  ;;  %8327 = vmatprep.mubr.f32.mxu1 %v12377_v41 }
 0x559   : > { %v12639_v45 = vld [vmem:[#allocation78_spill] sm:$0xff]  ;;  %v12646_v19 = vld [vmem:[#allocation173_spill] sm:$0xff]  ;;  %8197 = vmatpush2.msra.mxu0 %v7810_v37  ;;  %v12648_v52 = vld [vmem:[#allocation143_spill] sm:$0xff]  ;;  %v6601_v37 = vpop.f32.mrf.mxu1 }
 0x55a   : > { %v2474_v20 = vadd.f32 %v12640_v26, %v12639_v45  ;;  %v12641_v7 = vld [vmem:[#allocation50_spill] sm:$0xff]  ;;  %v4973_v27 = vadd.f32 %v12646_v19, %v12645_v8  ;;  %v5879_v33 = vadd.f32 %v11495_v48, %v5006_v32  ;;  %8198 = vmatprep.subr.mxu0 %v7807_v61  ;;  %v12649_v26 = vld [vmem:[#allocation80_spill] sm:$0xff]  ;;  %v12650_v60 = vld [vmem:[#allocation81_spill] sm:$0xff]  ;;  %v6602_v0 = vadd.f32 %v6601_v37, %v6488_v46  ;;  %v6490_v61 = vpop.f32.mrf.mxu0 }
 0x55b   : > { %v1606_v28 = vadd.f32 %v12642_v34, %v12641_v7  ;;  %v12643_v23 = vld [vmem:[#allocation110_spill] sm:$0xff]  ;;  %v2480_v32 = vadd.f32 %v12650_v60, %v12649_v26  ;;  %v12651_v7 = vld [vmem:[#allocation112_spill] sm:$0xff]  ;;  %v12652_v34 = vld [vmem:[#allocation113_spill] sm:$0xff]  ;;  %8795 = vmatmul.mubr.msk.f32.gmra.mxu1 %vm782_vm5, %v11644_v49 }
 0x55c   : > { %v3348_v2 = vadd.f32 %v12644_v12, %v12643_v23  ;;  %v7806_v29 = vld [vmem:[#allocation7 + $0x2a30] sm:$0xff]  ;;  %v7803_v15 = vld [vmem:[#allocation7 + $0x2a18] sm:$0xff]  ;;  %v2509_v62 = vadd.f32 %v2474_v20, %v1635_v39  ;;  %v11879_v48 = vadd.f32 %v6598_v14, %v5879_v33  ;;  %v5010_v5 = vadd.f32 %v4973_v27, %v4137_v17  ;;  %v6603_v12 = vpop.f32.mrf.mxu1  ;;  %8333 = vmatprep.mubr.f32.mxu1 %v12377_v41  ;;  %v6494_v19 = vpop.f32.mrf.mxu0  ;;  %v12657_v17 = vld [vmem:[#allocation176_spill] sm:$0xff] }
 0x55d   : > { %v7802_v59 = vld [vmem:[#allocation7 + $0x2a10] sm:$0xff]  ;;  %8199 = vmatpush2.msra.mxu0 %v7806_v29  ;;  %v1639_v53 = vadd.f32 %v1606_v28, %v11681_v6  ;;  %v3354_v39 = vadd.f32 %v12652_v34, %v12651_v7  ;;  %v12654_v11 = vld [vmem:[#allocation175_spill] sm:$0xff]  ;;  %v11894_v28 = vadd.f32 %v6602_v0, %v11498_v21  ;;  %v12655_v29 = vld [vmem:[#allocation144_spill] sm:$0xff] }
 0x55e   : > { %v12647_v54 = vld [vmem:[#allocation142_spill] sm:$0xff]  ;;  %8200 = vmatprep.subr.mxu0 %v7803_v15  ;;  %v3383_v57 = vadd.f32 %v3348_v2, %v2509_v62  ;;  %v5883_v6 = vadd.f32 %v11500_v43, %v5010_v5  ;;  %v6604_v2 = vadd.f32 %v6603_v12, %v6490_v61  ;;  %v12656_v63 = vld [vmem:[#allocation145_spill] sm:$0xff]  ;;  %v6607_v15 = vpop.f32.mrf.mxu1  ;;  %v6496_v14 = vpop.f32.mrf.mxu0  ;;  %v12667_v12 = vld [vmem:[#allocation216_spill] sm:$0xff] }
 0x55f   : > { %v4106_v45 = vadd.f32 %v12648_v52, %v12647_v54  ;;  %v12653_v20 = vld [vmem:[#allocation174_spill] sm:$0xff]  ;;  %8201 = vmatpush2.msra.mxu0 %v7802_v59  ;;  %v2513_v27 = vadd.f32 %v2480_v32, %v1639_v53  ;;  %v4112_v33 = vadd.f32 %v12656_v63, %v12655_v29  ;;  %8796 = vmatmul.mubr.msk.f32.gmra.mxu1 %vm782_vm5, %v11671_v25  ;;  %v12658_v59 = vld [vmem:[#allocation177_spill] sm:$0xff] }
 0x560   : > { %v4979_v23 = vadd.f32 %v12654_v11, %v12653_v20  ;;  %8203 = vmatmul.mubr.f32.vlgmr.msra.gmra.mxu0 %v11599_v24  ;;  %v11899_v49 = vadd.f32 %v6604_v2, %v5883_v6  ;;  %v6608_v24 = vadd.f32 %v6607_v15, %v6494_v19  ;;  %v4985_v46 = vadd.f32 %v12658_v59, %v12657_v17  ;;  %v12668_v2 = vld [vmem:[#allocation61_spill] sm:$0xff] }
 0x561   : > { %v4141_v8 = vadd.f32 %v4106_v45, %v3383_v57  ;;  %8208 = vmatprep.mubr.f32.mxu0 %v11602_v42  ;;  %v3387_v21 = vadd.f32 %v3354_v39, %v2513_v27  ;;  %8339 = vmatprep.mubr.f32.mxu1 %v12377_v41  ;;  %v6609_v42 = vpop.f32.mrf.mxu1  ;;  %v6500_v45 = vpop.f32.mrf.mxu0  ;;  %v12666_v39 = vld [vmem:[#allocation29_spill] sm:$0xff] }
 0x562   : > { %v11910_v54 = vadd.f32 %v6608_v24, %v11505_v30  ;;  %v6610_v52 = vadd.f32 %v6609_v42, %v6496_v14  ;;  %v12671_v15 = vld [vmem:[#allocation93_spill] sm:$0xff]  ;;  %v12674_v42 = vld [vmem:[#allocation124_spill] sm:$0xff] }
 0x563   : > { %v5014_v43 = vadd.f32 %v4979_v23, %v4141_v8  ;;  %v4145_v25 = vadd.f32 %v4112_v33, %v3387_v21  ;;  %8797 = vmatmul.mubr.msk.f32.gmra.mxu1 %vm782_vm5, %v11697_v4  ;;  %v6613_v53 = vpop.f32.mrf.mxu1  ;;  %v6502_v26 = vpop.f32.mrf.mxu0  ;;  %v12659_v4 = vld [vmem:[#allocation215_spill] sm:$0xff]  ;;  %v12669_v8 = vld [vmem:[#allocation62_spill] sm:$0xff]  ;;  %v12670_v33 = vld [vmem:[#allocation92_spill] sm:$0xff] }
 0x564   : > { %8209 = vmatmul.mubr.f32.gmra.mxu0 %v11618_v47  ;;  %8345 = vmatprep.mubr.f32.mxu1 %v12377_v41  ;;  %v2242_v19 = vadd.f32 %v12669_v8, %v12668_v2  ;;  %v12672_v14 = vld [vmem:[#allocation33_spill] sm:$0xff]  ;;  %v12673_v21 = vld [vmem:[#allocation31_spill] sm:$0xff]  ;;  %v12685_v2 = vld [vmem:[#allocation34_spill] sm:$0xff] }
 0x565   : > { %v5887_v62 = vadd.f32 %v11507_v38, %v5014_v43  ;;  %8214 = vmatprep.mubr.f32.mxu0 %v11630_v10  ;;  %v5018_v47 = vadd.f32 %v4985_v46, %v4145_v25  ;;  %v6614_v38 = vadd.f32 %v6613_v53, %v6500_v45  ;;  %v6615_v30 = vpop.f32.mrf.mxu1  ;;  %v3116_v43 = vadd.f32 %v12671_v15, %v12670_v33  ;;  %v12676_v45 = vld [vmem:[#allocation63_spill] sm:$0xff]  ;;  %v12677_v53 = vld [vmem:[#allocation64_spill] sm:$0xff] }
 0x566   : > { %v6616_v32 = vadd.f32 %v6615_v30, %v6502_v26  ;;  %v1374_v17 = vadd.f32 %v12673_v21, %v12672_v14  ;;  %v12678_v30 = vld [vmem:[#allocation156_spill] sm:$0xff]  ;;  %v12687_v33 = vld [vmem:[#allocation127_spill] sm:$0xff]  ;;  %v12688_v21 = vld [vmem:[#allocation65_spill] sm:$0xff] }
 0x567   : > { %v11914_v37 = vadd.f32 %v6610_v52, %v5887_v62  ;;  %v5891_v10 = vadd.f32 %v11517_v58, %v5018_v47  ;;  %v11921_v60 = vadd.f32 %v6614_v38, %v11515_v56  ;;  %8798 = vmatmul.mubr.msk.f32.gmra.mxu1 %vm782_vm5, %v11730_v13  ;;  %v12661_v56 = vld [vmem:[#allocation67_spill] sm:$0xff]  ;;  %v12662_v58 = vld [vmem:[#allocation37_spill] sm:$0xff]  ;;  %v11941_v13 = vpop.f32.mrf.mxu0  ;;  %v2248_v47 = vadd.f32 %v12677_v53, %v12676_v45  ;;  %v12690_v45 = vld [vmem:[#allocation158_spill] sm:$0xff] }
 0x568   : > { %8215 = vmatmul.mubr.f32.gmra.mxu0 %v11640_v9  ;;  %8351 = vmatprep.mubr.f32.mxu1 %v12377_v41  ;;  %v12675_v62 = vld [vmem:[#allocation125_spill] sm:$0xff]  ;;  %v12691_v53 = vld [vmem:[#allocation159_spill] sm:$0xff] }
 0x569   : > { %8220 = vmatprep.mubr.f32.mxu0 %v11656_v50  ;;  %v11927_v9 = vadd.f32 %v6616_v32, %v5891_v10  ;;  %v12660_v50 = vld [vmem:[#allocation217_spill] sm:$0xff]  ;;  %v11948_v5 = vpop.f32.mrf.mxu0  ;;  %v3874_v52 = vadd.f32 %v12675_v62, %v12674_v42 }
 0x56a   : > { %v12679_v10 = vld [vmem:[#allocation157_spill] sm:$0xff] }
 0x56b   : > { %8799 = vmatmul.mubr.msk.f32.gmra.mxu1 %vm782_vm5, %v11769_v40  ;;  %v4747_v32 = vadd.f32 %v12679_v10, %v12678_v30 }
 0x56c   : > { %8221 = vmatmul.mubr.f32.gmra.mxu0 %v11666_v51  ;;  %8357 = vmatprep.mubr.f32.mxu1 %v12377_v41  ;;  %v12663_v51 = vld [vmem:[#allocation36_spill] sm:$0xff] }
 0x56d   : > { %8226 = vmatprep.mubr.f32.mxu0 %v12659_v4 }
 0x56f   : > { %8800 = vmatmul.mubr.msk.f32.gmra.mxu1 %vm782_vm5, %v11799_v31 }
 0x570   : > { %8227 = vmatmul.mubr.f32.gmra.mxu0 %v12660_v50 }
 0x571   : > { %8232 = vmatprep.mubr.f32.mxu0 %v12661_v56  ;;  %v12680_v56 = vld [vmem:[#allocation94_spill] sm:$0xff] }
 0x574   : > { %8233 = vmatmul.mubr.f32.gmra.mxu0 %v12662_v58  ;;  %v12681_v58 = vld [vmem:[#allocation95_spill] sm:$0xff] }
 0x575   : > { %8238 = vmatprep.mubr.f32.mxu0 %v12663_v51  ;;  %v3122_v51 = vadd.f32 %v12681_v58, %v12680_v56  ;;  %v12692_v58 = vld [vmem:[#allocation96_spill] sm:$0xff] }
 0x576   : > { %v11944_v40 = vpop.f32.mrf.mxu1 }
 0x578   : > { %8239 = vmatmul.mubr.f32.gmra.mxu0 %v11759_v55  ;;  %v11946_v41 = vpop.f32.mrf.mxu1  ;;  %v12664_v55 = vld [vmem:[#allocation48_spill] sm:$0xff] }
 0x579   : > { %8244 = vmatprep.mubr.f32.mxu0 %v11774_v44  ;;  %v870_v44 = vsub.s32 1, %v12664_v55 }
 0x57a   : > { %v11950_v0 = vpop.f32.mrf.mxu1 }
 0x57b   : > { %v11952_v31 = vpop.f32.mrf.mxu0  ;;  %v11970_v6 = vrot.slane %v12667_v12, %v870_v44  ;;  %v12684_v12 = vld [vmem:[#allocation35_spill] sm:$0xff] }
 0x57c   : > { %8245 = vmatmul.mubr.f32.gmra.mxu0 %v11791_v36  ;;  %v11954_v61 = vpop.f32.mrf.mxu1  ;;  %v12665_v36 = vld [vmem:[#allocation32_spill] sm:$0xff]  ;;  %v1380_v8 = vadd.f32 %v12685_v2, %v12684_v12  ;;  %v12696_v2 = vld [vmem:[#allocation210_spill] sm:$0xff] }
 0x57d   : > { %v11956_v57 = vpop.f32.mrf.mxu0  ;;  %v1368_v20 = vadd.f32 %v12666_v39, %v12665_v36  ;;  %v1633_v50 = vadd.f32 %v1374_v17, %v11970_v6  ;;  %v12682_v36 = vld [vmem:[#allocation188_spill] sm:$0xff]  ;;  %v12683_v39 = vld [vmem:[#allocation189_spill] sm:$0xff]  ;;  %v12689_v17 = vld [vmem:[#allocation66_spill] sm:$0xff] }
 0x57e   : > { %v11959_v7 = vpop.f32.mrf.mxu1  ;;  %v1637_v56 = vadd.f32 %v1380_v8, %v11970_v6 }
 0x57f   : > { %v11961_v34 = vpop.f32.mrf.mxu0  ;;  %v1629_v63 = vadd.f32 %v1368_v20, %v11970_v6  ;;  %v5620_v20 = vadd.f32 %v12683_v39, %v12682_v36 }
 0x580   : > { %v11965_v11 = vpop.f32.mrf.mxu1 }
 0x581   : > { %v11967_v23 = vpop.f32.mrf.mxu0  ;;  %v2503_v46 = vadd.f32 %v2242_v19, %v1629_v63  ;;  %v2507_v19 = vadd.f32 %v2248_v47, %v1633_v50  ;;  %v12686_v63 = vld [vmem:[#allocation126_spill] sm:$0xff]  ;;  %v12693_v47 = vld [vmem:[#allocation97_spill] sm:$0xff] }
 0x582   : > { %v11974_v27 = vpop.f32.mrf.mxu1  ;;  %v3880_v15 = vadd.f32 %v12687_v33, %v12686_v63  ;;  %v3128_v50 = vadd.f32 %v12693_v47, %v12692_v58 }
 0x583   : > { %v11976_v29 = vpop.f32.mrf.mxu0  ;;  %v3377_v26 = vadd.f32 %v3116_v43, %v2503_v46  ;;  %v2254_v46 = vadd.f32 %v12689_v17, %v12688_v21  ;;  %v3381_v42 = vadd.f32 %v3122_v51, %v2507_v19  ;;  %v12697_v51 = vld [vmem:[#allocation209_spill] sm:$0xff] }
 0x584   : > { %v11981_v24 = vpop.f32.mrf.mxu1 }
 0x585   : > { %v11985_v59 = vpop.f32.mrf.mxu0  ;;  %v4135_v44 = vadd.f32 %v3874_v52, %v3377_v26  ;;  %v4753_v52 = vadd.f32 %v12691_v53, %v12690_v45  ;;  %v4139_v36 = vadd.f32 %v3880_v15, %v3381_v42  ;;  %v2511_v21 = vadd.f32 %v2254_v46, %v1637_v56  ;;  %v12700_v42 = vld [vmem:[#allocation160_spill] sm:$0xff]  ;;  %v12701_v53 = vld [vmem:[#allocation161_spill] sm:$0xff] }
 0x586   : > { %v11989_v25 = vpop.f32.mrf.mxu1  ;;  %v4759_v58 = vadd.f32 %v12701_v53, %v12700_v42  ;;  %v12704_v56 = vld [vmem:[#allocation212_spill] sm:$0xff] }
 0x587   : > { %v11993_v38 = vpop.f32.mrf.mxu0  ;;  %v5008_v43 = vadd.f32 %v4747_v32, %v4135_v44  ;;  %v12694_v32 = vld [vmem:[#allocation190_spill] sm:$0xff]  ;;  %v12695_v44 = vld [vmem:[#allocation191_spill] sm:$0xff]  ;;  %v5012_v17 = vadd.f32 %v4753_v52, %v4139_v36  ;;  %v3385_v45 = vadd.f32 %v3128_v50, %v2511_v21 }
 0x588   : > { %v11997_v4 = vpop.f32.mrf.mxu1  ;;  %v5626_v12 = vadd.f32 %v12695_v44, %v12694_v32 }
 0x589   : > { %v12002_v55 = vpop.f32.mrf.mxu0  ;;  %v5881_v26 = vadd.f32 %v5620_v20, %v5008_v43  ;;  %v12698_v20 = vld [vmem:[#allocation128_spill] sm:$0xff]  ;;  %v12699_v43 = vld [vmem:[#allocation129_spill] sm:$0xff] }
 0x58a   : > { %v5885_v47 = vadd.f32 %v5626_v12, %v5012_v17 }
 0x58b   : > { %v6639_v63 = vadd.f32 %v12696_v2, %v5881_v26  ;;  %v12702_v2 = vld [vmem:[#allocation192_spill] sm:$0xff] }
 0x58c   : > { %v7135_v14 = vpop.f32.mrf.mxu1 }
 0x58d   : > { %v7248_v62 = vpop.f32.mrf.mxu0 }
 0x58e   : > { %v7249_v30 = vadd.f32 %v7248_v62, %v7135_v14  ;;  %v7137_v10 = vpop.f32.mrf.mxu1  ;;  %v3886_v14 = vadd.f32 %v12699_v43, %v12698_v20 }
 0x58f   : > { %v7250_v39 = vpop.f32.mrf.mxu0 }
 0x590   : > { %v12021_v19 = vadd.f32 %v7249_v30, %v12697_v51  ;;  %v7251_v33 = vadd.f32 %v7250_v39, %v7137_v10  ;;  %v4143_v44 = vadd.f32 %v3886_v14, %v3385_v45  ;;  %v12703_v10 = vld [vmem:[#allocation193_spill] sm:$0xff]  ;;  %v6643_v39 = vadd.f32 %v12704_v56, %v5885_v47  ;;  %v12705_v51 = vld [vmem:[#allocation211_spill] sm:$0xff]  ;;  %v12706_v14 = vld [vmem:[#allocation214_spill] sm:$0xff] }
 0x591   : > { %v5632_v46 = vadd.f32 %v12703_v10, %v12702_v2  ;;  %v12707_v45 = vld [vmem:[#allocation213_spill] sm:$0xff] }
 0x592   : > { %v12025_v8 = vadd.f32 %v7251_v33, %v6639_v63  ;;  %v7141_v62 = vpop.f32.mrf.mxu1  ;;  %v5016_v63 = vadd.f32 %v4759_v58, %v4143_v44 }
 0x593   : > { %v7254_v15 = vpop.f32.mrf.mxu0 }
 0x594   : > { %v7255_v32 = vadd.f32 %v7254_v15, %v7141_v62  ;;  %v7143_v26 = vpop.f32.mrf.mxu1  ;;  %v5889_v20 = vadd.f32 %v5632_v46, %v5016_v63  ;;  %v12708_v46 = vld [vmem:[#allocation39_spill] sm:$0xff] }
 0x595   : > { %v7256_v30 = vpop.f32.mrf.mxu0 }
 0x596   : > { %v12033_v52 = vadd.f32 %v7255_v32, %v12705_v51  ;;  %v7257_v36 = vadd.f32 %v7256_v30, %v7143_v26  ;;  %v6647_v62 = vadd.f32 %v12706_v14, %v5889_v20 }
 0x598   : > { %v12035_v50 = vadd.f32 %v7257_v36, %v6643_v39  ;;  %v7147_v33 = vpop.f32.mrf.mxu1 }
 0x599   : > { %v7260_v21 = vpop.f32.mrf.mxu0 }
 0x59a   : > { %v7261_v12 = vadd.f32 %v7260_v21, %v7147_v33  ;;  %v7149_v43 = vpop.f32.mrf.mxu1  ;;  %v12709_v33 = vld [vmem:[#allocation38_spill] sm:$0xff] }
 0x59b   : > { %v7262_v17 = vpop.f32.mrf.mxu0 }
 0x59c   : > { %v12039_v15 = vadd.f32 %v7261_v12, %v12707_v45  ;;  %v7263_v42 = vadd.f32 %v7262_v17, %v7149_v43  ;;  %v12710_v43 = vld [vmem:[#allocation41_spill] sm:$0xff] }
 0x59e   : > { %v12041_v53 = vadd.f32 %v7263_v42, %v6647_v62  ;;  %v7444_v47 = vpop.f32.mrf.mxu1 }
 0x5a0   : > { %v7446_v58 = vpop.f32.mrf.mxu1 }
 0x5ae   : > { %v7331_v32 = vpop.f32.mrf.mxu0 }
 0x5af   : > { %v7445_v26 = vadd.f32 %v7444_v47, %v7331_v32 }
 0x5b0   : > { %v7333_v44 = vpop.f32.mrf.mxu0 }
 0x5b1   : > { %v12044_v30 = vadd.f32 %v7445_v26, %v11785_v35  ;;  %v7447_v2 = vadd.f32 %v7446_v58, %v7333_v44 }
 0x5b2   : > { %v7337_v10 = vpop.f32.mrf.mxu0 }
 0x5b3   : > { %v12047_v56 = vadd.f32 %v7447_v2, %v12708_v46  ;;  %v7450_v39 = vpop.f32.mrf.mxu1 }
 0x5b4   : > { %v7451_v51 = vadd.f32 %v7450_v39, %v7337_v10  ;;  %v7339_v36 = vpop.f32.mrf.mxu0 }
 0x5b5   : > { %v7452_v63 = vpop.f32.mrf.mxu1 }
 0x5b6   : > { %v12050_v21 = vadd.f32 %v7451_v51, %v12709_v33  ;;  %v7453_v20 = vadd.f32 %v7452_v63, %v7339_v36 }
 0x5b7   : > { %v7343_v12 = vpop.f32.mrf.mxu0 }
 0x5b8   : > { %v12053_v17 = vadd.f32 %v7453_v20, %v12710_v43  ;;  %v7456_v14 = vpop.f32.mrf.mxu1 }
 0x5b9   : > { %v7457_v35 = vadd.f32 %v7456_v14, %v7343_v12  ;;  %v7345_v62 = vpop.f32.mrf.mxu0 }
 0x5ba   : > { %v7458_v45 = vpop.f32.mrf.mxu1 }
 0x5bb   : > { %v12056_v42 = vadd.f32 %v7457_v35, %v11833_v22  ;;  %v7459_v47 = vadd.f32 %v7458_v45, %v7345_v62 }
 0x5bc   : > { %v7349_v32 = vpop.f32.mrf.mxu0 }
 0x5bd   : > { %v12059_v26 = vadd.f32 %v7459_v47, %v11840_v16  ;;  %v7462_v58 = vpop.f32.mrf.mxu1 }
 0x5be   : > { %v7463_v44 = vadd.f32 %v7462_v58, %v7349_v32  ;;  %v7351_v2 = vpop.f32.mrf.mxu0 }
 0x5bf   : > { %v7464_v10 = vpop.f32.mrf.mxu1 }
 0x5c0   : > { %v12062_v46 = vadd.f32 %v7463_v44, %v11852_v3  ;;  %v7465_v39 = vadd.f32 %v7464_v10, %v7351_v2 }
 0x5c1   : > { %v7355_v51 = vpop.f32.mrf.mxu0 }
 0x5c2   : > { %v12065_v36 = vadd.f32 %v7465_v39, %v11859_v1  ;;  %v7468_v63 = vpop.f32.mrf.mxu1 }
 0x5c3   : > { %v7469_v22 = vadd.f32 %v7468_v63, %v7355_v51  ;;  %v7357_v33 = vpop.f32.mrf.mxu0 }
 0x5c4   : > { %v7470_v20 = vpop.f32.mrf.mxu1 }
 0x5c5   : > { %v12068_v12 = vadd.f32 %v7469_v22, %v11874_v18  ;;  %v7471_v16 = vadd.f32 %v7470_v20, %v7357_v33 }
 0x5c6   : > { %v7361_v43 = vpop.f32.mrf.mxu0 }
 0x5c7   : > { %12711 = vst [vmem:[#allocation40_spill] sm:$0xff] %v12068_v12  ;;  %v12071_v14 = vadd.f32 %v7471_v16, %v11879_v48  ;;  %v7474_v35 = vpop.f32.mrf.mxu1 }
 0x5c8   : > { %v7475_v3 = vadd.f32 %v7474_v35, %v7361_v43  ;;  %v7363_v62 = vpop.f32.mrf.mxu0  ;;  %v12719_v35 = vld [vmem:[#allocation24_spill] sm:$0xff] }
 0x5c9   : > { %12712 = vst [vmem:[#allocation98_spill] sm:$0xff] %v12071_v14  ;;  %v7476_v45 = vpop.f32.mrf.mxu1 }
 0x5ca   : > { %v12074_v47 = vadd.f32 %v7475_v3, %v11894_v28  ;;  %v7477_v1 = vadd.f32 %v7476_v45, %v7363_v62  ;;  %v12720_v3 = vld [vmem:[#allocation20_spill] sm:$0xff]  ;;  %v12721_v62 = vld [vmem:[#allocation51_spill] sm:$0xff] }
 0x5cb   : > { %v7367_v32 = vpop.f32.mrf.mxu0  ;;  %v12722_v45 = vld [vmem:[#allocation52_spill] sm:$0xff] }
 0x5cc   : > { %12713 = vst [vmem:[#allocation99_spill] sm:$0xff] %v12074_v47  ;;  %v12077_v58 = vadd.f32 %v7477_v1, %v11899_v49  ;;  %v7480_v44 = vpop.f32.mrf.mxu1  ;;  %v2212_v1 = vadd.f32 %v12722_v45, %v12721_v62  ;;  %v12734_v62 = vld [vmem:[#allocation23_spill] sm:$0xff] }
 0x5cd   : > { %v7481_v18 = vadd.f32 %v7480_v44, %v7367_v32  ;;  %v7369_v2 = vpop.f32.mrf.mxu0  ;;  %v12723_v32 = vld [vmem:[#allocation82_spill] sm:$0xff]  ;;  %v12724_v44 = vld [vmem:[#allocation83_spill] sm:$0xff] }
 0x5ce   : > { %12714 = vst [vmem:[#allocation68_spill] sm:$0xff] %v12077_v58  ;;  %v7482_v10 = vpop.f32.mrf.mxu1  ;;  %v12743_v58 = vld [vmem:[#allocation57_spill] sm:$0xff] }
 0x5cf   : > { %v12080_v39 = vadd.f32 %v7481_v18, %v11910_v54  ;;  %v7483_v48 = vadd.f32 %v7482_v10, %v7369_v2  ;;  %v1338_v54 = vadd.f32 %v12720_v3, %v12719_v35  ;;  %v3086_v18 = vadd.f32 %v12724_v44, %v12723_v32  ;;  %v12725_v2 = vld [vmem:[#allocation25_spill] sm:$0xff]  ;;  %v12732_v35 = vld [vmem:[#allocation54_spill] sm:$0xff] }
 0x5d0   : > { %v7373_v51 = vpop.f32.mrf.mxu0  ;;  %v12726_v10 = vld [vmem:[#allocation21_spill] sm:$0xff]  ;;  %v12737_v44 = vld [vmem:[#allocation146_spill] sm:$0xff] }
 0x5d1   : > { %12715 = vst [vmem:[#allocation69_spill] sm:$0xff] %v12080_v39  ;;  %v12083_v63 = vadd.f32 %v7483_v48, %v11914_v37  ;;  %v7486_v22 = vpop.f32.mrf.mxu1  ;;  %v1609_v37 = vadd.f32 %v1338_v54, %v11970_v6  ;;  %v1344_v48 = vadd.f32 %v12726_v10, %v12725_v2  ;;  %v12735_v54 = vld [vmem:[#allocation30_spill] sm:$0xff]  ;;  %v12738_v39 = vld [vmem:[#allocation147_spill] sm:$0xff]  ;;  %v12740_v10 = vld [vmem:[#allocation56_spill] sm:$0xff] }
 0x5d2   : > { %v7487_v28 = vadd.f32 %v7486_v22, %v7373_v51  ;;  %v7375_v33 = vpop.f32.mrf.mxu0  ;;  %v12727_v51 = vld [vmem:[#allocation114_spill] sm:$0xff]  ;;  %v12728_v22 = vld [vmem:[#allocation115_spill] sm:$0xff]  ;;  %v4717_v2 = vadd.f32 %v12738_v39, %v12737_v44  ;;  %v12750_v44 = vld [vmem:[#allocation117_spill] sm:$0xff] }
 0x5d3   : > { %12716 = vst [vmem:[#allocation130_spill] sm:$0xff] %v12083_v63  ;;  %v7488_v20 = vpop.f32.mrf.mxu1  ;;  %v12748_v39 = vld [vmem:[#allocation87_spill] sm:$0xff] }
 0x5d4   : > { %v12086_v16 = vadd.f32 %v7487_v28, %v11921_v60  ;;  %v7489_v49 = vadd.f32 %v7488_v20, %v7375_v33  ;;  %v2483_v60 = vadd.f32 %v2212_v1, %v1609_v37  ;;  %v3844_v28 = vadd.f32 %v12728_v22, %v12727_v51  ;;  %v12730_v33 = vld [vmem:[#allocation22_spill] sm:$0xff]  ;;  %v12739_v37 = vld [vmem:[#allocation55_spill] sm:$0xff]  ;;  %v12741_v22 = vld [vmem:[#allocation84_spill] sm:$0xff] }
 0x5d5   : > { %v1613_v1 = vadd.f32 %v1344_v48, %v11970_v6  ;;  %v2224_v51 = vadd.f32 %v12740_v10, %v12739_v37  ;;  %v12749_v48 = vld [vmem:[#allocation116_spill] sm:$0xff] }
 0x5d6   : > { %12717 = vst [vmem:[#allocation131_spill] sm:$0xff] %v12086_v16  ;;  %v12089_v43 = vadd.f32 %v7489_v49, %v11927_v9  ;;  %v12729_v9 = vld [vmem:[#allocation27_spill] sm:$0xff]  ;;  %v12731_v49 = vld [vmem:[#allocation53_spill] sm:$0xff]  ;;  %v12736_v16 = vld [vmem:[#allocation26_spill] sm:$0xff]  ;;  %v3357_v32 = vadd.f32 %v3086_v18, %v2483_v60  ;;  %v3850_v12 = vadd.f32 %v12750_v44, %v12749_v48 }
 0x5d7   : > { %v1350_v20 = vadd.f32 %v12730_v33, %v12729_v9  ;;  %v2218_v3 = vadd.f32 %v12732_v35, %v12731_v49  ;;  %v1362_v63 = vadd.f32 %v12736_v16, %v12735_v54  ;;  %v12742_v9 = vld [vmem:[#allocation85_spill] sm:$0xff]  ;;  %v12744_v49 = vld [vmem:[#allocation58_spill] sm:$0xff]  ;;  %v12756_v48 = vld [vmem:[#allocation60_spill] sm:$0xff] }
 0x5d8   : > { %12718 = vst [vmem:[#allocation162_spill] sm:$0xff] %v12089_v43  ;;  %v12733_v43 = vld [vmem:[#allocation28_spill] sm:$0xff]  ;;  %v3092_v33 = vadd.f32 %v12742_v9, %v12741_v22  ;;  %v2230_v35 = vadd.f32 %v12744_v49, %v12743_v58  ;;  %v4115_v47 = vadd.f32 %v3844_v28, %v3357_v32  ;;  %v12747_v60 = vld [vmem:[#allocation86_spill] sm:$0xff]  ;;  %v7219_v58 = vadd.f32 %v11941_v13, %v11944_v40  ;;  %v12752_v49 = vld [vmem:[#allocation119_spill] sm:$0xff] }
 0x5d9   : > { %v1356_v45 = vadd.f32 %v12734_v62, %v12733_v43  ;;  %v12745_v43 = vld [vmem:[#allocation178_spill] sm:$0xff]  ;;  %v12746_v62 = vld [vmem:[#allocation179_spill] sm:$0xff]  ;;  %v1617_v16 = vadd.f32 %v1350_v20, %v11970_v6  ;;  %v2487_v18 = vadd.f32 %v2218_v3, %v1613_v1  ;;  %v3098_v54 = vadd.f32 %v12748_v39, %v12747_v60  ;;  %v12753_v3 = vld [vmem:[#allocation148_spill] sm:$0xff] }
 0x5da   : > { %v5590_v14 = vadd.f32 %v12746_v62, %v12745_v43  ;;  %v1625_v10 = vadd.f32 %v1362_v63, %v11970_v6  ;;  %v4988_v22 = vadd.f32 %v4717_v2, %v4115_v47  ;;  %v12751_v9 = vld [vmem:[#allocation118_spill] sm:$0xff]  ;;  %v12754_v1 = vld [vmem:[#allocation149_spill] sm:$0xff]  ;;  %v8091_v62 = vpop.f32.mrf.mxu0  ;;  %v12755_v39 = vld [vmem:[#allocation59_spill] sm:$0xff] }
 0x5db   : > { %v1621_v37 = vadd.f32 %v1356_v45, %v11970_v6  ;;  %v2491_v28 = vadd.f32 %v2224_v51, %v1617_v16  ;;  %v3361_v32 = vadd.f32 %v3092_v33, %v2487_v18  ;;  %v3856_v20 = vadd.f32 %v12752_v49, %v12751_v9  ;;  %v12757_v63 = vld [vmem:[#allocation88_spill] sm:$0xff]  ;;  %v12758_v13 = vld [vmem:[#allocation89_spill] sm:$0xff]  ;;  %v12761_v9 = vld [vmem:[#allocation150_spill] sm:$0xff] }
 0x5dc   : > { %v4723_v43 = vadd.f32 %v12754_v1, %v12753_v3  ;;  %v2236_v44 = vadd.f32 %v12756_v48, %v12755_v39  ;;  %v5861_v45 = vadd.f32 %v5590_v14, %v4988_v22  ;;  %v7221_v6 = vadd.f32 %v11948_v5, %v11946_v41  ;;  %v12759_v51 = vld [vmem:[#allocation180_spill] sm:$0xff]  ;;  %v12760_v33 = vld [vmem:[#allocation181_spill] sm:$0xff]  ;;  %v12762_v49 = vld [vmem:[#allocation151_spill] sm:$0xff] }
 0x5dd   : > { %v2495_v60 = vadd.f32 %v2230_v35, %v1621_v37  ;;  %v3365_v47 = vadd.f32 %v3098_v54, %v2491_v28  ;;  %v3104_v40 = vadd.f32 %v12758_v13, %v12757_v63  ;;  %v4119_v2 = vadd.f32 %v3850_v12, %v3361_v32  ;;  %v12763_v35 = vld [vmem:[#allocation200_spill] sm:$0xff]  ;;  %v12764_v1 = vld [vmem:[#allocation199_spill] sm:$0xff]  ;;  %v12766_v41 = vld [vmem:[#allocation121_spill] sm:$0xff]  ;;  %v8093_v28 = vpop.f32.mrf.mxu0 }
 0x5de   : > { %v5596_v16 = vadd.f32 %v12760_v33, %v12759_v51  ;;  %v4729_v3 = vadd.f32 %v12762_v49, %v12761_v9  ;;  %v6619_v37 = vadd.f32 %v12763_v35, %v5861_v45  ;;  %v7491_v39 = vadd.f32 %v7219_v58, %v12764_v1  ;;  %v12765_v48 = vld [vmem:[#allocation120_spill] sm:$0xff]  ;;  %v12767_v63 = vld [vmem:[#allocation182_spill] sm:$0xff]  ;;  %v12768_v13 = vld [vmem:[#allocation183_spill] sm:$0xff] }
 0x5df   : > { %v4123_v22 = vadd.f32 %v3856_v20, %v3365_v47  ;;  %v3862_v5 = vadd.f32 %v12766_v41, %v12765_v48  ;;  %v4992_v54 = vadd.f32 %v4723_v43, %v4119_v2  ;;  %v7225_v12 = vadd.f32 %v11952_v31, %v11950_v0  ;;  %v12769_v43 = vld [vmem:[#allocation90_spill] sm:$0xff]  ;;  %v12770_v2 = vld [vmem:[#allocation91_spill] sm:$0xff]  ;;  %v12771_v31 = vld [vmem:[#allocation152_spill] sm:$0xff] }
 0x5e0   : > { %v5602_v51 = vadd.f32 %v12768_v13, %v12767_v63  ;;  %v7492_v33 = vadd.f32 %v7221_v6, %v6619_v37  ;;  %v2499_v49 = vadd.f32 %v2236_v44, %v1625_v10  ;;  %v3369_v58 = vadd.f32 %v3104_v40, %v2495_v60  ;;  %v12772_v35 = vld [vmem:[#allocation153_spill] sm:$0xff]  ;;  %v12773_v37 = vld [vmem:[#allocation202_spill] sm:$0xff] }
 0x5e1   : > { %v7227_v20 = vadd.f32 %v11956_v57, %v11954_v61  ;;  %v4996_v0 = vadd.f32 %v4729_v3, %v4123_v22  ;;  %v4735_v1 = vadd.f32 %v12772_v35, %v12771_v31  ;;  %v12774_v10 = vld [vmem:[#allocation201_spill] sm:$0xff]  ;;  %v7231_v44 = vadd.f32 %v11961_v34, %v11959_v7  ;;  %v12777_v22 = vld [vmem:[#allocation184_spill] sm:$0xff]  ;;  %v12784_v35 = vld [vmem:[#allocation187_spill] sm:$0xff] }
 0x5e2   : > { %v7495_v60 = vadd.f32 %v7225_v12, %v12774_v10  ;;  %v4127_v40 = vadd.f32 %v3862_v5, %v3369_v58  ;;  %v7233_v12 = vadd.f32 %v11967_v23, %v11965_v11  ;;  %v12779_v5 = vld [vmem:[#allocation154_spill] sm:$0xff] }
 0x5e3   : > { %v5869_v3 = vadd.f32 %v5602_v51, %v4996_v0  ;;  %v12781_v51 = vld [vmem:[#allocation204_spill] sm:$0xff] }
 0x5e6   : > { %v7978_v18 = vpop.f32.mrf.mxu1 }
 0x5e7   : > { %v8092_v14 = vadd.f32 %v8091_v62, %v7978_v18  ;;  %v5865_v62 = vadd.f32 %v5596_v16, %v4992_v54  ;;  %v3110_v18 = vadd.f32 %v12770_v2, %v12769_v43  ;;  %v12775_v16 = vld [vmem:[#allocation122_spill] sm:$0xff]  ;;  %v12778_v54 = vld [vmem:[#allocation185_spill] sm:$0xff]  ;;  %v12782_v43 = vld [vmem:[#allocation203_spill] sm:$0xff] }
 0x5e8   : > { %v7980_v32 = vpop.f32.mrf.mxu1  ;;  %v7499_v2 = vadd.f32 %v7231_v44, %v12782_v43 }
 0x5e9   : > { %v8364_v9 = vadd.f32 %v8092_v14, %v7491_v39  ;;  %v8094_v45 = vadd.f32 %v8093_v28, %v7980_v32  ;;  %v6623_v39 = vadd.f32 %v12773_v37, %v5865_v62  ;;  %v12776_v14 = vld [vmem:[#allocation123_spill] sm:$0xff]  ;;  %v5608_v28 = vadd.f32 %v12778_v54, %v12777_v22 }
 0x5ea   : > { %v7984_v47 = vpop.f32.mrf.mxu1  ;;  %v3868_v41 = vadd.f32 %v12776_v14, %v12775_v16  ;;  %v3373_v34 = vadd.f32 %v3110_v18, %v2499_v49  ;;  %v6627_v62 = vadd.f32 %v12781_v51, %v5869_v3  ;;  %v12783_v18 = vld [vmem:[#allocation186_spill] sm:$0xff]  ;;  %v7239_v37 = vadd.f32 %v11985_v59, %v11981_v24 }
 0x5eb   : > { %8460 = vst [vmem:[%s9546_s13] sm:$0xff] %v8364_v9  ;;  %v8365_v48 = vadd.f32 %v8094_v45, %v7492_v33  ;;  %v8097_v6 = vpop.f32.mrf.mxu0  ;;  %v7496_v63 = vadd.f32 %v7227_v20, %v6623_v39  ;;  %v5000_v9 = vadd.f32 %v4735_v1, %v4127_v40  ;;  %v12780_v45 = vld [vmem:[#allocation155_spill] sm:$0xff]  ;;  %v7237_v20 = vadd.f32 %v11976_v29, %v11974_v27 }
 0x5ec   : > { %v8098_v61 = vadd.f32 %v8097_v6, %v7984_v47  ;;  %v7986_v57 = vpop.f32.mrf.mxu1  ;;  %v4741_v58 = vadd.f32 %v12780_v45, %v12779_v5  ;;  %v4131_v31 = vadd.f32 %v3868_v41, %v3373_v34  ;;  %v5614_v1 = vadd.f32 %v12784_v35, %v12783_v18 }
 0x5ed   : > { %8461 = vst [vmem:[%s9546_s13 + $0x8] sm:$0xff] %v8365_v48  ;;  %v8099_v32 = vpop.f32.mrf.mxu0  ;;  %v5873_v49 = vadd.f32 %v5608_v28, %v5000_v9  ;;  %v7500_v6 = vadd.f32 %v7233_v12, %v6627_v62  ;;  %v7243_v16 = vadd.f32 %v11993_v38, %v11989_v25  ;;  %v7245_v54 = vadd.f32 %v12002_v55, %v11997_v4  ;;  %v12788_v38 = vld [vmem:[#allocation207_spill] sm:$0xff] }
 0x5ee   : > { %v8368_v13 = vadd.f32 %v8098_v61, %v7495_v60  ;;  %v8100_v33 = vadd.f32 %v8099_v32, %v7986_v57  ;;  %v7990_v7 = vpop.f32.mrf.mxu1  ;;  %v5004_v29 = vadd.f32 %v4741_v58, %v4131_v31  ;;  %v12785_v60 = vld [vmem:[#allocation206_spill] sm:$0xff]  ;;  %v12786_v57 = vld [vmem:[#allocation205_spill] sm:$0xff] }
 0x5ef   : > { %v8103_v47 = vpop.f32.mrf.mxu0  ;;  %v6631_v44 = vadd.f32 %v12785_v60, %v5873_v49  ;;  %v7503_v40 = vadd.f32 %v7237_v20, %v12786_v57 }
 0x5f0   : > { %8464 = vst [vmem:[%s9546_s13 + $0x20] sm:$0xff] %v8368_v13  ;;  %v8369_v0 = vadd.f32 %v8100_v33, %v7496_v63  ;;  %v8104_v11 = vadd.f32 %v8103_v47, %v7990_v7  ;;  %v7992_v23 = vpop.f32.mrf.mxu1  ;;  %v5877_v24 = vadd.f32 %v5614_v1, %v5004_v29  ;;  %v12787_v13 = vld [vmem:[#allocation208_spill] sm:$0xff]  ;;  %v7507_v33 = vadd.f32 %v7243_v16, %v12788_v38 }
 0x5f1   : > { %v8105_v48 = vpop.f32.mrf.mxu0  ;;  %v7504_v22 = vadd.f32 %v7239_v37, %v6631_v44 }
 0x5f2   : > { %8465 = vst [vmem:[%s9546_s13 + $0x28] sm:$0xff] %v8369_v0  ;;  %v8372_v39 = vadd.f32 %v8104_v11, %v7499_v2  ;;  %v8106_v10 = vadd.f32 %v8105_v48, %v7992_v23  ;;  %v7996_v27 = vpop.f32.mrf.mxu1  ;;  %v6635_v25 = vadd.f32 %v12787_v13, %v5877_v24 }
 0x5f3   : > { %v8109_v61 = vpop.f32.mrf.mxu0 }
 0x5f4   : > { %8468 = vst [vmem:[%s9546_s13 + $0x40] sm:$0xff] %v8372_v39  ;;  %v8373_v14 = vadd.f32 %v8106_v10, %v7500_v6  ;;  %v8110_v41 = vadd.f32 %v8109_v61, %v7996_v27  ;;  %v7998_v3 = vpop.f32.mrf.mxu1  ;;  %v7508_v45 = vadd.f32 %v7245_v54, %v6635_v25 }
 0x5f5   : > { %v8111_v59 = vpop.f32.mrf.mxu0 }
 0x5f6   : > { %8469 = vst [vmem:[%s9546_s13 + $0x48] sm:$0xff] %v8373_v14  ;;  %v8376_v28 = vadd.f32 %v8110_v41, %v7503_v40  ;;  %v8112_v32 = vadd.f32 %v8111_v59, %v7998_v3  ;;  %v8002_v63 = vpop.f32.mrf.mxu1 }
 0x5f7   : > { %v8115_v12 = vpop.f32.mrf.mxu0 }
 0x5f8   : > { %8472 = vst [vmem:[%s9546_s13 + $0x60] sm:$0xff] %v8376_v28  ;;  %v8377_v7 = vadd.f32 %v8112_v32, %v7504_v22  ;;  %v8116_v34 = vadd.f32 %v8115_v12, %v8002_v63  ;;  %v8004_v9 = vpop.f32.mrf.mxu1 }
 0x5f9   : > { %v8117_v5 = vpop.f32.mrf.mxu0 }
 0x5fa   : > { %8473 = vst [vmem:[%s9546_s13 + $0x68] sm:$0xff] %v8377_v7  ;;  %v8380_v4 = vadd.f32 %v8116_v34, %v7507_v33  ;;  %v8118_v55 = vadd.f32 %v8117_v5, %v8004_v9 }
 0x5fb   : > { %v8008_v58 = vpop.f32.mrf.mxu1 }
 0x5fc   : > { %8476 = vst [vmem:[%s9546_s13 + $0x80] sm:$0xff] %v8380_v4  ;;  %v8381_v51 = vadd.f32 %v8118_v55, %v7508_v45  ;;  %v8121_v62 = vpop.f32.mrf.mxu0 }
 0x5fd   : > { %v8122_v47 = vadd.f32 %v8121_v62, %v8008_v58  ;;  %v8010_v43 = vpop.f32.mrf.mxu1 }
 0x5fe   : > { %8477 = vst [vmem:[%s9546_s13 + $0x88] sm:$0xff] %v8381_v51  ;;  %v8123_v2 = vpop.f32.mrf.mxu0 }
 0x5ff   : > { %v8384_v20 = vadd.f32 %v8122_v47, %v12021_v19  ;;  %v8124_v0 = vadd.f32 %v8123_v2, %v8010_v43 }
 0x600   : > { %v8014_v11 = vpop.f32.mrf.mxu1 }
 0x601   : > { %8480 = vst [vmem:[%s9546_s13 + $0xa0] sm:$0xff] %v8384_v20  ;;  %v8385_v23 = vadd.f32 %v8124_v0, %v12025_v8  ;;  %v8127_v31 = vpop.f32.mrf.mxu0  ;;  %v12791_v0 = vld [vmem:[#allocation98_spill] sm:$0xff] }
 0x602   : > { %v8128_v49 = vadd.f32 %v8127_v31, %v8014_v11  ;;  %v8016_v18 = vpop.f32.mrf.mxu1 }
 0x603   : > { %8481 = vst [vmem:[%s9546_s13 + $0xa8] sm:$0xff] %v8385_v23  ;;  %v8129_v35 = vpop.f32.mrf.mxu0 }
 0x604   : > { %v8388_v1 = vadd.f32 %v8128_v49, %v12033_v52  ;;  %v8130_v48 = vadd.f32 %v8129_v35, %v8016_v18 }
 0x606   : > { %v8020_v6 = vpop.f32.mrf.mxu1  ;;  %8484 = vst [vmem:[%s9546_s13 + $0xc0] sm:$0xff] %v8388_v1  ;;  %v8389_v19 = vadd.f32 %v8130_v48, %v12035_v50  ;;  %v8133_v37 = vpop.f32.mrf.mxu0  ;;  %v12793_v1 = vld [vmem:[#allocation68_spill] sm:$0xff] }
 0x607   : > { %v8134_v39 = vadd.f32 %v8133_v37, %v8020_v6 }
 0x608   : > { %v8022_v10 = vpop.f32.mrf.mxu1  ;;  %8485 = vst [vmem:[%s9546_s13 + $0xc8] sm:$0xff] %v8389_v19  ;;  %v8135_v27 = vpop.f32.mrf.mxu0 }
 0x609   : > { %v8392_v8 = vadd.f32 %v8134_v39, %v12039_v15  ;;  %v8136_v29 = vadd.f32 %v8135_v27, %v8022_v10  ;;  %v12794_v39 = vld [vmem:[#allocation69_spill] sm:$0xff] }
 0x60b   : > { %8488 = vst [vmem:[%s9546_s13 + $0xe0] sm:$0xff] %v8392_v8  ;;  %v8393_v60 = vadd.f32 %v8136_v29, %v12041_v53  ;;  %v12795_v29 = vld [vmem:[#allocation130_spill] sm:$0xff] }
 0x60d   : > { %8489 = vst [vmem:[%s9546_s13 + $0xe8] sm:$0xff] %v8393_v60 }
 0x612   : > { %v8317_v44 = vpop.f32.mrf.mxu1 }
 0x614   : > { %v8319_v52 = vpop.f32.mrf.mxu1 }
 0x617   : > { %v8323_v61 = vpop.f32.mrf.mxu1 }
 0x619   : > { %v8325_v57 = vpop.f32.mrf.mxu1 }
 0x61b   : > { %v8329_v40 = vpop.f32.mrf.mxu1 }
 0x61d   : > { %v8331_v14 = vpop.f32.mrf.mxu1 }
 0x61f   : > { %v8335_v24 = vpop.f32.mrf.mxu1 }
 0x620   : > { %v8204_v50 = vpop.f32.mrf.mxu0 }
 0x621   : > { %v8318_v16 = vadd.f32 %v8317_v44, %v8204_v50  ;;  %v8337_v54 = vpop.f32.mrf.mxu1 }
 0x622   : > { %v8206_v41 = vpop.f32.mrf.mxu0 }
 0x623   : > { %v8366_v3 = vadd.f32 %v8318_v16, %v12044_v30  ;;  %v8320_v15 = vadd.f32 %v8319_v52, %v8206_v41  ;;  %v8341_v12 = vpop.f32.mrf.mxu1  ;;  %v12799_v16 = vld [vmem:[#allocation162_spill] sm:$0xff] }
 0x624   : > { %v8210_v59 = vpop.f32.mrf.mxu0 }
 0x625   : > { %8462 = vst [vmem:[%s9546_s13 + $0x10] sm:$0xff] %v8366_v3  ;;  %v8367_v53 = vadd.f32 %v8320_v15, %v12047_v56  ;;  %v8324_v22 = vadd.f32 %v8323_v61, %v8210_v59  ;;  %v8343_v38 = vpop.f32.mrf.mxu1 }
 0x626   : > { %v8212_v28 = vpop.f32.mrf.mxu0 }
 0x627   : > { %8463 = vst [vmem:[%s9546_s13 + $0x18] sm:$0xff] %v8367_v53  ;;  %v8370_v32 = vadd.f32 %v8324_v22, %v12050_v21  ;;  %v8326_v63 = vadd.f32 %v8325_v57, %v8212_v28  ;;  %v8347_v34 = vpop.f32.mrf.mxu1  ;;  %v12797_v57 = vld [vmem:[#allocation131_spill] sm:$0xff] }
 0x628   : > { %v8216_v13 = vpop.f32.mrf.mxu0 }
 0x629   : > { %8466 = vst [vmem:[%s9546_s13 + $0x30] sm:$0xff] %v8370_v32  ;;  %v8371_v30 = vadd.f32 %v8326_v63, %v12053_v17  ;;  %v8330_v25 = vadd.f32 %v8329_v40, %v8216_v13  ;;  %v8349_v4 = vpop.f32.mrf.mxu1 }
 0x62a   : > { %v8218_v33 = vpop.f32.mrf.mxu0 }
 0x62b   : > { %8467 = vst [vmem:[%s9546_s13 + $0x38] sm:$0xff] %v8371_v30  ;;  %v8374_v56 = vadd.f32 %v8330_v25, %v12056_v42  ;;  %v8332_v7 = vadd.f32 %v8331_v14, %v8218_v33  ;;  %v8353_v47 = vpop.f32.mrf.mxu1 }
 0x62c   : > { %v8222_v9 = vpop.f32.mrf.mxu0 }
 0x62d   : > { %8470 = vst [vmem:[%s9546_s13 + $0x50] sm:$0xff] %v8374_v56  ;;  %v8375_v21 = vadd.f32 %v8332_v7, %v12059_v26  ;;  %v8336_v5 = vadd.f32 %v8335_v24, %v8222_v9  ;;  %v12790_v26 = vld [vmem:[#allocation40_spill] sm:$0xff]  ;;  %v8355_v31 = vpop.f32.mrf.mxu1 }
 0x62e   : > { %v8224_v45 = vpop.f32.mrf.mxu0 }
 0x62f   : > { %8471 = vst [vmem:[%s9546_s13 + $0x58] sm:$0xff] %v8375_v21  ;;  %v8378_v17 = vadd.f32 %v8336_v5, %v12062_v46  ;;  %v8338_v55 = vadd.f32 %v8337_v54, %v8224_v45  ;;  %v8359_v37 = vpop.f32.mrf.mxu1 }
 0x630   : > { %v8228_v58 = vpop.f32.mrf.mxu0 }
 0x631   : > { %8474 = vst [vmem:[%s9546_s13 + $0x70] sm:$0xff] %v8378_v17  ;;  %v8379_v42 = vadd.f32 %v8338_v55, %v12065_v36  ;;  %v8342_v51 = vadd.f32 %v8341_v12, %v8228_v58  ;;  %v12792_v36 = vld [vmem:[#allocation99_spill] sm:$0xff]  ;;  %v8361_v52 = vpop.f32.mrf.mxu1 }
 0x632   : > { %v8230_v62 = vpop.f32.mrf.mxu0 }
 0x633   : > { %8475 = vst [vmem:[%s9546_s13 + $0x78] sm:$0xff] %v8379_v42  ;;  %v8382_v43 = vadd.f32 %v8342_v51, %v12790_v26  ;;  %v8344_v2 = vadd.f32 %v8343_v38, %v8230_v62 }
 0x634   : > { %v8234_v20 = vpop.f32.mrf.mxu0 }
 0x635   : > { %8478 = vst [vmem:[%s9546_s13 + $0x90] sm:$0xff] %v8382_v43  ;;  %v8383_v46 = vadd.f32 %v8344_v2, %v12791_v0  ;;  %v8348_v11 = vadd.f32 %v8347_v34, %v8234_v20 }
 0x636   : > { %v8236_v23 = vpop.f32.mrf.mxu0 }
 0x637   : > { %8479 = vst [vmem:[%s9546_s13 + $0x98] sm:$0xff] %v8383_v46  ;;  %v8386_v49 = vadd.f32 %v8348_v11, %v12792_v36  ;;  %v8350_v18 = vadd.f32 %v8349_v4, %v8236_v23 }
 0x638   : > { %v8240_v35 = vpop.f32.mrf.mxu0 }
 0x639   : > { %8482 = vst [vmem:[%s9546_s13 + $0xb0] sm:$0xff] %v8386_v49  ;;  %v8387_v48 = vadd.f32 %v8350_v18, %v12793_v1  ;;  %v8354_v6 = vadd.f32 %v8353_v47, %v8240_v35 }
 0x63a   : > { %v8242_v19 = vpop.f32.mrf.mxu0 }
 0x63b   : > { %8483 = vst [vmem:[%s9546_s13 + $0xb8] sm:$0xff] %v8387_v48  ;;  %v8390_v10 = vadd.f32 %v8354_v6, %v12794_v39  ;;  %v8356_v27 = vadd.f32 %v8355_v31, %v8242_v19 }
 0x63c   : > { %v8246_v8 = vpop.f32.mrf.mxu0 }
 0x63d   : > { %8486 = vst [vmem:[%s9546_s13 + $0xd0] sm:$0xff] %v8390_v10  ;;  %v8391_v60 = vadd.f32 %v8356_v27, %v12795_v29  ;;  %v8360_v44 = vadd.f32 %v8359_v37, %v8246_v8 }
 0x63e   : > { %v8248_v61 = vpop.f32.mrf.mxu0 }
 0x63f   : > { %8487 = vst [vmem:[%s9546_s13 + $0xd8] sm:$0xff] %v8391_v60  ;;  %v8394_v40 = vadd.f32 %v8360_v44, %v12797_v57  ;;  %v8362_v50 = vadd.f32 %v8361_v52, %v8248_v61 }
 0x641   : > { %8490 = vst [vmem:[%s9546_s13 + $0xf0] sm:$0xff] %v8394_v40  ;;  %v8395_v14 = vadd.f32 %v8362_v50, %v12799_v16 }
 0x643   : > { %8491 = vst [vmem:[%s9546_s13 + $0xf8] sm:$0xff] %v8395_v14 }
 0x644   : > { %9083 = shalt.err (!%p9080_p6)
}
 0x645   : > { %s9084_s30 = scalar_lea.hbm %s12243_s10, 4096  ;;  %s9088_s13 = scalar_lea.hbm %s12798_s9, 32768 }
 0x646   : > { %p9085_p10 = scmp.ne.s32.totalorder %s12243_s10, %s9084_s30  ;;  %p9089_p8 = scmp.lt.s32.totalorder %s12243_s10, %s12798_s9 }
 0x647   : > { %p9090_p4 = scmp.lt.s32.totalorder %s9088_s13, %s9084_s30 }
 0x648   : > { %p9086_p0 = pnand %p9085_p10, %p12800_p12 }
 0x649   : > { %p9091_p11 = por %p9090_p4, %p9089_p8 }
 0x64a   : > { %p9087_p13 = pneg %p9086_p0 }
 0x64c   : > { %p9092_p9 = pnand %p9091_p11, %p9087_p13 }
 0x64e   : > { %9095 = shalt.err (!%p9092_p9)
}
 0x64f   : > { %s9207_s26 = smov 512   ;;  %s9208_s7 = smov 32  }
 0x650   : > { %8867 = dma.vmem_to_hbm [thread:$0]  (%p12800_p12), %s12245_s15, 4096, %s12243_s10, %s12252_s28, %s9207_s26, %s9207_s26, %s9208_s7  }
 0x651 PF: > { %s12801_s4 = sld [smem:[#allocation14_spill]]  ;;  %p8889_p2 = scmp.ge.s32.totalorder %s9194_s25, 2 }
 0x652   : > { %s12802_s3 = sld [smem:[#allocation18_spill]] }
 0x657   : > { %s8524_s22 = sand.u32 1, %s12801_s4  }
 0x658   : > { %p12803_p3 = scmp.ne.s32.totalorder %s12802_s3, 0  ;;  %s8525_s29 = scalar_lea.sflag [#allocation6], %s8524_s22 }
 0x65a   : > { %p8881_p7 = pnand %p8889_p2, %p12803_p3 }
 0x65c   : > { %p8882_p5 = pneg %p8881_p7 }
 0x65e   : > { %9149 = dma.done.wait (%p8882_p5), %s8525_s29, 4096  }
 0x65f   : > { %9151 = vsyncadd (%p8882_p5), %s8525_s29, 4294963200  ;;  %s21_s25 = sadd.s32 1, %s9194_s25   ;;  %s12804_s21 = sld [smem:[#allocation16_spill]] }
 0x660   : > { %p18_p1 = scmp.ge.s32.totalorder %s21_s25, 10   ;;  %s12805_s10 = sld [smem:[#allocation19_spill]] }
 0x661   : > { %s12806_s15 = smov %s9158_s16  ;;  %s12807_s16 = smov %s9162_s17 }
 0x662   : > { %s12808_s17 = smov %s9371_s23  ;;  %s12809_s18 = smov %s9170_s19 }
 0x663   : > { %s12810_s19 = smov %s9174_s20  ;;  %s12811_s20 = smov %s9374_s5 }
 0x664   : > { %s12812_s22 = smov %s9190_s24  ;;  %s12813_s23 = smov %s12816_s8 }
 0x665   :  { %20 = sbr.rel (!%p18_p1) target bundleno = 14 (0xe), region = 119 }
 0x666   : > { %s12814_s24 = smov %s12805_s10 }
 0x66a   :  { %8530 = vsyncpa [#allocation5], 1 }
 0x66b   :  { %8532 = vsyncpa [#allocation5 + $0x1], 1 }
 0x66c   :  { %8533 = vsyncpa [#allocation8], 1 }
 0x66d   :  { %8534 = vsyncpa [#allocation6], 1 }
 0x66e   :  { %8536 = vsyncpa [#allocation6 + $0x1], 1 }

</bundles_post_ra>
